<compile_context>
chip_gen: v5e
topology: v5e:2x2
jax: 0.10.0
libtpu: 0.0.40
codegen_flags: <defaults>
</compile_context>

<pallas_src>
import functools

import jax
import jax.numpy as jnp
from jax import lax
from jax.experimental import pallas as pl
from jax.experimental.pallas import tpu as pltpu

LEAKY_SLOPE = 0.2
BN_EPS = 1e-5


def _leaky(z):
    return jnp.where(z >= 0, z, LEAKY_SLOPE * z)


def _round_up(x, m):
    return ((x + m - 1) // m) * m


def _vmem_limit(block_bytes):
    """Per-call VMEM budget: ~triple-buffered blocks + headroom, clamped so the
    same code is safe on v7x (64 MiB physical VMEM); v5e/v6e have 128 MiB."""
    need = 3 * int(block_bytes) + (4 << 20)
    return int(min(max(need, 16 << 20), 40 << 20))


# ---------------------------------------------------------------------------
# 4x4 / stride-2 / pad-1 conv via 2x2 space-to-depth (no im2col in HBM)
# ---------------------------------------------------------------------------
def _pad_s2d(x_nhwc):
    """NHWC -> zero-pad 1 -> 2x2 space-to-depth: (N, (H+2)//2, (W+2)//2, 4*C).
    Macro-pixel channel order is (di, dj, c)."""
    n, h, w, c = x_nhwc.shape
    xp = jnp.pad(x_nhwc, ((0, 0), (1, 1), (1, 1), (0, 0)))
    s = xp.reshape(n, (h + 2) // 2, 2, (w + 2) // 2, 2, c)
    s = jnp.transpose(s, (0, 1, 3, 2, 4, 5))
    return s.reshape(n, (h + 2) // 2, (w + 2) // 2, 4 * c)


def _patch_parts(sd, ho, wo, cin4):
    """Four (ho*wo, 4*Cin) shift matrices of the resident s2d block.
    Rows are (h, w) raster order; columns (di, dj, c); parts ordered (ai, aj)."""
    return [sd[ai:ai + ho, aj:aj + wo, :].reshape(ho * wo, cin4)
            for ai in (0, 1) for aj in (0, 1)]


def _conv1_kernel(sd_ref, w_ref, o_ref, *, ho, wo, cin4):
    """conv1 (bias-free) + LeakyReLU for one image, M = ho*wo rows per dot."""
    sd = sd_ref[...]                            # (HP2, WP2, 4*Cin) bf16
    w = w_ref[...]                              # (16*Cin, Cout)   bf16
    parts = _patch_parts(sd, ho, wo, cin4)
    acc = jnp.dot(parts[0], w[0:cin4, :], preferred_element_type=jnp.float32)
    for idx in range(1, 4):
        acc = acc + jnp.dot(parts[idx], w[idx * cin4:(idx + 1) * cin4, :],
                            preferred_element_type=jnp.float32)
    o_ref[...] = _leaky(acc).astype(o_ref.dtype)


def _conv2_stats_kernel(sd_ref, w_ref, b_ref, z_ref, sum_ref, ssq_ref,
                        *, ho, wo, cin4):
    """conv2 + bias as a single K = 16*Cin dot (shifts concatenated along K;
    chunks are 128-lane aligned), plus fused BatchNorm2d sum / sumsq accumulation
    across the batch grid axis."""
    sd = sd_ref[...]                                              # (HP2, WP2, 4*C1)
    lhs = jnp.concatenate(_patch_parts(sd, ho, wo, cin4), axis=1)  # (M, 16*C1)
    z = jnp.dot(lhs, w_ref[...], preferred_element_type=jnp.float32) + b_ref[...]
    z_ref[...] = z                                                 # f32 (M, C2)

    @pl.when(pl.program_id(0) == 0)
    def _():
        sum_ref[...] = jnp.zeros_like(sum_ref)
        ssq_ref[...] = jnp.zeros_like(ssq_ref)

    # NOTE: E[x^2]-E[x]^2 in f32; conv pre-activations are well-centered here.
    sum_ref[...] += jnp.sum(z, axis=0, keepdims=True)
    ssq_ref[...] += jnp.sum(z * z, axis=0, keepdims=True)


def conv1_pallas(sd, w1p, *, ho, wo):
    n, hp2, wp2, cin4 = sd.shape
    cout = w1p.shape[1]
    blk = (hp2 * wp2 * cin4 + 4 * cin4 * cout + ho * wo * cout) * 2
    return pl.pallas_call(
        functools.partial(_conv1_kernel, ho=ho, wo=wo, cin4=cin4),
        out_shape=jax.ShapeDtypeStruct((n, ho * wo, cout), jnp.bfloat16),
        grid_spec=pltpu.PrefetchScalarGridSpec(
            num_scalar_prefetch=0, grid=(n,),
            in_specs=[pl.BlockSpec((None, hp2, wp2, cin4), lambda b: (b, 0, 0, 0)),
                      pl.BlockSpec((4 * cin4, cout), lambda b: (0, 0))],
            out_specs=pl.BlockSpec((None, ho * wo, cout), lambda b: (b, 0, 0))),
        compiler_params=pltpu.CompilerParams(
            dimension_semantics=("parallel",),            # per-image, megacore-able
            vmem_limit_bytes=_vmem_limit(blk)),
    )(sd, w1p)


def conv2_stats_pallas(sd, w2p, bias, *, ho, wo):
    n, hp2, wp2, cin4 = sd.shape
    cout = w2p.shape[1]
    b2 = bias.reshape(1, cout).astype(jnp.float32)
    blk = ((hp2 * wp2 * cin4 + 4 * cin4 * cout) * 2
           + (ho * wo * cout + 3 * cout) * 4)
    return pl.pallas_call(
        functools.partial(_conv2_stats_kernel, ho=ho, wo=wo, cin4=cin4),
        out_shape=(jax.ShapeDtypeStruct((n, ho * wo, cout), jnp.float32),
                   jax.ShapeDtypeStruct((1, cout), jnp.float32),
                   jax.ShapeDtypeStruct((1, cout), jnp.float32)),
        grid_spec=pltpu.PrefetchScalarGridSpec(
            num_scalar_prefetch=0, grid=(n,),
            in_specs=[pl.BlockSpec((None, hp2, wp2, cin4), lambda b: (b, 0, 0, 0)),
                      pl.BlockSpec((4 * cin4, cout), lambda b: (0, 0)),
                      pl.BlockSpec((1, cout), lambda b: (0, 0))],
            out_specs=(pl.BlockSpec((None, ho * wo, cout), lambda b: (b, 0, 0)),
                       pl.BlockSpec((1, cout), lambda b: (0, 0)),
                       pl.BlockSpec((1, cout), lambda b: (0, 0)))),
        compiler_params=pltpu.CompilerParams(
            dimension_semantics=("arbitrary",),           # stats accumulate over batch
            vmem_limit_bytes=_vmem_limit(blk)),
    )(sd, w2p, b2)


# ---------------------------------------------------------------------------
# Fused FC stage: BN2-apply + LeakyReLU + fc1 + BatchNorm1d + LeakyReLU + fc2
# ---------------------------------------------------------------------------
def _fc_fused_kernel(zf_ref, s2_ref, q2_ref, g2_ref, be2_ref,
                     w1_ref, b1_ref, g1_ref, be1_ref, w2_ref, b2_ref,
                     o_ref, *, inv_count2, inv_n):
    # BatchNorm2d apply (stats accumulated by the conv2 kernel) + LeakyReLU.
    mean2 = s2_ref[...] * inv_count2
    var2 = jnp.maximum(q2_ref[...] * inv_count2 - mean2 * mean2, 0.0)
    scale2 = g2_ref[...] * lax.rsqrt(var2 + BN_EPS)
    shift2 = be2_ref[...] - mean2 * scale2
    a = _leaky(zf_ref[...] * scale2 + shift2)                      # (N, flat) f32

    # fc1 (bf16 into the MXU, f32 accumulation).
    z3 = jnp.dot(a.astype(jnp.bfloat16), w1_ref[...],
                 preferred_element_type=jnp.float32) + b1_ref[...]  # (N, 1024)

    # BatchNorm1d over the batch: centered biased variance (cancellation-safe).
    mean3 = jnp.sum(z3, axis=0, keepdims=True) * inv_n
    cent = z3 - mean3
    var3 = jnp.sum(cent * cent, axis=0, keepdims=True) * inv_n
    h = _leaky(cent * (g1_ref[...] * lax.rsqrt(var3 + BN_EPS)) + be1_ref[...])

    # fc2 (weights padded to a 128-lane-dense output; caller slices).
    o_ref[...] = (jnp.dot(h.astype(jnp.bfloat16), w2_ref[...],
                          preferred_element_type=jnp.float32)
                  + b2_ref[...]).astype(o_ref.dtype)


def fc_stage_pallas(zflat, s2f, q2f, prep, *, n, count2):
    n_rows, flat = zflat.shape
    npad = prep['fc2_w'].shape[1]
    inputs = (zflat, s2f, q2f, prep['bn2_g'], prep['bn2_b'],
              prep['fc1_w'], prep['fc1_b'], prep['bn1_g'], prep['bn1_b'],
              prep['fc2_w'], prep['fc2_b'])
    blk = sum(int(a.size) * a.dtype.itemsize for a in inputs) + n_rows * npad * 4
    in_specs = [pl.BlockSpec(a.shape, lambda i: (0, 0)) for a in inputs]
    kernel = functools.partial(_fc_fused_kernel,
                               inv_count2=1.0 / float(count2),
                               inv_n=1.0 / float(n))
    return pl.pallas_call(
        kernel,
        out_shape=jax.ShapeDtypeStruct((n_rows, npad), jnp.float32),
        grid_spec=pltpu.PrefetchScalarGridSpec(
            num_scalar_prefetch=0, grid=(1,),
            in_specs=in_specs,
            out_specs=pl.BlockSpec((n_rows, npad), lambda i: (0, 0))),
        compiler_params=pltpu.CompilerParams(
            dimension_semantics=("arbitrary",),
            vmem_limit_bytes=_vmem_limit(blk)),
    )(*inputs)


# ---------------------------------------------------------------------------
# Parameters (PyTorch layouts) and one-time host-side layout preparation
# ---------------------------------------------------------------------------
def init_params(key, size_y, channel_y, dim_adv, dim_h=64):
    ks = jax.random.split(key, 11)
    h2 = size_y // 4
    flat = dim_h * 2 * h2 * h2
    p = {}
    p['w1'] = 0.05 * jax.random.normal(ks[0], (dim_h, channel_y, 4, 4), jnp.float32)
    p['w2'] = 0.05 * jax.random.normal(ks[1], (dim_h * 2, dim_h, 4, 4), jnp.float32)
    p['b2'] = 0.05 * jax.random.normal(ks[2], (dim_h * 2,), jnp.float32)
    p['bn2_g'] = 1.0 + 0.1 * jax.random.normal(ks[3], (dim_h * 2,), jnp.float32)
    p['bn2_b'] = 0.1 * jax.random.normal(ks[4], (dim_h * 2,), jnp.float32)
    p['fc1_w'] = 0.02 * jax.random.normal(ks[5], (1024, flat), jnp.float32)
    p['fc1_b'] = 0.02 * jax.random.normal(ks[6], (1024,), jnp.float32)
    p['bn1_g'] = 1.0 + 0.1 * jax.random.normal(ks[7], (1024,), jnp.float32)
    p['bn1_b'] = 0.1 * jax.random.normal(ks[8], (1024,), jnp.float32)
    p['fc2_w'] = 0.02 * jax.random.normal(ks[9], (dim_adv, 1024), jnp.float32)
    p['fc2_b'] = 0.02 * jax.random.normal(ks[10], (dim_adv,), jnp.float32)
    return p


def _prep_conv_weight(w):
    """(Cout, Cin, 4, 4) PyTorch conv weight -> (16*Cin, Cout) with rows ordered
    (ai, aj, di, dj, c), matching the in-kernel patch construction
    (ki = 2*ai + di, kj = 2*aj + dj)."""
    cout, cin = w.shape[:2]
    wr = w.reshape(cout, cin, 2, 2, 2, 2)        # (o, c, ai, di, aj, dj)
    wr = jnp.transpose(wr, (2, 4, 3, 5, 1, 0))   # (ai, aj, di, dj, c, o)
    return wr.reshape(16 * cin, cout)


def prepare_params(p, size_y, dim_h=64):
    """One-time host-side weight layout transforms (NHWC flatten order, bf16,
    lane-dense padded fc2, pre-tiled BN2 affine)."""
    h2 = size_y // 4
    c2 = dim_h * 2
    hw2 = h2 * h2
    flat = c2 * hw2
    # fc1 columns are (c, h, w) in PyTorch's NCHW flatten; permute to NHWC (h, w, c).
    fc1 = p['fc1_w'].reshape(1024, c2, h2, h2)
    fc1 = jnp.transpose(fc1, (0, 2, 3, 1)).reshape(1024, flat)
    dim_adv = p['fc2_w'].shape[0]
    npad = _round_up(dim_adv, 128)
    fc2_w = jnp.pad(p['fc2_w'].T, ((0, 0), (0, npad - dim_adv)))
    fc2_b = jnp.pad(p['fc2_b'], (0, npad - dim_adv))
    return {
        'w1': _prep_conv_weight(p['w1']).astype(jnp.bfloat16),      # (16*Cin, 64)
        'w2': _prep_conv_weight(p['w2']).astype(jnp.bfloat16),      # (1024, 128)
        'b2': p['b2'].astype(jnp.float32),
        'bn2_g': jnp.tile(p['bn2_g'].reshape(1, c2), (1, hw2)).astype(jnp.float32),
        'bn2_b': jnp.tile(p['bn2_b'].reshape(1, c2), (1, hw2)).astype(jnp.float32),
        'fc1_w': fc1.T.astype(jnp.bfloat16),                        # (flat, 1024)
        'fc1_b': p['fc1_b'].reshape(1, 1024).astype(jnp.float32),
        'bn1_g': p['bn1_g'].reshape(1, 1024).astype(jnp.float32),
        'bn1_b': p['bn1_b'].reshape(1, 1024).astype(jnp.float32),
        'fc2_w': fc2_w.astype(jnp.bfloat16),                        # (1024, npad)
        'fc2_b': fc2_b.reshape(1, npad).astype(jnp.float32),
    }


# ---------------------------------------------------------------------------
# Forward pass: AdversaryFixedX.forward(x, y)
# ---------------------------------------------------------------------------
def adversary_fixed_x_forward(prep, x, y, *, dim_adv):
    n, _, hy, wy = y.shape
    ho1, wo1 = hy // 2, wy // 2
    ho2, wo2 = ho1 // 2, wo1 // 2

    # NCHW -> NHWC bf16 once; pad + space-to-depth for conv1.
    y_nhwc = jnp.transpose(y, (0, 2, 3, 1)).astype(jnp.bfloat16)
    sd1 = _pad_s2d(y_nhwc)                                  # (N, ho1+1, wo1+1, 4*Cy)

    # conv1 (no bias) + LeakyReLU: one M = ho1*wo1 matmul per image.
    feat1 = conv1_pallas(sd1, prep['w1'], ho=ho1, wo=wo1)   # (N, ho1*wo1, 64) bf16

    # Layout glue for conv2 (tiny bf16 tensor; left to XLA, see TODO above).
    sd2 = _pad_s2d(feat1.reshape(n, ho1, wo1, -1))          # (N, ho2+1, wo2+1, 256)

    # conv2 + bias with fused BatchNorm2d sum/sumsq accumulation.
    z2, s2, q2 = conv2_stats_pallas(sd2, prep['w2'], prep['b2'], ho=ho2, wo=wo2)
    c2 = z2.shape[-1]
    hw2 = ho2 * wo2

    # Flatten in NHWC order (fc1 weights / BN2 affine were pre-permuted/tiled).
    zflat = z2.reshape(n, hw2 * c2)
    s2f = jnp.tile(s2, (1, hw2))
    q2f = jnp.tile(q2, (1, hw2))

    # BN2-apply + LeakyReLU + fc1 + BatchNorm1d + LeakyReLU + fc2, one kernel.
    adv_pad = fc_stage_pallas(zflat, s2f, q2f, prep, n=n, count2=n * hw2)

    # AdversaryFixedX returns (x flattened, adversary(y))
    return x.reshape(x.shape[0], -1), adv_pad[:, :dim_adv]


if __name__ == "__main__":
    key = jax.random.PRNGKey(0)
    kx, ky, kp = jax.random.split(key, 3)

    batch, size_y, channel_y, dim_adv = 2, 16, 4, 8
    x = jax.random.normal(kx, (batch, 3, 5), jnp.float32)                     # passthrough
    y = jax.random.normal(ky, (batch, channel_y, size_y, size_y), jnp.float32)

    params = init_params(kp, size_y, channel_y, dim_adv)
    prep = prepare_params(params, size_y)

    fwd = jax.jit(functools.partial(adversary_fixed_x_forward, dim_adv=dim_adv))
    x_flat, adv_out = fwd(prep, x, y)
    jax.block_until_ready((x_flat, adv_out))

    assert x_flat.shape == (batch, 15)
    assert adv_out.shape == (batch, dim_adv)
    assert bool(jnp.all(jnp.isfinite(adv_out)))
    print("KERNEL_OK")
</pallas_src>

<mosaic_0001>
module attributes {stable_mosaic.version = 11 : i64} {
  func.func @_conv1_kernel(%arg0: i32, %arg1: memref<1x9x9x16xbf16, #tpu.memory_space<vmem>>, %arg2: memref<64x64xbf16, #tpu.memory_space<vmem>>, %arg3: memref<1x64x64xbf16, #tpu.memory_space<vmem>>) attributes {dimension_semantics = [#tpu.dimension_semantics<parallel>], iteration_bounds = array<i64: 2>, scalar_prefetch = 0 : i64, scratch_operands = 0 : i64, tpu.core_type = #tpu.core_type<tc>, window_params = [{transform_indices = @transform_0, window_bounds = array<i64: 1, 9, 9, 16>}, {pipeline_mode = #tpu.pipeline_mode<synchronous>, transform_indices = @transform_1, window_bounds = array<i64: 64, 64>}, {transform_indices = @transform_2, window_bounds = array<i64: 1, 64, 64>}]} {
    %c0 = arith.constant 0 : index
    %c0_0 = arith.constant 0 : index
    %c0_1 = arith.constant 0 : index
    %c0_2 = arith.constant 0 : index
    %0 = vector.load %arg1[%c0, %c0_0, %c0_1, %c0_2] : memref<1x9x9x16xbf16, #tpu.memory_space<vmem>>, vector<1x9x9x16xbf16>
    %1 = vector.shape_cast %0 : vector<1x9x9x16xbf16> to vector<9x9x16xbf16>
    %c0_3 = arith.constant 0 : index
    %c0_4 = arith.constant 0 : index
    %2 = vector.load %arg2[%c0_3, %c0_4] : memref<64x64xbf16, #tpu.memory_space<vmem>>, vector<64x64xbf16>
    %3 = vector.extract_strided_slice %1 {offsets = [0, 0, 0], sizes = [8, 8, 16], strides = [1, 1, 1]} : vector<9x9x16xbf16> to vector<8x8x16xbf16>
    %4 = vector.shape_cast %3 : vector<8x8x16xbf16> to vector<64x16xbf16>
    %5 = vector.extract_strided_slice %1 {offsets = [0, 1, 0], sizes = [8, 8, 16], strides = [1, 1, 1]} : vector<9x9x16xbf16> to vector<8x8x16xbf16>
    %6 = vector.shape_cast %5 : vector<8x8x16xbf16> to vector<64x16xbf16>
    %7 = vector.extract_strided_slice %1 {offsets = [1, 0, 0], sizes = [8, 8, 16], strides = [1, 1, 1]} : vector<9x9x16xbf16> to vector<8x8x16xbf16>
    %8 = vector.shape_cast %7 : vector<8x8x16xbf16> to vector<64x16xbf16>
    %9 = vector.extract_strided_slice %1 {offsets = [1, 1, 0], sizes = [8, 8, 16], strides = [1, 1, 1]} : vector<9x9x16xbf16> to vector<8x8x16xbf16>
    %10 = vector.shape_cast %9 : vector<8x8x16xbf16> to vector<64x16xbf16>
    %11 = vector.extract_strided_slice %2 {offsets = [0, 0], sizes = [16, 64], strides = [1, 1]} : vector<64x64xbf16> to vector<16x64xbf16>
    %cst = arith.constant dense<0.000000e+00> : vector<64x64xf32>
    %12 = tpu.matmul %4, %11, %cst {dimension_numbers = #tpu.dot_dimension_numbers<[1], [0], [0], [1], [0, 0, 1, 1], [], []>} : vector<64x16xbf16>, vector<16x64xbf16>, vector<64x64xf32> -> vector<64x64xf32>
    %13 = vector.extract_strided_slice %2 {offsets = [16, 0], sizes = [16, 64], strides = [1, 1]} : vector<64x64xbf16> to vector<16x64xbf16>
    %cst_5 = arith.constant dense<0.000000e+00> : vector<64x64xf32>
    %14 = tpu.matmul %6, %13, %cst_5 {dimension_numbers = #tpu.dot_dimension_numbers<[1], [0], [0], [1], [0, 0, 1, 1], [], []>} : vector<64x16xbf16>, vector<16x64xbf16>, vector<64x64xf32> -> vector<64x64xf32>
    %15 = arith.addf %12, %14 : vector<64x64xf32>
    %16 = vector.extract_strided_slice %2 {offsets = [32, 0], sizes = [16, 64], strides = [1, 1]} : vector<64x64xbf16> to vector<16x64xbf16>
    %cst_6 = arith.constant dense<0.000000e+00> : vector<64x64xf32>
    %17 = tpu.matmul %8, %16, %cst_6 {dimension_numbers = #tpu.dot_dimension_numbers<[1], [0], [0], [1], [0, 0, 1, 1], [], []>} : vector<64x16xbf16>, vector<16x64xbf16>, vector<64x64xf32> -> vector<64x64xf32>
    %18 = arith.addf %15, %17 : vector<64x64xf32>
    %19 = vector.extract_strided_slice %2 {offsets = [48, 0], sizes = [16, 64], strides = [1, 1]} : vector<64x64xbf16> to vector<16x64xbf16>
    %cst_7 = arith.constant dense<0.000000e+00> : vector<64x64xf32>
    %20 = tpu.matmul %10, %19, %cst_7 {dimension_numbers = #tpu.dot_dimension_numbers<[1], [0], [0], [1], [0, 0, 1, 1], [], []>} : vector<64x16xbf16>, vector<16x64xbf16>, vector<64x64xf32> -> vector<64x64xf32>
    %21 = arith.addf %18, %20 : vector<64x64xf32>
    %cst_8 = arith.constant 0.000000e+00 : f32
    %22 = vector.broadcast %cst_8 : f32 to vector<64x64xf32>
    %23 = arith.cmpf oge, %21, %22 : vector<64x64xf32>
    %cst_9 = arith.constant 2.000000e-01 : f32
    %24 = vector.broadcast %cst_9 : f32 to vector<64x64xf32>
    %25 = arith.mulf %24, %21 : vector<64x64xf32>
    %26 = arith.select %23, %21, %25 : vector<64x64xi1>, vector<64x64xf32>
    %27 = arith.truncf %26 : vector<64x64xf32> to vector<64x64xbf16>
    %c0_10 = arith.constant 0 : index
    %c0_11 = arith.constant 0 : index
    %c0_12 = arith.constant 0 : index
    %28 = vector.load %arg3[%c0_10, %c0_11, %c0_12] : memref<1x64x64xbf16, #tpu.memory_space<vmem>>, vector<1x64x64xbf16>
    %29 = vector.shape_cast %28 : vector<1x64x64xbf16> to vector<64x64xbf16>
    %30 = vector.shape_cast %27 : vector<64x64xbf16> to vector<1x64x64xbf16>
    tpu.vector_store %arg3[%c0_10, %c0_11, %c0_12], %30 {strides = array<i32>} : memref<1x64x64xbf16, #tpu.memory_space<vmem>>, vector<1x64x64xbf16>,
    return
  }
  func.func @transform_0(%arg0: i32) -> (i32, i32, i32, i32) {
    %c0_i32 = arith.constant 0 : i32
    %c0_i32_0 = arith.constant 0 : i32
    %c0_i32_1 = arith.constant 0 : i32
    %c0_i32_2 = arith.constant 0 : i32
    return %arg0, %c0_i32, %c0_i32_0, %c0_i32_1 : i32, i32, i32, i32
  }
  func.func @transform_1(%arg0: i32) -> (i32, i32) {
    %c0_i32 = arith.constant 0 : i32
    %c0_i32_0 = arith.constant 0 : i32
    %c0_i32_1 = arith.constant 0 : i32
    return %c0_i32, %c0_i32_0 : i32, i32
  }
  func.func @transform_2(%arg0: i32) -> (i32, i32, i32) {
    %c0_i32 = arith.constant 0 : i32
    %c0_i32_0 = arith.constant 0 : i32
    %c0_i32_1 = arith.constant 0 : i32
    return %arg0, %c0_i32, %c0_i32_0 : i32, i32, i32
  }
}

module attributes {stable_mosaic.version = 11 : i64} {
  func.func @_conv2_stats_kernel(%arg0: i32, %arg1: memref<1x5x5x256xbf16, #tpu.memory_space<vmem>>, %arg2: memref<1024x128xbf16, #tpu.memory_space<vmem>>, %arg3: memref<1x128xf32, #tpu.memory_space<vmem>>, %arg4: memref<1x16x128xf32, #tpu.memory_space<vmem>>, %arg5: memref<1x128xf32, #tpu.memory_space<vmem>>, %arg6: memref<1x128xf32, #tpu.memory_space<vmem>>) attributes {dimension_semantics = [#tpu.dimension_semantics<arbitrary>], iteration_bounds = array<i64: 2>, scalar_prefetch = 0 : i64, scratch_operands = 0 : i64, tpu.core_type = #tpu.core_type<tc>, window_params = [{transform_indices = @transform_0, window_bounds = array<i64: 1, 5, 5, 256>}, {pipeline_mode = #tpu.pipeline_mode<synchronous>, transform_indices = @transform_1, window_bounds = array<i64: 1024, 128>}, {pipeline_mode = #tpu.pipeline_mode<synchronous>, transform_indices = @transform_2, window_bounds = array<i64: 1, 128>}, {transform_indices = @transform_3, window_bounds = array<i64: 1, 16, 128>}, {pipeline_mode = #tpu.pipeline_mode<synchronous>, transform_indices = @transform_4, window_bounds = array<i64: 1, 128>}, {pipeline_mode = #tpu.pipeline_mode<synchronous>, transform_indices = @transform_5, window_bounds = array<i64: 1, 128>}]} {
    %c0 = arith.constant 0 : index
    %c0_0 = arith.constant 0 : index
    %c0_1 = arith.constant 0 : index
    %c0_2 = arith.constant 0 : index
    %0 = vector.load %arg1[%c0, %c0_0, %c0_1, %c0_2] : memref<1x5x5x256xbf16, #tpu.memory_space<vmem>>, vector<1x5x5x256xbf16>
    %1 = vector.shape_cast %0 : vector<1x5x5x256xbf16> to vector<5x5x256xbf16>
    %2 = vector.extract_strided_slice %1 {offsets = [0, 0, 0], sizes = [4, 4, 256], strides = [1, 1, 1]} : vector<5x5x256xbf16> to vector<4x4x256xbf16>
    %3 = vector.shape_cast %2 : vector<4x4x256xbf16> to vector<16x256xbf16>
    %4 = vector.extract_strided_slice %1 {offsets = [0, 1, 0], sizes = [4, 4, 256], strides = [1, 1, 1]} : vector<5x5x256xbf16> to vector<4x4x256xbf16>
    %5 = vector.shape_cast %4 : vector<4x4x256xbf16> to vector<16x256xbf16>
    %6 = vector.extract_strided_slice %1 {offsets = [1, 0, 0], sizes = [4, 4, 256], strides = [1, 1, 1]} : vector<5x5x256xbf16> to vector<4x4x256xbf16>
    %7 = vector.shape_cast %6 : vector<4x4x256xbf16> to vector<16x256xbf16>
    %8 = vector.extract_strided_slice %1 {offsets = [1, 1, 0], sizes = [4, 4, 256], strides = [1, 1, 1]} : vector<5x5x256xbf16> to vector<4x4x256xbf16>
    %9 = vector.shape_cast %8 : vector<4x4x256xbf16> to vector<16x256xbf16>
    %10 = tpu.concatenate %3, %5, %7, %9 in 1 : vector<16x256xbf16>, vector<16x256xbf16>, vector<16x256xbf16>, vector<16x256xbf16> -> vector<16x1024xbf16>
    %c0_3 = arith.constant 0 : index
    %c0_4 = arith.constant 0 : index
    %11 = vector.load %arg2[%c0_3, %c0_4] : memref<1024x128xbf16, #tpu.memory_space<vmem>>, vector<1024x128xbf16>
    %cst = arith.constant dense<0.000000e+00> : vector<16x128xf32>
    %12 = tpu.matmul %10, %11, %cst {dimension_numbers = #tpu.dot_dimension_numbers<[1], [0], [0], [1], [0, 0, 1, 1], [], []>} : vector<16x1024xbf16>, vector<1024x128xbf16>, vector<16x128xf32> -> vector<16x128xf32>
    %c0_5 = arith.constant 0 : index
    %c0_6 = arith.constant 0 : index
    %13 = vector.load %arg3[%c0_5, %c0_6] : memref<1x128xf32, #tpu.memory_space<vmem>>, vector<1x128xf32>
    %14 = vector.broadcast %13 : vector<1x128xf32> to vector<16x128xf32>
    %15 = arith.addf %12, %14 : vector<16x128xf32>
    %c0_7 = arith.constant 0 : index
    %c0_8 = arith.constant 0 : index
    %c0_9 = arith.constant 0 : index
    %16 = vector.load %arg4[%c0_7, %c0_8, %c0_9] : memref<1x16x128xf32, #tpu.memory_space<vmem>>, vector<1x16x128xf32>
    %17 = vector.shape_cast %16 : vector<1x16x128xf32> to vector<16x128xf32>
    %18 = vector.shape_cast %15 : vector<16x128xf32> to vector<1x16x128xf32>
    tpu.vector_store %arg4[%c0_7, %c0_8, %c0_9], %18 {strides = array<i32>} : memref<1x16x128xf32, #tpu.memory_space<vmem>>, vector<1x16x128xf32>,
    %c0_i32 = arith.constant 0 : i32
    %19 = arith.cmpi eq, %arg0, %c0_i32 : i32
    %20 = arith.extui %19 : i1 to i32
    %c0_i32_10 = arith.constant 0 : i32
    %21 = arith.cmpi ne, %20, %c0_i32_10 : i32
    scf.if %21 {
      %cst_21 = arith.constant 0.000000e+00 : f32
      %33 = vector.broadcast %cst_21 : f32 to vector<1x128xf32>
      %c0_22 = arith.constant 0 : index
      %c0_23 = arith.constant 0 : index
      %34 = vector.load %arg5[%c0_22, %c0_23] : memref<1x128xf32, #tpu.memory_space<vmem>>, vector<1x128xf32>
      tpu.vector_store %arg5[%c0_22, %c0_23], %33 {strides = array<i32>} : memref<1x128xf32, #tpu.memory_space<vmem>>, vector<1x128xf32>,
      %cst_24 = arith.constant 0.000000e+00 : f32
      %35 = vector.broadcast %cst_24 : f32 to vector<1x128xf32>
      %c0_25 = arith.constant 0 : index
      %c0_26 = arith.constant 0 : index
      %36 = vector.load %arg6[%c0_25, %c0_26] : memref<1x128xf32, #tpu.memory_space<vmem>>, vector<1x128xf32>
      tpu.vector_store %arg6[%c0_25, %c0_26], %35 {strides = array<i32>} : memref<1x128xf32, #tpu.memory_space<vmem>>, vector<1x128xf32>,
    } else {
    }
    %c0_11 = arith.constant 0 : index
    %c0_12 = arith.constant 0 : index
    %22 = vector.load %arg5[%c0_11, %c0_12] : memref<1x128xf32, #tpu.memory_space<vmem>>, vector<1x128xf32>
    %cst_13 = arith.constant dense<0.000000e+00> : vector<128xf32>
    %23 = vector.multi_reduction <add>, %15, %cst_13 [0] : vector<16x128xf32> to vector<128xf32>
    %24 = vector.shape_cast %23 : vector<128xf32> to vector<1x128xf32>
    %25 = arith.addf %22, %24 : vector<1x128xf32>
    %c0_14 = arith.constant 0 : index
    %c0_15 = arith.constant 0 : index
    %26 = vector.load %arg5[%c0_14, %c0_15] : memref<1x128xf32, #tpu.memory_space<vmem>>, vector<1x128xf32>
    tpu.vector_store %arg5[%c0_14, %c0_15], %25 {strides = array<i32>} : memref<1x128xf32, #tpu.memory_space<vmem>>, vector<1x128xf32>,
    %c0_16 = arith.constant 0 : index
    %c0_17 = arith.constant 0 : index
    %27 = vector.load %arg6[%c0_16, %c0_17] : memref<1x128xf32, #tpu.memory_space<vmem>>, vector<1x128xf32>
    %28 = arith.mulf %15, %15 : vector<16x128xf32>
    %cst_18 = arith.constant dense<0.000000e+00> : vector<128xf32>
    %29 = vector.multi_reduction <add>, %28, %cst_18 [0] : vector<16x128xf32> to vector<128xf32>
    %30 = vector.shape_cast %29 : vector<128xf32> to vector<1x128xf32>
    %31 = arith.addf %27, %30 : vector<1x128xf32>
    %c0_19 = arith.constant 0 : index
    %c0_20 = arith.constant 0 : index
    %32 = vector.load %arg6[%c0_19, %c0_20] : memref<1x128xf32, #tpu.memory_space<vmem>>, vector<1x128xf32>
    tpu.vector_store %arg6[%c0_19, %c0_20], %31 {strides = array<i32>} : memref<1x128xf32, #tpu.memory_space<vmem>>, vector<1x128xf32>,
    return
  }
  func.func @transform_0(%arg0: i32) -> (i32, i32, i32, i32) {
    %c0_i32 = arith.constant 0 : i32
    %c0_i32_0 = arith.constant 0 : i32
    %c0_i32_1 = arith.constant 0 : i32
    %c0_i32_2 = arith.constant 0 : i32
    return %arg0, %c0_i32, %c0_i32_0, %c0_i32_1 : i32, i32, i32, i32
  }
  func.func @transform_1(%arg0: i32) -> (i32, i32) {
    %c0_i32 = arith.constant 0 : i32
    %c0_i32_0 = arith.constant 0 : i32
    %c0_i32_1 = arith.constant 0 : i32
    return %c0_i32, %c0_i32_0 : i32, i32
  }
  func.func @transform_2(%arg0: i32) -> (i32, i32) {
    %c0_i32 = arith.constant 0 : i32
    %c0_i32_0 = arith.constant 0 : i32
    %c0_i32_1 = arith.constant 0 : i32
    return %c0_i32, %c0_i32_0 : i32, i32
  }
  func.func @transform_3(%arg0: i32) -> (i32, i32, i32) {
    %c0_i32 = arith.constant 0 : i32
    %c0_i32_0 = arith.constant 0 : i32
    %c0_i32_1 = arith.constant 0 : i32
    return %arg0, %c0_i32, %c0_i32_0 : i32, i32, i32
  }
  func.func @transform_4(%arg0: i32) -> (i32, i32) {
    %c0_i32 = arith.constant 0 : i32
    %c0_i32_0 = arith.constant 0 : i32
    %c0_i32_1 = arith.constant 0 : i32
    return %c0_i32, %c0_i32_0 : i32, i32
  }
  func.func @transform_5(%arg0: i32) -> (i32, i32) {
    %c0_i32 = arith.constant 0 : i32
    %c0_i32_0 = arith.constant 0 : i32
    %c0_i32_1 = arith.constant 0 : i32
    return %c0_i32, %c0_i32_0 : i32, i32
  }
}

module attributes {stable_mosaic.version = 11 : i64} {
  func.func @_fc_fused_kernel(%arg0: i32, %arg1: memref<2x2048xf32, #tpu.memory_space<vmem>>, %arg2: memref<1x2048xf32, #tpu.memory_space<vmem>>, %arg3: memref<1x2048xf32, #tpu.memory_space<vmem>>, %arg4: memref<1x2048xf32, #tpu.memory_space<vmem>>, %arg5: memref<1x2048xf32, #tpu.memory_space<vmem>>, %arg6: memref<2048x1024xbf16, #tpu.memory_space<vmem>>, %arg7: memref<1x1024xf32, #tpu.memory_space<vmem>>, %arg8: memref<1x1024xf32, #tpu.memory_space<vmem>>, %arg9: memref<1x1024xf32, #tpu.memory_space<vmem>>, %arg10: memref<1024x128xbf16, #tpu.memory_space<vmem>>, %arg11: memref<1x128xf32, #tpu.memory_space<vmem>>, %arg12: memref<2x128xf32, #tpu.memory_space<vmem>>) attributes {dimension_semantics = [#tpu.dimension_semantics<arbitrary>], iteration_bounds = array<i64: 1>, scalar_prefetch = 0 : i64, scratch_operands = 0 : i64, tpu.core_type = #tpu.core_type<tc>, window_params = [{pipeline_mode = #tpu.pipeline_mode<synchronous>, transform_indices = @transform_0, window_bounds = array<i64: 2, 2048>}, {pipeline_mode = #tpu.pipeline_mode<synchronous>, transform_indices = @transform_1, window_bounds = array<i64: 1, 2048>}, {pipeline_mode = #tpu.pipeline_mode<synchronous>, transform_indices = @transform_2, window_bounds = array<i64: 1, 2048>}, {pipeline_mode = #tpu.pipeline_mode<synchronous>, transform_indices = @transform_3, window_bounds = array<i64: 1, 2048>}, {pipeline_mode = #tpu.pipeline_mode<synchronous>, transform_indices = @transform_4, window_bounds = array<i64: 1, 2048>}, {pipeline_mode = #tpu.pipeline_mode<synchronous>, transform_indices = @transform_5, window_bounds = array<i64: 2048, 1024>}, {pipeline_mode = #tpu.pipeline_mode<synchronous>, transform_indices = @transform_6, window_bounds = array<i64: 1, 1024>}, {pipeline_mode = #tpu.pipeline_mode<synchronous>, transform_indices = @transform_7, window_bounds = array<i64: 1, 1024>}, {pipeline_mode = #tpu.pipeline_mode<synchronous>, transform_indices = @transform_8, window_bounds = array<i64: 1, 1024>}, {pipeline_mode = #tpu.pipeline_mode<synchronous>, transform_indices = @transform_9, window_bounds = array<i64: 1024, 128>}, {pipeline_mode = #tpu.pipeline_mode<synchronous>, transform_indices = @transform_10, window_bounds = array<i64: 1, 128>}, {pipeline_mode = #tpu.pipeline_mode<synchronous>, transform_indices = @transform_11, window_bounds = array<i64: 2, 128>}]} {
    %c0 = arith.constant 0 : index
    %c0_0 = arith.constant 0 : index
    %0 = vector.load %arg2[%c0, %c0_0] : memref<1x2048xf32, #tpu.memory_space<vmem>>, vector<1x2048xf32>
    %cst = arith.constant 3.125000e-02 : f32
    %1 = vector.broadcast %cst : f32 to vector<1x2048xf32>
    %2 = arith.mulf %0, %1 : vector<1x2048xf32>
    %c0_1 = arith.constant 0 : index
    %c0_2 = arith.constant 0 : index
    %3 = vector.load %arg3[%c0_1, %c0_2] : memref<1x2048xf32, #tpu.memory_space<vmem>>, vector<1x2048xf32>
    %cst_3 = arith.constant 3.125000e-02 : f32
    %4 = vector.broadcast %cst_3 : f32 to vector<1x2048xf32>
    %5 = arith.mulf %3, %4 : vector<1x2048xf32>
    %6 = arith.mulf %2, %2 : vector<1x2048xf32>
    %7 = arith.subf %5, %6 : vector<1x2048xf32>
    %cst_4 = arith.constant 0.000000e+00 : f32
    %8 = vector.broadcast %cst_4 : f32 to vector<1x2048xf32>
    %9 = arith.maximumf %7, %8 : vector<1x2048xf32>
    %c0_5 = arith.constant 0 : index
    %c0_6 = arith.constant 0 : index
    %10 = vector.load %arg4[%c0_5, %c0_6] : memref<1x2048xf32, #tpu.memory_space<vmem>>, vector<1x2048xf32>
    %cst_7 = arith.constant 9.99999974E-6 : f32
    %11 = vector.broadcast %cst_7 : f32 to vector<1x2048xf32>
    %12 = arith.addf %9, %11 : vector<1x2048xf32>
    %13 = math.rsqrt %12 : vector<1x2048xf32>
    %14 = arith.mulf %10, %13 : vector<1x2048xf32>
    %c0_8 = arith.constant 0 : index
    %c0_9 = arith.constant 0 : index
    %15 = vector.load %arg5[%c0_8, %c0_9] : memref<1x2048xf32, #tpu.memory_space<vmem>>, vector<1x2048xf32>
    %16 = arith.mulf %2, %14 : vector<1x2048xf32>
    %17 = arith.subf %15, %16 : vector<1x2048xf32>
    %c0_10 = arith.constant 0 : index
    %c0_11 = arith.constant 0 : index
    %18 = vector.load %arg1[%c0_10, %c0_11] : memref<2x2048xf32, #tpu.memory_space<vmem>>, vector<2x2048xf32>
    %19 = vector.broadcast %14 : vector<1x2048xf32> to vector<2x2048xf32>
    %20 = arith.mulf %18, %19 : vector<2x2048xf32>
    %21 = vector.broadcast %17 : vector<1x2048xf32> to vector<2x2048xf32>
    %22 = arith.addf %20, %21 : vector<2x2048xf32>
    %cst_12 = arith.constant 0.000000e+00 : f32
    %23 = vector.broadcast %cst_12 : f32 to vector<2x2048xf32>
    %24 = arith.cmpf oge, %22, %23 : vector<2x2048xf32>
    %cst_13 = arith.constant 2.000000e-01 : f32
    %25 = vector.broadcast %cst_13 : f32 to vector<2x2048xf32>
    %26 = arith.mulf %25, %22 : vector<2x2048xf32>
    %27 = arith.select %24, %22, %26 : vector<2x2048xi1>, vector<2x2048xf32>
    %28 = arith.truncf %27 : vector<2x2048xf32> to vector<2x2048xbf16>
    %c0_14 = arith.constant 0 : index
    %c0_15 = arith.constant 0 : index
    %29 = vector.load %arg6[%c0_14, %c0_15] : memref<2048x1024xbf16, #tpu.memory_space<vmem>>, vector<2048x1024xbf16>
    %cst_16 = arith.constant dense<0.000000e+00> : vector<2x1024xf32>
    %30 = tpu.matmul %28, %29, %cst_16 {dimension_numbers = #tpu.dot_dimension_numbers<[1], [0], [0], [1], [0, 0, 1, 1], [], []>} : vector<2x2048xbf16>, vector<2048x1024xbf16>, vector<2x1024xf32> -> vector<2x1024xf32>
    %c0_17 = arith.constant 0 : index
    %c0_18 = arith.constant 0 : index
    %31 = vector.load %arg7[%c0_17, %c0_18] : memref<1x1024xf32, #tpu.memory_space<vmem>>, vector<1x1024xf32>
    %32 = vector.broadcast %31 : vector<1x1024xf32> to vector<2x1024xf32>
    %33 = arith.addf %30, %32 : vector<2x1024xf32>
    %cst_19 = arith.constant dense<0.000000e+00> : vector<1024xf32>
    %34 = vector.multi_reduction <add>, %33, %cst_19 [0] : vector<2x1024xf32> to vector<1024xf32>
    %35 = vector.shape_cast %34 : vector<1024xf32> to vector<1x1024xf32>
    %cst_20 = arith.constant 5.000000e-01 : f32
    %36 = vector.broadcast %cst_20 : f32 to vector<1x1024xf32>
    %37 = arith.mulf %35, %36 : vector<1x1024xf32>
    %38 = vector.broadcast %37 : vector<1x1024xf32> to vector<2x1024xf32>
    %39 = arith.subf %33, %38 : vector<2x1024xf32>
    %40 = arith.mulf %39, %39 : vector<2x1024xf32>
    %cst_21 = arith.constant dense<0.000000e+00> : vector<1024xf32>
    %41 = vector.multi_reduction <add>, %40, %cst_21 [0] : vector<2x1024xf32> to vector<1024xf32>
    %42 = vector.shape_cast %41 : vector<1024xf32> to vector<1x1024xf32>
    %cst_22 = arith.constant 5.000000e-01 : f32
    %43 = vector.broadcast %cst_22 : f32 to vector<1x1024xf32>
    %44 = arith.mulf %42, %43 : vector<1x1024xf32>
    %c0_23 = arith.constant 0 : index
    %c0_24 = arith.constant 0 : index
    %45 = vector.load %arg8[%c0_23, %c0_24] : memref<1x1024xf32, #tpu.memory_space<vmem>>, vector<1x1024xf32>
    %cst_25 = arith.constant 9.99999974E-6 : f32
    %46 = vector.broadcast %cst_25 : f32 to vector<1x1024xf32>
    %47 = arith.addf %44, %46 : vector<1x1024xf32>
    %48 = math.rsqrt %47 : vector<1x1024xf32>
    %49 = arith.mulf %45, %48 : vector<1x1024xf32>
    %50 = vector.broadcast %49 : vector<1x1024xf32> to vector<2x1024xf32>
    %51 = arith.mulf %39, %50 : vector<2x1024xf32>
    %c0_26 = arith.constant 0 : index
    %c0_27 = arith.constant 0 : index
    %52 = vector.load %arg9[%c0_26, %c0_27] : memref<1x1024xf32, #tpu.memory_space<vmem>>, vector<1x1024xf32>
    %53 = vector.broadcast %52 : vector<1x1024xf32> to vector<2x1024xf32>
    %54 = arith.addf %51, %53 : vector<2x1024xf32>
    %cst_28 = arith.constant 0.000000e+00 : f32
    %55 = vector.broadcast %cst_28 : f32 to vector<2x1024xf32>
    %56 = arith.cmpf oge, %54, %55 : vector<2x1024xf32>
    %cst_29 = arith.constant 2.000000e-01 : f32
    %57 = vector.broadcast %cst_29 : f32 to vector<2x1024xf32>
    %58 = arith.mulf %57, %54 : vector<2x1024xf32>
    %59 = arith.select %56, %54, %58 : vector<2x1024xi1>, vector<2x1024xf32>
    %60 = arith.truncf %59 : vector<2x1024xf32> to vector<2x1024xbf16>
    %c0_30 = arith.constant 0 : index
    %c0_31 = arith.constant 0 : index
    %61 = vector.load %arg10[%c0_30, %c0_31] : memref<1024x128xbf16, #tpu.memory_space<vmem>>, vector<1024x128xbf16>
    %cst_32 = arith.constant dense<0.000000e+00> : vector<2x128xf32>
    %62 = tpu.matmul %60, %61, %cst_32 {dimension_numbers = #tpu.dot_dimension_numbers<[1], [0], [0], [1], [0, 0, 1, 1], [], []>} : vector<2x1024xbf16>, vector<1024x128xbf16>, vector<2x128xf32> -> vector<2x128xf32>
    %c0_33 = arith.constant 0 : index
    %c0_34 = arith.constant 0 : index
    %63 = vector.load %arg11[%c0_33, %c0_34] : memref<1x128xf32, #tpu.memory_space<vmem>>, vector<1x128xf32>
    %64 = vector.broadcast %63 : vector<1x128xf32> to vector<2x128xf32>
    %65 = arith.addf %62, %64 : vector<2x128xf32>
    %c0_35 = arith.constant 0 : index
    %c0_36 = arith.constant 0 : index
    %66 = vector.load %arg12[%c0_35, %c0_36] : memref<2x128xf32, #tpu.memory_space<vmem>>, vector<2x128xf32>
    tpu.vector_store %arg12[%c0_35, %c0_36], %65 {strides = array<i32>} : memref<2x128xf32, #tpu.memory_space<vmem>>, vector<2x128xf32>,
    return
  }
  func.func @transform_0(%arg0: i32) -> (i32, i32) {
    %c0_i32 = arith.constant 0 : i32
    %c0_i32_0 = arith.constant 0 : i32
    %c0_i32_1 = arith.constant 0 : i32
    return %c0_i32, %c0_i32_0 : i32, i32
  }
  func.func @transform_1(%arg0: i32) -> (i32, i32) {
    %c0_i32 = arith.constant 0 : i32
    %c0_i32_0 = arith.constant 0 : i32
    %c0_i32_1 = arith.constant 0 : i32
    return %c0_i32, %c0_i32_0 : i32, i32
  }
  func.func @transform_2(%arg0: i32) -> (i32, i32) {
    %c0_i32 = arith.constant 0 : i32
    %c0_i32_0 = arith.constant 0 : i32
    %c0_i32_1 = arith.constant 0 : i32
    return %c0_i32, %c0_i32_0 : i32, i32
  }
  func.func @transform_3(%arg0: i32) -> (i32, i32) {
    %c0_i32 = arith.constant 0 : i32
    %c0_i32_0 = arith.constant 0 : i32
    %c0_i32_1 = arith.constant 0 : i32
    return %c0_i32, %c0_i32_0 : i32, i32
  }
  func.func @transform_4(%arg0: i32) -> (i32, i32) {
    %c0_i32 = arith.constant 0 : i32
    %c0_i32_0 = arith.constant 0 : i32
    %c0_i32_1 = arith.constant 0 : i32
    return %c0_i32, %c0_i32_0 : i32, i32
  }
  func.func @transform_5(%arg0: i32) -> (i32, i32) {
    %c0_i32 = arith.constant 0 : i32
    %c0_i32_0 = arith.constant 0 : i32
    %c0_i32_1 = arith.constant 0 : i32
    return %c0_i32, %c0_i32_0 : i32, i32
  }
  func.func @transform_6(%arg0: i32) -> (i32, i32) {
    %c0_i32 = arith.constant 0 : i32
    %c0_i32_0 = arith.constant 0 : i32
    %c0_i32_1 = arith.constant 0 : i32
    return %c0_i32, %c0_i32_0 : i32, i32
  }
  func.func @transform_7(%arg0: i32) -> (i32, i32) {
    %c0_i32 = arith.constant 0 : i32
    %c0_i32_0 = arith.constant 0 : i32
    %c0_i32_1 = arith.constant 0 : i32
    return %c0_i32, %c0_i32_0 : i32, i32
  }
  func.func @transform_8(%arg0: i32) -> (i32, i32) {
    %c0_i32 = arith.constant 0 : i32
    %c0_i32_0 = arith.constant 0 : i32
    %c0_i32_1 = arith.constant 0 : i32
    return %c0_i32, %c0_i32_0 : i32, i32
  }
  func.func @transform_9(%arg0: i32) -> (i32, i32) {
    %c0_i32 = arith.constant 0 : i32
    %c0_i32_0 = arith.constant 0 : i32
    %c0_i32_1 = arith.constant 0 : i32
    return %c0_i32, %c0_i32_0 : i32, i32
  }
  func.func @transform_10(%arg0: i32) -> (i32, i32) {
    %c0_i32 = arith.constant 0 : i32
    %c0_i32_0 = arith.constant 0 : i32
    %c0_i32_1 = arith.constant 0 : i32
    return %c0_i32, %c0_i32_0 : i32, i32
  }
  func.func @transform_11(%arg0: i32) -> (i32, i32) {
    %c0_i32 = arith.constant 0 : i32
    %c0_i32_0 = arith.constant 0 : i32
    %c0_i32_1 = arith.constant 0 : i32
    return %c0_i32, %c0_i32_0 : i32, i32
  }
}

</mosaic_0001>

<bundles_post_ra>
// kernel: adversary_fixed_x_forward.3
= control target key start
LH: loop header
LB: loop body
LE: loop exit
PB: predicated region body
PF: predicated region fallthrough
CT: control target
= control target key end

     0   :  { %7 = vsyncpa [#allocation3], 0  ;;  %s804_s9 = smov 0   ;;  %s925_s0 = inlined_call_operand.vmem [shape: bf16[2,9,9,16], index: 0, kind: input, shape index: {}]   ;;  %s926_s1 = inlined_call_operand.hbm [shape: bf16[64,64], index: 1, kind: input, shape index: {}]   ;;  %s927_s2 = inlined_call_operand.vmem [shape: bf16[2,64,64], index: 2, kind: output, shape index: {}]  }
   0x1 LB: > { %s102_s12 = sshll.u32 %s926_s1, 4  ;;  %s673_s13 = sadd.s32 4294967295, %s784_s9   ;;  %s784_s9 = sphi %s804_s9, %s13_s9   ;;  %s103_s12 = int_to_ptr.hbm [resolvable:$true] %s102_s12 }
   0x2   : > { %p675_p0 = scmp.ge.s32.totalorder %s784_s9, 1  ;;  %p91_p1 = scmp.lt.s32.totalorder %s784_s9, 3 }
   0x3   : > { %p731_p2 = scmp.eq.s32.totalorder %s673_s13, 0  ;;  %s786_s14 = smov [#allocation2]  }
   0x4   : > { %p92_p3 = pnand %p675_p0, %p91_p1  ;;  %s104_s15 = sshll.u32 %s786_s14, 4  ;;  %s105_s15 = int_to_ptr.vmem [resolvable:$true] %s104_s15 }
   0x5   : > { %s787_s16 = smov 64   ;;  %s788_s17 = smov 4  }
   0x6   : > { %p727_p4 = pneg %p92_p3  ;;  %128 = sbr.rel (%p92_p3) target bundleno = 229 (0xe5), region = 28 }
   0x8   : > { %p728_p5 = pnand %p731_p2, %p727_p4 }
   0xa   : > { %730 = dma.hbm_to_vmem [thread:$0]  (!%p728_p5), %s103_s12, 512, %s105_s15, [#allocation3], %s787_s16, %s787_s16, %s788_s17  }
   0xb   : > { %779 = dma.done.wait (%p731_p2), [#allocation3], 512  }
   0xc   : > { %781 = vsyncadd (%p731_p2), [#allocation3], 4294966784  ;;  %p151_p6 = scmp.lt.s32.totalorder %s673_s13, 1  ;;  %vm335_vm0 = vcmask 130048   ;;  %vm188_vm1 = vsmask.f32 3328 }
   0xd   : > { %v720_v0 = vld [vmem:[#allocation2 + $0x10] sm:$0xff]  ;;  %v718_v1 = vld [vmem:[#allocation2] sm:$0xff]  ;;  %vm189_vm2 = vsmask.f32 7440  ;;  %v719_v12 = vld [vmem:[#allocation2 + $0x8] sm:$0xff]  ;;  %vm597_vm5 = vcmask 519168  }
   0xe   : > { %s931_s13 = smov (!%p151_p6, %s673_s13), 1  ;;  %475 = vmatpush.bf16.msra.mxu2 %v720_v0  ;;  %422 = vmatpush.bf16.msra.mxu1 %v718_v1  ;;  %v721_v13 = vld [vmem:[#allocation2 + $0x18] sm:$0xff]  ;;  %vm844_vm3 = vmor %vm188_vm1, %vm189_vm2 }
   0xf   : > { %s722_s18 = smul.u32 72, %s931_s13  ;;  %355 = vmatpush.bf16.msra.mxu0 %v719_v12  ;;  %535 = vmatpush.bf16.msra.mxu3 %v721_v13  ;;  %s717_s22 = sshll.u32 %s931_s13, 5 }
  0x10   : > { %s904_s25 = scalar_lea.vmem %s927_s2, %s717_s22 }
  0x11   : > { %s821_s21 = scalar_lea.vmem %s925_s0, %s722_s18 }
  0x12   : > { %v164_v2 = vld [vmem:[%s821_s21 + $0x8] sm:$0xf]  ;;  %v825_v3 = vld [vmem:[%s821_s21 + $0x10] sm:$0xf]  ;;  %v162_v7 = vld [vmem:[%s821_s21] sm:$0xf] }
  0x13   : > { %v206_v4 = vshrl.u32 %v164_v2, 16  ;;  %v209_v5 = vshll.u32 %v164_v2, 16  ;;  %v386_v6 = vunpack.c.l.b16 %v164_v2  ;;  %v220_v8 = vshrl.u32 %v825_v3, 16  ;;  %v163_v18 = vld [vmem:[%s821_s21 + $0x4] sm:$0x1] }
  0x14   : > { %v223_v9 = vshll.u32 %v825_v3, 16  ;;  %v387_v10 = vunpack.c.l.b16 %v825_v3  ;;  %v192_v11 = vshrl.u32 %v162_v7, 16  ;;  %v195_v16 = vshll.u32 %v162_v7, 16  ;;  %v165_v23 = vld [vmem:[%s821_s21 + $0xc] sm:$0x1] }
  0x15   : > { %v208_v14 = vrot.slane %v206_v4, 4  ;;  %v211_v15 = vrot.slane %v209_v5, 5  ;;  %v385_v17 = vunpack.c.l.b16 %v162_v7  ;;  %v222_v19 = vrot.slane %v220_v8, 4  ;;  %v167_v28 = vld [vmem:[%s821_s21 + $0x14] sm:$0x1] }
  0x16   : > { %v225_v20 = vrot.slane %v223_v9, 5  ;;  %v446_v21 = vpack.c.b16 %v387_v10, %v386_v6  ;;  %v194_v22 = vrot.slane %v192_v11, 4  ;;  %v197_v24 = vrot.slane %v195_v16, 5  ;;  %v168_v29 = vld [vmem:[%s821_s21 + $0x18] sm:$0xf] }
  0x17   : > { %v393_v25 = vpack.c.b16 %v386_v6, %v385_v17  ;;  %v201_v26 = vshll.u32 %v163_v18, 16  ;;  %v212_v27 = vor.u32 %v211_v15, %v208_v14  ;;  %v215_v30 = vshll.u32 %v165_v23, 16  ;;  %v839_v33 = vld [vmem:[%s821_s21 + $0x20] sm:$0xf]  ;;  %v169_v50 = vld [vmem:[%s821_s21 + $0x1c] sm:$0x1] }
  0x18   : > { %703 = vmatmul.msk.bf16.vlgmr.msra.gmra.mxu2 %vm335_vm0, %v446_v21  ;;  %v226_v31 = vor.u32 %v225_v20, %v222_v19  ;;  %v229_v32 = vshll.u32 %v167_v28, 16  ;;  %v234_v34 = vshrl.u32 %v168_v29, 16  ;;  %v198_v36 = vor.u32 %v197_v24, %v194_v22  ;;  %v171_v51 = vld [vmem:[%s821_s21 + $0x24] sm:$0x1]  ;;  %v172_v7 = vld [vmem:[%s821_s21 + $0x28] sm:$0xf] }
  0x19   : > { %695 = vmatmul.msk.bf16.vlgmr.msra.gmra.mxu1 %vm335_vm0, %v393_v25  ;;  %v203_v37 = vrot.slane %v201_v26, 5  ;;  %v213_v38 = vrot.slane %v212_v27, 4  ;;  %v237_v39 = vshll.u32 %v168_v29, 16  ;;  %v217_v40 = vrot.slane %v215_v30, 5  ;;  %v863_v8 = vld [vmem:[%s821_s21 + $0x30] sm:$0xf] }
  0x1a   : > { %v227_v41 = vrot.slane %v226_v31, 4  ;;  %v231_v42 = vrot.slane %v229_v32, 5  ;;  %v236_v43 = vrot.slane %v234_v34, 4  ;;  %v199_v44 = vrot.slane %v198_v36, 4  ;;  %v173_v22 = vld [vmem:[%s821_s21 + $0x2c] sm:$0x1] }
  0x1b   : > { %v239_v45 = vrot.slane %v237_v39, 5  ;;  %v248_v46 = vshrl.u32 %v839_v33, 16  ;;  %v251_v47 = vshll.u32 %v839_v33, 16  ;;  %v218_v48 = vsel %vm844_vm3, %v213_v38, %v217_v40  ;;  %v175_v23 = vld [vmem:[%s821_s21 + $0x34] sm:$0x1] }
  0x1c   : > { %v232_v49 = vsel %vm844_vm3, %v227_v41, %v231_v42  ;;  %v204_v52 = vsel %vm844_vm3, %v199_v44, %v203_v37  ;;  %v318_v53 = vunpack.c.l.b16 %v218_v48  ;;  %v243_v60 = vshll.u32 %v169_v50, 16  ;;  %v176_v37 = vld [vmem:[%s821_s21 + $0x38] sm:$0xf]  ;;  %v178_v38 = vld [vmem:[%s821_s21 + $0x40] sm:$0xf] }
  0x1d   : > { %v319_v54 = vunpack.c.l.b16 %v232_v49  ;;  %v250_v55 = vrot.slane %v248_v46, 4  ;;  %v317_v56 = vunpack.c.l.b16 %v204_v52  ;;  %v253_v57 = vrot.slane %v251_v47, 5 }
  0x1e   : > { %v240_v59 = vor.u32 %v239_v45, %v236_v43  ;;  %v257_v61 = vshll.u32 %v171_v51, 16  ;;  %v388_v63 = vunpack.c.l.b16 %v168_v29  ;;  %v389_v0 = vunpack.c.l.b16 %v839_v33 }
  0x1f   : > { %v506_v58 = vpack.c.b16 %v319_v54, %v318_v53  ;;  %v325_v62 = vpack.c.b16 %v318_v53, %v317_v56  ;;  %v254_v1 = vor.u32 %v253_v57, %v250_v55  ;;  %v245_v4 = vrot.slane %v243_v60, 5  ;;  %v177_v53 = vld [vmem:[%s821_s21 + $0x3c] sm:$0x1] }
  0x20   : > { %v241_v2 = vrot.slane %v240_v59, 4  ;;  %v259_v6 = vrot.slane %v257_v61, 5  ;;  %v447_v9 = vpack.c.b16 %v389_v0, %v388_v63  ;;  %v394_v11 = vpack.c.b16 %v388_v63, %v387_v10 }
  0x21   : > { %711 = vmatmul.msk.bf16.vlgmr.msra.gmra.mxu3 %vm335_vm0, %v506_v58  ;;  %687 = vmatmul.msk.bf16.vlgmr.msra.gmra.mxu0 %vm335_vm0, %v325_v62  ;;  %v255_v5 = vrot.slane %v254_v1, 4  ;;  %v262_v12 = vshrl.u32 %v172_v7, 16  ;;  %v265_v13 = vshll.u32 %v172_v7, 16  ;;  %v276_v16 = vshrl.u32 %v863_v8, 16 }
  0x22   : > { %v246_v14 = vsel %vm844_vm3, %v241_v2, %v245_v4  ;;  %v279_v17 = vshll.u32 %v863_v8, 16  ;;  %v271_v27 = vshll.u32 %v173_v22, 16  ;;  %v285_v29 = vshll.u32 %v175_v23, 16 }
  0x23   : > { %v260_v15 = vsel %vm844_vm3, %v255_v5, %v259_v6  ;;  %v320_v3 = vunpack.c.l.b16 %v246_v14  ;;  %v264_v10 = vrot.slane %v262_v12, 4  ;;  %v267_v19 = vrot.slane %v265_v13, 5 }
  0x24   : > { %v321_v18 = vunpack.c.l.b16 %v260_v15  ;;  %v278_v20 = vrot.slane %v276_v16, 4  ;;  %v281_v21 = vrot.slane %v279_v17, 5  ;;  %v390_v30 = vunpack.c.l.b16 %v172_v7 }
  0x25   : > { %v268_v25 = vor.u32 %v267_v19, %v264_v10  ;;  %v326_v26 = vpack.c.b16 %v320_v3, %v319_v54  ;;  %v391_v31 = vunpack.c.l.b16 %v863_v8  ;;  %v273_v33 = vrot.slane %v271_v27, 5  ;;  %v179_v54 = vld [vmem:[%s821_s21 + $0x44] sm:$0x1] }
  0x26   : > { %v507_v24 = vpack.c.b16 %v321_v18, %v320_v3  ;;  %v282_v28 = vor.u32 %v281_v21, %v278_v20  ;;  %v287_v36 = vrot.slane %v285_v29, 5  ;;  %v395_v40 = vpack.c.b16 %v390_v30, %v389_v0 }
  0x27   : > { %v269_v32 = vrot.slane %v268_v25, 4  ;;  %v448_v39 = vpack.c.b16 %v391_v31, %v390_v30  ;;  %v290_v41 = vshrl.u32 %v176_v37, 16  ;;  %v293_v42 = vshll.u32 %v176_v37, 16 }
  0x28   : > { %704 = vmatmul.msk.bf16.gmra.mxu2 %vm335_vm0, %v447_v9  ;;  %v283_v34 = vrot.slane %v282_v28, 4  ;;  %v304_v45 = vshrl.u32 %v178_v38, 16  ;;  %v307_v46 = vshll.u32 %v178_v38, 16  ;;  %v299_v58 = vshll.u32 %v177_v53, 16 }
  0x29   : > { %696 = vmatmul.msk.bf16.gmra.mxu1 %vm335_vm0, %v394_v11  ;;  %v274_v43 = vsel %vm844_vm3, %v269_v32, %v273_v33  ;;  %v292_v49 = vrot.slane %v290_v41, 4  ;;  %v295_v50 = vrot.slane %v293_v42, 5  ;;  %v313_v60 = vshll.u32 %v179_v54, 16 }
  0x2a   : > { %v288_v44 = vsel %vm844_vm3, %v283_v34, %v287_v36  ;;  %v322_v47 = vunpack.c.l.b16 %v274_v43  ;;  %v306_v51 = vrot.slane %v304_v45, 4  ;;  %v309_v52 = vrot.slane %v307_v46, 5 }
  0x2b   : > { %v323_v48 = vunpack.c.l.b16 %v288_v44  ;;  %v296_v56 = vor.u32 %v295_v50, %v292_v49  ;;  %v392_v61 = vunpack.c.l.b16 %v176_v37  ;;  %v445_v62 = vunpack.c.l.b16 %v178_v38 }
  0x2c   : > { %v327_v57 = vpack.c.b16 %v322_v47, %v321_v18  ;;  %v310_v59 = vor.u32 %v309_v52, %v306_v51  ;;  %v301_v0 = vrot.slane %v299_v58, 5  ;;  %v315_v2 = vrot.slane %v313_v60, 5 }
  0x2d   : > { %v508_v55 = vpack.c.b16 %v323_v48, %v322_v47  ;;  %v297_v63 = vrot.slane %v296_v56, 4  ;;  %v449_v4 = vpack.c.b16 %v445_v62, %v392_v61  ;;  %v396_v5 = vpack.c.b16 %v392_v61, %v391_v31 }
  0x2e   : > { %v311_v1 = vrot.slane %v310_v59, 4 }
  0x2f   : > { %v302_v6 = vsel %vm844_vm3, %v297_v63, %v301_v0 }
  0x30   : > { %v316_v7 = vsel %vm844_vm3, %v311_v1, %v315_v2  ;;  %v324_v8 = vunpack.c.l.b16 %v302_v6 }
  0x31   : > { %712 = vmatmul.msk.bf16.gmra.mxu3 %vm335_vm0, %v507_v24  ;;  %688 = vmatmul.msk.bf16.gmra.mxu0 %vm335_vm0, %v326_v26  ;;  %v505_v9 = vunpack.c.l.b16 %v316_v7 }
  0x32   : > { %v328_v12 = vpack.c.b16 %v324_v8, %v323_v48 }
  0x33   : > { %v509_v11 = vpack.c.b16 %v505_v9, %v324_v8 }
  0x38   : > { %705 = vmatmul.msk.bf16.gmra.mxu2 %vm335_vm0, %v448_v39 }
  0x39   : > { %697 = vmatmul.msk.bf16.gmra.mxu1 %vm335_vm0, %v395_v40 }
  0x41   : > { %713 = vmatmul.msk.bf16.gmra.mxu3 %vm335_vm0, %v508_v55  ;;  %689 = vmatmul.msk.bf16.gmra.mxu0 %vm335_vm0, %v327_v57 }
  0x48   : > { %706 = vmatmul.msk.bf16.gmra.mxu2 %vm335_vm0, %v449_v4 }
  0x49   : > { %698 = vmatmul.msk.bf16.gmra.mxu1 %vm335_vm0, %v396_v5 }
  0x51   : > { %714 = vmatmul.msk.bf16.gmra.mxu3 %vm335_vm0, %v509_v11  ;;  %690 = vmatmul.msk.bf16.gmra.mxu0 %vm335_vm0, %v328_v12 }
  0x96   : > { %v424_v13 = vpop.f32.mrf.mxu1 }
  0x9b   : > { %v477_v14 = vpop.f32.mrf.mxu2 }
  0x9e   : > { %v426_v15 = vpop.f32.mrf.mxu1  ;;  %v357_v16 = vpop.f32.mrf.mxu0 }
  0x9f   : > { %v425_v17 = vadd.f32 %v424_v13, %v357_v16 }
  0xa1   : > { %v497_v35 = vadd.f32 %v477_v14, %v425_v17 }
  0xa3   : > { %v479_v3 = vpop.f32.mrf.mxu2 }
  0xa4   : > { %v537_v18 = vpop.f32.mrf.mxu3 }
  0xa5   : > { %v557_v10 = vadd.f32 %v537_v18, %v497_v35 }
  0xa6   : > { %v429_v19 = vpop.f32.mrf.mxu1  ;;  %v359_v21 = vpop.f32.mrf.mxu0 }
  0xa7   : > { %vm565_vm4 = vcmp.ge.f32.partialorder %v557_v10, 0.0  ;;  %v573_v20 = vmul.f32 0.2, %v557_v10  ;;  %v427_v22 = vadd.f32 %v426_v15, %v359_v21 }
  0xa9   : > { %v581_v23 = vsel %vm565_vm4, %v557_v10, %v573_v20  ;;  %v498_v26 = vadd.f32 %v479_v3, %v427_v22 }
  0xaa   : > { %v589_v24 = vpack.c.bf16 %v581_v23, %v581_v23 }
  0xab   : > { %v482_v25 = vpop.f32.mrf.mxu2 }
  0xac   : > { %598 = vst.msk [vmem:[%s904_s25] sm:$0xf] %vm597_vm5, %v589_v24  ;;  %v539_v27 = vpop.f32.mrf.mxu3 }
  0xad   : > { %v558_v28 = vadd.f32 %v539_v27, %v498_v26 }
  0xae   : > { %v362_v30 = vpop.f32.mrf.mxu0  ;;  %v431_v31 = vpop.f32.mrf.mxu1 }
  0xaf   : > { %vm566_vm6 = vcmp.ge.f32.partialorder %v558_v28, 0.0  ;;  %v574_v29 = vmul.f32 0.2, %v558_v28  ;;  %v430_v32 = vadd.f32 %v429_v19, %v362_v30 }
  0xb1   : > { %v582_v33 = vsel %vm566_vm6, %v558_v28, %v574_v29  ;;  %v499_v36 = vadd.f32 %v482_v25, %v430_v32 }
  0xb2   : > { %v590_v34 = vpack.c.bf16 %v582_v33, %v582_v33 }
  0xb3   : > { %v484_v37 = vpop.f32.mrf.mxu2 }
  0xb4   : > { %599 = vst.msk [vmem:[%s904_s25 + $0x4] sm:$0xf] %vm597_vm5, %v590_v34  ;;  %v542_v38 = vpop.f32.mrf.mxu3 }
  0xb5   : > { %v559_v39 = vadd.f32 %v542_v38, %v499_v36 }
  0xb6   : > { %v364_v41 = vpop.f32.mrf.mxu0  ;;  %v434_v44 = vpop.f32.mrf.mxu1 }
  0xb7   : > { %vm567_vm7 = vcmp.ge.f32.partialorder %v559_v39, 0.0  ;;  %v575_v40 = vmul.f32 0.2, %v559_v39  ;;  %v432_v42 = vadd.f32 %v431_v31, %v364_v41 }
  0xb9   : > { %v583_v43 = vsel %vm567_vm7, %v559_v39, %v575_v40  ;;  %v500_v46 = vadd.f32 %v484_v37, %v432_v42 }
  0xba   : > { %v591_v45 = vpack.c.bf16 %v583_v43, %v583_v43 }
  0xbb   : > { %v487_v47 = vpop.f32.mrf.mxu2 }
  0xbc   : > { %600 = vst.msk [vmem:[%s904_s25 + $0x8] sm:$0xf] %vm597_vm5, %v591_v45  ;;  %v544_v48 = vpop.f32.mrf.mxu3 }
  0xbd   : > { %v560_v49 = vadd.f32 %v544_v48, %v500_v46 }
  0xbe   : > { %v367_v51 = vpop.f32.mrf.mxu0  ;;  %v436_v56 = vpop.f32.mrf.mxu1 }
  0xbf   : > { %vm568_vm8 = vcmp.ge.f32.partialorder %v560_v49, 0.0  ;;  %v576_v50 = vmul.f32 0.2, %v560_v49  ;;  %v435_v52 = vadd.f32 %v434_v44, %v367_v51 }
  0xc1   : > { %v584_v53 = vsel %vm568_vm8, %v560_v49, %v576_v50  ;;  %v501_v55 = vadd.f32 %v487_v47, %v435_v52 }
  0xc2   : > { %v592_v54 = vpack.c.bf16 %v584_v53, %v584_v53 }
  0xc3   : > { %v489_v59 = vpop.f32.mrf.mxu2 }
  0xc4   : > { %601 = vst.msk [vmem:[%s904_s25 + $0xc] sm:$0xf] %vm597_vm5, %v592_v54  ;;  %v547_v57 = vpop.f32.mrf.mxu3 }
  0xc5   : > { %v561_v58 = vadd.f32 %v547_v57, %v501_v55 }
  0xc6   : > { %v369_v61 = vpop.f32.mrf.mxu0  ;;  %v439_v4 = vpop.f32.mrf.mxu1 }
  0xc7   : > { %vm569_vm9 = vcmp.ge.f32.partialorder %v561_v58, 0.0  ;;  %v577_v60 = vmul.f32 0.2, %v561_v58  ;;  %v437_v62 = vadd.f32 %v436_v56, %v369_v61 }
  0xc9   : > { %v585_v63 = vsel %vm569_vm9, %v561_v58, %v577_v60  ;;  %v502_v1 = vadd.f32 %v489_v59, %v437_v62 }
  0xca   : > { %v593_v0 = vpack.c.bf16 %v585_v63, %v585_v63 }
  0xcb   : > { %v492_v8 = vpop.f32.mrf.mxu2 }
  0xcc   : > { %602 = vst.msk [vmem:[%s904_s25 + $0x10] sm:$0xf] %vm597_vm5, %v593_v0  ;;  %v549_v2 = vpop.f32.mrf.mxu3 }
  0xcd   : > { %v562_v5 = vadd.f32 %v549_v2, %v502_v1 }
  0xce   : > { %v372_v7 = vpop.f32.mrf.mxu0  ;;  %v441_v16 = vpop.f32.mrf.mxu1 }
  0xcf   : > { %vm570_vm10 = vcmp.ge.f32.partialorder %v562_v5, 0.0  ;;  %v578_v6 = vmul.f32 0.2, %v562_v5  ;;  %v440_v9 = vadd.f32 %v439_v4, %v372_v7 }
  0xd1   : > { %v586_v11 = vsel %vm570_vm10, %v562_v5, %v578_v6  ;;  %v503_v13 = vadd.f32 %v492_v8, %v440_v9 }
  0xd2   : > { %v594_v12 = vpack.c.bf16 %v586_v11, %v586_v11 }
  0xd3   : > { %v494_v10 = vpop.f32.mrf.mxu2 }
  0xd4   : > { %603 = vst.msk [vmem:[%s904_s25 + $0x14] sm:$0xf] %vm597_vm5, %v594_v12  ;;  %v552_v14 = vpop.f32.mrf.mxu3 }
  0xd5   : > { %v563_v15 = vadd.f32 %v552_v14, %v503_v13 }
  0xd6   : > { %v374_v35 = vpop.f32.mrf.mxu0 }
  0xd7   : > { %vm571_vm11 = vcmp.ge.f32.partialorder %v563_v15, 0.0  ;;  %v579_v17 = vmul.f32 0.2, %v563_v15  ;;  %v442_v3 = vadd.f32 %v441_v16, %v374_v35 }
  0xd9   : > { %v587_v18 = vsel %vm571_vm11, %v563_v15, %v579_v17  ;;  %v504_v20 = vadd.f32 %v494_v10, %v442_v3 }
  0xda   : > { %v595_v19 = vpack.c.bf16 %v587_v18, %v587_v18 }
  0xdc   : > { %604 = vst.msk [vmem:[%s904_s25 + $0x18] sm:$0xf] %vm597_vm5, %v595_v19  ;;  %v554_v21 = vpop.f32.mrf.mxu3 }
  0xdd   : > { %v564_v22 = vadd.f32 %v554_v21, %v504_v20 }
  0xdf   : > { %vm572_vm12 = vcmp.ge.f32.partialorder %v564_v22, 0.0  ;;  %v580_v23 = vmul.f32 0.2, %v564_v22 }
  0xe1   : > { %v588_v24 = vsel %vm572_vm12, %v564_v22, %v580_v23 }
  0xe2   : > { %v596_v25 = vpack.c.bf16 %v588_v24, %v588_v24 }
  0xe4   : > { %605 = vst.msk [vmem:[%s904_s25 + $0x1c] sm:$0xf] %vm597_vm5, %v596_v25 }
  0xe5 PF: > { %s13_s9 = sadd.s32 1, %s784_s9  }
  0xe6   : > { %p10_p7 = scmp.ge.s32.totalorder %s13_s9, 4  }
  0xe8   :  { %12 = sbr.rel (!%p10_p7) target bundleno = 1 (0x1), region = 63 }
  0xed   :  { %627 = vsyncpa [#allocation3], 1 }
  0xee   :  { %629 = vsyncpa [#allocation3 + $0x1], 1 }

// kernel: adversary_fixed_x_forward.4
= control target key start
LH: loop header
LB: loop body
LE: loop exit
PB: predicated region body
PF: predicated region fallthrough
CT: control target
= control target key end

     0   :  { %11 = vsyncpa [#allocation3], 0  ;;  %s1796_s0 = inlined_call_operand.vmem [shape: bf16[2,5,5,256], index: 0, kind: input, shape index: {}]   ;;  %s1797_s1 = inlined_call_operand.hbm [shape: bf16[1024,128], index: 1, kind: input, shape index: {}]   ;;  %s1798_s2 = inlined_call_operand.hbm [shape: f32[1,128], index: 2, kind: input, shape index: {}]   ;;  %s1799_s3 = inlined_call_operand.vmem [shape: f32[2,16,128], index: 3, kind: output, shape index: {0}]   ;;  %s1800_s4 = inlined_call_operand.vmem [shape: f32[1,128], index: 4, kind: output, shape index: {1}]   ;;  %s1801_s5 = inlined_call_operand.vmem [shape: f32[1,128], index: 5, kind: output, shape index: {2}]  }
   0x1   :  { %12 = vsyncpa [#allocation5], 0  ;;  %s1648_s18 = smov 0  }
   0x2 LB: > { %s170_s21 = sshll.u32 %s1797_s1, 4  ;;  %s1657_s22 = sadd.s32 4294967295, %s1611_s18   ;;  %s1611_s18 = sphi %s1648_s18, %s18_s18   ;;  %s171_s21 = int_to_ptr.hbm [resolvable:$true] %s170_s21 }
   0x3   : > { %p1169_p0 = scmp.ge.s32.totalorder %s1611_s18, 1  ;;  %p159_p1 = scmp.lt.s32.totalorder %s1611_s18, 3 }
   0x4   : > { %p1170_p2 = scmp.ne.s32.totalorder %s1657_s22, 0  ;;  %p1519_p3 = scmp.eq.s32.totalorder %s1657_s22, 0 }
   0x5   : > { %p1663_p4 = pnand %p1169_p0, %p159_p1  ;;  %s1613_s24 = smov [#allocation2]  }
   0x6   : > { %s172_s25 = sshll.u32 %s1613_s24, 4  ;;  %s185_s28 = sshll.u32 %s1798_s2, 4  ;;  %s173_s25 = int_to_ptr.vmem [resolvable:$true] %s172_s25  ;;  %s186_s28 = int_to_ptr.hbm [resolvable:$true] %s185_s28 }
   0x7   : > { %p1512_p5 = pneg %p1663_p4  ;;  %s1614_s29 = smov [#allocation4]  }
   0x8   : > { %s187_s30 = sshll.u32 %s1614_s29, 4  ;;  %s1615_s6 = smov 64   ;;  %s188_s30 = int_to_ptr.vmem [resolvable:$true] %s187_s30 }
   0x9   : > { %p1513_p6 = pnand %p1519_p3, %p1512_p5  ;;  %s1616_s7 = smov 4  }
   0xa   : > { %208 = sbr.rel (%p1663_p4) target bundleno = 251 (0xfb), region = 32 }
   0xb   : > { %1515 = dma.hbm_to_vmem [thread:$0]  (!%p1513_p6), %s171_s21, 8192, %s173_s25, [#allocation3], %s1615_s6, %s1615_s6, %s1616_s7  }
   0xc   : > { %1518 = dma.hbm_to_vmem [thread:$0]  (!%p1513_p6), %s186_s28, 16, %s188_s30, [#allocation5]  }
   0xf   : > { %1602 = dma.done.wait (%p1519_p3), [#allocation3], 8192  }
  0x10   : > { %1604 = vsyncadd (%p1519_p3), [#allocation3], 4294959104 }
  0x11   : > { %1606 = dma.done.wait (%p1519_p3), [#allocation5], 16  }
  0x12   : > { %1608 = vsyncadd (%p1519_p3), [#allocation5], 4294967280  ;;  %p242_p7 = scmp.lt.s32.totalorder %s1657_s22, 1  ;;  %v1446_v0 = vld [vmem:[#allocation2 + $0x38] sm:$0xff]  ;;  %v1445_v4 = vld [vmem:[#allocation2 + $0x30] sm:$0xff]  ;;  %vm265_vm1 = vcmask 1041408  }
  0x13   : > { %v1454_v1 = vld [vmem:[#allocation2 + $0x78] sm:$0xff]  ;;  %936 = vmatpush.bf16.msra.mxu0 %v1446_v0  ;;  %v1453_v5 = vld [vmem:[#allocation2 + $0x70] sm:$0xff]  ;;  %v1444_v8 = vld [vmem:[#allocation2 + $0x28] sm:$0xff]  ;;  %vm291_vm0 = vsmask.f32 1280  ;;  %vm278_vm4 = vcmask 1043458  }
  0x14   : > { %v1462_v2 = vld [vmem:[#allocation2 + $0xb8] sm:$0xff]  ;;  %950 = vmatpush.bf16.msra.mxu1 %v1454_v1  ;;  %s1686_s8 = scalar_select %p242_p7, %s1657_s22, 1  ;;  %v1461_v6 = vld [vmem:[#allocation2 + $0xb0] sm:$0xff]  ;;  %v1452_v9 = vld [vmem:[#allocation2 + $0x68] sm:$0xff]  ;;  %vm292_vm2 = vsmask.f32 3336 }
  0x15   : > { %v1470_v3 = vld [vmem:[#allocation2 + $0xf8] sm:$0xff]  ;;  %964 = vmatpush.bf16.msra.mxu2 %v1462_v2  ;;  %v1469_v7 = vld [vmem:[#allocation2 + $0xf0] sm:$0xff]  ;;  %v1460_v10 = vld [vmem:[#allocation2 + $0xa8] sm:$0xff]  ;;  %vm294_vm3 = vsmask.f32 5392 }
  0x16   : > { %978 = vmatpush.bf16.msra.mxu3 %v1470_v3  ;;  %s1503_s9 = smul.u32 40, %s1686_s8  ;;  %v1468_v11 = vld [vmem:[#allocation2 + $0xe8] sm:$0xff]  ;;  %v1443_v12 = vld [vmem:[#allocation2 + $0x20] sm:$0xff]  ;;  %v1442_v16 = vld [vmem:[#allocation2 + $0x18] sm:$0xff]  ;;  %vm296_vm5 = vsmask.f32 7448 }
  0x17   : > { %937 = vmatpush.bf16.msra.mxu0 %v1445_v4  ;;  %v1451_v13 = vld [vmem:[#allocation2 + $0x60] sm:$0xff]  ;;  %v1450_v17 = vld [vmem:[#allocation2 + $0x58] sm:$0xff]  ;;  %v1441_v32 = vld [vmem:[#allocation2 + $0x10] sm:$0xff]  ;;  %s1438_s13 = sshll.u32 %s1686_s8, 4 }
  0x18   : > { %951 = vmatpush.bf16.msra.mxu1 %v1453_v5  ;;  %s1692_s12 = scalar_lea.vmem %s1796_s0, %s1503_s9  ;;  %v1459_v14 = vld [vmem:[#allocation2 + $0xa0] sm:$0xff]  ;;  %v1458_v24 = vld [vmem:[#allocation2 + $0x98] sm:$0xff]  ;;  %v1449_v33 = vld [vmem:[#allocation2 + $0x50] sm:$0xff]  ;;  %s251_s16 = scalar_lea.vmem %s1799_s3, %s1438_s13 }
  0x19   : > { %965 = vmatpush.bf16.msra.mxu2 %v1461_v6  ;;  %v1467_v15 = vld [vmem:[#allocation2 + $0xe0] sm:$0xff]  ;;  %v252_v18 = vld [vmem:[%s1692_s12] sm:$0x77]  ;;  %v254_v20 = vld [vmem:[%s1692_s12 + $0x10] sm:$0x77] }
  0x1a   : > { %979 = vmatpush.bf16.msra.mxu3 %v1469_v7  ;;  %v253_v19 = vld [vmem:[%s1692_s12 + $0x8] sm:$0x77]  ;;  %v255_v21 = vld [vmem:[%s1692_s12 + $0x18] sm:$0x77]  ;;  %v261_v22 = vrot.slane %v252_v18, 2  ;;  %v1466_v25 = vld [vmem:[#allocation2 + $0xd8] sm:$0xff] }
  0x1b   : > { %938 = vmatpush.bf16.msra.mxu0 %v1444_v8  ;;  %v262_v23 = vrot.slane %v253_v19, 2  ;;  %v263_v26 = vrot.slane %v254_v20, 2  ;;  %v264_v27 = vrot.slane %v255_v21, 2  ;;  %vm1712_vm6 = vmor %vm291_vm0, %vm292_vm2  ;;  %v1457_v39 = vld [vmem:[#allocation2 + $0x90] sm:$0xff]  ;;  %v1440_v58 = vld [vmem:[#allocation2 + $0x8] sm:$0xff] }
  0x1c   : > { %952 = vmatpush.bf16.msra.mxu1 %v1452_v9  ;;  %v268_v28 = vsel %vm265_vm1, %v252_v18, %v261_v22  ;;  %v279_v30 = vsel %vm278_vm4, %v252_v18, %v261_v22  ;;  %v1465_v40 = vld [vmem:[#allocation2 + $0xd0] sm:$0xff]  ;;  %vm1724_vm7 = vmor %vm1712_vm6, %vm294_vm3  ;;  %v1448_v59 = vld [vmem:[#allocation2 + $0x48] sm:$0xff] }
  0x1d   : > { %966 = vmatpush.bf16.msra.mxu2 %v1460_v10  ;;  %v1700_v29 = vsel %vm265_vm1, %v253_v19, %v262_v23  ;;  %v282_v31 = vsel %vm278_vm4, %v253_v19, %v262_v23  ;;  %v1705_v34 = vsel %vm265_vm1, %v254_v20, %v263_v26  ;;  %v1708_v35 = vsel %vm265_vm1, %v255_v21, %v264_v27  ;;  %v1456_v0 = vld [vmem:[#allocation2 + $0x88] sm:$0xff]  ;;  %vm1735_vm8 = vmor %vm1724_vm7, %vm296_vm5  ;;  %v1439_v7 = vld [vmem:[#allocation2] sm:$0xff] }
  0x1e   : > { %980 = vmatpush.bf16.msra.mxu3 %v1468_v11  ;;  %v281_v36 = vrot.slane %v279_v30, 2  ;;  %v284_v37 = vrot.slane %v282_v31, 2  ;;  %371 = vst [vmem:[#allocation1] ss:$4 sm:$0xff] %v268_v28  ;;  %v285_v41 = vsel %vm278_vm4, %v254_v20, %v263_v26  ;;  %v288_v42 = vsel %vm278_vm4, %v255_v21, %v264_v27  ;;  %v1464_v1 = vld [vmem:[#allocation2 + $0xc8] sm:$0xff]  ;;  %v1463_v18 = vld [vmem:[#allocation2 + $0xc0] sm:$0xff] }
  0x1f   : > { %939 = vmatpush.bf16.msra.mxu0 %v1443_v12  ;;  %v298_v43 = vshrl.u32 %v268_v28, 16  ;;  %v301_v44 = vshll.u32 %v268_v28, 16  ;;  %373 = vst [vmem:[#allocation1 + $0x1] ss:$4 sm:$0xff] %v1700_v29  ;;  %v287_v45 = vrot.slane %v285_v41, 2  ;;  %v290_v46 = vrot.slane %v288_v42, 2 }
  0x20   : > { %953 = vmatpush.bf16.msra.mxu1 %v1451_v13  ;;  %v307_v47 = vshll.u32 %v281_v36, 16  ;;  %v311_v48 = vshrl.u32 %v1700_v29, 16  ;;  %375 = vst [vmem:[#allocation1 + $0x2] ss:$4 sm:$0xff] %v1705_v34  ;;  %v314_v52 = vshll.u32 %v1700_v29, 16  ;;  %v320_v53 = vshll.u32 %v284_v37, 16 }
  0x21   : > { %967 = vmatpush.bf16.msra.mxu2 %v1459_v14  ;;  %v300_v50 = vrot.slane %v298_v43, 6  ;;  %v303_v51 = vrot.slane %v301_v44, 7  ;;  %377 = vst [vmem:[#allocation1 + $0x3] ss:$4 sm:$0xff] %v1708_v35  ;;  %v324_v56 = vshrl.u32 %v1705_v34, 16  ;;  %v327_v57 = vshll.u32 %v1705_v34, 16 }
  0x22   : > { %981 = vmatpush.bf16.msra.mxu3 %v1467_v15  ;;  %v309_v54 = vrot.slane %v307_v47, 7  ;;  %v313_v55 = vrot.slane %v311_v48, 6  ;;  %v316_v61 = vrot.slane %v314_v52, 7  ;;  %v322_v62 = vrot.slane %v320_v53, 7  ;;  %v256_v15 = vld [vmem:[%s1692_s12 + $0x20] sm:$0x77] }
  0x23   : > { %940 = vmatpush.bf16.msra.mxu0 %v1442_v16  ;;  %v304_v60 = vor.u32 %v303_v51, %v300_v50  ;;  %v333_v63 = vshll.u32 %v287_v45, 16  ;;  %v326_v3 = vrot.slane %v324_v56, 6  ;;  %v329_v4 = vrot.slane %v327_v57, 7  ;;  %v1447_v16 = vld [vmem:[#allocation2 + $0x40] sm:$0xff]  ;;  %v1478_v26 = vld [vmem:[#allocation2 + $0x138] sm:$0xff]  ;;  %v1493_v41 = vld [vmem:[#allocation2 + $0x1b0] sm:$0xff] }
  0x24   : > { %954 = vmatpush.bf16.msra.mxu1 %v1450_v17  ;;  %v337_v5 = vshrl.u32 %v1708_v35, 16  ;;  %v340_v6 = vshll.u32 %v1708_v35, 16  ;;  %v317_v9 = vor.u32 %v316_v61, %v313_v55  ;;  %v346_v11 = vshll.u32 %v290_v46, 16  ;;  %v1455_v17 = vld [vmem:[#allocation2 + $0x80] sm:$0xff]  ;;  %v1486_v27 = vld [vmem:[#allocation2 + $0x178] sm:$0xff]  ;;  %v1501_v42 = vld [vmem:[#allocation2 + $0x1f0] sm:$0xff] }
  0x25   : > { %968 = vmatpush.bf16.msra.mxu2 %v1458_v24  ;;  %v305_v8 = vrot.slane %v304_v60, 2  ;;  %v335_v10 = vrot.slane %v333_v63, 7  ;;  %v330_v12 = vor.u32 %v329_v4, %v326_v3  ;;  %v1494_v31 = vld [vmem:[#allocation2 + $0x1b8] sm:$0xff]  ;;  %v1476_v46 = vld [vmem:[#allocation2 + $0x128] sm:$0xff]  ;;  %v1475_v55 = vld [vmem:[#allocation2 + $0x120] sm:$0xff] }
  0x26   : > { %982 = vmatpush.bf16.msra.mxu3 %v1466_v25  ;;  %v339_v13 = vrot.slane %v337_v5, 6  ;;  %v342_v14 = vrot.slane %v340_v6, 7  ;;  %v318_v20 = vrot.slane %v317_v9, 2  ;;  %v348_v23 = vrot.slane %v346_v11, 7  ;;  %v1484_v47 = vld [vmem:[#allocation2 + $0x168] sm:$0xff]  ;;  %v1483_v56 = vld [vmem:[#allocation2 + $0x160] sm:$0xff] }
  0x27   : > { %941 = vmatpush.bf16.msra.mxu0 %v1441_v32  ;;  %v310_v19 = vsel %vm1735_vm8, %v305_v8, %v309_v54  ;;  %v331_v21 = vrot.slane %v330_v12, 2  ;;  %v351_v25 = vrot.slane %v256_v15, 2  ;;  %v1502_v32 = vld [vmem:[#allocation2 + $0x1f8] sm:$0xff]  ;;  %v1492_v48 = vld [vmem:[#allocation2 + $0x1a8] sm:$0xff]  ;;  %v1491_v57 = vld [vmem:[#allocation2 + $0x1a0] sm:$0xff] }
  0x28   : > { %955 = vmatpush.bf16.msra.mxu1 %v1449_v33  ;;  %v343_v22 = vor.u32 %v342_v14, %v339_v13  ;;  %v378_v24 = vld.sshfl [vmem:[#allocation1] sm:$0xff pattern:$0x73625140]  ;;  %v1746_v28 = vsel %vm1735_vm8, %v318_v20, %v322_v62  ;;  %v379_v30 = vld.sshfl [vmem:[#allocation1 + $0x8] sm:$0xff pattern:$0x73625140] }
  0x29   : > { %969 = vmatpush.bf16.msra.mxu2 %v1457_v39  ;;  %v1750_v33 = vsel %vm1735_vm8, %v331_v21, %v335_v10  ;;  %383 = vst [vmem:[#allocation1] ss:$4 sm:$0xff] %v310_v19  ;;  %v354_v38 = vsel %vm265_vm1, %v256_v15, %v351_v25  ;;  %v1477_v39 = vld [vmem:[#allocation2 + $0x130] sm:$0xff]  ;;  %v355_v45 = vsel %vm278_vm4, %v256_v15, %v351_v25  ;;  %v1500_v49 = vld [vmem:[#allocation2 + $0x1e8] sm:$0xff]  ;;  %v1474_v61 = vld [vmem:[#allocation2 + $0x118] sm:$0xff] }
  0x2a   : > { %983 = vmatpush.bf16.msra.mxu3 %v1465_v40  ;;  %v344_v36 = vrot.slane %v343_v22, 2  ;;  %386 = vst [vmem:[#allocation1 + $0x1] ss:$4 sm:$0xff] %v1746_v28  ;;  %v1485_v40 = vld [vmem:[#allocation2 + $0x170] sm:$0xff]  ;;  %v358_v43 = vshrl.u32 %v354_v38, 16  ;;  %v361_v44 = vshll.u32 %v354_v38, 16 }
  0x2b   : > { %942 = vmatpush.bf16.msra.mxu0 %v1440_v58  ;;  %389 = vst [vmem:[#allocation1 + $0x2] ss:$4 sm:$0xff] %v1750_v33  ;;  %v357_v52 = vrot.slane %v355_v45, 2  ;;  %v1499_v58 = vld [vmem:[#allocation2 + $0x1e0] sm:$0xff]  ;;  %v1490_v62 = vld [vmem:[#allocation2 + $0x198] sm:$0xff]  ;;  %v1489_v3 = vld [vmem:[#allocation2 + $0x190] sm:$0xff] }
  0x2c   : > { %956 = vmatpush.bf16.msra.mxu1 %v1448_v59  ;;  %v1755_v37 = vsel %vm1735_vm8, %v344_v36, %v348_v23  ;;  %v360_v50 = vrot.slane %v358_v43, 6  ;;  %v363_v51 = vrot.slane %v361_v44, 7  ;;  %v1498_v63 = vld [vmem:[#allocation2 + $0x1d8] sm:$0xff]  ;;  %v1497_v4 = vld [vmem:[#allocation2 + $0x1d0] sm:$0xff]  ;;  %v1472_v8 = vld [vmem:[#allocation2 + $0x108] sm:$0xff] }
  0x2d   : > { %970 = vmatpush.bf16.msra.mxu2 %v1456_v0  ;;  %392 = vst [vmem:[#allocation1 + $0x3] ss:$4 sm:$0xff] %v1755_v37  ;;  %v367_v60 = vshll.u32 %v357_v52, 16  ;;  %v1480_v9 = vld [vmem:[#allocation2 + $0x148] sm:$0xff]  ;;  %v1471_v12 = vld [vmem:[#allocation2 + $0x100] sm:$0xff] }
  0x2e   : > { %984 = vmatpush.bf16.msra.mxu3 %v1464_v1  ;;  %v364_v59 = vor.u32 %v363_v51, %v360_v50  ;;  %v1473_v1 = vld [vmem:[#allocation2 + $0x110] sm:$0xff]  ;;  %v1488_v10 = vld [vmem:[#allocation2 + $0x188] sm:$0xff]  ;;  %v1479_v2 = vld [vmem:[#allocation2 + $0x140] sm:$0xff] }
  0x2f   : > { %943 = vmatpush.bf16.msra.mxu0 %v1439_v7  ;;  %v1496_v11 = vld [vmem:[#allocation2 + $0x1c8] sm:$0xff]  ;;  %v1487_v13 = vld [vmem:[#allocation2 + $0x180] sm:$0xff] }
  0x30   : > { %957 = vmatpush.bf16.msra.mxu1 %v1447_v16  ;;  %v365_v0 = vrot.slane %v364_v59, 2  ;;  %v1495_v14 = vld [vmem:[#allocation2 + $0x1c0] sm:$0xff] }
  0x31   : > { %971 = vmatpush.bf16.msra.mxu2 %v1455_v17 }
  0x32   : > { %985 = vmatpush.bf16.msra.mxu3 %v1463_v18  ;;  %944 = vmatmul.bf16.vlgmr.msra.gmra.mxu0 %v378_v24  ;;  %v1536_v18 = vld [vmem:[#allocation4] ss:$0 sm:$0xff] }
  0x33   : > { %992 = vmatpush.bf16.msrb.mxu0 %v1478_v26  ;;  %958 = vmatmul.bf16.vlgmr.msra.gmra.mxu1 %v379_v30 }
  0x34   : > { %1006 = vmatpush.bf16.msrb.mxu1 %v1486_v27  ;;  %v393_v53 = vld.sshfl [vmem:[#allocation1] sm:$0xff pattern:$0x73625140]  ;;  %v394_v54 = vld.sshfl [vmem:[#allocation1 + $0x8] sm:$0xff pattern:$0x73625140] }
  0x35   : > { %1020 = vmatpush.bf16.msrb.mxu2 %v1494_v31  ;;  %397 = vst [vmem:[#allocation1] ss:$4 sm:$0xff] %v1700_v29  ;;  %986 = vmatmul.bf16.vlgmr.msra.gmra.mxu3 %v394_v54  ;;  %v1482_v29 = vld [vmem:[#allocation2 + $0x158] sm:$0xff] }
  0x36   : > { %1034 = vmatpush.bf16.msrb.mxu3 %v1502_v32  ;;  %972 = vmatmul.bf16.vlgmr.msra.gmra.mxu2 %v393_v53  ;;  %399 = vst [vmem:[#allocation1 + $0x1] ss:$4 sm:$0xff] %v1705_v34  ;;  %v369_v34 = vrot.slane %v367_v60, 7 }
  0x37   : > { %993 = vmatpush.bf16.msrb.mxu0 %v1477_v39  ;;  %401 = vst [vmem:[#allocation1 + $0x2] ss:$4 sm:$0xff] %v1708_v35  ;;  %v1481_v35 = vld [vmem:[#allocation2 + $0x150] sm:$0xff] }
  0x38   : > { %1007 = vmatpush.bf16.msrb.mxu1 %v1485_v40  ;;  %403 = vst [vmem:[#allocation1 + $0x3] ss:$4 sm:$0xff] %v354_v38  ;;  %v370_v7 = vsel %vm1735_vm8, %v365_v0, %v369_v34 }
  0x39   : > { %1021 = vmatpush.bf16.msrb.mxu2 %v1493_v41 }
  0x3a   : > { %1035 = vmatpush.bf16.msrb.mxu3 %v1501_v42 }
  0x3b   : > { %994 = vmatpush.bf16.msrb.mxu0 %v1476_v46 }
  0x3c   : > { %1008 = vmatpush.bf16.msrb.mxu1 %v1484_v47 }
  0x3d   : > { %1022 = vmatpush.bf16.msrb.mxu2 %v1492_v48 }
  0x3e   : > { %1036 = vmatpush.bf16.msrb.mxu3 %v1500_v49 }
  0x3f   : > { %995 = vmatpush.bf16.msrb.mxu0 %v1475_v55  ;;  %v404_v5 = vld.sshfl [vmem:[#allocation1] sm:$0xff pattern:$0x73625140]  ;;  %v405_v6 = vld.sshfl [vmem:[#allocation1 + $0x8] sm:$0xff pattern:$0x73625140] }
  0x40   : > { %1009 = vmatpush.bf16.msrb.mxu1 %v1483_v56  ;;  %408 = vst [vmem:[#allocation1] ss:$4 sm:$0xff] %v1746_v28 }
  0x41   : > { %1023 = vmatpush.bf16.msrb.mxu2 %v1491_v57  ;;  %410 = vst [vmem:[#allocation1 + $0x1] ss:$4 sm:$0xff] %v1750_v33 }
  0x42   : > { %1037 = vmatpush.bf16.msrb.mxu3 %v1499_v58  ;;  %412 = vst [vmem:[#allocation1 + $0x2] ss:$4 sm:$0xff] %v1755_v37 }
  0x43   : > { %996 = vmatpush.bf16.msrb.mxu0 %v1474_v61  ;;  %415 = vst [vmem:[#allocation1 + $0x3] ss:$4 sm:$0xff] %v370_v7 }
  0x44   : > { %1010 = vmatpush.bf16.msrb.mxu1 %v1482_v29 }
  0x45   : > { %1024 = vmatpush.bf16.msrb.mxu2 %v1490_v62 }
  0x46   : > { %1038 = vmatpush.bf16.msrb.mxu3 %v1498_v63 }
  0x47   : > { %997 = vmatpush.bf16.msrb.mxu0 %v1473_v1 }
  0x48   : > { %1011 = vmatpush.bf16.msrb.mxu1 %v1481_v35 }
  0x49   : > { %1025 = vmatpush.bf16.msrb.mxu2 %v1489_v3 }
  0x4a   : > { %1039 = vmatpush.bf16.msrb.mxu3 %v1497_v4  ;;  %v416_v15 = vld.sshfl [vmem:[#allocation1] sm:$0xff pattern:$0x73625140]  ;;  %v417_v16 = vld.sshfl [vmem:[#allocation1 + $0x8] sm:$0xff pattern:$0x73625140] }
  0x4b   : > { %998 = vmatpush.bf16.msrb.mxu0 %v1472_v8 }
  0x4c   : > { %1012 = vmatpush.bf16.msrb.mxu1 %v1480_v9 }
  0x4d   : > { %1026 = vmatpush.bf16.msrb.mxu2 %v1488_v10 }
  0x4e   : > { %1040 = vmatpush.bf16.msrb.mxu3 %v1496_v11 }
  0x4f   : > { %999 = vmatpush.bf16.msrb.mxu0 %v1471_v12 }
  0x50   : > { %1013 = vmatpush.bf16.msrb.mxu1 %v1479_v2 }
  0x51   : > { %1027 = vmatpush.bf16.msrb.mxu2 %v1487_v13 }
  0x52   : > { %1041 = vmatpush.bf16.msrb.mxu3 %v1495_v14  ;;  %1000 = vmatmul.bf16.vlgmr.msrb.gmra.mxu0 %v404_v5 }
  0x53   : > { %1014 = vmatmul.bf16.vlgmr.msrb.gmra.mxu1 %v405_v6 }
  0x54   : > { %1028 = vmatmul.bf16.vlgmr.msrb.gmra.mxu2 %v416_v15 }
  0x55   : > { %1042 = vmatmul.bf16.vlgmr.msrb.gmra.mxu3 %v417_v16 }
  0xaf   : > { %v945_v17 = vpop.f32.mrf.mxu0 }
  0xb0   : > { %v959_v19 = vpop.f32.mrf.mxu1  ;;  %v946_v20 = vadd.f32 %v1536_v18, %v945_v17 }
  0xb2   : > { %v960_v23 = vadd.f32 %v959_v19, %v946_v20 }
  0xb7   : > { %v947_v24 = vpop.f32.mrf.mxu0 }
  0xb8   : > { %v987_v22 = vpop.f32.mrf.mxu3  ;;  %v961_v25 = vpop.f32.mrf.mxu1  ;;  %v948_v27 = vadd.f32 %v1536_v18, %v947_v24 }
  0xb9   : > { %v973_v21 = vpop.f32.mrf.mxu2 }
  0xba   : > { %v974_v26 = vadd.f32 %v973_v21, %v960_v23  ;;  %v962_v31 = vadd.f32 %v961_v25, %v948_v27 }
  0xbc   : > { %v988_v30 = vadd.f32 %v987_v22, %v974_v26 }
  0xc0   : > { %v989_v32 = vpop.f32.mrf.mxu3 }
  0xc1   : > { %v975_v28 = vpop.f32.mrf.mxu2 }
  0xc2   : > { %v976_v38 = vadd.f32 %v975_v28, %v962_v31 }
  0xc4   : > { %v990_v41 = vadd.f32 %v989_v32, %v976_v38 }
  0xcf   : > { %v1001_v33 = vpop.f32.mrf.mxu0 }
  0xd0   : > { %v1002_v36 = vadd.f32 %v1001_v33, %v988_v30  ;;  %v1015_v37 = vpop.f32.mrf.mxu1 }
  0xd2   : > { %v1016_v39 = vadd.f32 %v1015_v37, %v1002_v36 }
  0xd7   : > { %v1029_v40 = vpop.f32.mrf.mxu2  ;;  %v1003_v44 = vpop.f32.mrf.mxu0 }
  0xd8   : > { %v1030_v42 = vadd.f32 %v1029_v40, %v1016_v39  ;;  %v1043_v43 = vpop.f32.mrf.mxu3  ;;  %v1004_v46 = vadd.f32 %v1003_v44, %v990_v41  ;;  %v1017_v47 = vpop.f32.mrf.mxu1 }
  0xda   : > { %v1044_v45 = vadd.f32 %v1043_v43, %v1030_v42  ;;  %v1018_v48 = vadd.f32 %v1017_v47, %v1004_v46 }
  0xdc   : > { %1048 = vst [vmem:[%s251_s16] sm:$0xff] %v1044_v45 }
  0xdf   : > { %v1031_v49 = vpop.f32.mrf.mxu2 }
  0xe0   : > { %v1032_v50 = vadd.f32 %v1031_v49, %v1018_v48  ;;  %v1045_v51 = vpop.f32.mrf.mxu3  ;;  %1053 = sbr.rel (%p1170_p2) target bundleno = 232 (0xe8), region = 44 }
  0xe2   : > { %v1046_v52 = vadd.f32 %v1045_v51, %v1032_v50 }
  0xe4   : > { %1049 = vst [vmem:[%s251_s16 + $0x8] sm:$0xff] %v1046_v52 }
  0xe5   : > { %v1617_v53 = vmov 0.0  }
  0xe6   : > { %1054 = vst [vmem:[%s1800_s4] sm:$0x1] %v1617_v53 }
  0xe7   : > { %1055 = vst [vmem:[%s1801_s5] sm:$0x1] %v1617_v53 }
  0xe8 PF: > { %v1057_v54 = vadd.f32 %v1046_v52, %v1044_v45  ;;  %v1067_v55 = vmul.f32 %v1044_v45, %v1044_v45  ;;  %v1068_v56 = vmul.f32 %v1046_v52, %v1046_v52 }
  0xea   : > { %v1058_v57 = vrot.slane %v1057_v54, 4  ;;  %v1069_v58 = vadd.f32 %v1068_v56, %v1067_v55 }
  0xec   : > { %v1059_v59 = vadd.f32 %v1058_v57, %v1057_v54  ;;  %v1070_v60 = vrot.slane %v1069_v58, 4 }
  0xed   : > { %v1056_v1 = vld [vmem:[%s1800_s4] sm:$0x1] }
  0xee   : > { %v1060_v61 = vrot.slane %v1059_v59, 2  ;;  %v1071_v29 = vadd.f32 %v1070_v60, %v1069_v58  ;;  %v1066_v4 = vld [vmem:[%s1801_s5] sm:$0x1] }
  0xf0   : > { %v1061_v62 = vadd.f32 %v1060_v61, %v1059_v59  ;;  %v1072_v63 = vrot.slane %v1071_v29, 2 }
  0xf2   : > { %v1062_v0 = vrot.slane %v1061_v62, 1  ;;  %v1073_v34 = vadd.f32 %v1072_v63, %v1071_v29 }
  0xf4   : > { %v1063_v35 = vadd.f32 %v1062_v0, %v1061_v62  ;;  %v1074_v3 = vrot.slane %v1073_v34, 1 }
  0xf6   : > { %v1064_v5 = vadd.f32 %v1063_v35, %v1056_v1  ;;  %v1075_v6 = vadd.f32 %v1074_v3, %v1073_v34 }
  0xf8   : > { %1065 = vst [vmem:[%s1800_s4] sm:$0x1] %v1064_v5  ;;  %v1076_v7 = vadd.f32 %v1075_v6, %v1066_v4 }
  0xfa   : > { %1077 = vst [vmem:[%s1801_s5] sm:$0x1] %v1076_v7 }
  0xfb PF: > { %s18_s18 = sadd.s32 1, %s1611_s18  }
  0xfc   : > { %p15_p8 = scmp.ge.s32.totalorder %s18_s18, 4  }
  0xfe   :  { %17 = sbr.rel (!%p15_p8) target bundleno = 2 (0x2), region = 103 }
 0x103   :  { %1111 = vsyncpa [#allocation3], 1 }
 0x104   :  { %1113 = vsyncpa [#allocation3 + $0x1], 1 }
 0x105   :  { %1114 = vsyncpa [#allocation5], 1 }

// kernel: adversary_fixed_x_forward.5
= control target key start
LH: loop header
LB: loop body
LE: loop exit
PB: predicated region body
PF: predicated region fallthrough
CT: control target
= control target key end

     0   :  { %16 = vsyncpa [#allocation3], 0  ;;  %s15589_s0 = inlined_call_operand.vmem [shape: f32[2,2048], index: 0, kind: input, shape index: {}]   ;;  %s15590_s1 = inlined_call_operand.vmem [shape: f32[1,2048], index: 1, kind: input, shape index: {}]   ;;  %s15591_s2 = inlined_call_operand.vmem [shape: f32[1,2048], index: 2, kind: input, shape index: {}]   ;;  %s15592_s3 = inlined_call_operand.hbm [shape: f32[1,2048], index: 3, kind: input, shape index: {}]   ;;  %s15593_s4 = inlined_call_operand.hbm [shape: f32[1,2048], index: 4, kind: input, shape index: {}]   ;;  %s15594_s5 = inlined_call_operand.hbm [shape: bf16[2048,1024], index: 5, kind: input, shape index: {}]   ;;  %s15595_s6 = inlined_call_operand.hbm [shape: f32[1,1024], index: 6, kind: input, shape index: {}]   ;;  %s15596_s7 = inlined_call_operand.hbm [shape: f32[1,1024], index: 7, kind: input, shape index: {}]   ;;  %s15597_s8 = inlined_call_operand.hbm [shape: f32[1,1024], index: 8, kind: input, shape index: {}]   ;;  %s15598_s9 = inlined_call_operand.hbm [shape: bf16[1024,128], index: 9, kind: input, shape index: {}]   ;;  %s15599_s10 = inlined_call_operand.hbm [shape: f32[1,128], index: 10, kind: input, shape index: {}]   ;;  %s15600_s11 = inlined_call_operand.hbm [shape: f32[2,128], index: 11, kind: output, shape index: {}]  }
   0x1   :  { %17 = vsyncpa [#allocation6], 0 }
   0x2   :  { %18 = vsyncpa [#allocation9], 0 }
   0x3   :  { %19 = vsyncpa [#allocation12], 0 }
   0x4   :  { %20 = vsyncpa [#allocation15], 0  ;;  %s44_s19 = sshll.u32 %s15593_s4, 4  ;;  %s45_s19 = int_to_ptr.hbm [resolvable:$true] %s44_s19 }
   0x5   :  { %21 = vsyncpa [#allocation4], 0  ;;  %s14893_s20 = smov [#allocation5]   ;;  %s68_s24 = sshll.u32 %s15595_s6, 4  ;;  %s69_s24 = int_to_ptr.hbm [resolvable:$true] %s68_s24 }
   0x6   :  { %s46_s21 = sshll.u32 %s14893_s20, 4  ;;  %s14894_s25 = smov [#allocation8]   ;;  %s47_s21 = int_to_ptr.vmem [resolvable:$true] %s46_s21 }
   0x7   :  { %49 = dma.hbm_to_vmem [thread:$0]  %s45_s19, 256, %s47_s21, [#allocation6]  }
   0x8   :  { %s70_s26 = sshll.u32 %s14894_s25, 4  ;;  %s90_s29 = sshll.u32 %s15597_s8, 4  ;;  %s71_s26 = int_to_ptr.vmem [resolvable:$true] %s70_s26  ;;  %s91_s29 = int_to_ptr.hbm [resolvable:$true] %s90_s29 }
   0x9   :  { %73 = dma.hbm_to_vmem [thread:$0]  %s69_s24, 128, %s71_s26, [#allocation9]  }
   0xa   :  { %s33_s12 = sshll.u32 %s15592_s3, 4  ;;  %s14895_s13 = smov [#allocation11]   ;;  %s34_s12 = int_to_ptr.hbm [resolvable:$true] %s33_s12 }
   0xb   :  { %s92_s14 = sshll.u32 %s14895_s13, 4  ;;  %s14896_s6 = smov [#allocation2]   ;;  %s93_s14 = int_to_ptr.vmem [resolvable:$true] %s92_s14 }
   0xc   :  { %95 = dma.hbm_to_vmem [thread:$0]  %s91_s29, 128, %s93_s14, [#allocation12]  }
   0xd   :  { %s35_s15 = sshll.u32 %s14896_s6, 4  ;;  %s54_s18 = sshll.u32 %s15594_s5, 4  ;;  %s36_s15 = int_to_ptr.vmem [resolvable:$true] %s35_s15  ;;  %s55_s18 = int_to_ptr.hbm [resolvable:$true] %s54_s18 }
   0xe   :  { %38 = dma.hbm_to_vmem [thread:$0]  %s34_s12, 256, %s36_s15, [#allocation3]  }
   0xf   :  { %s14897_s8 = smov [#allocation7]   ;;  %s79_s3 = sshll.u32 %s15596_s7, 4  ;;  %s80_s3 = int_to_ptr.hbm [resolvable:$true] %s79_s3 }
  0x10   :  { %s56_s19 = sshll.u32 %s14897_s8, 4  ;;  %s14898_s22 = smov 512   ;;  %s57_s19 = int_to_ptr.vmem [resolvable:$true] %s56_s19 }
  0x11   :  { %s14899_s23 = smov 32   ;;  %s14900_s24 = smov [#allocation10]  }
  0x12   :  { %62 = dma.hbm_to_vmem [thread:$0]  %s55_s18, 131072, %s57_s19, [#allocation6], %s14898_s22, %s14898_s22, %s14899_s23  }
  0x13   :  { %s81_s25 = sshll.u32 %s14900_s24, 4  ;;  %s100_s5 = sshll.u32 %s15598_s9, 4  ;;  %s82_s25 = int_to_ptr.vmem [resolvable:$true] %s81_s25  ;;  %s101_s5 = int_to_ptr.hbm [resolvable:$true] %s100_s5 }
  0x14   :  { %84 = dma.hbm_to_vmem [thread:$0]  %s80_s3, 128, %s82_s25, [#allocation9]  }
  0x15   :  { %s14901_s28 = smov [#allocation13]   ;;  %s114_s7 = sshll.u32 %s15599_s10, 4  ;;  %s115_s7 = int_to_ptr.hbm [resolvable:$true] %s114_s7 }
  0x16   :  { %s102_s29 = sshll.u32 %s14901_s28, 4  ;;  %s14902_s12 = smov 64   ;;  %s103_s29 = int_to_ptr.vmem [resolvable:$true] %s102_s29 }
  0x17   :  { %s14903_s13 = smov 4   ;;  %s14904_s14 = smov [#allocation14]  }
  0x18   :  { %108 = dma.hbm_to_vmem [thread:$0]  %s101_s5, 8192, %s103_s29, [#allocation12], %s14902_s12, %s14902_s12, %s14903_s13  }
  0x19   :  { %s116_s6 = sshll.u32 %s14904_s14, 4  ;;  %s117_s6 = int_to_ptr.vmem [resolvable:$true] %s116_s6 }
  0x1a   :  { %119 = dma.hbm_to_vmem [thread:$0]  %s115_s7, 16, %s117_s6, [#allocation15]  }
  0x1b   :  { %14881 = dma.done.wait [#allocation3], 256  }
  0x1c   :  { %14882 = vsyncadd [#allocation3], 4294967040 }
  0x1d   :  { %14883 = dma.done.wait [#allocation6], 131328  }
  0x1e   :  { %14884 = vsyncadd [#allocation6], 4294835968 }
  0x1f   :  { %14885 = dma.done.wait [#allocation9], 256  }
  0x20   :  { %14886 = vsyncadd [#allocation9], 4294967040 }
  0x21   :  { %14887 = dma.done.wait [#allocation12], 8320  }
  0x22   :  { %14888 = vsyncadd [#allocation12], 4294958976 }
  0x23   :  { %14889 = dma.done.wait [#allocation15], 16  }
  0x24   :  { %14890 = vsyncadd [#allocation15], 4294967280  ;;  %v9412_v0 = vld [vmem:[#allocation7 + $0x1c0] sm:$0xf]  ;;  %vm232_vm6 = vcmask 1041408   ;;  %vm234_vm7 = vcmask 1045508  }
  0x25   :  { %v13598_v1 = vld [vmem:[#allocation7 + $0x1dc] sm:$0xf0]  ;;  %vm236_vm8 = vcmask 1043456   ;;  %s9172_s5 = sshll.u32 %s15600_s11, 4  ;;  %s9173_s5 = int_to_ptr.hbm [resolvable:$true] %s9172_s5 }
  0x26   :  { %v9668_v2 = vld [vmem:[#allocation7 + $0x3c0] sm:$0xf]  ;;  %v9413_v3 = vor.u32 %v13598_v1, %v9412_v0 }
  0x27   :  { %v13662_v4 = vld [vmem:[#allocation7 + $0x3dc] sm:$0xf0] }
  0x28   :  { %v9924_v5 = vld [vmem:[#allocation7 + $0x5c0] sm:$0xf]  ;;  %v9669_v7 = vor.u32 %v13662_v4, %v9668_v2  ;;  %6536 = vmatpush.bf16.msra.mxu0 %v9413_v3 }
  0x29   :  { %v13726_v6 = vld [vmem:[#allocation7 + $0x5dc] sm:$0xf0] }
  0x2a   :  { %v9925_v8 = vor.u32 %v13726_v6, %v9924_v5  ;;  %v10180_v9 = vld [vmem:[#allocation7 + $0x7c0] sm:$0xf]  ;;  %6549 = vmatpush.bf16.msra.mxu1 %v9669_v7 }
  0x2b   :  { %v13790_v10 = vld [vmem:[#allocation7 + $0x7dc] sm:$0xf0] }
  0x2c   :  { %v9380_v11 = vld [vmem:[#allocation7 + $0x180] sm:$0xf]  ;;  %v10181_v12 = vor.u32 %v13790_v10, %v10180_v9  ;;  %6562 = vmatpush.bf16.msra.mxu2 %v9925_v8 }
  0x2d   :  { %v13590_v13 = vld [vmem:[#allocation7 + $0x19c] sm:$0xf0] }
  0x2e   :  { %v9636_v14 = vld [vmem:[#allocation7 + $0x380] sm:$0xf]  ;;  %v9381_v16 = vor.u32 %v13590_v13, %v9380_v11  ;;  %6575 = vmatpush.bf16.msra.mxu3 %v10181_v12 }
  0x2f   :  { %v13654_v15 = vld [vmem:[#allocation7 + $0x39c] sm:$0xf0] }
  0x30   :  { %v9637_v17 = vor.u32 %v13654_v15, %v9636_v14  ;;  %v9892_v18 = vld [vmem:[#allocation7 + $0x580] sm:$0xf]  ;;  %6537 = vmatpush.bf16.msra.mxu0 %v9381_v16 }
  0x31   :  { %v13718_v19 = vld [vmem:[#allocation7 + $0x59c] sm:$0xf0] }
  0x32   :  { %v10148_v20 = vld [vmem:[#allocation7 + $0x780] sm:$0xf]  ;;  %v9893_v21 = vor.u32 %v13718_v19, %v9892_v18  ;;  %6550 = vmatpush.bf16.msra.mxu1 %v9637_v17 }
  0x33   :  { %v13782_v22 = vld [vmem:[#allocation7 + $0x79c] sm:$0xf0] }
  0x34   :  { %v9348_v23 = vld [vmem:[#allocation7 + $0x140] sm:$0xf]  ;;  %v10149_v25 = vor.u32 %v13782_v22, %v10148_v20  ;;  %6563 = vmatpush.bf16.msra.mxu2 %v9893_v21 }
  0x35   :  { %v13582_v24 = vld [vmem:[#allocation7 + $0x15c] sm:$0xf0] }
  0x36   :  { %v9604_v26 = vld [vmem:[#allocation7 + $0x340] sm:$0xf]  ;;  %v9349_v29 = vor.u32 %v13582_v24, %v9348_v23  ;;  %6576 = vmatpush.bf16.msra.mxu3 %v10149_v25 }
  0x37   :  { %v13646_v27 = vld [vmem:[#allocation7 + $0x35c] sm:$0xf0] }
  0x38   :  { %v9860_v28 = vld [vmem:[#allocation7 + $0x540] sm:$0xf]  ;;  %v9605_v33 = vor.u32 %v13646_v27, %v9604_v26  ;;  %6538 = vmatpush.bf16.msra.mxu0 %v9349_v29 }
  0x39   :  { %v13710_v30 = vld [vmem:[#allocation7 + $0x55c] sm:$0xf0] }
  0x3a   :  { %v10116_v31 = vld [vmem:[#allocation7 + $0x740] sm:$0xf]  ;;  %v9861_v34 = vor.u32 %v13710_v30, %v9860_v28  ;;  %6551 = vmatpush.bf16.msra.mxu1 %v9605_v33 }
  0x3b   :  { %v13774_v32 = vld [vmem:[#allocation7 + $0x75c] sm:$0xf0] }
  0x3c   :  { %v9316_v35 = vld [vmem:[#allocation7 + $0x100] sm:$0xf]  ;;  %v10117_v38 = vor.u32 %v13774_v32, %v10116_v31  ;;  %6564 = vmatpush.bf16.msra.mxu2 %v9861_v34 }
  0x3d   :  { %v13574_v36 = vld [vmem:[#allocation7 + $0x11c] sm:$0xf0] }
  0x3e   :  { %v9572_v37 = vld [vmem:[#allocation7 + $0x300] sm:$0xf]  ;;  %v9317_v44 = vor.u32 %v13574_v36, %v9316_v35  ;;  %6577 = vmatpush.bf16.msra.mxu3 %v10117_v38 }
  0x3f   :  { %v13638_v39 = vld [vmem:[#allocation7 + $0x31c] sm:$0xf0] }
  0x40   :  { %v9828_v40 = vld [vmem:[#allocation7 + $0x500] sm:$0xf]  ;;  %v9573_v45 = vor.u32 %v13638_v39, %v9572_v37  ;;  %6539 = vmatpush.bf16.msra.mxu0 %v9317_v44 }
  0x41   :  { %v13702_v41 = vld [vmem:[#allocation7 + $0x51c] sm:$0xf0] }
  0x42   :  { %v10084_v42 = vld [vmem:[#allocation7 + $0x700] sm:$0xf]  ;;  %v9829_v46 = vor.u32 %v13702_v41, %v9828_v40  ;;  %6552 = vmatpush.bf16.msra.mxu1 %v9573_v45 }
  0x43   :  { %v13766_v43 = vld [vmem:[#allocation7 + $0x71c] sm:$0xf0] }
  0x44   :  { %v9284_v47 = vld [vmem:[#allocation7 + $0xc0] sm:$0xf]  ;;  %v10085_v50 = vor.u32 %v13766_v43, %v10084_v42  ;;  %6565 = vmatpush.bf16.msra.mxu2 %v9829_v46 }
  0x45   :  { %v13566_v48 = vld [vmem:[#allocation7 + $0xdc] sm:$0xf0] }
  0x46   :  { %v9540_v49 = vld [vmem:[#allocation7 + $0x2c0] sm:$0xf]  ;;  %v9285_v56 = vor.u32 %v13566_v48, %v9284_v47  ;;  %6578 = vmatpush.bf16.msra.mxu3 %v10085_v50 }
  0x47   :  { %v13630_v51 = vld [vmem:[#allocation7 + $0x2dc] sm:$0xf0] }
  0x48   :  { %v9796_v52 = vld [vmem:[#allocation7 + $0x4c0] sm:$0xf]  ;;  %v9541_v57 = vor.u32 %v13630_v51, %v9540_v49  ;;  %6540 = vmatpush.bf16.msra.mxu0 %v9285_v56 }
  0x49   :  { %v13694_v53 = vld [vmem:[#allocation7 + $0x4dc] sm:$0xf0] }
  0x4a   :  { %v10052_v54 = vld [vmem:[#allocation7 + $0x6c0] sm:$0xf]  ;;  %v9797_v58 = vor.u32 %v13694_v53, %v9796_v52  ;;  %6553 = vmatpush.bf16.msra.mxu1 %v9541_v57 }
  0x4b   :  { %v13758_v55 = vld [vmem:[#allocation7 + $0x6dc] sm:$0xf0] }
  0x4c   :  { %v9252_v59 = vld [vmem:[#allocation7 + $0x80] sm:$0xf]  ;;  %v10053_v62 = vor.u32 %v13758_v55, %v10052_v54  ;;  %6566 = vmatpush.bf16.msra.mxu2 %v9797_v58 }
  0x4d   :  { %v13558_v60 = vld [vmem:[#allocation7 + $0x9c] sm:$0xf0] }
  0x4e   :  { %v9508_v61 = vld [vmem:[#allocation7 + $0x280] sm:$0xf]  ;;  %v9253_v4 = vor.u32 %v13558_v60, %v9252_v59  ;;  %6579 = vmatpush.bf16.msra.mxu3 %v10053_v62 }
  0x4f   :  { %v13622_v63 = vld [vmem:[#allocation7 + $0x29c] sm:$0xf0] }
  0x50   :  { %v9764_v0 = vld [vmem:[#allocation7 + $0x480] sm:$0xf]  ;;  %v9509_v5 = vor.u32 %v13622_v63, %v9508_v61  ;;  %6541 = vmatpush.bf16.msra.mxu0 %v9253_v4  ;;  %v156_v4 = vld [vmem:[%s15591_s2] sm:$0xff] }
  0x51   :  { %v13686_v1 = vld [vmem:[#allocation7 + $0x49c] sm:$0xf0] }
  0x52   :  { %v10020_v2 = vld [vmem:[#allocation7 + $0x680] sm:$0xf]  ;;  %v9765_v6 = vor.u32 %v13686_v1, %v9764_v0  ;;  %6554 = vmatpush.bf16.msra.mxu1 %v9509_v5 }
  0x53   :  { %v13750_v3 = vld [vmem:[#allocation7 + $0x69c] sm:$0xf0] }
  0x54   :  { %v9220_v7 = vld [vmem:[#allocation7 + $0x40] sm:$0xf]  ;;  %v10021_v10 = vor.u32 %v13750_v3, %v10020_v2  ;;  %6567 = vmatpush.bf16.msra.mxu2 %v9765_v6  ;;  %v152_v3 = vld [vmem:[%s15590_s1] sm:$0xff] }
  0x55   :  { %v13550_v8 = vld [vmem:[#allocation7 + $0x5c] sm:$0xf0] }
  0x56   :  { %v9476_v9 = vld [vmem:[#allocation7 + $0x240] sm:$0xf]  ;;  %v9221_v16 = vor.u32 %v13550_v8, %v9220_v7  ;;  %6580 = vmatpush.bf16.msra.mxu3 %v10021_v10  ;;  %v158_v10 = vmul.f32 0.03125, %v156_v4 }
  0x57   :  { %v13614_v11 = vld [vmem:[#allocation7 + $0x25c] sm:$0xf0] }
  0x58   :  { %v9732_v12 = vld [vmem:[#allocation7 + $0x440] sm:$0xf]  ;;  %v9477_v19 = vor.u32 %v13614_v11, %v9476_v9  ;;  %6542 = vmatpush.bf16.msra.mxu0 %v9221_v16  ;;  %v14996_v9 = vmul.f32 0.03125, %v152_v3 }
  0x59   :  { %v13678_v13 = vld [vmem:[#allocation7 + $0x45c] sm:$0xf0] }
  0x5a   :  { %v9988_v14 = vld [vmem:[#allocation7 + $0x640] sm:$0xf]  ;;  %v9733_v20 = vor.u32 %v13678_v13, %v9732_v12  ;;  %6555 = vmatpush.bf16.msra.mxu1 %v9477_v19  ;;  %v160_v16 = vmul.f32 %v14996_v9, %v14996_v9 }
  0x5b   :  { %v13742_v15 = vld [vmem:[#allocation7 + $0x65c] sm:$0xf0] }
  0x5c   :  { %v9188_v17 = vld [vmem:[#allocation7] sm:$0xf]  ;;  %v9989_v24 = vor.u32 %v13742_v15, %v9988_v14  ;;  %6568 = vmatpush.bf16.msra.mxu2 %v9733_v20 }
  0x5d   :  { %v13542_v18 = vld [vmem:[#allocation7 + $0x1c] sm:$0xf0] }
  0x5e   :  { %v9444_v21 = vld [vmem:[#allocation7 + $0x200] sm:$0xf]  ;;  %v9189_v31 = vor.u32 %v13542_v18, %v9188_v17  ;;  %6581 = vmatpush.bf16.msra.mxu3 %v9989_v24  ;;  %v162_v24 = vsub.f32 %v158_v10, %v160_v16 }
  0x5f   :  { %v13606_v22 = vld [vmem:[#allocation7 + $0x21c] sm:$0xf0] }
  0x60   :  { %v9700_v23 = vld [vmem:[#allocation7 + $0x400] sm:$0xf]  ;;  %v9445_v35 = vor.u32 %v13606_v22, %v9444_v21  ;;  %6543 = vmatpush.bf16.msra.mxu0 %v9189_v31  ;;  %v164_v31 = vmax.f32 %v162_v24, 0.0 }
  0x61   :  { %v13670_v25 = vld [vmem:[#allocation7 + $0x41c] sm:$0xf0] }
  0x62   :  { %v9956_v26 = vld [vmem:[#allocation7 + $0x600] sm:$0xf]  ;;  %v9701_v36 = vor.u32 %v13670_v25, %v9700_v23  ;;  %6556 = vmatpush.bf16.msra.mxu1 %v9445_v35 }
  0x63   :  { %v13734_v27 = vld [vmem:[#allocation7 + $0x61c] sm:$0xf0] }
  0x64   :  { %v10436_v28 = vld [vmem:[#allocation7 + $0x9c0] sm:$0xf]  ;;  %v9957_v39 = vor.u32 %v13734_v27, %v9956_v26  ;;  %6569 = vmatpush.bf16.msra.mxu2 %v9701_v36 }
  0x65   :  { %v13854_v29 = vld [vmem:[#allocation7 + $0x9dc] sm:$0xf0] }
  0x66   :  { %v10692_v30 = vld [vmem:[#allocation7 + $0xbc0] sm:$0xf]  ;;  %v10437_v40 = vor.u32 %v13854_v29, %v10436_v28  ;;  %6582 = vmatpush.bf16.msra.mxu3 %v9957_v39 }
  0x67   :  { %v13918_v32 = vld [vmem:[#allocation7 + $0xbdc] sm:$0xf0] }
  0x68   :  { %v10948_v33 = vld [vmem:[#allocation7 + $0xdc0] sm:$0xf]  ;;  %v10693_v41 = vor.u32 %v13918_v32, %v10692_v30  ;;  %6588 = vmatpush.bf16.msrb.mxu0 %v10437_v40  ;;  %v168_v40 = vadd.f32 1e-05, %v164_v31 }
  0x69   :  { %v13982_v34 = vld [vmem:[#allocation7 + $0xddc] sm:$0xf0] }
  0x6a   :  { %v11204_v37 = vld [vmem:[#allocation7 + $0xfc0] sm:$0xf]  ;;  %v10949_v42 = vor.u32 %v13982_v34, %v10948_v33  ;;  %6601 = vmatpush.bf16.msrb.mxu1 %v10693_v41  ;;  %14640 = vrsqrt.f32 %v168_v40  ;;  %vm176_vm0 = vweird.f32 %v168_v40 }
  0x6b   :  { %v14046_v38 = vld [vmem:[#allocation7 + $0xfdc] sm:$0xf0] }
  0x6c   :  { %v10404_v43 = vld [vmem:[#allocation7 + $0x980] sm:$0xf]  ;;  %v11205_v46 = vor.u32 %v14046_v38, %v11204_v37  ;;  %6614 = vmatpush.bf16.msrb.mxu2 %v10949_v42 }
  0x6d   :  { %v13846_v44 = vld [vmem:[#allocation7 + $0x99c] sm:$0xf0] }
  0x6e   :  { %v10660_v45 = vld [vmem:[#allocation7 + $0xb80] sm:$0xf]  ;;  %v10405_v52 = vor.u32 %v13846_v44, %v10404_v43  ;;  %6627 = vmatpush.bf16.msrb.mxu3 %v11205_v46 }
  0x6f   :  { %v13910_v47 = vld [vmem:[#allocation7 + $0xb9c] sm:$0xf0] }
  0x70   :  { %v10916_v48 = vld [vmem:[#allocation7 + $0xd80] sm:$0xf]  ;;  %v10661_v53 = vor.u32 %v13910_v47, %v10660_v45  ;;  %6589 = vmatpush.bf16.msrb.mxu0 %v10405_v52 }
  0x71   :  { %v13974_v49 = vld [vmem:[#allocation7 + $0xd9c] sm:$0xf0] }
  0x72   :  { %v11172_v50 = vld [vmem:[#allocation7 + $0xf80] sm:$0xf]  ;;  %v10917_v54 = vor.u32 %v13974_v49, %v10916_v48  ;;  %6602 = vmatpush.bf16.msrb.mxu1 %v10661_v53 }
  0x73   :  { %v14038_v51 = vld [vmem:[#allocation7 + $0xf9c] sm:$0xf0] }
  0x74   :  { %v10372_v55 = vld [vmem:[#allocation7 + $0x940] sm:$0xf]  ;;  %v11173_v58 = vor.u32 %v14038_v51, %v11172_v50  ;;  %6615 = vmatpush.bf16.msrb.mxu2 %v10917_v54 }
  0x75   :  { %v13838_v56 = vld [vmem:[#allocation7 + $0x95c] sm:$0xf0] }
  0x76   :  { %v10628_v57 = vld [vmem:[#allocation7 + $0xb40] sm:$0xf]  ;;  %v10373_v1 = vor.u32 %v13838_v56, %v10372_v55  ;;  %6628 = vmatpush.bf16.msrb.mxu3 %v11173_v58  ;;  %v14641_v56 = vpop.eup %14640 }
  0x77   :  { %v13902_v59 = vld [vmem:[#allocation7 + $0xb5c] sm:$0xf0]  ;;  %vm177_vm1 = vweird.f32 %v14641_v56 }
  0x78   :  { %v10884_v60 = vld [vmem:[#allocation7 + $0xd40] sm:$0xf]  ;;  %v10629_v5 = vor.u32 %v13902_v59, %v10628_v57  ;;  %6590 = vmatpush.bf16.msrb.mxu0 %v10373_v1  ;;  %v171_v57 = vmul.f32 %v14641_v56, %v168_v40  ;;  %vm15012_vm2 = vmor %vm176_vm0, %vm177_vm1 }
  0x79   :  { %v13966_v61 = vld [vmem:[#allocation7 + $0xd5c] sm:$0xf0] }
  0x7a   :  { %v11140_v62 = vld [vmem:[#allocation7 + $0xf40] sm:$0xf]  ;;  %v10885_v6 = vor.u32 %v13966_v61, %v10884_v60  ;;  %6603 = vmatpush.bf16.msrb.mxu1 %v10629_v5  ;;  %v172_v58 = vmul.f32 %v14641_v56, %v171_v57  ;;  %v193_v57 = vld [vmem:[#allocation5 + $0x8] sm:$0xff] }
  0x7b   :  { %v14030_v63 = vld [vmem:[#allocation7 + $0xf5c] sm:$0xf0] }
  0x7c   :  { %v10340_v0 = vld [vmem:[#allocation7 + $0x900] sm:$0xf]  ;;  %v11141_v11 = vor.u32 %v14030_v63, %v11140_v62  ;;  %6616 = vmatpush.bf16.msrb.mxu2 %v10885_v6  ;;  %v173_v59 = vmul.f32 0.5, %v172_v58 }
  0x7d   :  { %v13830_v2 = vld [vmem:[#allocation7 + $0x91c] sm:$0xf0] }
  0x7e   :  { %v10596_v7 = vld [vmem:[#allocation7 + $0xb00] sm:$0xf]  ;;  %v10341_v17 = vor.u32 %v13830_v2, %v10340_v0  ;;  %6629 = vmatpush.bf16.msrb.mxu3 %v11141_v11  ;;  %v174_v0 = vsub.f32 1.5, %v173_v59 }
  0x7f   :  { %v13894_v8 = vld [vmem:[#allocation7 + $0xb1c] sm:$0xf0] }
  0x80   :  { %v10852_v12 = vld [vmem:[#allocation7 + $0xd00] sm:$0xf]  ;;  %v10597_v19 = vor.u32 %v13894_v8, %v10596_v7  ;;  %6591 = vmatpush.bf16.msrb.mxu0 %v10341_v17 }
  0x81   :  { %v13958_v13 = vld [vmem:[#allocation7 + $0xd1c] sm:$0xf0] }
  0x82   :  { %v11108_v14 = vld [vmem:[#allocation7 + $0xf00] sm:$0xf]  ;;  %v10853_v20 = vor.u32 %v13958_v13, %v10852_v12  ;;  %6604 = vmatpush.bf16.msrb.mxu1 %v10597_v19  ;;  %v175_v12 = vmul.f32 %v14641_v56, %v174_v0 }
  0x83   :  { %v14022_v15 = vld [vmem:[#allocation7 + $0xf1c] sm:$0xf0] }
  0x84   :  { %v10308_v18 = vld [vmem:[#allocation7 + $0x8c0] sm:$0xf]  ;;  %v11109_v25 = vor.u32 %v14022_v15, %v11108_v14  ;;  %6617 = vmatpush.bf16.msrb.mxu2 %v10853_v20  ;;  %v179_v19 = vsel %vm15012_vm2, %v14641_v56, %v175_v12  ;;  %vm8448_vm2 = vcmask 1040384  }
  0x85   :  { %v13822_v21 = vld [vmem:[#allocation7 + $0x8dc] sm:$0xf0] }
  0x86   :  { %v10564_v22 = vld [vmem:[#allocation7 + $0xac0] sm:$0xf]  ;;  %v10309_v33 = vor.u32 %v13822_v21, %v10308_v18  ;;  %6630 = vmatpush.bf16.msrb.mxu3 %v11109_v25 }
  0x87   :  { %v13886_v23 = vld [vmem:[#allocation7 + $0xadc] sm:$0xf0] }
  0x88   :  { %v10820_v26 = vld [vmem:[#allocation7 + $0xcc0] sm:$0xf]  ;;  %v10565_v34 = vor.u32 %v13886_v23, %v10564_v22  ;;  %6592 = vmatpush.bf16.msrb.mxu0 %v10309_v33 }
  0x89   :  { %v13950_v27 = vld [vmem:[#allocation7 + $0xcdc] sm:$0xf0] }
  0x8a   :  { %v153_v28 = vld [vmem:[%s15590_s1 + $0x8] sm:$0xff]  ;;  %v10821_v38 = vor.u32 %v13950_v27, %v10820_v26  ;;  %6605 = vmatpush.bf16.msrb.mxu1 %v10565_v34 }
  0x8b   :  { %v11076_v29 = vld [vmem:[#allocation7 + $0xec0] sm:$0xf]  ;;  %v15003_v32 = vmul.f32 0.03125, %v153_v28 }
  0x8c   :  { %v14014_v30 = vld [vmem:[#allocation7 + $0xedc] sm:$0xf0]  ;;  %6618 = vmatpush.bf16.msrb.mxu2 %v10821_v38 }
  0x8d   :  { %v10276_v35 = vld [vmem:[#allocation7 + $0x880] sm:$0xf]  ;;  %v161_v42 = vmul.f32 %v15003_v32, %v15003_v32  ;;  %v11077_v43 = vor.u32 %v14014_v30, %v11076_v29  ;;  %v192_v29 = vld [vmem:[#allocation5] sm:$0xff] }
  0x8e   :  { %v13814_v36 = vld [vmem:[#allocation7 + $0x89c] sm:$0xf0] }
  0x8f   :  { %v157_v37 = vld [vmem:[%s15591_s2 + $0x8] sm:$0xff]  ;;  %v10277_v50 = vor.u32 %v13814_v36, %v10276_v35  ;;  %6631 = vmatpush.bf16.msrb.mxu3 %v11077_v43  ;;  %v167_v43 = vld [vmem:[#allocation2 + $0x8] sm:$0xff] }
  0x90   :  { %v10532_v39 = vld [vmem:[#allocation7 + $0xa80] sm:$0xf]  ;;  %v159_v41 = vmul.f32 0.03125, %v157_v37 }
  0x91   :  { %v13878_v44 = vld [vmem:[#allocation7 + $0xa9c] sm:$0xf0]  ;;  %6593 = vmatpush.bf16.msrb.mxu0 %v10277_v50 }
  0x92   :  { %v10788_v45 = vld [vmem:[#allocation7 + $0xc80] sm:$0xf]  ;;  %v163_v49 = vsub.f32 %v159_v41, %v161_v42  ;;  %v10533_v51 = vor.u32 %v13878_v44, %v10532_v39 }
  0x93   :  { %v13942_v46 = vld [vmem:[#allocation7 + $0xc9c] sm:$0xf0] }
  0x94   :  { %v11044_v47 = vld [vmem:[#allocation7 + $0xe80] sm:$0xf]  ;;  %v10789_v52 = vor.u32 %v13942_v46, %v10788_v45  ;;  %v165_v53 = vmax.f32 %v163_v49, 0.0  ;;  %6606 = vmatpush.bf16.msrb.mxu1 %v10533_v51  ;;  %v198_v46 = vld [vmem:[%s15589_s0] sm:$0xff] }
  0x95   :  { %v14006_v48 = vld [vmem:[#allocation7 + $0xe9c] sm:$0xf0] }
  0x96   :  { %v11045_v54 = vor.u32 %v14006_v48, %v11044_v47  ;;  %v169_v55 = vadd.f32 1e-05, %v165_v53  ;;  %6619 = vmatpush.bf16.msrb.mxu2 %v10789_v52  ;;  %v10244_v61 = vld [vmem:[#allocation7 + $0x840] sm:$0xf] }
  0x97   :  { %v13806_v62 = vld [vmem:[#allocation7 + $0x85c] sm:$0xf0] }
  0x98   :  { %14642 = vrsqrt.f32 %v169_v55  ;;  %6632 = vmatpush.bf16.msrb.mxu3 %v11045_v54  ;;  %v10500_v63 = vld [vmem:[#allocation7 + $0xa40] sm:$0xf]  ;;  %v10245_v2 = vor.u32 %v13806_v62, %v10244_v61  ;;  %vm186_vm3 = vweird.f32 %v169_v55 }
  0x99   :  { %v13870_v3 = vld [vmem:[#allocation7 + $0xa5c] sm:$0xf0] }
  0x9a   :  { %v10756_v4 = vld [vmem:[#allocation7 + $0xc40] sm:$0xf]  ;;  %v10501_v6 = vor.u32 %v13870_v3, %v10500_v63  ;;  %6594 = vmatpush.bf16.msrb.mxu0 %v10245_v2 }
  0x9b   :  { %v13934_v7 = vld [vmem:[#allocation7 + $0xc5c] sm:$0xf0] }
  0x9c   :  { %v11012_v8 = vld [vmem:[#allocation7 + $0xe40] sm:$0xf]  ;;  %v10757_v13 = vor.u32 %v13934_v7, %v10756_v4  ;;  %6607 = vmatpush.bf16.msrb.mxu1 %v10501_v6 }
  0x9d   :  { %v13998_v10 = vld [vmem:[#allocation7 + $0xe5c] sm:$0xf0] }
  0x9e   :  { %v15010_v60 = vpop.eup %14642  ;;  %v166_v11 = vld [vmem:[#allocation2] sm:$0xff]  ;;  %v11013_v14 = vor.u32 %v13998_v10, %v11012_v8  ;;  %6620 = vmatpush.bf16.msrb.mxu2 %v10757_v13  ;;  %v200_v8 = vld [vmem:[%s15589_s0 + $0x10] sm:$0xff] }
  0x9f   :  { %v181_v5 = vmul.f32 %v15010_v60, %v169_v55  ;;  %v10212_v16 = vld [vmem:[#allocation7 + $0x800] sm:$0xf]  ;;  %vm187_vm4 = vweird.f32 %v15010_v60  ;;  %v15021_v24 = vmul.f32 %v179_v19, %v166_v11 }
  0xa0   :  { %v13798_v17 = vld [vmem:[#allocation7 + $0x81c] sm:$0xf0]  ;;  %6633 = vmatpush.bf16.msrb.mxu3 %v11013_v14  ;;  %vm15031_vm5 = vmor %vm186_vm3, %vm187_vm4 }
  0xa1   :  { %v182_v15 = vmul.f32 %v15010_v60, %v181_v5  ;;  %v10468_v18 = vld [vmem:[#allocation7 + $0xa00] sm:$0xf]  ;;  %v10213_v21 = vor.u32 %v13798_v17, %v10212_v16  ;;  %v194_v34 = vmul.f32 %v15021_v24, %v14996_v9  ;;  %v204_v35 = vperm.slane %v15021_v24, 0 }
  0xa2   :  { %v13862_v22 = vld [vmem:[#allocation7 + $0xa1c] sm:$0xf0]  ;;  %v205_v36 = vperm.slane %v15021_v24, 1  ;;  %v206_v37 = vperm.slane %v15021_v24, 2  ;;  %v207_v39 = vperm.slane %v15021_v24, 3  ;;  %v209_v16 = vperm.slane %v15021_v24, 5 }
  0xa3   :  { %v183_v20 = vmul.f32 0.5, %v182_v15  ;;  %v10724_v23 = vld [vmem:[#allocation7 + $0xc00] sm:$0xf]  ;;  %v10469_v25 = vor.u32 %v13862_v22, %v10468_v18  ;;  %6595 = vmatpush.bf16.msrb.mxu0 %v10213_v21  ;;  %v15037_v9 = vsub.f32 %v192_v29, %v194_v34 }
  0xa4   :  { %v13926_v26 = vld [vmem:[#allocation7 + $0xc1c] sm:$0xf0]  ;;  %v220_v41 = vrot.slane %v205_v36, 6  ;;  %v221_v42 = vrot.slane %v206_v37, 4  ;;  %v222_v44 = vrot.slane %v207_v39, 2  ;;  %v223_v38 = vrot.slane %v209_v16, 6 }
  0xa5   :  { %v10980_v27 = vld [vmem:[#allocation7 + $0xe00] sm:$0xf]  ;;  %v184_v30 = vsub.f32 1.5, %v183_v20  ;;  %v10725_v31 = vor.u32 %v13926_v26, %v10724_v23  ;;  %6608 = vmatpush.bf16.msrb.mxu1 %v10469_v25  ;;  %v257_v48 = vperm.slane %v15037_v9, 0  ;;  %v258_v49 = vperm.slane %v15037_v9, 1 }
  0xa6   :  { %v13990_v28 = vld [vmem:[#allocation7 + $0xe1c] sm:$0xf0]  ;;  %v233_v47 = vsel %vm232_vm6, %v204_v35, %v220_v41  ;;  %v259_v50 = vperm.slane %v15037_v9, 2  ;;  %v235_v51 = vsel %vm234_vm7, %v221_v42, %v222_v44  ;;  %v260_v52 = vperm.slane %v15037_v9, 3 }
  0xa7   :  { %v10981_v33 = vor.u32 %v13990_v28, %v10980_v27  ;;  %v185_v40 = vmul.f32 %v15010_v60, %v184_v30  ;;  %6621 = vmatpush.bf16.msrb.mxu2 %v10725_v31  ;;  %v237_v54 = vsel %vm236_vm8, %v233_v47, %v235_v51  ;;  %v273_v55 = vrot.slane %v258_v49, 6  ;;  %v15079_v28 = vld [vmem:[#allocation7 + $0x11c0] sm:$0xf] }
  0xa8   :  { %v274_v56 = vrot.slane %v259_v50, 4  ;;  %v251_v58 = vmul.f32 %v237_v54, %v198_v46  ;;  %v275_v59 = vrot.slane %v260_v52, 2  ;;  %v208_v26 = vperm.slane %v15021_v24, 4  ;;  %v15081_v29 = vld [vmem:[#allocation7 + $0x11dc] sm:$0xf0] }
  0xa9   :  { %6634 = vmatpush.bf16.msrb.mxu3 %v10981_v33  ;;  %v189_v45 = vsel %vm15031_vm5, %v15010_v60, %v185_v40  ;;  %v285_v62 = vsel %vm232_vm6, %v257_v48, %v273_v55  ;;  %v210_v30 = vperm.slane %v15021_v24, 6  ;;  %v211_v31 = vperm.slane %v15021_v24, 7  ;;  %v15086_v34 = vld [vmem:[#allocation7 + $0x13c0] sm:$0xf] }
  0xaa   :  { %v15051_v53 = vmul.f32 %v189_v45, %v167_v43  ;;  %v286_v2 = vsel %vm234_vm7, %v274_v56, %v275_v59  ;;  %v15088_v35 = vld [vmem:[#allocation7 + $0x13dc] sm:$0xf0]  ;;  %v261_v39 = vperm.slane %v15037_v9, 4  ;;  %v262_v40 = vperm.slane %v15037_v9, 5 }
  0xab   :  { %v287_v4 = vsel %vm236_vm8, %v285_v62, %v286_v2  ;;  %v15090_v36 = vld [vmem:[#allocation7 + $0x15c0] sm:$0xf]  ;;  %v224_v45 = vrot.slane %v210_v30, 4  ;;  %v225_v46 = vrot.slane %v211_v31, 2  ;;  %v263_v47 = vperm.slane %v15037_v9, 6 }
  0xac   :  { %v195_v60 = vmul.f32 %v15051_v53, %v15003_v32  ;;  %v212_v61 = vperm.slane %v15051_v53, 0  ;;  %v213_v63 = vperm.slane %v15051_v53, 1  ;;  %v214_v0 = vperm.slane %v15051_v53, 2  ;;  %v15092_v37 = vld [vmem:[#allocation7 + $0x15dc] sm:$0xf0] }
  0xad   :  { %v215_v1 = vperm.slane %v15051_v53, 3  ;;  %v301_v32 = vadd.f32 %v287_v4, %v251_v58  ;;  %v15096_v42 = vld [vmem:[#allocation7 + $0x17c0] sm:$0xf]  ;;  %v238_v50 = vsel %vm232_vm6, %v208_v26, %v223_v38  ;;  %v264_v51 = vperm.slane %v15037_v9, 7 }
  0xae   :  { %v15062_v3 = vsub.f32 %v193_v57, %v195_v60  ;;  %v226_v5 = vrot.slane %v213_v63, 6  ;;  %v227_v6 = vrot.slane %v214_v0, 4  ;;  %v15098_v43 = vld [vmem:[#allocation7 + $0x17dc] sm:$0xf0]  ;;  %v276_v52 = vrot.slane %v262_v40, 6 }
  0xaf   :  { %v228_v7 = vrot.slane %v215_v1, 2  ;;  %vm305_vm9 = vcmp.ge.f32.partialorder %v301_v32, 0.0  ;;  %v309_v17 = vmul.f32 0.2, %v301_v32  ;;  %v15100_v24 = vld [vmem:[#allocation7 + $0x1180] sm:$0xf]  ;;  %v239_v56 = vsel %vm234_vm7, %v224_v45, %v225_v46 }
  0xb0   :  { %v265_v10 = vperm.slane %v15062_v3, 0  ;;  %v266_v11 = vperm.slane %v15062_v3, 1  ;;  %v267_v12 = vperm.slane %v15062_v3, 2  ;;  %v241_v13 = vsel %vm232_vm6, %v212_v61, %v226_v5  ;;  %v199_v44 = vld [vmem:[%s15589_s0 + $0x8] sm:$0xff] }
  0xb1   :  { %v242_v14 = vsel %vm234_vm7, %v227_v6, %v228_v7  ;;  %v268_v15 = vperm.slane %v15062_v3, 3  ;;  %v313_v23 = vsel %vm305_vm9, %v301_v32, %v309_v17  ;;  %v15106_v48 = vld [vmem:[#allocation7 + $0x119c] sm:$0xf0]  ;;  %v277_v57 = vrot.slane %v263_v47, 4 }
  0xb2   :  { %v243_v18 = vsel %vm236_vm8, %v241_v13, %v242_v14  ;;  %v279_v19 = vrot.slane %v266_v11, 6  ;;  %v280_v21 = vrot.slane %v267_v12, 4  ;;  %321 = vst [vmem:[#allocation1] ss:$4 sm:$0xff] %v313_v23  ;;  %v15108_v49 = vld [vmem:[#allocation7 + $0x1380] sm:$0xf]  ;;  %v11461_v58 = vor.u32 %v15081_v29, %v15079_v28 }
  0xb3   :  { %v253_v20 = vmul.f32 %v243_v18, %v200_v8  ;;  %v281_v22 = vrot.slane %v268_v15, 2  ;;  %v15112_v55 = vld [vmem:[#allocation7 + $0x139c] sm:$0xf0]  ;;  %v240_v61 = vsel %vm236_vm8, %v238_v50, %v239_v56  ;;  %v278_v62 = vrot.slane %v264_v51, 2 }
  0xb4   :  { %v291_v25 = vsel %vm232_vm6, %v265_v10, %v279_v19  ;;  %v15117_v59 = vld [vmem:[#allocation7 + $0x1580] sm:$0xf]  ;;  %v288_v9 = vsel %vm232_vm6, %v261_v39, %v276_v52  ;;  %v11717_v0 = vor.u32 %v15088_v35, %v15086_v34  ;;  %v11973_v1 = vor.u32 %v15092_v37, %v15090_v36 }
  0xb5   :  { %v292_v27 = vsel %vm234_vm7, %v280_v21, %v281_v22  ;;  %v15119_v60 = vld [vmem:[#allocation7 + $0x159c] sm:$0xf0]  ;;  %v252_v2 = vmul.f32 %v240_v61, %v199_v44  ;;  %v12229_v6 = vor.u32 %v15098_v43, %v15096_v42  ;;  %v11429_v7 = vor.u32 %v15106_v48, %v15100_v24  ;;  %v201_v43 = vld [vmem:[%s15589_s0 + $0x18] sm:$0xff]  ;;  %s14905_s0 = smov [#allocation16]  }
  0xb6   :  { %v293_v33 = vsel %vm236_vm8, %v291_v25, %v292_v27  ;;  %v11685_v32 = vor.u32 %v15112_v55, %v15108_v49  ;;  %v289_v8 = vsel %vm234_vm7, %v277_v57, %v278_v62  ;;  %v11941_v14 = vor.u32 %v15119_v60, %v15117_v59  ;;  %v12196_v15 = vld [vmem:[#allocation7 + $0x1780] sm:$0xf]  ;;  %s9170_s25 = sshll.u32 %s14905_s0, 4  ;;  %s9171_s25 = int_to_ptr.vmem [resolvable:$true] %s9170_s25 }
  0xb7   :  { %v303_v41 = vadd.f32 %v293_v33, %v253_v20  ;;  %v290_v16 = vsel %vm236_vm8, %v288_v9, %v289_v8  ;;  %v14294_v19 = vld [vmem:[#allocation7 + $0x179c] sm:$0xf0]  ;;  %v216_v21 = vperm.slane %v15051_v53, 4  ;;  %v217_v25 = vperm.slane %v15051_v53, 5 }
  0xb8   :  { %v302_v20 = vadd.f32 %v290_v16, %v252_v2  ;;  %v11396_v22 = vld [vmem:[#allocation7 + $0x1140] sm:$0xf]  ;;  %v218_v26 = vperm.slane %v15051_v53, 6  ;;  %v219_v27 = vperm.slane %v15051_v53, 7  ;;  %v269_v28 = vperm.slane %v15062_v3, 4 }
  0xb9   :  { %vm307_vm10 = vcmp.ge.f32.partialorder %v303_v41, 0.0  ;;  %v311_v54 = vmul.f32 0.2, %v303_v41  ;;  %v324_v4 = vld.sshfl [vmem:[#allocation1] sm:$0xff pattern:$0x73625140]  ;;  %v12197_v40 = vor.u32 %v14294_v19, %v12196_v15 }
  0xba   :  { %v326_v5 = vld.sshfl [vmem:[#allocation1 + $0x10] sm:$0xff pattern:$0x73625140]  ;;  %v15134_v10 = vpack.c.bf16 %v324_v4, %v324_v4  ;;  %v327_v12 = vld.sshfl [vmem:[#allocation1 + $0x18] sm:$0xff pattern:$0x73625140] }
  0xbb   :  { %v315_v63 = vsel %vm307_vm10, %v303_v41, %v311_v54  ;;  %v15136_v11 = vpack.c.bf16 %v326_v5, %v326_v5  ;;  %v325_v13 = vld.sshfl [vmem:[#allocation1 + $0x8] sm:$0xff pattern:$0x73625140]  ;;  %v15141_v17 = vpack.c.bf16 %v327_v12, %v327_v12  ;;  %vm306_vm11 = vcmp.ge.f32.partialorder %v302_v20, 0.0 }
  0xbc   :  { %332 = vst [vmem:[#allocation1] ss:$4 sm:$0xff] %v315_v63  ;;  %v15143_v18 = vpack.c.bf16 %v325_v13, %v325_v13  ;;  %6544 = vmatmul.bf16.vlgmr.msra.gmra.mxu0 %v15134_v10  ;;  %v14094_v23 = vld [vmem:[#allocation7 + $0x115c] sm:$0xf0]  ;;  %v310_v31 = vmul.f32 0.2, %v302_v20 }
  0xbd   :  { %6570 = vmatmul.bf16.vlgmr.msra.gmra.mxu2 %v15136_v11  ;;  %6583 = vmatmul.bf16.vlgmr.msra.gmra.mxu3 %v15141_v17  ;;  %v11652_v29 = vld [vmem:[#allocation7 + $0x1340] sm:$0xf]  ;;  %v270_v33 = vperm.slane %v15062_v3, 5  ;;  %v271_v34 = vperm.slane %v15062_v3, 6  ;;  %v229_v37 = vrot.slane %v217_v25, 6  ;;  %v230_v53 = vrot.slane %v218_v26, 4 }
  0xbe   :  { %6557 = vmatmul.bf16.vlgmr.msra.gmra.mxu1 %v15143_v18  ;;  %v14158_v30 = vld [vmem:[#allocation7 + $0x135c] sm:$0xf0]  ;;  %6640 = vmatpush.bf16.msra.mxu0 %v11461_v58  ;;  %v231_v38 = vrot.slane %v219_v27, 2  ;;  %v272_v39 = vperm.slane %v15062_v3, 7  ;;  %v314_v42 = vsel %vm306_vm11, %v302_v20, %v310_v31  ;;  %v11397_v3 = vor.u32 %v14094_v23, %v11396_v22 }
  0xbf   :  { %6653 = vmatpush.bf16.msra.mxu1 %v11717_v0  ;;  %v11908_v35 = vld [vmem:[#allocation7 + $0x1540] sm:$0xf]  ;;  %6666 = vmatpush.bf16.msra.mxu2 %v11973_v1  ;;  %v282_v24 = vrot.slane %v270_v33, 6  ;;  %v283_v44 = vrot.slane %v271_v34, 4  ;;  %323 = vst [vmem:[#allocation1 + $0x20] ss:$4 sm:$0xff] %v314_v42  ;;  %v244_v46 = vsel %vm232_vm6, %v216_v21, %v229_v37  ;;  %v11653_v51 = vor.u32 %v14158_v30, %v11652_v29 }
  0xc0   :  { %v14222_v36 = vld [vmem:[#allocation7 + $0x155c] sm:$0xf0]  ;;  %6679 = vmatpush.bf16.msra.mxu3 %v12229_v6  ;;  %v245_v47 = vsel %vm234_vm7, %v230_v53, %v231_v38  ;;  %v284_v48 = vrot.slane %v272_v39, 2 }
  0xc1   :  { %v12164_v41 = vld [vmem:[#allocation7 + $0x1740] sm:$0xf]  ;;  %v246_v49 = vsel %vm236_vm8, %v244_v46, %v245_v47  ;;  %v294_v50 = vsel %vm232_vm6, %v269_v28, %v282_v24  ;;  %v11909_v57 = vor.u32 %v14222_v36, %v11908_v35 }
  0xc2   :  { %v14286_v45 = vld [vmem:[#allocation7 + $0x175c] sm:$0xf0]  ;;  %6641 = vmatpush.bf16.msra.mxu0 %v11429_v7  ;;  %v254_v55 = vmul.f32 %v246_v49, %v201_v43  ;;  %v295_v56 = vsel %vm234_vm7, %v283_v44, %v284_v48 }
  0xc3   :  { %6654 = vmatpush.bf16.msra.mxu1 %v11685_v32  ;;  %v11364_v52 = vld [vmem:[#allocation7 + $0x1100] sm:$0xf]  ;;  %6667 = vmatpush.bf16.msra.mxu2 %v11941_v14  ;;  %v12165_v58 = vor.u32 %v14286_v45, %v12164_v41  ;;  %v296_v62 = vsel %vm236_vm8, %v294_v50, %v295_v56 }
  0xc4   :  { %v14086_v54 = vld [vmem:[#allocation7 + $0x111c] sm:$0xf0]  ;;  %6680 = vmatpush.bf16.msra.mxu3 %v12197_v40  ;;  %v304_v1 = vadd.f32 %v296_v62, %v254_v55 }
  0xc5   :  { %v11620_v59 = vld [vmem:[#allocation7 + $0x1300] sm:$0xf]  ;;  %v11365_v7 = vor.u32 %v14086_v54, %v11364_v52 }
  0xc6   :  { %v14150_v60 = vld [vmem:[#allocation7 + $0x131c] sm:$0xf0]  ;;  %6642 = vmatpush.bf16.msra.mxu0 %v11397_v3  ;;  %vm308_vm12 = vcmp.ge.f32.partialorder %v304_v1, 0.0  ;;  %v312_v8 = vmul.f32 0.2, %v304_v1 }
  0xc7   :  { %v11876_v61 = vld [vmem:[#allocation7 + $0x1500] sm:$0xf]  ;;  %6655 = vmatpush.bf16.msra.mxu1 %v11653_v51  ;;  %v11621_v32 = vor.u32 %v14150_v60, %v11620_v59  ;;  %6668 = vmatpush.bf16.msra.mxu2 %v11909_v57  ;;  %v328_v16 = vld.sshfl [vmem:[#allocation1 + $0x20] sm:$0xff pattern:$0x73625140] }
  0xc8   :  { %v14214_v9 = vld [vmem:[#allocation7 + $0x151c] sm:$0xf0]  ;;  %6681 = vmatpush.bf16.msra.mxu3 %v12165_v58  ;;  %v330_v19 = vld.sshfl [vmem:[#allocation1 + $0x30] sm:$0xff pattern:$0x73625140]  ;;  %v15167_v22 = vpack.c.bf16 %v328_v16, %v328_v16  ;;  %v316_v26 = vsel %vm308_vm12, %v304_v1, %v312_v8 }
  0xc9   :  { %v12132_v63 = vld [vmem:[#allocation7 + $0x1700] sm:$0xf]  ;;  %v11877_v20 = vor.u32 %v14214_v9, %v11876_v61  ;;  %v15169_v23 = vpack.c.bf16 %v330_v19, %v330_v19  ;;  %v331_v27 = vld.sshfl [vmem:[#allocation1 + $0x38] sm:$0xff pattern:$0x73625140] }
  0xca   :  { %v14278_v0 = vld [vmem:[#allocation7 + $0x171c] sm:$0xf0]  ;;  %v15173_v29 = vpack.c.bf16 %v331_v27, %v331_v27  ;;  %6643 = vmatpush.bf16.msra.mxu0 %v11365_v7 }
  0xcb   :  { %v11332_v2 = vld [vmem:[#allocation7 + $0x10c0] sm:$0xf]  ;;  %v12133_v21 = vor.u32 %v14278_v0, %v12132_v63  ;;  %6656 = vmatpush.bf16.msra.mxu1 %v11621_v32  ;;  %6669 = vmatpush.bf16.msra.mxu2 %v11877_v20  ;;  %v337_v20 = vld.sshfl [vmem:[#allocation1 + $0x18] sm:$0xff pattern:$0x73625140] }
  0xcc   :  { %v14078_v4 = vld [vmem:[#allocation7 + $0x10dc] sm:$0xf0]  ;;  %6596 = vmatmul.bf16.vlgmr.msrb.gmra.mxu0 %v15167_v22 }
  0xcd   :  { %v11588_v5 = vld [vmem:[#allocation7 + $0x12c0] sm:$0xf]  ;;  %v11333_v30 = vor.u32 %v14078_v4, %v11332_v2  ;;  %6682 = vmatpush.bf16.msra.mxu3 %v12133_v21  ;;  %6622 = vmatmul.bf16.vlgmr.msrb.gmra.mxu2 %v15169_v23 }
  0xce   :  { %v14142_v6 = vld [vmem:[#allocation7 + $0x12dc] sm:$0xf0]  ;;  %6635 = vmatmul.bf16.vlgmr.msrb.gmra.mxu3 %v15173_v29 }
  0xcf   :  { %v11844_v12 = vld [vmem:[#allocation7 + $0x14c0] sm:$0xf]  ;;  %v11589_v31 = vor.u32 %v14142_v6, %v11588_v5  ;;  %6644 = vmatpush.bf16.msra.mxu0 %v11333_v30 }
  0xd0   :  { %v14206_v13 = vld [vmem:[#allocation7 + $0x14dc] sm:$0xf0] }
  0xd1   :  { %v12100_v14 = vld [vmem:[#allocation7 + $0x16c0] sm:$0xf]  ;;  %v11845_v35 = vor.u32 %v14206_v13, %v11844_v12  ;;  %6657 = vmatpush.bf16.msra.mxu1 %v11589_v31  ;;  %v334_v13 = vld.sshfl [vmem:[#allocation1] sm:$0xff pattern:$0x73625140] }
  0xd2   :  { %v14270_v15 = vld [vmem:[#allocation7 + $0x16dc] sm:$0xf0] }
  0xd3   :  { %v329_v25 = vld.sshfl [vmem:[#allocation1 + $0x28] sm:$0xff pattern:$0x73625140]  ;;  %v12101_v36 = vor.u32 %v14270_v15, %v12100_v14  ;;  %6670 = vmatpush.bf16.msra.mxu2 %v11845_v35  ;;  %v336_v14 = vld.sshfl [vmem:[#allocation1 + $0x10] sm:$0xff pattern:$0x73625140] }
  0xd4   :  { %v15171_v28 = vpack.c.bf16 %v329_v25, %v329_v25  ;;  %333 = vst [vmem:[#allocation1 + $0x20] ss:$4 sm:$0xff] %v316_v26  ;;  %v11300_v33 = vld [vmem:[#allocation7 + $0x1080] sm:$0xf] }
  0xd5   :  { %v14070_v34 = vld [vmem:[#allocation7 + $0x109c] sm:$0xf0]  ;;  %6683 = vmatpush.bf16.msra.mxu3 %v12101_v36  ;;  %v15179_v36 = vpack.c.bf16 %v334_v13, %v334_v13 }
  0xd6   :  { %v11556_v37 = vld [vmem:[#allocation7 + $0x1280] sm:$0xf]  ;;  %6609 = vmatmul.bf16.vlgmr.msrb.gmra.mxu1 %v15171_v28  ;;  %v11301_v42 = vor.u32 %v14070_v34, %v11300_v33 }
  0xd7   :  { %v14134_v53 = vld [vmem:[#allocation7 + $0x129c] sm:$0xf0] }
  0xd8   :  { %v11812_v38 = vld [vmem:[#allocation7 + $0x1480] sm:$0xf]  ;;  %v11557_v43 = vor.u32 %v14134_v53, %v11556_v37  ;;  %6645 = vmatpush.bf16.msra.mxu0 %v11301_v42  ;;  %v15181_v37 = vpack.c.bf16 %v336_v14, %v336_v14 }
  0xd9   :  { %v14198_v39 = vld [vmem:[#allocation7 + $0x149c] sm:$0xf0] }
  0xda   :  { %v12068_v40 = vld [vmem:[#allocation7 + $0x1680] sm:$0xf]  ;;  %v11813_v45 = vor.u32 %v14198_v39, %v11812_v38  ;;  %6658 = vmatpush.bf16.msra.mxu1 %v11557_v43 }
  0xdb   :  { %v14262_v41 = vld [vmem:[#allocation7 + $0x169c] sm:$0xf0] }
  0xdc   :  { %v11268_v24 = vld [vmem:[#allocation7 + $0x1040] sm:$0xf]  ;;  %v12069_v46 = vor.u32 %v14262_v41, %v12068_v40  ;;  %6671 = vmatpush.bf16.msra.mxu2 %v11813_v45  ;;  %v15185_v41 = vpack.c.bf16 %v337_v20, %v337_v20 }
  0xdd   :  { %v14062_v44 = vld [vmem:[#allocation7 + $0x105c] sm:$0xf0] }
  0xde   :  { %v11524_v47 = vld [vmem:[#allocation7 + $0x1240] sm:$0xf]  ;;  %v11269_v57 = vor.u32 %v14062_v44, %v11268_v24  ;;  %6684 = vmatpush.bf16.msra.mxu3 %v12069_v46 }
  0xdf   :  { %v14126_v48 = vld [vmem:[#allocation7 + $0x125c] sm:$0xf0] }
  0xe0   :  { %v11780_v3 = vld [vmem:[#allocation7 + $0x1440] sm:$0xf]  ;;  %v11525_v58 = vor.u32 %v14126_v48, %v11524_v47  ;;  %6646 = vmatpush.bf16.msra.mxu0 %v11269_v57 }
  0xe1   :  { %v14190_v49 = vld [vmem:[#allocation7 + $0x145c] sm:$0xf0] }
  0xe2   :  { %v12036_v50 = vld [vmem:[#allocation7 + $0x1640] sm:$0xf]  ;;  %v11781_v62 = vor.u32 %v14190_v49, %v11780_v3  ;;  %6659 = vmatpush.bf16.msra.mxu1 %v11525_v58 }
  0xe3   :  { %v14254_v51 = vld [vmem:[#allocation7 + $0x165c] sm:$0xf0] }
  0xe4   :  { %v11236_v52 = vld [vmem:[#allocation7 + $0x1000] sm:$0xf]  ;;  %v12037_v9 = vor.u32 %v14254_v51, %v12036_v50  ;;  %6672 = vmatpush.bf16.msra.mxu2 %v11781_v62 }
  0xe5   :  { %v14054_v54 = vld [vmem:[#allocation7 + $0x101c] sm:$0xf0] }
  0xe6   :  { %v11492_v55 = vld [vmem:[#allocation7 + $0x1200] sm:$0xf]  ;;  %v11237_v8 = vor.u32 %v14054_v54, %v11236_v52  ;;  %6685 = vmatpush.bf16.msra.mxu3 %v12037_v9 }
  0xe7   :  { %v14118_v56 = vld [vmem:[#allocation7 + $0x121c] sm:$0xf0] }
  0xe8   :  { %v11748_v59 = vld [vmem:[#allocation7 + $0x1400] sm:$0xf]  ;;  %v11493_v12 = vor.u32 %v14118_v56, %v11492_v55  ;;  %6647 = vmatpush.bf16.msra.mxu0 %v11237_v8 }
  0xe9   :  { %v14182_v60 = vld [vmem:[#allocation7 + $0x141c] sm:$0xf0] }
  0xea   :  { %v12004_v61 = vld [vmem:[#allocation7 + $0x1600] sm:$0xf]  ;;  %v11749_v15 = vor.u32 %v14182_v60, %v11748_v59  ;;  %6660 = vmatpush.bf16.msra.mxu1 %v11493_v12 }
  0xeb   :  { %v14246_v63 = vld [vmem:[#allocation7 + $0x161c] sm:$0xf0]  ;;  %6648 = vmatmul.bf16.vlgmr.msra.gmra.mxu0 %v15179_v36 }
  0xec   :  { %v12484_v0 = vld [vmem:[#allocation7 + $0x19c0] sm:$0xf]  ;;  %v12005_v16 = vor.u32 %v14246_v63, %v12004_v61  ;;  %6673 = vmatpush.bf16.msra.mxu2 %v11749_v15 }
  0xed   :  { %v14366_v1 = vld [vmem:[#allocation7 + $0x19dc] sm:$0xf0] }
  0xee   :  { %v12740_v2 = vld [vmem:[#allocation7 + $0x1bc0] sm:$0xf]  ;;  %v12485_v21 = vor.u32 %v14366_v1, %v12484_v0  ;;  %6686 = vmatpush.bf16.msra.mxu3 %v12005_v16 }
  0xef   :  { %v14430_v4 = vld [vmem:[#allocation7 + $0x1bdc] sm:$0xf0]  ;;  %6674 = vmatmul.bf16.vlgmr.msra.gmra.mxu2 %v15181_v37 }
  0xf0   :  { %v12996_v5 = vld [vmem:[#allocation7 + $0x1dc0] sm:$0xf]  ;;  %v12741_v25 = vor.u32 %v14430_v4, %v12740_v2  ;;  %6692 = vmatpush.bf16.msrb.mxu0 %v12485_v21 }
  0xf1   :  { %v14494_v6 = vld [vmem:[#allocation7 + $0x1ddc] sm:$0xf0]  ;;  %6687 = vmatmul.bf16.vlgmr.msra.gmra.mxu3 %v15185_v41 }
  0xf2   :  { %v13252_v7 = vld [vmem:[#allocation7 + $0x1fc0] sm:$0xf]  ;;  %v12997_v30 = vor.u32 %v14494_v6, %v12996_v5  ;;  %6705 = vmatpush.bf16.msrb.mxu1 %v12741_v25 }
  0xf3   :  { %v14558_v32 = vld [vmem:[#allocation7 + $0x1fdc] sm:$0xf0] }
  0xf4   :  { %v335_v19 = vld.sshfl [vmem:[#allocation1 + $0x8] sm:$0xff pattern:$0x73625140]  ;;  %v13253_v31 = vor.u32 %v14558_v32, %v13252_v7  ;;  %6718 = vmatpush.bf16.msrb.mxu2 %v12997_v30 }
  0xf5   :  { %v12452_v26 = vld [vmem:[#allocation7 + $0x1980] sm:$0xf]  ;;  %v15183_v40 = vpack.c.bf16 %v335_v19, %v335_v19 }
  0xf6   :  { %v14358_v27 = vld [vmem:[#allocation7 + $0x199c] sm:$0xf0]  ;;  %6731 = vmatpush.bf16.msrb.mxu3 %v13253_v31 }
  0xf7   :  { %v12708_v33 = vld [vmem:[#allocation7 + $0x1b80] sm:$0xf]  ;;  %v12453_v42 = vor.u32 %v14358_v27, %v12452_v26  ;;  %6661 = vmatmul.bf16.vlgmr.msra.gmra.mxu1 %v15183_v40 }
  0xf8   :  { %v14422_v34 = vld [vmem:[#allocation7 + $0x1b9c] sm:$0xf0] }
  0xf9   :  { %v12964_v35 = vld [vmem:[#allocation7 + $0x1d80] sm:$0xf]  ;;  %v12709_v43 = vor.u32 %v14422_v34, %v12708_v33  ;;  %6693 = vmatpush.bf16.msrb.mxu0 %v12453_v42 }
  0xfa   :  { %v14486_v53 = vld [vmem:[#allocation7 + $0x1d9c] sm:$0xf0] }
  0xfb   :  { %v13220_v38 = vld [vmem:[#allocation7 + $0x1f80] sm:$0xf]  ;;  %v12965_v45 = vor.u32 %v14486_v53, %v12964_v35  ;;  %6706 = vmatpush.bf16.msrb.mxu1 %v12709_v43 }
  0xfc   :  { %v14550_v39 = vld [vmem:[#allocation7 + $0x1f9c] sm:$0xf0] }
  0xfd   :  { %v12420_v24 = vld [vmem:[#allocation7 + $0x1940] sm:$0xf]  ;;  %v13221_v46 = vor.u32 %v14550_v39, %v13220_v38  ;;  %6719 = vmatpush.bf16.msrb.mxu2 %v12965_v45 }
  0xfe   :  { %v14350_v44 = vld [vmem:[#allocation7 + $0x195c] sm:$0xf0] }
  0xff   :  { %v12676_v47 = vld [vmem:[#allocation7 + $0x1b40] sm:$0xf]  ;;  %v12421_v52 = vor.u32 %v14350_v44, %v12420_v24  ;;  %6732 = vmatpush.bf16.msrb.mxu3 %v13221_v46 }
 0x100   :  { %v14414_v48 = vld [vmem:[#allocation7 + $0x1b5c] sm:$0xf0] }
 0x101   :  { %v12932_v3 = vld [vmem:[#allocation7 + $0x1d40] sm:$0xf]  ;;  %v12677_v54 = vor.u32 %v14414_v48, %v12676_v47  ;;  %6694 = vmatpush.bf16.msrb.mxu0 %v12421_v52 }
 0x102   :  { %v14478_v49 = vld [vmem:[#allocation7 + $0x1d5c] sm:$0xf0] }
 0x103   :  { %v13188_v50 = vld [vmem:[#allocation7 + $0x1f40] sm:$0xf]  ;;  %v12933_v57 = vor.u32 %v14478_v49, %v12932_v3  ;;  %6707 = vmatpush.bf16.msrb.mxu1 %v12677_v54 }
 0x104   :  { %v14542_v51 = vld [vmem:[#allocation7 + $0x1f5c] sm:$0xf0] }
 0x105   :  { %v12388_v55 = vld [vmem:[#allocation7 + $0x1900] sm:$0xf]  ;;  %v13189_v58 = vor.u32 %v14542_v51, %v13188_v50  ;;  %6720 = vmatpush.bf16.msrb.mxu2 %v12933_v57 }
 0x106   :  { %v14342_v56 = vld [vmem:[#allocation7 + $0x191c] sm:$0xf0] }
 0x107   :  { %v12644_v59 = vld [vmem:[#allocation7 + $0x1b00] sm:$0xf]  ;;  %v12389_v0 = vor.u32 %v14342_v56, %v12388_v55  ;;  %6733 = vmatpush.bf16.msrb.mxu3 %v13189_v58 }
 0x108   :  { %v14406_v60 = vld [vmem:[#allocation7 + $0x1b1c] sm:$0xf0] }
 0x109   :  { %v12900_v61 = vld [vmem:[#allocation7 + $0x1d00] sm:$0xf]  ;;  %v12645_v1 = vor.u32 %v14406_v60, %v12644_v59  ;;  %6695 = vmatpush.bf16.msrb.mxu0 %v12389_v0  ;;  %v13722_v0 = vld [vmem:[#allocation7 + $0x5c4] sm:$0xf] }
 0x10a   :  { %v14470_v62 = vld [vmem:[#allocation7 + $0x1d1c] sm:$0xf0] }
 0x10b   :  { %v13156_v9 = vld [vmem:[#allocation7 + $0x1f00] sm:$0xf]  ;;  %v12901_v5 = vor.u32 %v14470_v62, %v12900_v61  ;;  %6708 = vmatpush.bf16.msrb.mxu1 %v12645_v1  ;;  %v13594_v61 = vld [vmem:[#allocation7 + $0x1c4] sm:$0xf] }
 0x10c   :  { %v14534_v63 = vld [vmem:[#allocation7 + $0x1f1c] sm:$0xf0]  ;;  %v9414_v62 = vld [vmem:[#allocation7 + $0x1e0] sm:$0xf0] }
 0x10d   :  { %v12356_v2 = vld [vmem:[#allocation7 + $0x18c0] sm:$0xf]  ;;  %v13157_v6 = vor.u32 %v14534_v63, %v13156_v9  ;;  %6721 = vmatpush.bf16.msrb.mxu2 %v12901_v5  ;;  %v13658_v9 = vld [vmem:[#allocation7 + $0x3c4] sm:$0xf] }
 0x10e   :  { %v14334_v4 = vld [vmem:[#allocation7 + $0x18dc] sm:$0xf0]  ;;  %v9670_v63 = vld [vmem:[#allocation7 + $0x3e0] sm:$0xf0] }
 0x10f   :  { %v12612_v7 = vld [vmem:[#allocation7 + $0x1ac0] sm:$0xf]  ;;  %v12357_v15 = vor.u32 %v14334_v4, %v12356_v2  ;;  %6734 = vmatpush.bf16.msrb.mxu3 %v13157_v6  ;;  %v9926_v1 = vld [vmem:[#allocation7 + $0x5e0] sm:$0xf0] }
 0x110   :  { %v14398_v32 = vld [vmem:[#allocation7 + $0x1adc] sm:$0xf0]  ;;  %v13786_v2 = vld [vmem:[#allocation7 + $0x7c4] sm:$0xf] }
 0x111   :  { %v12868_v8 = vld [vmem:[#allocation7 + $0x1cc0] sm:$0xf]  ;;  %v12613_v16 = vor.u32 %v14398_v32, %v12612_v7  ;;  %6696 = vmatpush.bf16.msrb.mxu0 %v12357_v15  ;;  %v10182_v4 = vld [vmem:[#allocation7 + $0x7e0] sm:$0xf0]  ;;  %v9417_v15 = vor.u32 %v13594_v61, %v9414_v62 }
 0x112   :  { %v14462_v12 = vld [vmem:[#allocation7 + $0x1cdc] sm:$0xf0]  ;;  %v338_v7 = vld.sshfl [vmem:[#allocation1 + $0x20] sm:$0xff pattern:$0x73625140] }
 0x113   :  { %v13124_v13 = vld [vmem:[#allocation7 + $0x1ec0] sm:$0xf]  ;;  %v12869_v21 = vor.u32 %v14462_v12, %v12868_v8  ;;  %6709 = vmatpush.bf16.msrb.mxu1 %v12613_v16  ;;  %v340_v32 = vld.sshfl [vmem:[#allocation1 + $0x30] sm:$0xff pattern:$0x73625140]  ;;  %v9673_v16 = vor.u32 %v13658_v9, %v9670_v63 }
 0x114   :  { %v14526_v14 = vld [vmem:[#allocation7 + $0x1edc] sm:$0xf0]  ;;  %v13698_v61 = vld [vmem:[#allocation7 + $0x504] sm:$0xf] }
 0x115   :  { %v12324_v19 = vld [vmem:[#allocation7 + $0x1880] sm:$0xf]  ;;  %v13125_v25 = vor.u32 %v14526_v14, %v13124_v13  ;;  %6722 = vmatpush.bf16.msrb.mxu2 %v12869_v21  ;;  %v341_v14 = vld.sshfl [vmem:[#allocation1 + $0x38] sm:$0xff pattern:$0x73625140]  ;;  %v9929_v21 = vor.u32 %v13722_v0, %v9926_v1 }
 0x116   :  { %v14326_v20 = vld [vmem:[#allocation7 + $0x189c] sm:$0xf0]  ;;  %v9830_v62 = vld [vmem:[#allocation7 + $0x520] sm:$0xf0] }
 0x117   :  { %v12580_v26 = vld [vmem:[#allocation7 + $0x1a80] sm:$0xf]  ;;  %v12325_v35 = vor.u32 %v14326_v20, %v12324_v19  ;;  %6735 = vmatpush.bf16.msrb.mxu3 %v13125_v25  ;;  %v13586_v19 = vld [vmem:[#allocation7 + $0x184] sm:$0xf]  ;;  %v10185_v25 = vor.u32 %v13786_v2, %v10182_v4 }
 0x118   :  { %v14390_v27 = vld [vmem:[#allocation7 + $0x1a9c] sm:$0xf0]  ;;  %v9382_v20 = vld [vmem:[#allocation7 + $0x1a0] sm:$0xf0] }
 0x119   :  { %v12836_v30 = vld [vmem:[#allocation7 + $0x1c80] sm:$0xf]  ;;  %v12581_v53 = vor.u32 %v14390_v27, %v12580_v26  ;;  %6697 = vmatpush.bf16.msrb.mxu0 %v12325_v35  ;;  %v13650_v26 = vld [vmem:[#allocation7 + $0x384] sm:$0xf] }
 0x11a   :  { %v14454_v31 = vld [vmem:[#allocation7 + $0x1c9c] sm:$0xf0]  ;;  %v9638_v27 = vld [vmem:[#allocation7 + $0x3a0] sm:$0xf0] }
 0x11b   :  { %v13092_v33 = vld [vmem:[#allocation7 + $0x1e80] sm:$0xf]  ;;  %v12837_v42 = vor.u32 %v14454_v31, %v12836_v30  ;;  %6710 = vmatpush.bf16.msrb.mxu1 %v12581_v53  ;;  %v13714_v30 = vld [vmem:[#allocation7 + $0x584] sm:$0xf]  ;;  %v15191_v31 = vpack.c.bf16 %v338_v7, %v338_v7 }
 0x11c   :  { %v14518_v34 = vld [vmem:[#allocation7 + $0x1e9c] sm:$0xf0]  ;;  %v13778_v35 = vld [vmem:[#allocation7 + $0x784] sm:$0xf] }
 0x11d   :  { %v12292_v38 = vld [vmem:[#allocation7 + $0x1840] sm:$0xf]  ;;  %v13093_v43 = vor.u32 %v14518_v34, %v13092_v33  ;;  %6723 = vmatpush.bf16.msrb.mxu2 %v12837_v42  ;;  %v15193_v33 = vpack.c.bf16 %v340_v32, %v340_v32  ;;  %v9894_v34 = vld [vmem:[#allocation7 + $0x5a0] sm:$0xf0]  ;;  %v9385_v42 = vor.u32 %v13586_v19, %v9382_v20 }
 0x11e   :  { %v14318_v39 = vld [vmem:[#allocation7 + $0x185c] sm:$0xf0]  ;;  %v10150_v53 = vld [vmem:[#allocation7 + $0x7a0] sm:$0xf0] }
 0x11f   :  { %v12548_v24 = vld [vmem:[#allocation7 + $0x1a40] sm:$0xf]  ;;  %v12293_v52 = vor.u32 %v14318_v39, %v12292_v38  ;;  %6736 = vmatpush.bf16.msrb.mxu3 %v13093_v43  ;;  %v15197_v39 = vpack.c.bf16 %v341_v14, %v341_v14  ;;  %v9641_v43 = vor.u32 %v13650_v26, %v9638_v27  ;;  %v13762_v9 = vld [vmem:[#allocation7 + $0x704] sm:$0xf] }
 0x120   :  { %v14382_v44 = vld [vmem:[#allocation7 + $0x1a5c] sm:$0xf0]  ;;  %v10086_v63 = vld [vmem:[#allocation7 + $0x720] sm:$0xf0] }
 0x121   :  { %v12804_v45 = vld [vmem:[#allocation7 + $0x1c40] sm:$0xf]  ;;  %v12549_v54 = vor.u32 %v14382_v44, %v12548_v24  ;;  %6698 = vmatpush.bf16.msrb.mxu0 %v12293_v52  ;;  %v13578_v24 = vld [vmem:[#allocation7 + $0x144] sm:$0xf] }
 0x122   :  { %v14446_v46 = vld [vmem:[#allocation7 + $0x1c5c] sm:$0xf0]  ;;  %v9350_v44 = vld [vmem:[#allocation7 + $0x160] sm:$0xf0] }
 0x123   :  { %v13060_v47 = vld [vmem:[#allocation7 + $0x1e40] sm:$0xf]  ;;  %v12805_v58 = vor.u32 %v14446_v46, %v12804_v45  ;;  %6711 = vmatpush.bf16.msrb.mxu1 %v12549_v54  ;;  %v9897_v45 = vor.u32 %v13714_v30, %v9894_v34  ;;  %v10153_v46 = vor.u32 %v13778_v35, %v10150_v53  ;;  %v9353_v52 = vor.u32 %v13578_v24, %v9350_v44  ;;  %v13562_v2 = vld [vmem:[#allocation7 + $0xc4] sm:$0xf] }
 0x124   :  { %v14510_v48 = vld [vmem:[#allocation7 + $0x1e5c] sm:$0xf0]  ;;  %v9286_v4 = vld [vmem:[#allocation7 + $0xe0] sm:$0xf0] }
 0x125   :  { %v12260_v3 = vld [vmem:[#allocation7 + $0x1800] sm:$0xf]  ;;  %v13061_v59 = vor.u32 %v14510_v48, %v13060_v47  ;;  %6724 = vmatpush.bf16.msrb.mxu2 %v12805_v58  ;;  %v13642_v47 = vld [vmem:[#allocation7 + $0x344] sm:$0xf] }
 0x126   :  { %v14310_v49 = vld [vmem:[#allocation7 + $0x181c] sm:$0xf0]  ;;  %v9606_v48 = vld [vmem:[#allocation7 + $0x360] sm:$0xf0] }
 0x127   :  { %v12516_v50 = vld [vmem:[#allocation7 + $0x1a00] sm:$0xf]  ;;  %v12261_v5 = vor.u32 %v14310_v49, %v12260_v3  ;;  %6737 = vmatpush.bf16.msrb.mxu3 %v13061_v59  ;;  %v13706_v3 = vld [vmem:[#allocation7 + $0x544] sm:$0xf]  ;;  %v9609_v54 = vor.u32 %v13642_v47, %v9606_v48 }
 0x128   :  { %v14374_v51 = vld [vmem:[#allocation7 + $0x1a1c] sm:$0xf0]  ;;  %v9862_v49 = vld [vmem:[#allocation7 + $0x560] sm:$0xf0] }
 0x129   :  { %v12772_v55 = vld [vmem:[#allocation7 + $0x1c00] sm:$0xf]  ;;  %v12517_v6 = vor.u32 %v14374_v51, %v12516_v50  ;;  %6699 = vmatpush.bf16.msrb.mxu0 %v12261_v5  ;;  %v13770_v50 = vld [vmem:[#allocation7 + $0x744] sm:$0xf]  ;;  %v9833_v5 = vor.u32 %v13698_v61, %v9830_v62 }
 0x12a   :  { %v14438_v56 = vld [vmem:[#allocation7 + $0x1c1c] sm:$0xf0]  ;;  %v10118_v51 = vld [vmem:[#allocation7 + $0x760] sm:$0xf0] }
 0x12b   :  { %v13028_v57 = vld [vmem:[#allocation7 + $0x1e00] sm:$0xf]  ;;  %v12773_v8 = vor.u32 %v14438_v56, %v12772_v55  ;;  %6712 = vmatpush.bf16.msrb.mxu1 %v12517_v6  ;;  %v13570_v55 = vld [vmem:[#allocation7 + $0x104] sm:$0xf]  ;;  %v10121_v58 = vor.u32 %v13770_v50, %v10118_v51  ;;  %v10089_v6 = vor.u32 %v13762_v9, %v10086_v63 }
 0x12c   :  { %v14502_v60 = vld [vmem:[#allocation7 + $0x1e1c] sm:$0xf0]  ;;  %6700 = vmatmul.bf16.vlgmr.msrb.gmra.mxu0 %v15191_v31  ;;  %v9318_v56 = vld [vmem:[#allocation7 + $0x120] sm:$0xf0] }
 0x12d   :  { %v13029_v12 = vor.u32 %v14502_v60, %v13028_v57  ;;  %v339_v13 = vld.sshfl [vmem:[#allocation1 + $0x28] sm:$0xff pattern:$0x73625140]  ;;  %6725 = vmatpush.bf16.msrb.mxu2 %v12773_v8  ;;  %6744 = vmatpush.bf16.msra.mxu0 %v9417_v15  ;;  %v9865_v57 = vor.u32 %v13706_v3, %v9862_v49  ;;  %v9321_v0 = vor.u32 %v13570_v55, %v9318_v56 }
 0x12e   :  { %v15195_v38 = vpack.c.bf16 %v339_v13, %v339_v13  ;;  %v13634_v59 = vld [vmem:[#allocation7 + $0x304] sm:$0xf]  ;;  %v9289_v15 = vor.u32 %v13562_v2, %v9286_v4 }
 0x12f   :  { %6738 = vmatpush.bf16.msrb.mxu3 %v13029_v12  ;;  %6757 = vmatpush.bf16.msra.mxu1 %v9673_v16  ;;  %v9574_v60 = vld [vmem:[#allocation7 + $0x320] sm:$0xf0] }
 0x130   :  { %6726 = vmatmul.bf16.vlgmr.msrb.gmra.mxu2 %v15193_v33  ;;  %6713 = vmatmul.bf16.vlgmr.msrb.gmra.mxu1 %v15195_v38  ;;  %v9577_v1 = vor.u32 %v13634_v59, %v9574_v60  ;;  %v13626_v7 = vld [vmem:[#allocation7 + $0x2c4] sm:$0xf] }
 0x131   :  { %6770 = vmatpush.bf16.msra.mxu2 %v9929_v21  ;;  %6745 = vmatpush.bf16.msra.mxu0 %v9385_v42  ;;  %v9542_v32 = vld [vmem:[#allocation7 + $0x2e0] sm:$0xf0] }
 0x132   :  { %6739 = vmatmul.bf16.vlgmr.msrb.gmra.mxu3 %v15197_v39  ;;  %v13690_v8 = vld [vmem:[#allocation7 + $0x4c4] sm:$0xf]  ;;  %v9545_v16 = vor.u32 %v13626_v7, %v9542_v32 }
 0x133   :  { %6783 = vmatpush.bf16.msra.mxu3 %v10185_v25  ;;  %6758 = vmatpush.bf16.msra.mxu1 %v9641_v43  ;;  %v9798_v12 = vld [vmem:[#allocation7 + $0x4e0] sm:$0xf0] }
 0x134   :  { %v13754_v13 = vld [vmem:[#allocation7 + $0x6c4] sm:$0xf]  ;;  %v9801_v21 = vor.u32 %v13690_v8, %v9798_v12 }
 0x135   :  { %6771 = vmatpush.bf16.msra.mxu2 %v9897_v45  ;;  %6746 = vmatpush.bf16.msra.mxu0 %v9353_v52  ;;  %v10054_v14 = vld [vmem:[#allocation7 + $0x6e0] sm:$0xf0] }
 0x136   :  { %v13554_v19 = vld [vmem:[#allocation7 + $0x84] sm:$0xf]  ;;  %v10057_v25 = vor.u32 %v13754_v13, %v10054_v14 }
 0x137   :  { %6784 = vmatpush.bf16.msra.mxu3 %v10153_v46  ;;  %6759 = vmatpush.bf16.msra.mxu1 %v9609_v54  ;;  %v9254_v20 = vld [vmem:[#allocation7 + $0xa0] sm:$0xf0] }
 0x138   :  { %v13618_v26 = vld [vmem:[#allocation7 + $0x284] sm:$0xf]  ;;  %v9257_v42 = vor.u32 %v13554_v19, %v9254_v20 }
 0x139   :  { %6772 = vmatpush.bf16.msra.mxu2 %v9865_v57  ;;  %6747 = vmatpush.bf16.msra.mxu0 %v9321_v0  ;;  %v9510_v27 = vld [vmem:[#allocation7 + $0x2a0] sm:$0xf0] }
 0x13a   :  { %v13682_v30 = vld [vmem:[#allocation7 + $0x484] sm:$0xf]  ;;  %v9513_v43 = vor.u32 %v13618_v26, %v9510_v27 }
 0x13b   :  { %6785 = vmatpush.bf16.msra.mxu3 %v10121_v58  ;;  %6760 = vmatpush.bf16.msra.mxu1 %v9577_v1  ;;  %v9766_v34 = vld [vmem:[#allocation7 + $0x4a0] sm:$0xf0] }
 0x13c   :  { %v13746_v35 = vld [vmem:[#allocation7 + $0x684] sm:$0xf]  ;;  %v9769_v45 = vor.u32 %v13682_v30, %v9766_v34 }
 0x13d   :  { %6773 = vmatpush.bf16.msra.mxu2 %v9833_v5  ;;  %v10022_v53 = vld [vmem:[#allocation7 + $0x6a0] sm:$0xf0]  ;;  %6748 = vmatpush.bf16.msra.mxu0 %v9289_v15 }
 0x13e   :  { %v13546_v24 = vld [vmem:[#allocation7 + $0x44] sm:$0xf]  ;;  %v10025_v46 = vor.u32 %v13746_v35, %v10022_v53 }
 0x13f   :  { %6786 = vmatpush.bf16.msra.mxu3 %v10089_v6  ;;  %6761 = vmatpush.bf16.msra.mxu1 %v9545_v16  ;;  %v9222_v44 = vld [vmem:[#allocation7 + $0x60] sm:$0xf0] }
 0x140   :  { %v13610_v47 = vld [vmem:[#allocation7 + $0x244] sm:$0xf]  ;;  %v9225_v54 = vor.u32 %v13546_v24, %v9222_v44 }
 0x141   :  { %6774 = vmatpush.bf16.msra.mxu2 %v9801_v21  ;;  %v9478_v48 = vld [vmem:[#allocation7 + $0x260] sm:$0xf0]  ;;  %6749 = vmatpush.bf16.msra.mxu0 %v9257_v42 }
 0x142   :  { %v13674_v3 = vld [vmem:[#allocation7 + $0x444] sm:$0xf]  ;;  %v9481_v55 = vor.u32 %v13610_v47, %v9478_v48 }
 0x143   :  { %6787 = vmatpush.bf16.msra.mxu3 %v10057_v25  ;;  %v9734_v49 = vld [vmem:[#allocation7 + $0x460] sm:$0xf0]  ;;  %6762 = vmatpush.bf16.msra.mxu1 %v9513_v43 }
 0x144   :  { %v13738_v50 = vld [vmem:[#allocation7 + $0x644] sm:$0xf]  ;;  %v9737_v59 = vor.u32 %v13674_v3, %v9734_v49 }
 0x145   :  { %v9990_v51 = vld [vmem:[#allocation7 + $0x660] sm:$0xf0]  ;;  %6775 = vmatpush.bf16.msra.mxu2 %v9769_v45  ;;  %6750 = vmatpush.bf16.msra.mxu0 %v9225_v54 }
 0x146   :  { %v13538_v52 = vld [vmem:[#allocation7 + $0x4] sm:$0xf]  ;;  %v9993_v60 = vor.u32 %v13738_v50, %v9990_v51 }
 0x147   :  { %v9190_v56 = vld [vmem:[#allocation7 + $0x20] sm:$0xf0]  ;;  %6788 = vmatpush.bf16.msra.mxu3 %v10025_v46  ;;  %6763 = vmatpush.bf16.msra.mxu1 %v9481_v55 }
 0x148   :  { %v13602_v57 = vld [vmem:[#allocation7 + $0x204] sm:$0xf]  ;;  %v9193_v6 = vor.u32 %v13538_v52, %v9190_v56 }
 0x149   :  { %v9446_v58 = vld [vmem:[#allocation7 + $0x220] sm:$0xf0]  ;;  %6776 = vmatpush.bf16.msra.mxu2 %v9737_v59 }
 0x14a   :  { %v13666_v61 = vld [vmem:[#allocation7 + $0x404] sm:$0xf]  ;;  %v9449_v7 = vor.u32 %v13602_v57, %v9446_v58  ;;  %6751 = vmatpush.bf16.msra.mxu0 %v9193_v6 }
 0x14b   :  { %v9702_v62 = vld [vmem:[#allocation7 + $0x420] sm:$0xf0]  ;;  %6789 = vmatpush.bf16.msra.mxu3 %v9993_v60 }
 0x14c   :  { %v13730_v9 = vld [vmem:[#allocation7 + $0x604] sm:$0xf]  ;;  %v9705_v13 = vor.u32 %v13666_v61, %v9702_v62  ;;  %6764 = vmatpush.bf16.msra.mxu1 %v9449_v7 }
 0x14d   :  { %v9958_v63 = vld [vmem:[#allocation7 + $0x620] sm:$0xf0]  ;;  %6752 = vmatmul.bf16.vlgmr.msra.gmra.mxu0 %v15134_v10 }
 0x14e   :  { %v13850_v0 = vld [vmem:[#allocation7 + $0x9c4] sm:$0xf]  ;;  %v9961_v14 = vor.u32 %v13730_v9, %v9958_v63  ;;  %6777 = vmatpush.bf16.msra.mxu2 %v9705_v13 }
 0x14f   :  { %v10438_v1 = vld [vmem:[#allocation7 + $0x9e0] sm:$0xf0]  ;;  %6765 = vmatmul.bf16.vlgmr.msra.gmra.mxu1 %v15143_v18 }
 0x150   :  { %v13914_v2 = vld [vmem:[#allocation7 + $0xbc4] sm:$0xf]  ;;  %v10441_v15 = vor.u32 %v13850_v0, %v10438_v1  ;;  %6790 = vmatpush.bf16.msra.mxu3 %v9961_v14 }
 0x151   :  { %v10694_v4 = vld [vmem:[#allocation7 + $0xbe0] sm:$0xf0]  ;;  %6778 = vmatmul.bf16.vlgmr.msra.gmra.mxu2 %v15136_v11 }
 0x152   :  { %v13978_v5 = vld [vmem:[#allocation7 + $0xdc4] sm:$0xf]  ;;  %v10697_v16 = vor.u32 %v13914_v2, %v10694_v4  ;;  %6796 = vmatpush.bf16.msrb.mxu0 %v10441_v15 }
 0x153   :  { %v10950_v32 = vld [vmem:[#allocation7 + $0xde0] sm:$0xf0]  ;;  %6791 = vmatmul.bf16.vlgmr.msra.gmra.mxu3 %v15141_v17 }
 0x154   :  { %v14042_v8 = vld [vmem:[#allocation7 + $0xfc4] sm:$0xf]  ;;  %v10953_v21 = vor.u32 %v13978_v5, %v10950_v32  ;;  %6809 = vmatpush.bf16.msrb.mxu1 %v10697_v16 }
 0x155   :  { %v11206_v12 = vld [vmem:[#allocation7 + $0xfe0] sm:$0xf0] }
 0x156   :  { %v13842_v19 = vld [vmem:[#allocation7 + $0x984] sm:$0xf]  ;;  %v11209_v25 = vor.u32 %v14042_v8, %v11206_v12  ;;  %6822 = vmatpush.bf16.msrb.mxu2 %v10953_v21 }
 0x157   :  { %v10406_v20 = vld [vmem:[#allocation7 + $0x9a0] sm:$0xf0] }
 0x158   :  { %v13906_v26 = vld [vmem:[#allocation7 + $0xb84] sm:$0xf]  ;;  %v10409_v42 = vor.u32 %v13842_v19, %v10406_v20  ;;  %6835 = vmatpush.bf16.msrb.mxu3 %v11209_v25 }
 0x159   :  { %v10662_v27 = vld [vmem:[#allocation7 + $0xba0] sm:$0xf0] }
 0x15a   :  { %v13970_v30 = vld [vmem:[#allocation7 + $0xd84] sm:$0xf]  ;;  %v10665_v43 = vor.u32 %v13906_v26, %v10662_v27  ;;  %6797 = vmatpush.bf16.msrb.mxu0 %v10409_v42 }
 0x15b   :  { %v10918_v34 = vld [vmem:[#allocation7 + $0xda0] sm:$0xf0] }
 0x15c   :  { %v14034_v35 = vld [vmem:[#allocation7 + $0xf84] sm:$0xf]  ;;  %v10921_v45 = vor.u32 %v13970_v30, %v10918_v34  ;;  %6810 = vmatpush.bf16.msrb.mxu1 %v10665_v43 }
 0x15d   :  { %v11174_v53 = vld [vmem:[#allocation7 + $0xfa0] sm:$0xf0] }
 0x15e   :  { %v13834_v24 = vld [vmem:[#allocation7 + $0x944] sm:$0xf]  ;;  %v11177_v46 = vor.u32 %v14034_v35, %v11174_v53  ;;  %6823 = vmatpush.bf16.msrb.mxu2 %v10921_v45 }
 0x15f   :  { %v10374_v44 = vld [vmem:[#allocation7 + $0x960] sm:$0xf0] }
 0x160   :  { %v13898_v47 = vld [vmem:[#allocation7 + $0xb44] sm:$0xf]  ;;  %v10377_v52 = vor.u32 %v13834_v24, %v10374_v44  ;;  %6836 = vmatpush.bf16.msrb.mxu3 %v11177_v46 }
 0x161   :  { %v10630_v48 = vld [vmem:[#allocation7 + $0xb60] sm:$0xf0] }
 0x162   :  { %v13962_v3 = vld [vmem:[#allocation7 + $0xd44] sm:$0xf]  ;;  %v10633_v54 = vor.u32 %v13898_v47, %v10630_v48  ;;  %6798 = vmatpush.bf16.msrb.mxu0 %v10377_v52 }
 0x163   :  { %v10886_v49 = vld [vmem:[#allocation7 + $0xd60] sm:$0xf0] }
 0x164   :  { %v14026_v50 = vld [vmem:[#allocation7 + $0xf44] sm:$0xf]  ;;  %v10889_v57 = vor.u32 %v13962_v3, %v10886_v49  ;;  %6811 = vmatpush.bf16.msrb.mxu1 %v10633_v54 }
 0x165   :  { %v11142_v51 = vld [vmem:[#allocation7 + $0xf60] sm:$0xf0] }
 0x166   :  { %v13826_v55 = vld [vmem:[#allocation7 + $0x904] sm:$0xf]  ;;  %v11145_v58 = vor.u32 %v14026_v50, %v11142_v51  ;;  %6824 = vmatpush.bf16.msrb.mxu2 %v10889_v57 }
 0x167   :  { %v10342_v56 = vld [vmem:[#allocation7 + $0x920] sm:$0xf0] }
 0x168   :  { %v13890_v59 = vld [vmem:[#allocation7 + $0xb04] sm:$0xf]  ;;  %v10345_v0 = vor.u32 %v13826_v55, %v10342_v56  ;;  %6837 = vmatpush.bf16.msrb.mxu3 %v11145_v58 }
 0x169   :  { %v10598_v60 = vld [vmem:[#allocation7 + $0xb20] sm:$0xf0] }
 0x16a   :  { %v13954_v61 = vld [vmem:[#allocation7 + $0xd04] sm:$0xf]  ;;  %v10601_v1 = vor.u32 %v13890_v59, %v10598_v60  ;;  %6799 = vmatpush.bf16.msrb.mxu0 %v10345_v0 }
 0x16b   :  { %v10854_v62 = vld [vmem:[#allocation7 + $0xd20] sm:$0xf0] }
 0x16c   :  { %v14018_v9 = vld [vmem:[#allocation7 + $0xf04] sm:$0xf]  ;;  %v10857_v5 = vor.u32 %v13954_v61, %v10854_v62  ;;  %6812 = vmatpush.bf16.msrb.mxu1 %v10601_v1 }
 0x16d   :  { %v11110_v63 = vld [vmem:[#allocation7 + $0xf20] sm:$0xf0] }
 0x16e   :  { %v13818_v2 = vld [vmem:[#allocation7 + $0x8c4] sm:$0xf]  ;;  %v11113_v6 = vor.u32 %v14018_v9, %v11110_v63  ;;  %6825 = vmatpush.bf16.msrb.mxu2 %v10857_v5 }
 0x16f   :  { %v10310_v4 = vld [vmem:[#allocation7 + $0x8e0] sm:$0xf0] }
 0x170   :  { %v13882_v7 = vld [vmem:[#allocation7 + $0xac4] sm:$0xf]  ;;  %v10313_v15 = vor.u32 %v13818_v2, %v10310_v4  ;;  %6838 = vmatpush.bf16.msrb.mxu3 %v11113_v6 }
 0x171   :  { %v10566_v32 = vld [vmem:[#allocation7 + $0xae0] sm:$0xf0] }
 0x172   :  { %v13946_v8 = vld [vmem:[#allocation7 + $0xcc4] sm:$0xf]  ;;  %v10569_v16 = vor.u32 %v13882_v7, %v10566_v32  ;;  %6800 = vmatpush.bf16.msrb.mxu0 %v10313_v15 }
 0x173   :  { %v10822_v12 = vld [vmem:[#allocation7 + $0xce0] sm:$0xf0] }
 0x174   :  { %v14010_v13 = vld [vmem:[#allocation7 + $0xec4] sm:$0xf]  ;;  %v10825_v21 = vor.u32 %v13946_v8, %v10822_v12  ;;  %6813 = vmatpush.bf16.msrb.mxu1 %v10569_v16 }
 0x175   :  { %v11078_v14 = vld [vmem:[#allocation7 + $0xee0] sm:$0xf0] }
 0x176   :  { %v13810_v19 = vld [vmem:[#allocation7 + $0x884] sm:$0xf]  ;;  %v11081_v25 = vor.u32 %v14010_v13, %v11078_v14  ;;  %6826 = vmatpush.bf16.msrb.mxu2 %v10825_v21 }
 0x177   :  { %v10278_v20 = vld [vmem:[#allocation7 + $0x8a0] sm:$0xf0] }
 0x178   :  { %v13874_v26 = vld [vmem:[#allocation7 + $0xa84] sm:$0xf]  ;;  %v10281_v42 = vor.u32 %v13810_v19, %v10278_v20  ;;  %6839 = vmatpush.bf16.msrb.mxu3 %v11081_v25 }
 0x179   :  { %v10534_v27 = vld [vmem:[#allocation7 + $0xaa0] sm:$0xf0] }
 0x17a   :  { %v13938_v30 = vld [vmem:[#allocation7 + $0xc84] sm:$0xf]  ;;  %v10537_v43 = vor.u32 %v13874_v26, %v10534_v27  ;;  %6801 = vmatpush.bf16.msrb.mxu0 %v10281_v42 }
 0x17b   :  { %v10790_v34 = vld [vmem:[#allocation7 + $0xca0] sm:$0xf0] }
 0x17c   :  { %v14002_v35 = vld [vmem:[#allocation7 + $0xe84] sm:$0xf]  ;;  %v10793_v45 = vor.u32 %v13938_v30, %v10790_v34  ;;  %6814 = vmatpush.bf16.msrb.mxu1 %v10537_v43 }
 0x17d   :  { %v11046_v53 = vld [vmem:[#allocation7 + $0xea0] sm:$0xf0] }
 0x17e   :  { %v13802_v24 = vld [vmem:[#allocation7 + $0x844] sm:$0xf]  ;;  %v11049_v46 = vor.u32 %v14002_v35, %v11046_v53  ;;  %6827 = vmatpush.bf16.msrb.mxu2 %v10793_v45 }
 0x17f   :  { %v10246_v44 = vld [vmem:[#allocation7 + $0x860] sm:$0xf0] }
 0x180   :  { %v13866_v47 = vld [vmem:[#allocation7 + $0xa44] sm:$0xf]  ;;  %v10249_v54 = vor.u32 %v13802_v24, %v10246_v44  ;;  %6840 = vmatpush.bf16.msrb.mxu3 %v11049_v46 }
 0x181   :  { %v10502_v48 = vld [vmem:[#allocation7 + $0xa60] sm:$0xf0] }
 0x182   :  { %v13930_v3 = vld [vmem:[#allocation7 + $0xc44] sm:$0xf]  ;;  %v10505_v55 = vor.u32 %v13866_v47, %v10502_v48  ;;  %6802 = vmatpush.bf16.msrb.mxu0 %v10249_v54 }
 0x183   :  { %v10758_v49 = vld [vmem:[#allocation7 + $0xc60] sm:$0xf0] }
 0x184   :  { %v13994_v50 = vld [vmem:[#allocation7 + $0xe44] sm:$0xf]  ;;  %v10761_v59 = vor.u32 %v13930_v3, %v10758_v49  ;;  %6815 = vmatpush.bf16.msrb.mxu1 %v10505_v55  ;;  %v6545_v55 = vpop.f32.mrf.mxu0 }
 0x185   :  { %v11014_v51 = vld [vmem:[#allocation7 + $0xe60] sm:$0xf0] }
 0x186   :  { %v13794_v52 = vld [vmem:[#allocation7 + $0x804] sm:$0xf]  ;;  %v11017_v60 = vor.u32 %v13994_v50, %v11014_v51  ;;  %6828 = vmatpush.bf16.msrb.mxu2 %v10761_v59 }
 0x187   :  { %v10214_v56 = vld [vmem:[#allocation7 + $0x820] sm:$0xf0] }
 0x188   :  { %v13858_v57 = vld [vmem:[#allocation7 + $0xa04] sm:$0xf]  ;;  %v10217_v6 = vor.u32 %v13794_v52, %v10214_v56  ;;  %6841 = vmatpush.bf16.msrb.mxu3 %v11017_v60 }
 0x189   :  { %v10470_v58 = vld [vmem:[#allocation7 + $0xa20] sm:$0xf0] }
 0x18a   :  { %v13922_v61 = vld [vmem:[#allocation7 + $0xc04] sm:$0xf]  ;;  %v10473_v7 = vor.u32 %v13858_v57, %v10470_v58  ;;  %6803 = vmatpush.bf16.msrb.mxu0 %v10217_v6  ;;  %v6558_v57 = vpop.f32.mrf.mxu1 }
 0x18b   :  { %v10726_v62 = vld [vmem:[#allocation7 + $0xc20] sm:$0xf0] }
 0x18c   :  { %v13986_v9 = vld [vmem:[#allocation7 + $0xe04] sm:$0xf]  ;;  %v10729_v13 = vor.u32 %v13922_v61, %v10726_v62  ;;  %6816 = vmatpush.bf16.msrb.mxu1 %v10473_v7 }
 0x18d   :  { %v10982_v63 = vld [vmem:[#allocation7 + $0xe20] sm:$0xf0]  ;;  %6804 = vmatmul.bf16.vlgmr.msrb.gmra.mxu0 %v15167_v22 }
 0x18e   :  { %v14106_v0 = vld [vmem:[#allocation7 + $0x11c4] sm:$0xf]  ;;  %v10985_v14 = vor.u32 %v13986_v9, %v10982_v63  ;;  %6829 = vmatpush.bf16.msrb.mxu2 %v10729_v13  ;;  %v6571_v13 = vpop.f32.mrf.mxu2 }
 0x18f   :  { %v11462_v1 = vld [vmem:[#allocation7 + $0x11e0] sm:$0xf0]  ;;  %6817 = vmatmul.bf16.vlgmr.msrb.gmra.mxu1 %v15171_v28 }
 0x190   :  { %v14170_v2 = vld [vmem:[#allocation7 + $0x13c4] sm:$0xf]  ;;  %v11465_v15 = vor.u32 %v14106_v0, %v11462_v1  ;;  %6842 = vmatpush.bf16.msrb.mxu3 %v10985_v14 }
 0x191   :  { %v11718_v4 = vld [vmem:[#allocation7 + $0x13e0] sm:$0xf0]  ;;  %6830 = vmatmul.bf16.vlgmr.msrb.gmra.mxu2 %v15169_v23 }
 0x192   :  { %v14234_v5 = vld [vmem:[#allocation7 + $0x15c4] sm:$0xf]  ;;  %v11721_v16 = vor.u32 %v14170_v2, %v11718_v4  ;;  %6848 = vmatpush.bf16.msra.mxu0 %v11465_v15 }
 0x193   :  { %v11974_v32 = vld [vmem:[#allocation7 + $0x15e0] sm:$0xf0]  ;;  %6843 = vmatmul.bf16.vlgmr.msrb.gmra.mxu3 %v15173_v29 }
 0x194   :  { %v14298_v8 = vld [vmem:[#allocation7 + $0x17c4] sm:$0xf]  ;;  %v11977_v25 = vor.u32 %v14234_v5, %v11974_v32  ;;  %6861 = vmatpush.bf16.msra.mxu1 %v11721_v16 }
 0x195   :  { %v12230_v12 = vld [vmem:[#allocation7 + $0x17e0] sm:$0xf0] }
 0x196   :  { %v15207_v19 = vld [vmem:[#allocation8] sm:$0xff]  ;;  %v12233_v26 = vor.u32 %v14298_v8, %v12230_v12  ;;  %6874 = vmatpush.bf16.msra.mxu2 %v11977_v25 }
 0x197   :  { %v14098_v20 = vld [vmem:[#allocation7 + $0x1184] sm:$0xf]  ;;  %v1400_v43 = vperm.slane %v15207_v19, 0 }
 0x198   :  { %v11430_v21 = vld [vmem:[#allocation7 + $0x11a0] sm:$0xf0]  ;;  %6887 = vmatpush.bf16.msra.mxu3 %v12233_v26  ;;  %v6584_v26 = vpop.f32.mrf.mxu3 }
 0x199   :  { %v14162_v27 = vld [vmem:[#allocation7 + $0x1384] sm:$0xf]  ;;  %v11433_v24 = vor.u32 %v14098_v20, %v11430_v21  ;;  %v6546_v56 = vadd.f32 %v6545_v55, %v1400_v43 }
 0x19a   :  { %v11686_v30 = vld [vmem:[#allocation7 + $0x13a0] sm:$0xf0] }
 0x19b   :  { %v14226_v34 = vld [vmem:[#allocation7 + $0x1584] sm:$0xf]  ;;  %v11689_v44 = vor.u32 %v14162_v27, %v11686_v30  ;;  %6849 = vmatpush.bf16.msra.mxu0 %v11433_v24  ;;  %v6559_v2 = vadd.f32 %v6558_v57, %v6546_v56 }
 0x19c   :  { %v11942_v35 = vld [vmem:[#allocation7 + $0x15a0] sm:$0xf0] }
 0x19d   :  { %v14290_v53 = vld [vmem:[#allocation7 + $0x1784] sm:$0xf]  ;;  %v11945_v47 = vor.u32 %v14226_v34, %v11942_v35  ;;  %6862 = vmatpush.bf16.msra.mxu1 %v11689_v44  ;;  %v6572_v25 = vadd.f32 %v6571_v13, %v6559_v2  ;;  %v6547_v35 = vpop.f32.mrf.mxu0 }
 0x19e   :  { %v12198_v42 = vld [vmem:[#allocation7 + $0x17a0] sm:$0xf0] }
 0x19f   :  { %v14090_v45 = vld [vmem:[#allocation7 + $0x1144] sm:$0xf]  ;;  %v12201_v48 = vor.u32 %v14290_v53, %v12198_v42  ;;  %6875 = vmatpush.bf16.msra.mxu2 %v11945_v47  ;;  %v6585_v53 = vadd.f32 %v6584_v26, %v6572_v25  ;;  %v6560_v42 = vpop.f32.mrf.mxu1 }
 0x1a0   :  { %v11398_v46 = vld [vmem:[#allocation7 + $0x1160] sm:$0xf0] }
 0x1a1   :  { %v14154_v3 = vld [vmem:[#allocation7 + $0x1344] sm:$0xf]  ;;  %v11401_v58 = vor.u32 %v14090_v45, %v11398_v46  ;;  %6888 = vmatpush.bf16.msra.mxu3 %v12201_v48 }
 0x1a2   :  { %v11654_v49 = vld [vmem:[#allocation7 + $0x1360] sm:$0xf0] }
 0x1a3   :  { %v14218_v50 = vld [vmem:[#allocation7 + $0x1544] sm:$0xf]  ;;  %v11657_v59 = vor.u32 %v14154_v3, %v11654_v49  ;;  %6850 = vmatpush.bf16.msra.mxu0 %v11401_v58  ;;  %v6573_v58 = vpop.f32.mrf.mxu2 }
 0x1a4   :  { %v11910_v51 = vld [vmem:[#allocation7 + $0x1560] sm:$0xf0] }
 0x1a5   :  { %v14282_v52 = vld [vmem:[#allocation7 + $0x1744] sm:$0xf]  ;;  %v11913_v62 = vor.u32 %v14218_v50, %v11910_v51  ;;  %6863 = vmatpush.bf16.msra.mxu1 %v11657_v59 }
 0x1a6   :  { %v12166_v54 = vld [vmem:[#allocation7 + $0x1760] sm:$0xf0] }
 0x1a7   :  { %v14082_v60 = vld [vmem:[#allocation7 + $0x1104] sm:$0xf]  ;;  %v12169_v9 = vor.u32 %v14282_v52, %v12166_v54  ;;  %6876 = vmatpush.bf16.msra.mxu2 %v11913_v62 }
 0x1a8   :  { %v11366_v61 = vld [vmem:[#allocation7 + $0x1120] sm:$0xf0] }
 0x1a9   :  { %v14146_v63 = vld [vmem:[#allocation7 + $0x1304] sm:$0xf]  ;;  %v11369_v7 = vor.u32 %v14082_v60, %v11366_v61  ;;  %6889 = vmatpush.bf16.msra.mxu3 %v12169_v9 }
 0x1aa   :  { %v11622_v0 = vld [vmem:[#allocation7 + $0x1320] sm:$0xf0] }
 0x1ab   :  { %v14210_v1 = vld [vmem:[#allocation7 + $0x1504] sm:$0xf]  ;;  %v11625_v32 = vor.u32 %v14146_v63, %v11622_v0  ;;  %6851 = vmatpush.bf16.msra.mxu0 %v11369_v7  ;;  %v6586_v63 = vpop.f32.mrf.mxu3  ;;  %v6610_v7 = vpop.f32.mrf.mxu1 }
 0x1ac   :  { %v11878_v4 = vld [vmem:[#allocation7 + $0x1520] sm:$0xf0] }
 0x1ad   :  { %v14274_v5 = vld [vmem:[#allocation7 + $0x1704] sm:$0xf]  ;;  %v11881_v14 = vor.u32 %v14210_v1, %v11878_v4  ;;  %6864 = vmatpush.bf16.msra.mxu1 %v11625_v32  ;;  %v6597_v4 = vpop.f32.mrf.mxu0 }
 0x1ae   :  { %v12134_v6 = vld [vmem:[#allocation7 + $0x1720] sm:$0xf0] }
 0x1af   :  { %v14074_v8 = vld [vmem:[#allocation7 + $0x10c4] sm:$0xf]  ;;  %v12137_v15 = vor.u32 %v14274_v5, %v12134_v6  ;;  %6877 = vmatpush.bf16.msra.mxu2 %v11881_v14  ;;  %v6598_v6 = vadd.f32 %v6597_v4, %v6585_v53 }
 0x1b0   :  { %v11334_v12 = vld [vmem:[#allocation7 + $0x10e0] sm:$0xf0] }
 0x1b1   :  { %v14138_v16 = vld [vmem:[#allocation7 + $0x12c4] sm:$0xf]  ;;  %v11337_v43 = vor.u32 %v14074_v8, %v11334_v12  ;;  %6890 = vmatpush.bf16.msra.mxu3 %v12137_v15  ;;  %v6611_v26 = vadd.f32 %v6610_v7, %v6598_v6 }
 0x1b2   :  { %v11590_v20 = vld [vmem:[#allocation7 + $0x12e0] sm:$0xf0] }
 0x1b3   :  { %v14202_v21 = vld [vmem:[#allocation7 + $0x14c4] sm:$0xf]  ;;  %v11593_v24 = vor.u32 %v14138_v16, %v11590_v20  ;;  %6852 = vmatpush.bf16.msra.mxu0 %v11337_v43 }
 0x1b4   :  { %v11846_v27 = vld [vmem:[#allocation7 + $0x14e0] sm:$0xf0] }
 0x1b5   :  { %v14266_v30 = vld [vmem:[#allocation7 + $0x16c4] sm:$0xf]  ;;  %v11849_v46 = vor.u32 %v14202_v21, %v11846_v27  ;;  %6865 = vmatpush.bf16.msra.mxu1 %v11593_v24  ;;  %v6599_v58 = vpop.f32.mrf.mxu0 }
 0x1b6   :  { %v12102_v34 = vld [vmem:[#allocation7 + $0x16e0] sm:$0xf0] }
 0x1b7   :  { %v14066_v44 = vld [vmem:[#allocation7 + $0x1084] sm:$0xf]  ;;  %v12105_v47 = vor.u32 %v14266_v30, %v12102_v34  ;;  %6878 = vmatpush.bf16.msra.mxu2 %v11849_v46 }
 0x1b8   :  { %v11302_v45 = vld [vmem:[#allocation7 + $0x10a0] sm:$0xf0] }
 0x1b9   :  { %v14130_v48 = vld [vmem:[#allocation7 + $0x1284] sm:$0xf]  ;;  %v11305_v54 = vor.u32 %v14066_v44, %v11302_v45  ;;  %6891 = vmatpush.bf16.msra.mxu3 %v12105_v47  ;;  %v6623_v47 = vpop.f32.mrf.mxu2 }
 0x1ba   :  { %v11558_v3 = vld [vmem:[#allocation7 + $0x12a0] sm:$0xf0] }
 0x1bb   :  { %v14194_v49 = vld [vmem:[#allocation7 + $0x1484] sm:$0xf]  ;;  %v11561_v55 = vor.u32 %v14130_v48, %v11558_v3  ;;  %6853 = vmatpush.bf16.msra.mxu0 %v11305_v54 }
 0x1bc   :  { %v11814_v50 = vld [vmem:[#allocation7 + $0x14a0] sm:$0xf0] }
 0x1bd   :  { %v14258_v51 = vld [vmem:[#allocation7 + $0x1684] sm:$0xf]  ;;  %v11817_v59 = vor.u32 %v14194_v49, %v11814_v50  ;;  %6866 = vmatpush.bf16.msra.mxu1 %v11561_v55  ;;  %v6624_v49 = vadd.f32 %v6623_v47, %v6611_v26  ;;  %v6636_v50 = vpop.f32.mrf.mxu3 }
 0x1be   :  { %v12070_v52 = vld [vmem:[#allocation7 + $0x16a0] sm:$0xf0] }
 0x1bf   :  { %v14058_v56 = vld [vmem:[#allocation7 + $0x1044] sm:$0xf]  ;;  %v12073_v60 = vor.u32 %v14258_v51, %v12070_v52  ;;  %6879 = vmatpush.bf16.msra.mxu2 %v11817_v59 }
 0x1c0   :  { %v11270_v57 = vld [vmem:[#allocation7 + $0x1060] sm:$0xf0] }
 0x1c1   :  { %v14122_v61 = vld [vmem:[#allocation7 + $0x1244] sm:$0xf]  ;;  %v11273_v32 = vor.u32 %v14058_v56, %v11270_v57  ;;  %6892 = vmatpush.bf16.msra.mxu3 %v12073_v60 }
 0x1c2   :  { %v11526_v62 = vld [vmem:[#allocation7 + $0x1260] sm:$0xf0] }
 0x1c3   :  { %v14186_v9 = vld [vmem:[#allocation7 + $0x1444] sm:$0xf]  ;;  %v11529_v8 = vor.u32 %v14122_v61, %v11526_v62  ;;  %6854 = vmatpush.bf16.msra.mxu0 %v11273_v32  ;;  %v6637_v62 = vadd.f32 %v6636_v50, %v6624_v49 }
 0x1c4   :  { %v11782_v0 = vld [vmem:[#allocation7 + $0x1460] sm:$0xf0] }
 0x1c5   :  { %v14250_v1 = vld [vmem:[#allocation7 + $0x1644] sm:$0xf]  ;;  %v11785_v15 = vor.u32 %v14186_v9, %v11782_v0  ;;  %6867 = vmatpush.bf16.msra.mxu1 %v11529_v8  ;;  %v6638_v26 = vpop.f32.mrf.mxu3 }
 0x1c6   :  { %v12038_v2 = vld [vmem:[#allocation7 + $0x1660] sm:$0xf0] }
 0x1c7   :  { %v14050_v5 = vld [vmem:[#allocation7 + $0x1004] sm:$0xf]  ;;  %v12041_v16 = vor.u32 %v14250_v1, %v12038_v2  ;;  %6880 = vmatpush.bf16.msra.mxu2 %v11785_v15  ;;  %v6612_v1 = vpop.f32.mrf.mxu1 }
 0x1c8   :  { %v11238_v12 = vld [vmem:[#allocation7 + $0x1020] sm:$0xf0] }
 0x1c9   :  { %v14114_v13 = vld [vmem:[#allocation7 + $0x1204] sm:$0xf]  ;;  %v11241_v43 = vor.u32 %v14050_v5, %v11238_v12  ;;  %6893 = vmatpush.bf16.msra.mxu3 %v12041_v16 }
 0x1ca   :  { %v11494_v14 = vld [vmem:[#allocation7 + $0x1220] sm:$0xf0] }
 0x1cb   :  { %v14178_v20 = vld [vmem:[#allocation7 + $0x1404] sm:$0xf]  ;;  %v11497_v24 = vor.u32 %v14114_v13, %v11494_v14  ;;  %6855 = vmatpush.bf16.msra.mxu0 %v11241_v43 }
 0x1cc   :  { %v11750_v21 = vld [vmem:[#allocation7 + $0x1420] sm:$0xf0] }
 0x1cd   :  { %v14242_v25 = vld [vmem:[#allocation7 + $0x1604] sm:$0xf]  ;;  %v11753_v48 = vor.u32 %v14178_v20, %v11750_v21  ;;  %6868 = vmatpush.bf16.msra.mxu1 %v11497_v24  ;;  %v6625_v20 = vpop.f32.mrf.mxu2 }
 0x1ce   :  { %v12006_v27 = vld [vmem:[#allocation7 + $0x1620] sm:$0xf0]  ;;  %6856 = vmatmul.bf16.vlgmr.msra.gmra.mxu0 %v15179_v36 }
 0x1cf   :  { %v14362_v30 = vld [vmem:[#allocation7 + $0x19c4] sm:$0xf]  ;;  %v12009_v3 = vor.u32 %v14242_v25, %v12006_v27  ;;  %6881 = vmatpush.bf16.msra.mxu2 %v11753_v48  ;;  %v6662_v49 = vpop.f32.mrf.mxu1 }
 0x1d0   :  { %v12486_v34 = vld [vmem:[#allocation7 + $0x19e0] sm:$0xf0]  ;;  %6869 = vmatmul.bf16.vlgmr.msra.gmra.mxu1 %v15183_v40 }
 0x1d1   :  { %v14426_v35 = vld [vmem:[#allocation7 + $0x1bc4] sm:$0xf]  ;;  %v12489_v51 = vor.u32 %v14362_v30, %v12486_v34  ;;  %6894 = vmatpush.bf16.msra.mxu3 %v12009_v3 }
 0x1d2   :  { %v12742_v53 = vld [vmem:[#allocation7 + $0x1be0] sm:$0xf0]  ;;  %6882 = vmatmul.bf16.vlgmr.msra.gmra.mxu2 %v15181_v37 }
 0x1d3   :  { %v14490_v42 = vld [vmem:[#allocation7 + $0x1dc4] sm:$0xf]  ;;  %v12745_v52 = vor.u32 %v14426_v35, %v12742_v53  ;;  %6900 = vmatpush.bf16.msrb.mxu0 %v12489_v51 }
 0x1d4   :  { %v12998_v44 = vld [vmem:[#allocation7 + $0x1de0] sm:$0xf0]  ;;  %6895 = vmatmul.bf16.vlgmr.msra.gmra.mxu3 %v15185_v41 }
 0x1d5   :  { %v14554_v45 = vld [vmem:[#allocation7 + $0x1fc4] sm:$0xf]  ;;  %v13001_v56 = vor.u32 %v14490_v42, %v12998_v44  ;;  %6913 = vmatpush.bf16.msrb.mxu1 %v12745_v52 }
 0x1d6   :  { %v13254_v46 = vld [vmem:[#allocation7 + $0x1fe0] sm:$0xf0] }
 0x1d7   :  { %v14354_v54 = vld [vmem:[#allocation7 + $0x1984] sm:$0xf]  ;;  %v13257_v57 = vor.u32 %v14554_v45, %v13254_v46  ;;  %6926 = vmatpush.bf16.msrb.mxu2 %v13001_v56  ;;  %v6649_v46 = vpop.f32.mrf.mxu0 }
 0x1d8   :  { %v12454_v55 = vld [vmem:[#allocation7 + $0x19a0] sm:$0xf0]  ;;  %v6650_v47 = vadd.f32 %v6649_v46, %v6637_v62 }
 0x1d9   :  { %v14418_v59 = vld [vmem:[#allocation7 + $0x1b84] sm:$0xf]  ;;  %v12457_v2 = vor.u32 %v14354_v54, %v12454_v55  ;;  %6939 = vmatpush.bf16.msrb.mxu3 %v13257_v57 }
 0x1da   :  { %v12710_v60 = vld [vmem:[#allocation7 + $0x1ba0] sm:$0xf0]  ;;  %v6663_v58 = vadd.f32 %v6662_v49, %v6650_v47 }
 0x1db   :  { %v14482_v61 = vld [vmem:[#allocation7 + $0x1d84] sm:$0xf]  ;;  %v12713_v4 = vor.u32 %v14418_v59, %v12710_v60  ;;  %6901 = vmatpush.bf16.msrb.mxu0 %v12457_v2 }
 0x1dc   :  { %v12966_v9 = vld [vmem:[#allocation7 + $0x1da0] sm:$0xf0] }
 0x1dd   :  { %v14546_v63 = vld [vmem:[#allocation7 + $0x1f84] sm:$0xf]  ;;  %v12969_v7 = vor.u32 %v14482_v61, %v12966_v9  ;;  %6914 = vmatpush.bf16.msrb.mxu1 %v12713_v4  ;;  %v6675_v4 = vpop.f32.mrf.mxu2 }
 0x1de   :  { %v13222_v0 = vld [vmem:[#allocation7 + $0x1fa0] sm:$0xf0] }
 0x1df   :  { %v14346_v5 = vld [vmem:[#allocation7 + $0x1944] sm:$0xf]  ;;  %v13225_v32 = vor.u32 %v14546_v63, %v13222_v0  ;;  %6927 = vmatpush.bf16.msrb.mxu2 %v12969_v7 }
 0x1e0   :  { %v12422_v6 = vld [vmem:[#allocation7 + $0x1960] sm:$0xf0] }
 0x1e1   :  { %v14410_v8 = vld [vmem:[#allocation7 + $0x1b44] sm:$0xf]  ;;  %v12425_v21 = vor.u32 %v14346_v5, %v12422_v6  ;;  %6940 = vmatpush.bf16.msrb.mxu3 %v13225_v32  ;;  %v6676_v32 = vadd.f32 %v6675_v4, %v6663_v58  ;;  %v9420_v58 = vld [vmem:[#allocation7 + $0x1c8] sm:$0xf] }
 0x1e2   :  { %v12678_v12 = vld [vmem:[#allocation7 + $0x1b60] sm:$0xf0]  ;;  %v13791_v4 = vld [vmem:[#allocation7 + $0x7e4] sm:$0xf0] }
 0x1e3   :  { %v14474_v13 = vld [vmem:[#allocation7 + $0x1d44] sm:$0xf]  ;;  %v12681_v25 = vor.u32 %v14410_v8, %v12678_v12  ;;  %6902 = vmatpush.bf16.msrb.mxu0 %v12425_v21  ;;  %v6688_v8 = vpop.f32.mrf.mxu3 }
 0x1e4   :  { %v12934_v14 = vld [vmem:[#allocation7 + $0x1d60] sm:$0xf0] }
 0x1e5   :  { %v14538_v15 = vld [vmem:[#allocation7 + $0x1f44] sm:$0xf]  ;;  %v12937_v34 = vor.u32 %v14474_v13, %v12934_v14  ;;  %6915 = vmatpush.bf16.msrb.mxu1 %v12681_v25 }
 0x1e6   :  { %v13190_v16 = vld [vmem:[#allocation7 + $0x1f60] sm:$0xf0] }
 0x1e7   :  { %v14338_v27 = vld [vmem:[#allocation7 + $0x1904] sm:$0xf]  ;;  %v13193_v35 = vor.u32 %v14538_v15, %v13190_v16  ;;  %6928 = vmatpush.bf16.msrb.mxu2 %v12937_v34  ;;  %v6651_v15 = vpop.f32.mrf.mxu0  ;;  %v15218_v16 = vadd.f32 %v6688_v8, %v6676_v32  ;;  %v9388_v8 = vld [vmem:[#allocation7 + $0x188] sm:$0xf] }
 0x1e8   :  { %v12390_v30 = vld [vmem:[#allocation7 + $0x1920] sm:$0xf0]  ;;  %v9644_v15 = vld [vmem:[#allocation7 + $0x388] sm:$0xf] }
 0x1e9   :  { %v14402_v53 = vld [vmem:[#allocation7 + $0x1b04] sm:$0xf]  ;;  %v12393_v48 = vor.u32 %v14338_v27, %v12390_v30  ;;  %6941 = vmatpush.bf16.msrb.mxu3 %v13193_v35  ;;  %v6664_v27 = vpop.f32.mrf.mxu1 }
 0x1ea   :  { %v12646_v42 = vld [vmem:[#allocation7 + $0x1b20] sm:$0xf0]  ;;  %v13783_v27 = vld [vmem:[#allocation7 + $0x7a4] sm:$0xf0] }
 0x1eb   :  { %v14466_v43 = vld [vmem:[#allocation7 + $0x1d04] sm:$0xf]  ;;  %v12649_v3 = vor.u32 %v14402_v53, %v12646_v42  ;;  %6903 = vmatpush.bf16.msrb.mxu0 %v12393_v48 }
 0x1ec   :  { %v12902_v24 = vld [vmem:[#allocation7 + $0x1d20] sm:$0xf0] }
 0x1ed   :  { %v14530_v44 = vld [vmem:[#allocation7 + $0x1f04] sm:$0xf]  ;;  %v12905_v52 = vor.u32 %v14466_v43, %v12902_v24  ;;  %6916 = vmatpush.bf16.msrb.mxu1 %v12649_v3 }
 0x1ee   :  { %v13158_v45 = vld [vmem:[#allocation7 + $0x1f20] sm:$0xf0] }
 0x1ef   :  { %v14330_v50 = vld [vmem:[#allocation7 + $0x18c4] sm:$0xf]  ;;  %v13161_v54 = vor.u32 %v14530_v44, %v13158_v45  ;;  %6929 = vmatpush.bf16.msrb.mxu2 %v12905_v52 }
 0x1f0   :  { %v12358_v51 = vld [vmem:[#allocation7 + $0x18e0] sm:$0xf0] }
 0x1f1   :  { %v14394_v55 = vld [vmem:[#allocation7 + $0x1ac4] sm:$0xf]  ;;  %v12361_v9 = vor.u32 %v14330_v50, %v12358_v51  ;;  %6942 = vmatpush.bf16.msrb.mxu3 %v13161_v54 }
 0x1f2   :  { %v12614_v56 = vld [vmem:[#allocation7 + $0x1ae0] sm:$0xf0] }
 0x1f3   :  { %v14458_v57 = vld [vmem:[#allocation7 + $0x1cc4] sm:$0xf]  ;;  %v12617_v62 = vor.u32 %v14394_v55, %v12614_v56  ;;  %6904 = vmatpush.bf16.msrb.mxu0 %v12361_v9  ;;  %v6677_v56 = vpop.f32.mrf.mxu2  ;;  %v13663_v9 = vld [vmem:[#allocation7 + $0x3e4] sm:$0xf0] }
 0x1f4   :  { %v12870_v59 = vld [vmem:[#allocation7 + $0x1ce0] sm:$0xf0]  ;;  %v13639_v56 = vld [vmem:[#allocation7 + $0x324] sm:$0xf0] }
 0x1f5   :  { %v14522_v60 = vld [vmem:[#allocation7 + $0x1ec4] sm:$0xf]  ;;  %v12873_v1 = vor.u32 %v14458_v57, %v12870_v59  ;;  %6917 = vmatpush.bf16.msrb.mxu1 %v12617_v62  ;;  %v13599_v59 = vld [vmem:[#allocation7 + $0x1e4] sm:$0xf0] }
 0x1f6   :  { %v13126_v61 = vld [vmem:[#allocation7 + $0x1ee0] sm:$0xf0]  ;;  %v9932_v62 = vld [vmem:[#allocation7 + $0x5c8] sm:$0xf] }
 0x1f7   :  { %v14322_v63 = vld [vmem:[#allocation7 + $0x1884] sm:$0xf]  ;;  %v13129_v2 = vor.u32 %v14522_v60, %v13126_v61  ;;  %6930 = vmatpush.bf16.msrb.mxu2 %v12873_v1  ;;  %v6690_v60 = vpop.f32.mrf.mxu3  ;;  %v9676_v61 = vld [vmem:[#allocation7 + $0x3c8] sm:$0xf] }
 0x1f8   :  { %v12326_v0 = vld [vmem:[#allocation7 + $0x18a0] sm:$0xf0]  ;;  %v13727_v1 = vld [vmem:[#allocation7 + $0x5e4] sm:$0xf0]  ;;  %v9677_v32 = vor.u32 %v13663_v9, %v9676_v61  ;;  %v6701_v61 = vpop.f32.mrf.mxu0 }
 0x1f9   :  { %v14386_v5 = vld [vmem:[#allocation7 + $0x1a84] sm:$0xf]  ;;  %v12329_v20 = vor.u32 %v14322_v63, %v12326_v0  ;;  %6943 = vmatpush.bf16.msrb.mxu3 %v13129_v2  ;;  %v10188_v2 = vld [vmem:[#allocation7 + $0x7c8] sm:$0xf]  ;;  %v6702_v9 = vadd.f32 %v6701_v61, %v15218_v16 }
 0x1fa   :  { %v12582_v6 = vld [vmem:[#allocation7 + $0x1aa0] sm:$0xf0]  ;;  %v13767_v60 = vld [vmem:[#allocation7 + $0x724] sm:$0xf0] }
 0x1fb   :  { %v14450_v7 = vld [vmem:[#allocation7 + $0x1c84] sm:$0xf]  ;;  %v12585_v21 = vor.u32 %v14386_v5, %v12582_v6  ;;  %6905 = vmatpush.bf16.msrb.mxu0 %v12329_v20  ;;  %v13655_v20 = vld [vmem:[#allocation7 + $0x3a4] sm:$0xf0] }
 0x1fc   :  { %v12838_v12 = vld [vmem:[#allocation7 + $0x1ca0] sm:$0xf0] }
 0x1fd   :  { %v14514_v13 = vld [vmem:[#allocation7 + $0x1e84] sm:$0xf]  ;;  %v12841_v30 = vor.u32 %v14450_v7, %v12838_v12  ;;  %6918 = vmatpush.bf16.msrb.mxu1 %v12585_v21  ;;  %v9421_v7 = vor.u32 %v13599_v59, %v9420_v58  ;;  %v13591_v12 = vld [vmem:[#allocation7 + $0x1a4] sm:$0xf0] }
 0x1fe   :  { %v13094_v14 = vld [vmem:[#allocation7 + $0x1ea0] sm:$0xf0]  ;;  %v9900_v21 = vld [vmem:[#allocation7 + $0x588] sm:$0xf] }
 0x1ff   :  { %v14314_v25 = vld [vmem:[#allocation7 + $0x1844] sm:$0xf]  ;;  %v13097_v34 = vor.u32 %v14514_v13, %v13094_v14  ;;  %6931 = vmatpush.bf16.msrb.mxu2 %v12841_v30  ;;  %v9933_v13 = vor.u32 %v13727_v1, %v9932_v62  ;;  %v10189_v14 = vor.u32 %v13791_v4, %v10188_v2  ;;  %v9389_v30 = vor.u32 %v13591_v12, %v9388_v8  ;;  %v13703_v58 = vld [vmem:[#allocation7 + $0x524] sm:$0xf0] }
 0x200   :  { %v12294_v26 = vld [vmem:[#allocation7 + $0x1860] sm:$0xf0]  ;;  %v10092_v59 = vld [vmem:[#allocation7 + $0x708] sm:$0xf] }
 0x201   :  { %v14378_v35 = vld [vmem:[#allocation7 + $0x1a44] sm:$0xf]  ;;  %v12297_v46 = vor.u32 %v14314_v25, %v12294_v26  ;;  %6944 = vmatpush.bf16.msrb.mxu3 %v13097_v34  ;;  %v13719_v25 = vld [vmem:[#allocation7 + $0x5a4] sm:$0xf0]  ;;  %v9645_v34 = vor.u32 %v13655_v20, %v9644_v15 }
 0x202   :  { %v12550_v53 = vld [vmem:[#allocation7 + $0x1a60] sm:$0xf0]  ;;  %v10156_v26 = vld [vmem:[#allocation7 + $0x788] sm:$0xf] }
 0x203   :  { %v14442_v42 = vld [vmem:[#allocation7 + $0x1c44] sm:$0xf]  ;;  %v12553_v47 = vor.u32 %v14378_v35, %v12550_v53  ;;  %6906 = vmatpush.bf16.msrb.mxu0 %v12297_v46  ;;  %v9356_v35 = vld [vmem:[#allocation7 + $0x148] sm:$0xf] }
 0x204   :  { %v12806_v43 = vld [vmem:[#allocation7 + $0x1c60] sm:$0xf0]  ;;  %v13583_v53 = vld [vmem:[#allocation7 + $0x164] sm:$0xf0] }
 0x205   :  { %v14506_v24 = vld [vmem:[#allocation7 + $0x1e44] sm:$0xf]  ;;  %v12809_v50 = vor.u32 %v14442_v42, %v12806_v43  ;;  %6919 = vmatpush.bf16.msrb.mxu1 %v12553_v47  ;;  %v9901_v42 = vor.u32 %v13719_v25, %v9900_v21  ;;  %v10157_v43 = vor.u32 %v13783_v27, %v10156_v26  ;;  %v13711_v46 = vld [vmem:[#allocation7 + $0x564] sm:$0xf0]  ;;  %v6727_v27 = vpop.f32.mrf.mxu2 }
 0x206   :  { %v13062_v44 = vld [vmem:[#allocation7 + $0x1e60] sm:$0xf0]  ;;  %v10124_v47 = vld [vmem:[#allocation7 + $0x748] sm:$0xf] }
 0x207   :  { %v14306_v45 = vld [vmem:[#allocation7 + $0x1804] sm:$0xf]  ;;  %v13065_v51 = vor.u32 %v14506_v24, %v13062_v44  ;;  %6932 = vmatpush.bf16.msrb.mxu2 %v12809_v50  ;;  %v9612_v24 = vld [vmem:[#allocation7 + $0x348] sm:$0xf] }
 0x208   :  { %v12262_v48 = vld [vmem:[#allocation7 + $0x1820] sm:$0xf0]  ;;  %v13647_v44 = vld [vmem:[#allocation7 + $0x364] sm:$0xf0] }
 0x209   :  { %v14370_v3 = vld [vmem:[#allocation7 + $0x1a04] sm:$0xf]  ;;  %v12265_v63 = vor.u32 %v14306_v45, %v12262_v48  ;;  %6945 = vmatpush.bf16.msrb.mxu3 %v13065_v51  ;;  %v9868_v45 = vld [vmem:[#allocation7 + $0x548] sm:$0xf] }
 0x20a   :  { %v12518_v49 = vld [vmem:[#allocation7 + $0x1a20] sm:$0xf0]  ;;  %v13775_v48 = vld [vmem:[#allocation7 + $0x764] sm:$0xf0] }
 0x20b   :  { %v14434_v52 = vld [vmem:[#allocation7 + $0x1c04] sm:$0xf]  ;;  %v12521_v0 = vor.u32 %v14370_v3, %v12518_v49  ;;  %6907 = vmatpush.bf16.msrb.mxu0 %v12265_v63  ;;  %v9357_v3 = vor.u32 %v13583_v53, %v9356_v35  ;;  %v9613_v49 = vor.u32 %v13647_v44, %v9612_v24  ;;  %v9324_v50 = vld [vmem:[#allocation7 + $0x108] sm:$0xf] }
 0x20c   :  { %v12774_v54 = vld [vmem:[#allocation7 + $0x1c20] sm:$0xf0]  ;;  %v13575_v51 = vld [vmem:[#allocation7 + $0x124] sm:$0xf0] }
 0x20d   :  { %v14498_v55 = vld [vmem:[#allocation7 + $0x1e04] sm:$0xf]  ;;  %v12777_v5 = vor.u32 %v14434_v52, %v12774_v54  ;;  %6920 = vmatpush.bf16.msrb.mxu1 %v12521_v0  ;;  %v9869_v52 = vor.u32 %v13711_v46, %v9868_v45  ;;  %v10125_v54 = vor.u32 %v13775_v48, %v10124_v47  ;;  %v9325_v62 = vor.u32 %v13575_v51, %v9324_v50  ;;  %v6714_v0 = vpop.f32.mrf.mxu1  ;;  %v9292_v1 = vld [vmem:[#allocation7 + $0xc8] sm:$0xf]  ;;  %v6703_v45 = vpop.f32.mrf.mxu0 }
 0x20e   :  { %v13030_v57 = vld [vmem:[#allocation7 + $0x1e20] sm:$0xf0]  ;;  %6908 = vmatmul.bf16.vlgmr.msrb.gmra.mxu0 %v15191_v31  ;;  %v13567_v2 = vld [vmem:[#allocation7 + $0xe4] sm:$0xf0]  ;;  %v6715_v8 = vadd.f32 %v6714_v0, %v6702_v9 }
 0x20f   :  { %v13033_v6 = vor.u32 %v14498_v55, %v13030_v57  ;;  %6933 = vmatpush.bf16.msrb.mxu2 %v12777_v5  ;;  %6952 = vmatpush.bf16.msra.mxu0 %v9421_v7  ;;  %v9580_v55 = vld [vmem:[#allocation7 + $0x308] sm:$0xf]  ;;  %v10093_v5 = vor.u32 %v13767_v60, %v10092_v59  ;;  %v9293_v15 = vor.u32 %v13567_v2, %v9292_v1 }
 0x210   :  { %6921 = vmatmul.bf16.vlgmr.msrb.gmra.mxu1 %v15195_v38  ;;  %v9836_v57 = vld [vmem:[#allocation7 + $0x508] sm:$0xf]  ;;  %v9581_v63 = vor.u32 %v13639_v56, %v9580_v55  ;;  %v6728_v53 = vadd.f32 %v6727_v27, %v6715_v8 }
 0x211   :  { %6946 = vmatpush.bf16.msrb.mxu3 %v13033_v6  ;;  %6965 = vmatpush.bf16.msra.mxu1 %v9677_v32  ;;  %v9837_v4 = vor.u32 %v13703_v58, %v9836_v57  ;;  %v9548_v6 = vld [vmem:[#allocation7 + $0x2c8] sm:$0xf] }
 0x212   :  { %6934 = vmatmul.bf16.vlgmr.msrb.gmra.mxu2 %v15193_v33  ;;  %v13631_v7 = vld [vmem:[#allocation7 + $0x2e4] sm:$0xf0] }
 0x213   :  { %6978 = vmatpush.bf16.msra.mxu2 %v9933_v13  ;;  %6953 = vmatpush.bf16.msra.mxu0 %v9389_v30  ;;  %v9804_v32 = vld [vmem:[#allocation7 + $0x4c8] sm:$0xf]  ;;  %v9549_v16 = vor.u32 %v13631_v7, %v9548_v6  ;;  %v6729_v7 = vpop.f32.mrf.mxu2 }
 0x214   :  { %6947 = vmatmul.bf16.vlgmr.msrb.gmra.mxu3 %v15197_v39  ;;  %v13695_v12 = vld [vmem:[#allocation7 + $0x4e4] sm:$0xf0] }
 0x215   :  { %6991 = vmatpush.bf16.msra.mxu3 %v10189_v14  ;;  %6966 = vmatpush.bf16.msra.mxu1 %v9645_v34  ;;  %v10060_v13 = vld [vmem:[#allocation7 + $0x6c8] sm:$0xf]  ;;  %v9805_v25 = vor.u32 %v13695_v12, %v9804_v32  ;;  %v6716_v50 = vpop.f32.mrf.mxu1 }
 0x216   :  { %v13759_v14 = vld [vmem:[#allocation7 + $0x6e4] sm:$0xf0] }
 0x217   :  { %6979 = vmatpush.bf16.msra.mxu2 %v9901_v42  ;;  %6954 = vmatpush.bf16.msra.mxu0 %v9357_v3  ;;  %v9260_v20 = vld [vmem:[#allocation7 + $0x88] sm:$0xf]  ;;  %v10061_v26 = vor.u32 %v13759_v14, %v10060_v13  ;;  %v6740_v42 = vpop.f32.mrf.mxu3 }
 0x218   :  { %v13559_v21 = vld [vmem:[#allocation7 + $0xa4] sm:$0xf0]  ;;  %v15225_v46 = vadd.f32 %v6740_v42, %v6728_v53 }
 0x219   :  { %6992 = vmatpush.bf16.msra.mxu3 %v10157_v43  ;;  %6967 = vmatpush.bf16.msra.mxu1 %v9613_v49  ;;  %v9516_v30 = vld [vmem:[#allocation7 + $0x288] sm:$0xf]  ;;  %v9261_v47 = vor.u32 %v13559_v21, %v9260_v20 }
 0x21a   :  { %v13623_v34 = vld [vmem:[#allocation7 + $0x2a4] sm:$0xf0] }
 0x21b   :  { %6980 = vmatpush.bf16.msra.mxu2 %v9869_v52  ;;  %6955 = vmatpush.bf16.msra.mxu0 %v9325_v62  ;;  %v9772_v35 = vld [vmem:[#allocation7 + $0x488] sm:$0xf]  ;;  %v9517_v48 = vor.u32 %v13623_v34, %v9516_v30 }
 0x21c   :  { %v13687_v43 = vld [vmem:[#allocation7 + $0x4a4] sm:$0xf0] }
 0x21d   :  { %6993 = vmatpush.bf16.msra.mxu3 %v10125_v54  ;;  %6968 = vmatpush.bf16.msra.mxu1 %v9581_v63  ;;  %v10028_v24 = vld [vmem:[#allocation7 + $0x688] sm:$0xf]  ;;  %v9773_v51 = vor.u32 %v13687_v43, %v9772_v35 }
 0x21e   :  { %v13751_v44 = vld [vmem:[#allocation7 + $0x6a4] sm:$0xf0] }
 0x21f   :  { %6981 = vmatpush.bf16.msra.mxu2 %v9837_v4  ;;  %6956 = vmatpush.bf16.msra.mxu0 %v9293_v15  ;;  %v9228_v3 = vld [vmem:[#allocation7 + $0x48] sm:$0xf]  ;;  %v10029_v52 = vor.u32 %v13751_v44, %v10028_v24  ;;  %v6742_v13 = vpop.f32.mrf.mxu3 }
 0x220   :  { %v13551_v49 = vld [vmem:[#allocation7 + $0x64] sm:$0xf0] }
 0x221   :  { %6994 = vmatpush.bf16.msra.mxu3 %v10093_v5  ;;  %6969 = vmatpush.bf16.msra.mxu1 %v9549_v16  ;;  %v9484_v54 = vld [vmem:[#allocation7 + $0x248] sm:$0xf]  ;;  %v9229_v61 = vor.u32 %v13551_v49, %v9228_v3 }
 0x222   :  { %v13615_v55 = vld [vmem:[#allocation7 + $0x264] sm:$0xf0] }
 0x223   :  { %6982 = vmatpush.bf16.msra.mxu2 %v9805_v25  ;;  %v9740_v56 = vld [vmem:[#allocation7 + $0x448] sm:$0xf]  ;;  %6957 = vmatpush.bf16.msra.mxu0 %v9261_v47  ;;  %v9485_v9 = vor.u32 %v13615_v55, %v9484_v54 }
 0x224   :  { %v13679_v57 = vld [vmem:[#allocation7 + $0x464] sm:$0xf0] }
 0x225   :  { %6995 = vmatpush.bf16.msra.mxu3 %v10061_v26  ;;  %v9996_v58 = vld [vmem:[#allocation7 + $0x648] sm:$0xf]  ;;  %6970 = vmatpush.bf16.msra.mxu1 %v9517_v48  ;;  %v9741_v1 = vor.u32 %v13679_v57, %v9740_v56 }
 0x226   :  { %v13743_v59 = vld [vmem:[#allocation7 + $0x664] sm:$0xf0] }
 0x227   :  { %v9196_v60 = vld [vmem:[#allocation7 + $0x8] sm:$0xf]  ;;  %6983 = vmatpush.bf16.msra.mxu2 %v9773_v51  ;;  %v9997_v2 = vor.u32 %v13743_v59, %v9996_v58  ;;  %6958 = vmatpush.bf16.msra.mxu0 %v9229_v61 }
 0x228   :  { %v13543_v62 = vld [vmem:[#allocation7 + $0x24] sm:$0xf0] }
 0x229   :  { %v9452_v63 = vld [vmem:[#allocation7 + $0x208] sm:$0xf]  ;;  %6996 = vmatpush.bf16.msra.mxu3 %v10029_v52  ;;  %6971 = vmatpush.bf16.msra.mxu1 %v9485_v9  ;;  %v9197_v20 = vor.u32 %v13543_v62, %v9196_v60 }
 0x22a   :  { %v13607_v0 = vld [vmem:[#allocation7 + $0x224] sm:$0xf0] }
 0x22b   :  { %v9708_v4 = vld [vmem:[#allocation7 + $0x408] sm:$0xf]  ;;  %v9453_v21 = vor.u32 %v13607_v0, %v9452_v63  ;;  %6984 = vmatpush.bf16.msra.mxu2 %v9741_v1  ;;  %6959 = vmatpush.bf16.msra.mxu0 %v9197_v20 }
 0x22c   :  { %v13671_v5 = vld [vmem:[#allocation7 + $0x424] sm:$0xf0] }
 0x22d   :  { %v9964_v6 = vld [vmem:[#allocation7 + $0x608] sm:$0xf]  ;;  %6997 = vmatpush.bf16.msra.mxu3 %v9997_v2  ;;  %v9709_v30 = vor.u32 %v13671_v5, %v9708_v4  ;;  %6972 = vmatpush.bf16.msra.mxu1 %v9453_v21 }
 0x22e   :  { %v13735_v32 = vld [vmem:[#allocation7 + $0x624] sm:$0xf0]  ;;  %6960 = vmatmul.bf16.vlgmr.msra.gmra.mxu0 %v15134_v10 }
 0x22f   :  { %v10444_v8 = vld [vmem:[#allocation7 + $0x9c8] sm:$0xf]  ;;  %v9965_v34 = vor.u32 %v13735_v32, %v9964_v6  ;;  %6985 = vmatpush.bf16.msra.mxu2 %v9709_v30 }
 0x230   :  { %v13855_v12 = vld [vmem:[#allocation7 + $0x9e4] sm:$0xf0]  ;;  %6973 = vmatmul.bf16.vlgmr.msra.gmra.mxu1 %v15143_v18 }
 0x231   :  { %v10700_v14 = vld [vmem:[#allocation7 + $0xbc8] sm:$0xf]  ;;  %v10445_v35 = vor.u32 %v13855_v12, %v10444_v8  ;;  %6998 = vmatpush.bf16.msra.mxu3 %v9965_v34 }
 0x232   :  { %v13919_v15 = vld [vmem:[#allocation7 + $0xbe4] sm:$0xf0]  ;;  %6986 = vmatmul.bf16.vlgmr.msra.gmra.mxu2 %v15136_v11 }
 0x233   :  { %v10956_v16 = vld [vmem:[#allocation7 + $0xdc8] sm:$0xf]  ;;  %v10701_v53 = vor.u32 %v13919_v15, %v10700_v14  ;;  %7004 = vmatpush.bf16.msrb.mxu0 %v10445_v35  ;;  %v6753_v14 = vpop.f32.mrf.mxu0 }
 0x234   :  { %v13983_v25 = vld [vmem:[#allocation7 + $0xde4] sm:$0xf0]  ;;  %6999 = vmatmul.bf16.vlgmr.msra.gmra.mxu3 %v15141_v17 }
 0x235   :  { %v11212_v26 = vld [vmem:[#allocation7 + $0xfc8] sm:$0xf]  ;;  %v10957_v24 = vor.u32 %v13983_v25, %v10956_v16  ;;  %7017 = vmatpush.bf16.msrb.mxu1 %v10701_v53  ;;  %v1401_v53 = vperm.slane %v15207_v19, 1 }
 0x236   :  { %v14047_v27 = vld [vmem:[#allocation7 + $0xfe4] sm:$0xf0] }
 0x237   :  { %v10412_v42 = vld [vmem:[#allocation7 + $0x988] sm:$0xf]  ;;  %v11213_v44 = vor.u32 %v14047_v27, %v11212_v26  ;;  %7030 = vmatpush.bf16.msrb.mxu2 %v10957_v24  ;;  %v6766_v26 = vpop.f32.mrf.mxu1 }
 0x238   :  { %v13847_v43 = vld [vmem:[#allocation7 + $0x9a4] sm:$0xf0] }
 0x239   :  { %v10668_v45 = vld [vmem:[#allocation7 + $0xb88] sm:$0xf]  ;;  %v10413_v51 = vor.u32 %v13847_v43, %v10412_v42  ;;  %7043 = vmatpush.bf16.msrb.mxu3 %v11213_v44  ;;  %v6754_v44 = vadd.f32 %v6753_v14, %v1401_v53 }
 0x23a   :  { %v13911_v47 = vld [vmem:[#allocation7 + $0xba4] sm:$0xf0] }
 0x23b   :  { %v10924_v48 = vld [vmem:[#allocation7 + $0xd88] sm:$0xf]  ;;  %v10669_v52 = vor.u32 %v13911_v47, %v10668_v45  ;;  %7005 = vmatpush.bf16.msrb.mxu0 %v10413_v51 }
 0x23c   :  { %v13975_v3 = vld [vmem:[#allocation7 + $0xda4] sm:$0xf0] }
 0x23d   :  { %v11180_v49 = vld [vmem:[#allocation7 + $0xf88] sm:$0xf]  ;;  %v10925_v56 = vor.u32 %v13975_v3, %v10924_v48  ;;  %7018 = vmatpush.bf16.msrb.mxu1 %v10669_v52 }
 0x23e   :  { %v14039_v50 = vld [vmem:[#allocation7 + $0xfa4] sm:$0xf0] }
 0x23f   :  { %v10380_v54 = vld [vmem:[#allocation7 + $0x948] sm:$0xf]  ;;  %v11181_v57 = vor.u32 %v14039_v50, %v11180_v49  ;;  %7031 = vmatpush.bf16.msrb.mxu2 %v10925_v56  ;;  %v6779_v56 = vpop.f32.mrf.mxu2 }
 0x240   :  { %v13839_v55 = vld [vmem:[#allocation7 + $0x964] sm:$0xf0] }
 0x241   :  { %v10636_v58 = vld [vmem:[#allocation7 + $0xb48] sm:$0xf]  ;;  %v10381_v63 = vor.u32 %v13839_v55, %v10380_v54  ;;  %7044 = vmatpush.bf16.msrb.mxu3 %v11181_v57  ;;  %v6767_v55 = vadd.f32 %v6766_v26, %v6754_v44 }
 0x242   :  { %v13903_v59 = vld [vmem:[#allocation7 + $0xb64] sm:$0xf0] }
 0x243   :  { %v10892_v60 = vld [vmem:[#allocation7 + $0xd48] sm:$0xf]  ;;  %v10637_v0 = vor.u32 %v13903_v59, %v10636_v58  ;;  %7006 = vmatpush.bf16.msrb.mxu0 %v10381_v63  ;;  %v6792_v59 = vpop.f32.mrf.mxu3 }
 0x244   :  { %v13967_v61 = vld [vmem:[#allocation7 + $0xd64] sm:$0xf0] }
 0x245   :  { %v11148_v9 = vld [vmem:[#allocation7 + $0xf48] sm:$0xf]  ;;  %v10893_v4 = vor.u32 %v13967_v61, %v10892_v60  ;;  %7019 = vmatpush.bf16.msrb.mxu1 %v10637_v0  ;;  %v6780_v60 = vadd.f32 %v6779_v56, %v6767_v55  ;;  %v6755_v61 = vpop.f32.mrf.mxu0 }
 0x246   :  { %v14031_v62 = vld [vmem:[#allocation7 + $0xf64] sm:$0xf0] }
 0x247   :  { %v10348_v1 = vld [vmem:[#allocation7 + $0x908] sm:$0xf]  ;;  %v11149_v5 = vor.u32 %v14031_v62, %v11148_v9  ;;  %7032 = vmatpush.bf16.msrb.mxu2 %v10893_v4  ;;  %v6781_v53 = vpop.f32.mrf.mxu2 }
 0x248   :  { %v13831_v2 = vld [vmem:[#allocation7 + $0x924] sm:$0xf0] }
 0x249   :  { %v10604_v6 = vld [vmem:[#allocation7 + $0xb08] sm:$0xf]  ;;  %v10349_v15 = vor.u32 %v13831_v2, %v10348_v1  ;;  %7045 = vmatpush.bf16.msrb.mxu3 %v11149_v5  ;;  %v6768_v1 = vpop.f32.mrf.mxu1 }
 0x24a   :  { %v13895_v7 = vld [vmem:[#allocation7 + $0xb24] sm:$0xf0] }
 0x24b   :  { %v10860_v32 = vld [vmem:[#allocation7 + $0xd08] sm:$0xf]  ;;  %v10605_v16 = vor.u32 %v13895_v7, %v10604_v6  ;;  %7007 = vmatpush.bf16.msrb.mxu0 %v10349_v15  ;;  %v6794_v44 = vpop.f32.mrf.mxu3 }
 0x24c   :  { %v13959_v8 = vld [vmem:[#allocation7 + $0xd24] sm:$0xf0] }
 0x24d   :  { %v11116_v12 = vld [vmem:[#allocation7 + $0xf08] sm:$0xf]  ;;  %v10861_v27 = vor.u32 %v13959_v8, %v10860_v32  ;;  %7020 = vmatpush.bf16.msrb.mxu1 %v10605_v16  ;;  %v15232_v32 = vadd.f32 %v6792_v59, %v6780_v60 }
 0x24e   :  { %v14023_v13 = vld [vmem:[#allocation7 + $0xf24] sm:$0xf0] }
 0x24f   :  { %v10316_v20 = vld [vmem:[#allocation7 + $0x8c8] sm:$0xf]  ;;  %v11117_v30 = vor.u32 %v14023_v13, %v11116_v12  ;;  %7033 = vmatpush.bf16.msrb.mxu2 %v10861_v27 }
 0x250   :  { %v13823_v21 = vld [vmem:[#allocation7 + $0x8e4] sm:$0xf0] }
 0x251   :  { %v10572_v25 = vld [vmem:[#allocation7 + $0xac8] sm:$0xf]  ;;  %v10317_v45 = vor.u32 %v13823_v21, %v10316_v20  ;;  %7046 = vmatpush.bf16.msrb.mxu3 %v11117_v30 }
 0x252   :  { %v13887_v34 = vld [vmem:[#allocation7 + $0xae4] sm:$0xf0] }
 0x253   :  { %v10828_v35 = vld [vmem:[#allocation7 + $0xcc8] sm:$0xf]  ;;  %v10573_v47 = vor.u32 %v13887_v34, %v10572_v25  ;;  %7008 = vmatpush.bf16.msrb.mxu0 %v10317_v45 }
 0x254   :  { %v13951_v42 = vld [vmem:[#allocation7 + $0xce4] sm:$0xf0] }
 0x255   :  { %v11084_v43 = vld [vmem:[#allocation7 + $0xec8] sm:$0xf]  ;;  %v10829_v49 = vor.u32 %v13951_v42, %v10828_v35  ;;  %7021 = vmatpush.bf16.msrb.mxu1 %v10573_v47 }
 0x256   :  { %v14015_v24 = vld [vmem:[#allocation7 + $0xee4] sm:$0xf0] }
 0x257   :  { %v10284_v48 = vld [vmem:[#allocation7 + $0x888] sm:$0xf]  ;;  %v11085_v50 = vor.u32 %v14015_v24, %v11084_v43  ;;  %7034 = vmatpush.bf16.msrb.mxu2 %v10829_v49 }
 0x258   :  { %v13815_v3 = vld [vmem:[#allocation7 + $0x8a4] sm:$0xf0] }
 0x259   :  { %v10540_v51 = vld [vmem:[#allocation7 + $0xa88] sm:$0xf]  ;;  %v10285_v9 = vor.u32 %v13815_v3, %v10284_v48  ;;  %7047 = vmatpush.bf16.msrb.mxu3 %v11085_v50 }
 0x25a   :  { %v13879_v52 = vld [vmem:[#allocation7 + $0xaa4] sm:$0xf0] }
 0x25b   :  { %v10796_v54 = vld [vmem:[#allocation7 + $0xc88] sm:$0xf]  ;;  %v10541_v62 = vor.u32 %v13879_v52, %v10540_v51  ;;  %7009 = vmatpush.bf16.msrb.mxu0 %v10285_v9 }
 0x25c   :  { %v13943_v19 = vld [vmem:[#allocation7 + $0xca4] sm:$0xf0] }
 0x25d   :  { %v11052_v57 = vld [vmem:[#allocation7 + $0xe88] sm:$0xf]  ;;  %v10797_v2 = vor.u32 %v13943_v19, %v10796_v54  ;;  %7022 = vmatpush.bf16.msrb.mxu1 %v10541_v62 }
 0x25e   :  { %v14007_v58 = vld [vmem:[#allocation7 + $0xea4] sm:$0xf0] }
 0x25f   :  { %v10252_v63 = vld [vmem:[#allocation7 + $0x848] sm:$0xf]  ;;  %v11053_v4 = vor.u32 %v14007_v58, %v11052_v57  ;;  %7035 = vmatpush.bf16.msrb.mxu2 %v10797_v2 }
 0x260   :  { %v13807_v0 = vld [vmem:[#allocation7 + $0x864] sm:$0xf0] }
 0x261   :  { %v10508_v5 = vld [vmem:[#allocation7 + $0xa48] sm:$0xf]  ;;  %v10253_v15 = vor.u32 %v13807_v0, %v10252_v63  ;;  %7048 = vmatpush.bf16.msrb.mxu3 %v11053_v4 }
 0x262   :  { %v13871_v6 = vld [vmem:[#allocation7 + $0xa64] sm:$0xf0] }
 0x263   :  { %v10764_v7 = vld [vmem:[#allocation7 + $0xc48] sm:$0xf]  ;;  %v10509_v16 = vor.u32 %v13871_v6, %v10508_v5  ;;  %7010 = vmatpush.bf16.msrb.mxu0 %v10253_v15 }
 0x264   :  { %v13935_v8 = vld [vmem:[#allocation7 + $0xc64] sm:$0xf0] }
 0x265   :  { %v11020_v12 = vld [vmem:[#allocation7 + $0xe48] sm:$0xf]  ;;  %v10765_v26 = vor.u32 %v13935_v8, %v10764_v7  ;;  %7023 = vmatpush.bf16.msrb.mxu1 %v10509_v16 }
 0x266   :  { %v13999_v13 = vld [vmem:[#allocation7 + $0xe64] sm:$0xf0] }
 0x267   :  { %v10220_v14 = vld [vmem:[#allocation7 + $0x808] sm:$0xf]  ;;  %v11021_v27 = vor.u32 %v13999_v13, %v11020_v12  ;;  %7036 = vmatpush.bf16.msrb.mxu2 %v10765_v26 }
 0x268   :  { %v13799_v20 = vld [vmem:[#allocation7 + $0x824] sm:$0xf0] }
 0x269   :  { %v10476_v21 = vld [vmem:[#allocation7 + $0xa08] sm:$0xf]  ;;  %v10221_v3 = vor.u32 %v13799_v20, %v10220_v14  ;;  %7049 = vmatpush.bf16.msrb.mxu3 %v11021_v27 }
 0x26a   :  { %v13863_v25 = vld [vmem:[#allocation7 + $0xa24] sm:$0xf0] }
 0x26b   :  { %v10732_v30 = vld [vmem:[#allocation7 + $0xc08] sm:$0xf]  ;;  %v10477_v49 = vor.u32 %v13863_v25, %v10476_v21  ;;  %7011 = vmatpush.bf16.msrb.mxu0 %v10221_v3 }
 0x26c   :  { %v13927_v34 = vld [vmem:[#allocation7 + $0xc24] sm:$0xf0] }
 0x26d   :  { %v10988_v35 = vld [vmem:[#allocation7 + $0xe08] sm:$0xf]  ;;  %v10733_v54 = vor.u32 %v13927_v34, %v10732_v30  ;;  %7024 = vmatpush.bf16.msrb.mxu1 %v10477_v49 }
 0x26e   :  { %v13991_v42 = vld [vmem:[#allocation7 + $0xe24] sm:$0xf0]  ;;  %7012 = vmatmul.bf16.vlgmr.msrb.gmra.mxu0 %v15167_v22 }
 0x26f   :  { %v11468_v43 = vld [vmem:[#allocation7 + $0x11c8] sm:$0xf]  ;;  %v10989_v55 = vor.u32 %v13991_v42, %v10988_v35  ;;  %7037 = vmatpush.bf16.msrb.mxu2 %v10733_v54 }
 0x270   :  { %v14111_v24 = vld [vmem:[#allocation7 + $0x11e4] sm:$0xf0]  ;;  %7025 = vmatmul.bf16.vlgmr.msrb.gmra.mxu1 %v15171_v28 }
 0x271   :  { %v11724_v45 = vld [vmem:[#allocation7 + $0x13c8] sm:$0xf]  ;;  %v11469_v56 = vor.u32 %v14111_v24, %v11468_v43  ;;  %7050 = vmatpush.bf16.msrb.mxu3 %v10989_v55 }
 0x272   :  { %v14175_v47 = vld [vmem:[#allocation7 + $0x13e4] sm:$0xf0]  ;;  %7038 = vmatmul.bf16.vlgmr.msrb.gmra.mxu2 %v15169_v23 }
 0x273   :  { %v11980_v48 = vld [vmem:[#allocation7 + $0x15c8] sm:$0xf]  ;;  %v11725_v19 = vor.u32 %v14175_v47, %v11724_v45  ;;  %7056 = vmatpush.bf16.msra.mxu0 %v11469_v56  ;;  %v6805_v45 = vpop.f32.mrf.mxu0 }
 0x274   :  { %v14239_v50 = vld [vmem:[#allocation7 + $0x15e4] sm:$0xf0]  ;;  %7051 = vmatmul.bf16.vlgmr.msrb.gmra.mxu3 %v15173_v29 }
 0x275   :  { %v12236_v51 = vld [vmem:[#allocation7 + $0x17c8] sm:$0xf]  ;;  %v11981_v59 = vor.u32 %v14239_v50, %v11980_v48  ;;  %7069 = vmatpush.bf16.msra.mxu1 %v11725_v19  ;;  %v6806_v50 = vadd.f32 %v6805_v45, %v15232_v32 }
 0x276   :  { %v14303_v52 = vld [vmem:[#allocation7 + $0x17e4] sm:$0xf0] }
 0x277   :  { %v11436_v57 = vld [vmem:[#allocation7 + $0x1188] sm:$0xf]  ;;  %v12237_v60 = vor.u32 %v14303_v52, %v12236_v51  ;;  %7082 = vmatpush.bf16.msra.mxu2 %v11981_v59  ;;  %v6818_v51 = vpop.f32.mrf.mxu1 }
 0x278   :  { %v14103_v58 = vld [vmem:[#allocation7 + $0x11a4] sm:$0xf0] }
 0x279   :  { %v11692_v61 = vld [vmem:[#allocation7 + $0x1388] sm:$0xf]  ;;  %v11437_v2 = vor.u32 %v14103_v58, %v11436_v57  ;;  %7095 = vmatpush.bf16.msra.mxu3 %v12237_v60  ;;  %v6819_v60 = vadd.f32 %v6818_v51, %v6806_v50 }
 0x27a   :  { %v14167_v9 = vld [vmem:[#allocation7 + $0x13a4] sm:$0xf0] }
 0x27b   :  { %v11948_v62 = vld [vmem:[#allocation7 + $0x1588] sm:$0xf]  ;;  %v11693_v4 = vor.u32 %v14167_v9, %v11692_v61  ;;  %7057 = vmatpush.bf16.msra.mxu0 %v11437_v2 }
 0x27c   :  { %v14231_v63 = vld [vmem:[#allocation7 + $0x15a4] sm:$0xf0] }
 0x27d   :  { %v12204_v0 = vld [vmem:[#allocation7 + $0x1788] sm:$0xf]  ;;  %v11949_v7 = vor.u32 %v14231_v63, %v11948_v62  ;;  %7070 = vmatpush.bf16.msra.mxu1 %v11693_v4 }
 0x27e   :  { %v14295_v1 = vld [vmem:[#allocation7 + $0x17a4] sm:$0xf0] }
 0x27f   :  { %v11404_v5 = vld [vmem:[#allocation7 + $0x1148] sm:$0xf]  ;;  %v12205_v8 = vor.u32 %v14295_v1, %v12204_v0  ;;  %7083 = vmatpush.bf16.msra.mxu2 %v11949_v7 }
 0x280   :  { %v14095_v6 = vld [vmem:[#allocation7 + $0x1164] sm:$0xf0] }
 0x281   :  { %v11660_v12 = vld [vmem:[#allocation7 + $0x1348] sm:$0xf]  ;;  %v11405_v21 = vor.u32 %v14095_v6, %v11404_v5  ;;  %7096 = vmatpush.bf16.msra.mxu3 %v12205_v8  ;;  %v6831_v5 = vpop.f32.mrf.mxu2 }
 0x282   :  { %v14159_v13 = vld [vmem:[#allocation7 + $0x1364] sm:$0xf0] }
 0x283   :  { %v11916_v14 = vld [vmem:[#allocation7 + $0x1548] sm:$0xf]  ;;  %v11661_v25 = vor.u32 %v14159_v13, %v11660_v12  ;;  %7058 = vmatpush.bf16.msra.mxu0 %v11405_v21  ;;  %v6832_v12 = vadd.f32 %v6831_v5, %v6819_v60  ;;  %v6844_v13 = vpop.f32.mrf.mxu3 }
 0x284   :  { %v14223_v15 = vld [vmem:[#allocation7 + $0x1564] sm:$0xf0] }
 0x285   :  { %v12172_v16 = vld [vmem:[#allocation7 + $0x1748] sm:$0xf]  ;;  %v11917_v30 = vor.u32 %v14223_v15, %v11916_v14  ;;  %7071 = vmatpush.bf16.msra.mxu1 %v11661_v25  ;;  %v6807_v14 = vpop.f32.mrf.mxu0  ;;  %v15239_v25 = vadd.f32 %v6844_v13, %v6832_v12 }
 0x286   :  { %v14287_v20 = vld [vmem:[#allocation7 + $0x1764] sm:$0xf0] }
 0x287   :  { %v11372_v26 = vld [vmem:[#allocation7 + $0x1108] sm:$0xf]  ;;  %v12173_v34 = vor.u32 %v14287_v20, %v12172_v16  ;;  %7084 = vmatpush.bf16.msra.mxu2 %v11917_v30 }
 0x288   :  { %v14087_v27 = vld [vmem:[#allocation7 + $0x1124] sm:$0xf0] }
 0x289   :  { %v11628_v35 = vld [vmem:[#allocation7 + $0x1308] sm:$0xf]  ;;  %v11373_v47 = vor.u32 %v14087_v27, %v11372_v26  ;;  %7097 = vmatpush.bf16.msra.mxu3 %v12173_v34  ;;  %v6820_v26 = vpop.f32.mrf.mxu1 }
 0x28a   :  { %v14151_v53 = vld [vmem:[#allocation7 + $0x1324] sm:$0xf0] }
 0x28b   :  { %v11884_v42 = vld [vmem:[#allocation7 + $0x1508] sm:$0xf]  ;;  %v11629_v48 = vor.u32 %v14151_v53, %v11628_v35  ;;  %7059 = vmatpush.bf16.msra.mxu0 %v11373_v47  ;;  %v6846_v60 = vpop.f32.mrf.mxu3 }
 0x28c   :  { %v14215_v43 = vld [vmem:[#allocation7 + $0x1524] sm:$0xf0] }
 0x28d   :  { %v12140_v24 = vld [vmem:[#allocation7 + $0x1708] sm:$0xf]  ;;  %v11885_v52 = vor.u32 %v14215_v43, %v11884_v42  ;;  %7072 = vmatpush.bf16.msra.mxu1 %v11629_v48 }
 0x28e   :  { %v14279_v44 = vld [vmem:[#allocation7 + $0x1724] sm:$0xf0] }
 0x28f   :  { %v11340_v3 = vld [vmem:[#allocation7 + $0x10c8] sm:$0xf]  ;;  %v12141_v54 = vor.u32 %v14279_v44, %v12140_v24  ;;  %7085 = vmatpush.bf16.msra.mxu2 %v11885_v52  ;;  %v8200_v44 = vsel %vm232_vm6, %v15225_v46, 0.0 }
 0x290   :  { %v14079_v49 = vld [vmem:[#allocation7 + $0x10e4] sm:$0xf0] }
 0x291   :  { %v11596_v55 = vld [vmem:[#allocation7 + $0x12c8] sm:$0xf]  ;;  %v11341_v61 = vor.u32 %v14079_v49, %v11340_v3  ;;  %7098 = vmatpush.bf16.msra.mxu3 %v12141_v54 }
 0x292   :  { %v14143_v56 = vld [vmem:[#allocation7 + $0x12e4] sm:$0xf0] }
 0x293   :  { %v11852_v19 = vld [vmem:[#allocation7 + $0x14c8] sm:$0xf]  ;;  %v11597_v9 = vor.u32 %v14143_v56, %v11596_v55  ;;  %7060 = vmatpush.bf16.msra.mxu0 %v11341_v61 }
 0x294   :  { %v14207_v57 = vld [vmem:[#allocation7 + $0x14e4] sm:$0xf0] }
 0x295   :  { %v12108_v58 = vld [vmem:[#allocation7 + $0x16c8] sm:$0xf]  ;;  %v11853_v32 = vor.u32 %v14207_v57, %v11852_v19  ;;  %7073 = vmatpush.bf16.msra.mxu1 %v11597_v9  ;;  %v6833_v19 = vpop.f32.mrf.mxu2 }
 0x296   :  { %v14271_v59 = vld [vmem:[#allocation7 + $0x16e4] sm:$0xf0] }
 0x297   :  { %v11308_v62 = vld [vmem:[#allocation7 + $0x1088] sm:$0xf]  ;;  %v12109_v0 = vor.u32 %v14271_v59, %v12108_v58  ;;  %7086 = vmatpush.bf16.msra.mxu2 %v11853_v32 }
 0x298   :  { %v14071_v63 = vld [vmem:[#allocation7 + $0x10a4] sm:$0xf0] }
 0x299   :  { %v11564_v1 = vld [vmem:[#allocation7 + $0x1288] sm:$0xf]  ;;  %v11309_v15 = vor.u32 %v14071_v63, %v11308_v62  ;;  %7099 = vmatpush.bf16.msra.mxu3 %v12109_v0 }
 0x29a   :  { %v14135_v2 = vld [vmem:[#allocation7 + $0x12a4] sm:$0xf0] }
 0x29b   :  { %v11820_v4 = vld [vmem:[#allocation7 + $0x1488] sm:$0xf]  ;;  %v11565_v16 = vor.u32 %v14135_v2, %v11564_v1  ;;  %7061 = vmatpush.bf16.msra.mxu0 %v11309_v15 }
 0x29c   :  { %v14199_v6 = vld [vmem:[#allocation7 + $0x14a4] sm:$0xf0] }
 0x29d   :  { %v12076_v7 = vld [vmem:[#allocation7 + $0x1688] sm:$0xf]  ;;  %v11821_v27 = vor.u32 %v14199_v6, %v11820_v4  ;;  %7074 = vmatpush.bf16.msra.mxu1 %v11565_v16  ;;  %v8201_v4 = vrot.slane %v8200_v44, 4 }
 0x29e   :  { %v14263_v8 = vld [vmem:[#allocation7 + $0x16a4] sm:$0xf0] }
 0x29f   :  { %v11276_v20 = vld [vmem:[#allocation7 + $0x1048] sm:$0xf]  ;;  %v12077_v30 = vor.u32 %v14263_v8, %v12076_v7  ;;  %7087 = vmatpush.bf16.msra.mxu2 %v11821_v27 }
 0x2a0   :  { %v14063_v21 = vld [vmem:[#allocation7 + $0x1064] sm:$0xf0] }
 0x2a1   :  { %v11532_v34 = vld [vmem:[#allocation7 + $0x1248] sm:$0xf]  ;;  %v11277_v47 = vor.u32 %v14063_v21, %v11276_v20  ;;  %7100 = vmatpush.bf16.msra.mxu3 %v12077_v30 }
 0x2a2   :  { %v14127_v35 = vld [vmem:[#allocation7 + $0x1264] sm:$0xf0] }
 0x2a3   :  { %v11788_v53 = vld [vmem:[#allocation7 + $0x1448] sm:$0xf]  ;;  %v11533_v48 = vor.u32 %v14127_v35, %v11532_v34  ;;  %7062 = vmatpush.bf16.msra.mxu0 %v11277_v47  ;;  %v8202_v34 = vadd.f32 %v8201_v4, %v8200_v44  ;;  %v6870_v4 = vpop.f32.mrf.mxu1 }
 0x2a4   :  { %v14191_v42 = vld [vmem:[#allocation7 + $0x1464] sm:$0xf0] }
 0x2a5   :  { %v12044_v43 = vld [vmem:[#allocation7 + $0x1648] sm:$0xf]  ;;  %v11789_v51 = vor.u32 %v14191_v42, %v11788_v53  ;;  %7075 = vmatpush.bf16.msra.mxu1 %v11533_v48 }
 0x2a6   :  { %v14255_v24 = vld [vmem:[#allocation7 + $0x1664] sm:$0xf0] }
 0x2a7   :  { %v11244_v45 = vld [vmem:[#allocation7 + $0x1008] sm:$0xf]  ;;  %v12045_v52 = vor.u32 %v14255_v24, %v12044_v43  ;;  %7088 = vmatpush.bf16.msra.mxu2 %v11789_v51  ;;  %v8203_v51 = vrot.slane %v8202_v34, 2 }
 0x2a8   :  { %v14055_v3 = vld [vmem:[#allocation7 + $0x1024] sm:$0xf0] }
 0x2a9   :  { %v11500_v49 = vld [vmem:[#allocation7 + $0x1208] sm:$0xf]  ;;  %v11245_v63 = vor.u32 %v14055_v3, %v11244_v45  ;;  %7101 = vmatpush.bf16.msra.mxu3 %v12045_v52 }
 0x2aa   :  { %v14119_v50 = vld [vmem:[#allocation7 + $0x1224] sm:$0xf0] }
 0x2ab   :  { %v11756_v54 = vld [vmem:[#allocation7 + $0x1408] sm:$0xf]  ;;  %v11501_v32 = vor.u32 %v14119_v50, %v11500_v49  ;;  %7063 = vmatpush.bf16.msra.mxu0 %v11245_v63  ;;  %v8204_v63 = vadd.f32 %v8203_v51, %v8202_v34 }
 0x2ac   :  { %v14183_v55 = vld [vmem:[#allocation7 + $0x1424] sm:$0xf0] }
 0x2ad   :  { %v12012_v56 = vld [vmem:[#allocation7 + $0x1608] sm:$0xf]  ;;  %v11757_v5 = vor.u32 %v14183_v55, %v11756_v54  ;;  %7076 = vmatpush.bf16.msra.mxu1 %v11501_v32  ;;  %v6857_v32 = vpop.f32.mrf.mxu0 }
 0x2ae   :  { %v14247_v57 = vld [vmem:[#allocation7 + $0x1624] sm:$0xf0]  ;;  %7064 = vmatmul.bf16.vlgmr.msra.gmra.mxu0 %v15179_v36 }
 0x2af   :  { %v12492_v58 = vld [vmem:[#allocation7 + $0x19c8] sm:$0xf]  ;;  %v12013_v6 = vor.u32 %v14247_v57, %v12012_v56  ;;  %7089 = vmatpush.bf16.msra.mxu2 %v11757_v5 }
 0x2b0   :  { %v14367_v59 = vld [vmem:[#allocation7 + $0x19e4] sm:$0xf0]  ;;  %7077 = vmatmul.bf16.vlgmr.msra.gmra.mxu1 %v15183_v40 }
 0x2b1   :  { %v12748_v61 = vld [vmem:[#allocation7 + $0x1bc8] sm:$0xf]  ;;  %v12493_v7 = vor.u32 %v14367_v59, %v12492_v58  ;;  %7102 = vmatpush.bf16.msra.mxu3 %v12013_v6 }
 0x2b2   :  { %v14431_v9 = vld [vmem:[#allocation7 + $0x1be4] sm:$0xf0]  ;;  %7090 = vmatmul.bf16.vlgmr.msra.gmra.mxu2 %v15181_v37 }
 0x2b3   :  { %v13004_v62 = vld [vmem:[#allocation7 + $0x1dc8] sm:$0xf]  ;;  %v12749_v8 = vor.u32 %v14431_v9, %v12748_v61  ;;  %7108 = vmatpush.bf16.msrb.mxu0 %v12493_v7 }
 0x2b4   :  { %v14495_v0 = vld [vmem:[#allocation7 + $0x1de4] sm:$0xf0]  ;;  %7103 = vmatmul.bf16.vlgmr.msra.gmra.mxu3 %v15185_v41 }
 0x2b5   :  { %v13260_v1 = vld [vmem:[#allocation7 + $0x1fc8] sm:$0xf]  ;;  %v13005_v14 = vor.u32 %v14495_v0, %v13004_v62  ;;  %7121 = vmatpush.bf16.msrb.mxu1 %v12749_v8  ;;  %v6858_v0 = vadd.f32 %v6857_v32, %v15239_v25  ;;  %v6859_v51 = vpop.f32.mrf.mxu0 }
 0x2b6   :  { %v14559_v2 = vld [vmem:[#allocation7 + $0x1fe4] sm:$0xf0] }
 0x2b7   :  { %v12460_v12 = vld [vmem:[#allocation7 + $0x1988] sm:$0xf]  ;;  %v13261_v15 = vor.u32 %v14559_v2, %v13260_v1  ;;  %7134 = vmatpush.bf16.msrb.mxu2 %v13005_v14 }
 0x2b8   :  { %v14359_v13 = vld [vmem:[#allocation7 + $0x19a4] sm:$0xf0] }
 0x2b9   :  { %v12716_v16 = vld [vmem:[#allocation7 + $0x1b88] sm:$0xf]  ;;  %v12461_v35 = vor.u32 %v14359_v13, %v12460_v12  ;;  %7147 = vmatpush.bf16.msrb.mxu3 %v13261_v15  ;;  %v6871_v15 = vadd.f32 %v6870_v4, %v6858_v0 }
 0x2ba   :  { %v14423_v20 = vld [vmem:[#allocation7 + $0x1ba4] sm:$0xf0] }
 0x2bb   :  { %v12972_v21 = vld [vmem:[#allocation7 + $0x1d88] sm:$0xf]  ;;  %v12717_v53 = vor.u32 %v14423_v20, %v12716_v16  ;;  %7109 = vmatpush.bf16.msrb.mxu0 %v12461_v35 }
 0x2bc   :  { %v14487_v26 = vld [vmem:[#allocation7 + $0x1da4] sm:$0xf0] }
 0x2bd   :  { %v13228_v27 = vld [vmem:[#allocation7 + $0x1f88] sm:$0xf]  ;;  %v12973_v24 = vor.u32 %v14487_v26, %v12972_v21  ;;  %7122 = vmatpush.bf16.msrb.mxu1 %v12717_v53  ;;  %v8205_v26 = vrot.slane %v8204_v63, 1 }
 0x2be   :  { %v14551_v30 = vld [vmem:[#allocation7 + $0x1fa4] sm:$0xf0] }
 0x2bf   :  { %v12428_v42 = vld [vmem:[#allocation7 + $0x1948] sm:$0xf]  ;;  %v13229_v45 = vor.u32 %v14551_v30, %v13228_v27  ;;  %7135 = vmatpush.bf16.msrb.mxu2 %v12973_v24 }
 0x2c0   :  { %v14351_v43 = vld [vmem:[#allocation7 + $0x1964] sm:$0xf0] }
 0x2c1   :  { %v12684_v47 = vld [vmem:[#allocation7 + $0x1b48] sm:$0xf]  ;;  %v12429_v52 = vor.u32 %v14351_v43, %v12428_v42  ;;  %7148 = vmatpush.bf16.msrb.mxu3 %v13229_v45  ;;  %v6883_v42 = vpop.f32.mrf.mxu2 }
 0x2c2   :  { %v14415_v48 = vld [vmem:[#allocation7 + $0x1b64] sm:$0xf0] }
 0x2c3   :  { %v12940_v3 = vld [vmem:[#allocation7 + $0x1d48] sm:$0xf]  ;;  %v12685_v54 = vor.u32 %v14415_v48, %v12684_v47  ;;  %7110 = vmatpush.bf16.msrb.mxu0 %v12429_v52  ;;  %v6884_v47 = vadd.f32 %v6883_v42, %v6871_v15  ;;  %v6896_v48 = vpop.f32.mrf.mxu3  ;;  %v9934_v42 = vld [vmem:[#allocation7 + $0x5e8] sm:$0xf0] }
 0x2c4   :  { %v14479_v44 = vld [vmem:[#allocation7 + $0x1d64] sm:$0xf0] }
 0x2c5   :  { %v13196_v49 = vld [vmem:[#allocation7 + $0x1f48] sm:$0xf]  ;;  %v12941_v19 = vor.u32 %v14479_v44, %v12940_v3  ;;  %7123 = vmatpush.bf16.msrb.mxu1 %v12685_v54  ;;  %v15248_v52 = vadd.f32 %v6896_v48, %v6884_v47 }
 0x2c6   :  { %v14543_v50 = vld [vmem:[#allocation7 + $0x1f64] sm:$0xf0] }
 0x2c7   :  { %v12396_v55 = vld [vmem:[#allocation7 + $0x1908] sm:$0xf]  ;;  %v13197_v57 = vor.u32 %v14543_v50, %v13196_v49  ;;  %7136 = vmatpush.bf16.msrb.mxu2 %v12941_v19  ;;  %v8206_v50 = vadd.f32 %v8205_v26, %v8204_v63  ;;  %v9422_v26 = vld [vmem:[#allocation7 + $0x1e8] sm:$0xf0] }
 0x2c8   :  { %v14343_v56 = vld [vmem:[#allocation7 + $0x1924] sm:$0xf0] }
 0x2c9   :  { %v12652_v58 = vld [vmem:[#allocation7 + $0x1b08] sm:$0xf]  ;;  %v12397_v1 = vor.u32 %v14343_v56, %v12396_v55  ;;  %7149 = vmatpush.bf16.msrb.mxu3 %v13197_v57  ;;  %v6872_v57 = vpop.f32.mrf.mxu1  ;;  %v8256_v0 = vmul.f32 0.5, %v8206_v50  ;;  %v9390_v50 = vld [vmem:[#allocation7 + $0x1a8] sm:$0xf0] }
 0x2ca   :  { %v14407_v59 = vld [vmem:[#allocation7 + $0x1b24] sm:$0xf0]  ;;  %v9902_v57 = vld [vmem:[#allocation7 + $0x5a8] sm:$0xf0] }
 0x2cb   :  { %v12908_v60 = vld [vmem:[#allocation7 + $0x1d08] sm:$0xf]  ;;  %v12653_v2 = vor.u32 %v14407_v59, %v12652_v58  ;;  %7111 = vmatpush.bf16.msrb.mxu0 %v12397_v1  ;;  %v15251_v48 = vsub.f32 %v15225_v46, %v8256_v0  ;;  %v13643_v0 = vld [vmem:[#allocation7 + $0x34c] sm:$0xf] }
 0x2cc   :  { %v14471_v61 = vld [vmem:[#allocation7 + $0x1d24] sm:$0xf0] }
 0x2cd   :  { %v13164_v9 = vld [vmem:[#allocation7 + $0x1f08] sm:$0xf]  ;;  %v12909_v7 = vor.u32 %v14471_v61, %v12908_v60  ;;  %7124 = vmatpush.bf16.msrb.mxu1 %v12653_v2  ;;  %v8272_v46 = vmul.f32 %v15251_v48, %v15251_v48 }
 0x2ce   :  { %v14535_v62 = vld [vmem:[#allocation7 + $0x1f24] sm:$0xf0] }
 0x2cf   :  { %v12364_v5 = vld [vmem:[#allocation7 + $0x18c8] sm:$0xf]  ;;  %v13165_v8 = vor.u32 %v14535_v62, %v13164_v9  ;;  %7137 = vmatpush.bf16.msrb.mxu2 %v12909_v7 }
 0x2d0   :  { %v14335_v6 = vld [vmem:[#allocation7 + $0x18e4] sm:$0xf0] }
 0x2d1   :  { %v12620_v12 = vld [vmem:[#allocation7 + $0x1ac8] sm:$0xf]  ;;  %v12365_v25 = vor.u32 %v14335_v6, %v12364_v5  ;;  %7150 = vmatpush.bf16.msrb.mxu3 %v13165_v8 }
 0x2d2   :  { %v14399_v13 = vld [vmem:[#allocation7 + $0x1ae4] sm:$0xf0] }
 0x2d3   :  { %v12876_v14 = vld [vmem:[#allocation7 + $0x1cc8] sm:$0xf]  ;;  %v12621_v27 = vor.u32 %v14399_v13, %v12620_v12  ;;  %7112 = vmatpush.bf16.msrb.mxu0 %v12365_v25  ;;  %v6898_v25 = vpop.f32.mrf.mxu3 }
 0x2d4   :  { %v14463_v16 = vld [vmem:[#allocation7 + $0x1ce4] sm:$0xf0]  ;;  %v9838_v25 = vld [vmem:[#allocation7 + $0x528] sm:$0xf0] }
 0x2d5   :  { %v13132_v20 = vld [vmem:[#allocation7 + $0x1ec8] sm:$0xf]  ;;  %v12877_v35 = vor.u32 %v14463_v16, %v12876_v14  ;;  %7125 = vmatpush.bf16.msrb.mxu1 %v12621_v27  ;;  %v6885_v16 = vpop.f32.mrf.mxu2  ;;  %v13659_v27 = vld [vmem:[#allocation7 + $0x3cc] sm:$0xf] }
 0x2d6   :  { %v14527_v21 = vld [vmem:[#allocation7 + $0x1ee4] sm:$0xf0] }
 0x2d7   :  { %v12332_v30 = vld [vmem:[#allocation7 + $0x1888] sm:$0xf]  ;;  %v13133_v53 = vor.u32 %v14527_v21, %v13132_v20  ;;  %7138 = vmatpush.bf16.msrb.mxu2 %v12877_v35  ;;  %v13595_v21 = vld [vmem:[#allocation7 + $0x1cc] sm:$0xf] }
 0x2d8   :  { %v14327_v34 = vld [vmem:[#allocation7 + $0x18a4] sm:$0xf0] }
 0x2d9   :  { %v12588_v43 = vld [vmem:[#allocation7 + $0x1a88] sm:$0xf]  ;;  %v12333_v54 = vor.u32 %v14327_v34, %v12332_v30  ;;  %7151 = vmatpush.bf16.msrb.mxu3 %v13133_v53  ;;  %v9678_v30 = vld [vmem:[#allocation7 + $0x3e8] sm:$0xf0] }
 0x2da   :  { %v14391_v24 = vld [vmem:[#allocation7 + $0x1aa4] sm:$0xf0]  ;;  %v13723_v34 = vld [vmem:[#allocation7 + $0x5cc] sm:$0xf] }
 0x2db   :  { %v12844_v45 = vld [vmem:[#allocation7 + $0x1c88] sm:$0xf]  ;;  %v12589_v55 = vor.u32 %v14391_v24, %v12588_v43  ;;  %7113 = vmatpush.bf16.msrb.mxu0 %v12333_v54  ;;  %v13787_v43 = vld [vmem:[#allocation7 + $0x7cc] sm:$0xf]  ;;  %v9937_v51 = vor.u32 %v13723_v34, %v9934_v42 }
 0x2dc   :  { %v14455_v3 = vld [vmem:[#allocation7 + $0x1ca4] sm:$0xf0]  ;;  %v10190_v24 = vld [vmem:[#allocation7 + $0x7e8] sm:$0xf0] }
 0x2dd   :  { %v13100_v44 = vld [vmem:[#allocation7 + $0x1e88] sm:$0xf]  ;;  %v12845_v58 = vor.u32 %v14455_v3, %v12844_v45  ;;  %7126 = vmatpush.bf16.msrb.mxu1 %v12589_v55  ;;  %v9425_v3 = vor.u32 %v13595_v21, %v9422_v26  ;;  %v10193_v54 = vor.u32 %v13787_v43, %v10190_v24  ;;  %v13651_v55 = vld [vmem:[#allocation7 + $0x38c] sm:$0xf]  ;;  %v6922_v24 = vpop.f32.mrf.mxu1 }
 0x2de   :  { %v14519_v49 = vld [vmem:[#allocation7 + $0x1ea4] sm:$0xf0]  ;;  %v9582_v21 = vld [vmem:[#allocation7 + $0x328] sm:$0xf0] }
 0x2df   :  { %v12300_v56 = vld [vmem:[#allocation7 + $0x1848] sm:$0xf]  ;;  %v13101_v59 = vor.u32 %v14519_v49, %v13100_v44  ;;  %7139 = vmatpush.bf16.msrb.mxu2 %v12845_v58  ;;  %v9681_v44 = vor.u32 %v13659_v27, %v9678_v30  ;;  %v13587_v49 = vld [vmem:[#allocation7 + $0x18c] sm:$0xf] }
 0x2e0   :  { %v14319_v19 = vld [vmem:[#allocation7 + $0x1864] sm:$0xf0]  ;;  %v13779_v58 = vld [vmem:[#allocation7 + $0x78c] sm:$0xf] }
 0x2e1   :  { %v12556_v60 = vld [vmem:[#allocation7 + $0x1a48] sm:$0xf]  ;;  %v12301_v2 = vor.u32 %v14319_v19, %v12300_v56  ;;  %7152 = vmatpush.bf16.msrb.mxu3 %v13101_v59  ;;  %v9646_v56 = vld [vmem:[#allocation7 + $0x3a8] sm:$0xf0] }
 0x2e2   :  { %v14383_v61 = vld [vmem:[#allocation7 + $0x1a64] sm:$0xf0]  ;;  %v13715_v19 = vld [vmem:[#allocation7 + $0x58c] sm:$0xf] }
 0x2e3   :  { %v12812_v9 = vld [vmem:[#allocation7 + $0x1c48] sm:$0xf]  ;;  %v12557_v4 = vor.u32 %v14383_v61, %v12556_v60  ;;  %7114 = vmatpush.bf16.msrb.mxu0 %v12301_v2  ;;  %v10158_v59 = vld [vmem:[#allocation7 + $0x7a8] sm:$0xf0]  ;;  %v9393_v60 = vor.u32 %v13587_v49, %v9390_v50  ;;  %v9649_v61 = vor.u32 %v13651_v55, %v9646_v56 }
 0x2e4   :  { %v14447_v62 = vld [vmem:[#allocation7 + $0x1c64] sm:$0xf0]  ;;  %v13707_v2 = vld [vmem:[#allocation7 + $0x54c] sm:$0xf] }
 0x2e5   :  { %v13068_v32 = vld [vmem:[#allocation7 + $0x1e48] sm:$0xf]  ;;  %v12813_v8 = vor.u32 %v14447_v62, %v12812_v9  ;;  %7127 = vmatpush.bf16.msrb.mxu1 %v12557_v4  ;;  %v13579_v9 = vld [vmem:[#allocation7 + $0x14c] sm:$0xf] }
 0x2e6   :  { %v14511_v63 = vld [vmem:[#allocation7 + $0x1e64] sm:$0xf0]  ;;  %v9358_v62 = vld [vmem:[#allocation7 + $0x168] sm:$0xf0] }
 0x2e7   :  { %v12268_v1 = vld [vmem:[#allocation7 + $0x1808] sm:$0xf]  ;;  %v13069_v12 = vor.u32 %v14511_v63, %v13068_v32  ;;  %7140 = vmatpush.bf16.msrb.mxu2 %v12813_v8  ;;  %v9905_v32 = vor.u32 %v13715_v19, %v9902_v57  ;;  %v10161_v63 = vor.u32 %v13779_v58, %v10158_v59  ;;  %v9870_v4 = vld [vmem:[#allocation7 + $0x568] sm:$0xf0]  ;;  %v9361_v8 = vor.u32 %v13579_v9, %v9358_v62  ;;  %v6935_v9 = vpop.f32.mrf.mxu2 }
 0x2e8   :  { %v14311_v5 = vld [vmem:[#allocation7 + $0x1824] sm:$0xf0]  ;;  %v13699_v26 = vld [vmem:[#allocation7 + $0x50c] sm:$0xf] }
 0x2e9   :  { %v12524_v6 = vld [vmem:[#allocation7 + $0x1a08] sm:$0xf]  ;;  %v12269_v35 = vor.u32 %v14311_v5, %v12268_v1  ;;  %7153 = vmatpush.bf16.msrb.mxu3 %v13069_v12  ;;  %v9614_v1 = vld [vmem:[#allocation7 + $0x368] sm:$0xf0] }
 0x2ea   :  { %v14375_v7 = vld [vmem:[#allocation7 + $0x1a24] sm:$0xf0]  ;;  %v13771_v5 = vld [vmem:[#allocation7 + $0x74c] sm:$0xf]  ;;  %v9617_v12 = vor.u32 %v13643_v0, %v9614_v1  ;;  %v6948_v1 = vpop.f32.mrf.mxu3 }
 0x2eb   :  { %v12780_v13 = vld [vmem:[#allocation7 + $0x1c08] sm:$0xf]  ;;  %v12525_v53 = vor.u32 %v14375_v7, %v12524_v6  ;;  %7115 = vmatpush.bf16.msrb.mxu0 %v12269_v35  ;;  %v10126_v6 = vld [vmem:[#allocation7 + $0x768] sm:$0xf0]  ;;  %v8280_v7 = vsel %vm232_vm6, %v8272_v46, 0.0  ;;  %v6909_v35 = vpop.f32.mrf.mxu0 }
 0x2ec   :  { %v14439_v14 = vld [vmem:[#allocation7 + $0x1c24] sm:$0xf0]  ;;  %v10129_v16 = vor.u32 %v13771_v5, %v10126_v6  ;;  %v13763_v27 = vld [vmem:[#allocation7 + $0x70c] sm:$0xf]  ;;  %v8281_v34 = vrot.slane %v8280_v7, 4 }
 0x2ed   :  { %v13036_v15 = vld [vmem:[#allocation7 + $0x1e08] sm:$0xf]  ;;  %v12781_v45 = vor.u32 %v14439_v14, %v12780_v13  ;;  %7128 = vmatpush.bf16.msrb.mxu1 %v12525_v53  ;;  %v13571_v13 = vld [vmem:[#allocation7 + $0x10c] sm:$0xf]  ;;  %v6910_v53 = vadd.f32 %v6909_v35, %v15248_v52 }
 0x2ee   :  { %v14503_v20 = vld [vmem:[#allocation7 + $0x1e24] sm:$0xf0]  ;;  %7116 = vmatmul.bf16.vlgmr.msrb.gmra.mxu0 %v15191_v31  ;;  %v9326_v14 = vld [vmem:[#allocation7 + $0x128] sm:$0xf0]  ;;  %v8282_v57 = vadd.f32 %v8281_v34, %v8280_v7 }
 0x2ef   :  { %v13037_v47 = vor.u32 %v14503_v20, %v13036_v15  ;;  %7141 = vmatpush.bf16.msrb.mxu2 %v12781_v45  ;;  %7160 = vmatpush.bf16.msra.mxu0 %v9425_v3  ;;  %v9873_v15 = vor.u32 %v13707_v2, %v9870_v4  ;;  %v13635_v20 = vld [vmem:[#allocation7 + $0x30c] sm:$0xf]  ;;  %v9329_v42 = vor.u32 %v13571_v13, %v9326_v14 }
 0x2f0   :  { %7129 = vmatmul.bf16.vlgmr.msrb.gmra.mxu1 %v15195_v38  ;;  %v10094_v30 = vld [vmem:[#allocation7 + $0x728] sm:$0xf0]  ;;  %v9585_v43 = vor.u32 %v13635_v20, %v9582_v21  ;;  %v9841_v3 = vor.u32 %v13699_v26, %v9838_v25  ;;  %v8283_v6 = vrot.slane %v8282_v57, 2  ;;  %v6924_v20 = vpop.f32.mrf.mxu1 }
 0x2f1   :  { %7154 = vmatpush.bf16.msrb.mxu3 %v13037_v47  ;;  %7173 = vmatpush.bf16.msra.mxu1 %v9681_v44  ;;  %v13563_v45 = vld [vmem:[#allocation7 + $0xcc] sm:$0xf]  ;;  %v10097_v44 = vor.u32 %v13763_v27, %v10094_v30 }
 0x2f2   :  { %7142 = vmatmul.bf16.vlgmr.msrb.gmra.mxu2 %v15193_v33  ;;  %v9294_v47 = vld [vmem:[#allocation7 + $0xe8] sm:$0xf0] }
 0x2f3   :  { %7186 = vmatpush.bf16.msra.mxu2 %v9937_v51  ;;  %7161 = vmatpush.bf16.msra.mxu0 %v9393_v60  ;;  %v13627_v49 = vld [vmem:[#allocation7 + $0x2cc] sm:$0xf]  ;;  %v9297_v52 = vor.u32 %v13563_v45, %v9294_v47  ;;  %v6911_v7 = vpop.f32.mrf.mxu0  ;;  %v8284_v45 = vadd.f32 %v8283_v6, %v8282_v57  ;;  %v6950_v57 = vpop.f32.mrf.mxu3 }
 0x2f4   :  { %7155 = vmatmul.bf16.vlgmr.msrb.gmra.mxu3 %v15197_v39  ;;  %v9550_v50 = vld [vmem:[#allocation7 + $0x2e8] sm:$0xf0] }
 0x2f5   :  { %7199 = vmatpush.bf16.msra.mxu3 %v10193_v54  ;;  %7174 = vmatpush.bf16.msra.mxu1 %v9649_v61  ;;  %v13691_v51 = vld [vmem:[#allocation7 + $0x4cc] sm:$0xf]  ;;  %v6923_v54 = vadd.f32 %v6922_v24, %v6910_v53  ;;  %v9553_v58 = vor.u32 %v13627_v49, %v9550_v50 }
 0x2f6   :  { %v9806_v55 = vld [vmem:[#allocation7 + $0x4e8] sm:$0xf0] }
 0x2f7   :  { %7187 = vmatpush.bf16.msra.mxu2 %v9905_v32  ;;  %7162 = vmatpush.bf16.msra.mxu0 %v9361_v8  ;;  %v13755_v56 = vld [vmem:[#allocation7 + $0x6cc] sm:$0xf]  ;;  %v9809_v60 = vor.u32 %v13691_v51, %v9806_v55  ;;  %v6936_v0 = vadd.f32 %v6935_v9, %v6923_v54 }
 0x2f8   :  { %v10062_v19 = vld [vmem:[#allocation7 + $0x6e8] sm:$0xf0] }
 0x2f9   :  { %7200 = vmatpush.bf16.msra.mxu3 %v10161_v63  ;;  %7175 = vmatpush.bf16.msra.mxu1 %v9617_v12  ;;  %v13555_v59 = vld [vmem:[#allocation7 + $0x8c] sm:$0xf]  ;;  %v10065_v61 = vor.u32 %v13755_v56, %v10062_v19  ;;  %v15261_v8 = vadd.f32 %v6948_v1, %v6936_v0 }
 0x2fa   :  { %v9262_v46 = vld [vmem:[#allocation7 + $0xa8] sm:$0xf0] }
 0x2fb   :  { %7188 = vmatpush.bf16.msra.mxu2 %v9873_v15  ;;  %7163 = vmatpush.bf16.msra.mxu0 %v9329_v42  ;;  %v13619_v62 = vld [vmem:[#allocation7 + $0x28c] sm:$0xf]  ;;  %v9265_v12 = vor.u32 %v13555_v59, %v9262_v46  ;;  %v8207_v34 = vsel %vm232_vm6, %v15261_v8, 0.0 }
 0x2fc   :  { %v9518_v32 = vld [vmem:[#allocation7 + $0x2a8] sm:$0xf0]  ;;  %v8208_v42 = vrot.slane %v8207_v34, 4 }
 0x2fd   :  { %7201 = vmatpush.bf16.msra.mxu3 %v10129_v16  ;;  %7176 = vmatpush.bf16.msra.mxu1 %v9585_v43  ;;  %v13683_v63 = vld [vmem:[#allocation7 + $0x48c] sm:$0xf]  ;;  %v9521_v13 = vor.u32 %v13619_v62, %v9518_v32 }
 0x2fe   :  { %v9774_v2 = vld [vmem:[#allocation7 + $0x4a8] sm:$0xf0]  ;;  %v8209_v51 = vadd.f32 %v8208_v42, %v8207_v34 }
 0x2ff   :  { %7189 = vmatpush.bf16.msra.mxu2 %v9841_v3  ;;  %v13747_v4 = vld [vmem:[#allocation7 + $0x68c] sm:$0xf]  ;;  %7164 = vmatpush.bf16.msra.mxu0 %v9297_v52  ;;  %v9777_v21 = vor.u32 %v13683_v63, %v9774_v2 }
 0x300   :  { %v10030_v5 = vld [vmem:[#allocation7 + $0x6a8] sm:$0xf0] }
 0x301   :  { %7202 = vmatpush.bf16.msra.mxu3 %v10097_v44  ;;  %7177 = vmatpush.bf16.msra.mxu1 %v9553_v58  ;;  %v13547_v14 = vld [vmem:[#allocation7 + $0x4c] sm:$0xf]  ;;  %v10033_v26 = vor.u32 %v13747_v4, %v10030_v5  ;;  %v6937_v58 = vpop.f32.mrf.mxu2  ;;  %v8285_v4 = vrot.slane %v8284_v45, 1 }
 0x302   :  { %v9230_v15 = vld [vmem:[#allocation7 + $0x68] sm:$0xf0] }
 0x303   :  { %v13611_v16 = vld [vmem:[#allocation7 + $0x24c] sm:$0xf]  ;;  %7190 = vmatpush.bf16.msra.mxu2 %v9809_v60  ;;  %7165 = vmatpush.bf16.msra.mxu0 %v9265_v12  ;;  %v9233_v47 = vor.u32 %v13547_v14, %v9230_v15 }
 0x304   :  { %v9486_v25 = vld [vmem:[#allocation7 + $0x268] sm:$0xf0] }
 0x305   :  { %7203 = vmatpush.bf16.msra.mxu3 %v10065_v61  ;;  %v13675_v27 = vld [vmem:[#allocation7 + $0x44c] sm:$0xf]  ;;  %7178 = vmatpush.bf16.msra.mxu1 %v9521_v13  ;;  %v9489_v3 = vor.u32 %v13611_v16, %v9486_v25  ;;  %v8210_v61 = vrot.slane %v8209_v51, 2 }
 0x306   :  { %v9742_v30 = vld [vmem:[#allocation7 + $0x468] sm:$0xf0] }
 0x307   :  { %v13739_v35 = vld [vmem:[#allocation7 + $0x64c] sm:$0xf]  ;;  %7191 = vmatpush.bf16.msra.mxu2 %v9777_v21  ;;  %v9745_v54 = vor.u32 %v13675_v27, %v9742_v30  ;;  %7166 = vmatpush.bf16.msra.mxu0 %v9233_v47  ;;  %v8211_v5 = vadd.f32 %v8210_v61, %v8209_v51 }
 0x308   :  { %v9998_v53 = vld [vmem:[#allocation7 + $0x668] sm:$0xf0] }
 0x309   :  { %v13539_v43 = vld [vmem:[#allocation7 + $0xc] sm:$0xf]  ;;  %7204 = vmatpush.bf16.msra.mxu3 %v10033_v26  ;;  %v10001_v55 = vor.u32 %v13739_v35, %v9998_v53  ;;  %7179 = vmatpush.bf16.msra.mxu1 %v9489_v3  ;;  %v8212_v20 = vrot.slane %v8211_v5, 1  ;;  %v8286_v53 = vadd.f32 %v8285_v4, %v8284_v45 }
 0x30a   :  { %v9198_v24 = vld [vmem:[#allocation7 + $0x28] sm:$0xf0] }
 0x30b   :  { %v13603_v44 = vld [vmem:[#allocation7 + $0x20c] sm:$0xf]  ;;  %v9201_v32 = vor.u32 %v13539_v43, %v9198_v24  ;;  %7192 = vmatpush.bf16.msra.mxu2 %v9745_v54  ;;  %v8213_v42 = vadd.f32 %v8212_v20, %v8211_v5  ;;  %v6974_v20 = vpop.f32.mrf.mxu1 }
 0x30c   :  { %v9454_v49 = vld [vmem:[#allocation7 + $0x228] sm:$0xf0] }
 0x30d   :  { %v13667_v50 = vld [vmem:[#allocation7 + $0x40c] sm:$0xf]  ;;  %v9457_v63 = vor.u32 %v13603_v44, %v9454_v49  ;;  %7205 = vmatpush.bf16.msra.mxu3 %v10001_v55  ;;  %7167 = vmatpush.bf16.msra.mxu0 %v9201_v32  ;;  %v8257_v49 = vmul.f32 0.5, %v8213_v42 }
 0x30e   :  { %v9710_v56 = vld [vmem:[#allocation7 + $0x428] sm:$0xf0] }
 0x30f   :  { %v13731_v19 = vld [vmem:[#allocation7 + $0x60c] sm:$0xf]  ;;  %v9713_v6 = vor.u32 %v13667_v50, %v9710_v56  ;;  %7180 = vmatpush.bf16.msra.mxu1 %v9457_v63  ;;  %v15268_v58 = vsub.f32 %v15261_v8, %v8257_v49 }
 0x310   :  { %v9966_v52 = vld [vmem:[#allocation7 + $0x628] sm:$0xf0]  ;;  %7168 = vmatmul.bf16.vlgmr.msra.gmra.mxu0 %v15134_v10 }
 0x311   :  { %v13851_v59 = vld [vmem:[#allocation7 + $0x9cc] sm:$0xf]  ;;  %v9969_v7 = vor.u32 %v13731_v19, %v9966_v52  ;;  %7193 = vmatpush.bf16.msra.mxu2 %v9713_v6  ;;  %v8336_v52 = vmul.f32 0.5, %v8286_v53  ;;  %v8273_v61 = vmul.f32 %v15268_v58, %v15268_v58 }
 0x312   :  { %v10446_v46 = vld [vmem:[#allocation7 + $0x9e8] sm:$0xf0]  ;;  %7181 = vmatmul.bf16.vlgmr.msra.gmra.mxu1 %v15143_v18 }
 0x313   :  { %v13915_v60 = vld [vmem:[#allocation7 + $0xbcc] sm:$0xf]  ;;  %v10449_v12 = vor.u32 %v13851_v59, %v10446_v46  ;;  %7206 = vmatpush.bf16.msra.mxu3 %v9969_v7  ;;  %v15274_v4 = vadd.f32 1e-05, %v8336_v52  ;;  %v8287_v5 = vsel %vm232_vm6, %v8273_v61, 0.0  ;;  %v6961_v7 = vpop.f32.mrf.mxu0  ;;  %v6987_v52 = vpop.f32.mrf.mxu2 }
 0x314   :  { %v10702_v9 = vld [vmem:[#allocation7 + $0xbe8] sm:$0xf0]  ;;  %7194 = vmatmul.bf16.vlgmr.msra.gmra.mxu2 %v15136_v11  ;;  %v7000_v61 = vpop.f32.mrf.mxu3 }
 0x315   :  { %v13979_v62 = vld [vmem:[#allocation7 + $0xdcc] sm:$0xf]  ;;  %v10705_v13 = vor.u32 %v13915_v60, %v10702_v9  ;;  %7212 = vmatpush.bf16.msrb.mxu0 %v10449_v12  ;;  %v8288_v12 = vrot.slane %v8287_v5, 4  ;;  %14644 = vrsqrt.f32 %v15274_v4  ;;  %vm8359_vm1 = vweird.f32 %v15274_v4 }
 0x316   :  { %v10958_v0 = vld [vmem:[#allocation7 + $0xde8] sm:$0xf0]  ;;  %7207 = vmatmul.bf16.vlgmr.msra.gmra.mxu3 %v15141_v17 }
 0x317   :  { %v14043_v1 = vld [vmem:[#allocation7 + $0xfcc] sm:$0xf]  ;;  %v10961_v21 = vor.u32 %v13979_v62, %v10958_v0  ;;  %7225 = vmatpush.bf16.msrb.mxu1 %v10705_v13 }
 0x318   :  { %v11214_v2 = vld [vmem:[#allocation7 + $0xfe8] sm:$0xf0] }
 0x319   :  { %v13843_v14 = vld [vmem:[#allocation7 + $0x98c] sm:$0xf]  ;;  %v11217_v26 = vor.u32 %v14043_v1, %v11214_v2  ;;  %7238 = vmatpush.bf16.msrb.mxu2 %v10961_v21 }
 0x31a   :  { %v10414_v15 = vld [vmem:[#allocation7 + $0x9a8] sm:$0xf0] }
 0x31b   :  { %v13907_v16 = vld [vmem:[#allocation7 + $0xb8c] sm:$0xf]  ;;  %v10417_v43 = vor.u32 %v13843_v14, %v10414_v15  ;;  %7251 = vmatpush.bf16.msrb.mxu3 %v11217_v26 }
 0x31c   :  { %v10670_v25 = vld [vmem:[#allocation7 + $0xba8] sm:$0xf0] }
 0x31d   :  { %v13971_v27 = vld [vmem:[#allocation7 + $0xd8c] sm:$0xf]  ;;  %v10673_v24 = vor.u32 %v13907_v16, %v10670_v25  ;;  %7213 = vmatpush.bf16.msrb.mxu0 %v10417_v43 }
 0x31e   :  { %v10926_v30 = vld [vmem:[#allocation7 + $0xda8] sm:$0xf0] }
 0x31f   :  { %v14035_v34 = vld [vmem:[#allocation7 + $0xf8c] sm:$0xf]  ;;  %v10929_v50 = vor.u32 %v13971_v27, %v10926_v30  ;;  %7226 = vmatpush.bf16.msrb.mxu1 %v10673_v24  ;;  %v14660_v30 = vld [vmem:[#allocation8] sm:$0xff] }
 0x320   :  { %v11182_v35 = vld [vmem:[#allocation7 + $0xfa8] sm:$0xf0] }
 0x321   :  { %v13835_v47 = vld [vmem:[#allocation7 + $0x94c] sm:$0xf]  ;;  %v11185_v51 = vor.u32 %v14035_v34, %v11182_v35  ;;  %7239 = vmatpush.bf16.msrb.mxu2 %v10929_v50  ;;  %v1402_v34 = vperm.slane %v14660_v30, 2  ;;  %v8289_v35 = vadd.f32 %v8288_v12, %v8287_v5 }
 0x322   :  { %v10382_v3 = vld [vmem:[#allocation7 + $0x968] sm:$0xf0] }
 0x323   :  { %v13899_v44 = vld [vmem:[#allocation7 + $0xb4c] sm:$0xf]  ;;  %v10385_v59 = vor.u32 %v13835_v47, %v10382_v3  ;;  %7252 = vmatpush.bf16.msrb.mxu3 %v11185_v51  ;;  %v6962_v24 = vadd.f32 %v6961_v7, %v1402_v34  ;;  %v8290_v47 = vrot.slane %v8289_v35, 2 }
 0x324   :  { %v10638_v54 = vld [vmem:[#allocation7 + $0xb68] sm:$0xf0] }
 0x325   :  { %v13963_v55 = vld [vmem:[#allocation7 + $0xd4c] sm:$0xf]  ;;  %v10641_v46 = vor.u32 %v13899_v44, %v10638_v54  ;;  %7214 = vmatpush.bf16.msrb.mxu0 %v10385_v59  ;;  %v8291_v59 = vadd.f32 %v8290_v47, %v8289_v35 }
 0x326   :  { %v10894_v56 = vld [vmem:[#allocation7 + $0xd68] sm:$0xf0] }
 0x327   :  { %v14027_v19 = vld [vmem:[#allocation7 + $0xf4c] sm:$0xf]  ;;  %v10897_v9 = vor.u32 %v13963_v55, %v10894_v56  ;;  %7227 = vmatpush.bf16.msrb.mxu1 %v10641_v46 }
 0x328   :  { %v11150_v45 = vld [vmem:[#allocation7 + $0xf68] sm:$0xf0] }
 0x329   :  { %v13827_v60 = vld [vmem:[#allocation7 + $0x90c] sm:$0xf]  ;;  %v11153_v62 = vor.u32 %v14027_v19, %v11150_v45  ;;  %7240 = vmatpush.bf16.msrb.mxu2 %v10897_v9  ;;  %v6975_v45 = vadd.f32 %v6974_v20, %v6962_v24 }
 0x32a   :  { %v10350_v57 = vld [vmem:[#allocation7 + $0x928] sm:$0xf0] }
 0x32b   :  { %v13891_v32 = vld [vmem:[#allocation7 + $0xb0c] sm:$0xf]  ;;  %v10353_v13 = vor.u32 %v13827_v60, %v10350_v57  ;;  %7253 = vmatpush.bf16.msrb.mxu3 %v11153_v62  ;;  %v6988_v9 = vadd.f32 %v6987_v52, %v6975_v45  ;;  %v6963_v62 = vpop.f32.mrf.mxu0 }
 0x32c   :  { %v10606_v8 = vld [vmem:[#allocation7 + $0xb28] sm:$0xf0] }
 0x32d   :  { %v13955_v63 = vld [vmem:[#allocation7 + $0xd0c] sm:$0xf]  ;;  %v10609_v14 = vor.u32 %v13891_v32, %v10606_v8  ;;  %7215 = vmatpush.bf16.msrb.mxu0 %v10353_v13  ;;  %v8292_v32 = vrot.slane %v8291_v59, 1 }
 0x32e   :  { %v10862_v0 = vld [vmem:[#allocation7 + $0xd28] sm:$0xf0] }
 0x32f   :  { %v14019_v1 = vld [vmem:[#allocation7 + $0xf0c] sm:$0xf]  ;;  %v10865_v21 = vor.u32 %v13955_v63, %v10862_v0  ;;  %7228 = vmatpush.bf16.msrb.mxu1 %v10609_v14  ;;  %v15278_v14 = vadd.f32 %v7000_v61, %v6988_v9 }
 0x330   :  { %v11118_v2 = vld [vmem:[#allocation7 + $0xf28] sm:$0xf0] }
 0x331   :  { %v13819_v6 = vld [vmem:[#allocation7 + $0x8cc] sm:$0xf]  ;;  %v11121_v26 = vor.u32 %v14019_v1, %v11118_v2  ;;  %7241 = vmatpush.bf16.msrb.mxu2 %v10865_v21  ;;  %v6976_v2 = vpop.f32.mrf.mxu1 }
 0x332   :  { %v10318_v15 = vld [vmem:[#allocation7 + $0x8e8] sm:$0xf0] }
 0x333   :  { %v13883_v16 = vld [vmem:[#allocation7 + $0xacc] sm:$0xf]  ;;  %v10321_v3 = vor.u32 %v13819_v6, %v10318_v15  ;;  %7254 = vmatpush.bf16.msrb.mxu3 %v11121_v26  ;;  %v15280_v15 = vpop.eup %14644 }
 0x334   :  { %v10574_v25 = vld [vmem:[#allocation7 + $0xae8] sm:$0xf0]  ;;  %v8354_v24 = vmul.f32 %v15280_v15, %v15274_v4  ;;  %vm8360_vm14 = vweird.f32 %v15280_v15 }
 0x335   :  { %v13947_v27 = vld [vmem:[#allocation7 + $0xccc] sm:$0xf]  ;;  %v10577_v44 = vor.u32 %v13883_v16, %v10574_v25  ;;  %7216 = vmatpush.bf16.msrb.mxu0 %v10321_v3  ;;  %v8293_v16 = vadd.f32 %v8292_v32, %v8291_v59  ;;  %vm15309_vm3 = vmor %vm8359_vm1, %vm8360_vm14 }
 0x336   :  { %v10830_v53 = vld [vmem:[#allocation7 + $0xce8] sm:$0xf0]  ;;  %v8355_v62 = vmul.f32 %v15280_v15, %v8354_v24 }
 0x337   :  { %v14011_v42 = vld [vmem:[#allocation7 + $0xecc] sm:$0xf]  ;;  %v10833_v51 = vor.u32 %v13947_v27, %v10830_v53  ;;  %7229 = vmatpush.bf16.msrb.mxu1 %v10577_v44  ;;  %v8337_v34 = vmul.f32 0.5, %v8293_v16 }
 0x338   :  { %v11086_v43 = vld [vmem:[#allocation7 + $0xee8] sm:$0xf0] }
 0x339   :  { %v13811_v49 = vld [vmem:[#allocation7 + $0x88c] sm:$0xf]  ;;  %v11089_v54 = vor.u32 %v14011_v42, %v11086_v43  ;;  %7242 = vmatpush.bf16.msrb.mxu2 %v10833_v51  ;;  %v6989_v51 = vpop.f32.mrf.mxu2 }
 0x33a   :  { %v10286_v50 = vld [vmem:[#allocation7 + $0x8a8] sm:$0xf0] }
 0x33b   :  { %v13875_v55 = vld [vmem:[#allocation7 + $0xa8c] sm:$0xf]  ;;  %v10289_v8 = vor.u32 %v13811_v49, %v10286_v50  ;;  %7255 = vmatpush.bf16.msrb.mxu3 %v11089_v54  ;;  %v15284_v54 = vadd.f32 1e-05, %v8337_v34 }
 0x33c   :  { %v10542_v56 = vld [vmem:[#allocation7 + $0xaa8] sm:$0xf0] }
 0x33d   :  { %v13939_v19 = vld [vmem:[#allocation7 + $0xc8c] sm:$0xf]  ;;  %v10545_v63 = vor.u32 %v13875_v55, %v10542_v56  ;;  %7217 = vmatpush.bf16.msrb.mxu0 %v10289_v8  ;;  %14646 = vrsqrt.f32 %v15284_v54  ;;  %vm8369_vm15 = vweird.f32 %v15284_v54 }
 0x33e   :  { %v10798_v46 = vld [vmem:[#allocation7 + $0xca8] sm:$0xf0] }
 0x33f   :  { %v14003_v60 = vld [vmem:[#allocation7 + $0xe8c] sm:$0xf]  ;;  %v10801_v5 = vor.u32 %v13939_v19, %v10798_v46  ;;  %7230 = vmatpush.bf16.msrb.mxu1 %v10545_v63  ;;  %v7002_v19 = vpop.f32.mrf.mxu3 }
 0x340   :  { %v11054_v57 = vld [vmem:[#allocation7 + $0xea8] sm:$0xf0] }
 0x341   :  { %v13803_v0 = vld [vmem:[#allocation7 + $0x84c] sm:$0xf]  ;;  %v11057_v6 = vor.u32 %v14003_v60, %v11054_v57  ;;  %7243 = vmatpush.bf16.msrb.mxu2 %v10801_v5 }
 0x342   :  { %v10254_v1 = vld [vmem:[#allocation7 + $0x868] sm:$0xf0] }
 0x343   :  { %v13867_v7 = vld [vmem:[#allocation7 + $0xa4c] sm:$0xf]  ;;  %v10257_v35 = vor.u32 %v13803_v0, %v10254_v1  ;;  %7256 = vmatpush.bf16.msrb.mxu3 %v11057_v6 }
 0x344   :  { %v10510_v12 = vld [vmem:[#allocation7 + $0xa68] sm:$0xf0] }
 0x345   :  { %v13931_v13 = vld [vmem:[#allocation7 + $0xc4c] sm:$0xf]  ;;  %v10513_v53 = vor.u32 %v13867_v7, %v10510_v12  ;;  %7218 = vmatpush.bf16.msrb.mxu0 %v10257_v35 }
 0x346   :  { %v10766_v20 = vld [vmem:[#allocation7 + $0xc68] sm:$0xf0] }
 0x347   :  { %v13995_v21 = vld [vmem:[#allocation7 + $0xe4c] sm:$0xf]  ;;  %v10769_v47 = vor.u32 %v13931_v13, %v10766_v20  ;;  %7231 = vmatpush.bf16.msrb.mxu1 %v10513_v53 }
 0x348   :  { %v11022_v26 = vld [vmem:[#allocation7 + $0xe68] sm:$0xf0] }
 0x349   :  { %v13795_v25 = vld [vmem:[#allocation7 + $0x80c] sm:$0xf]  ;;  %v11025_v3 = vor.u32 %v13995_v21, %v11022_v26  ;;  %7244 = vmatpush.bf16.msrb.mxu2 %v10769_v47  ;;  %v8356_v26 = vmul.f32 0.5, %v8355_v62 }
 0x34a   :  { %v10222_v27 = vld [vmem:[#allocation7 + $0x828] sm:$0xf0] }
 0x34b   :  { %v13859_v30 = vld [vmem:[#allocation7 + $0xa0c] sm:$0xf]  ;;  %v10225_v46 = vor.u32 %v13795_v25, %v10222_v27  ;;  %7257 = vmatpush.bf16.msrb.mxu3 %v11025_v3  ;;  %v15288_v25 = vpop.eup %14646  ;;  %v8357_v51 = vsub.f32 1.5, %v8356_v26 }
 0x34c   :  { %v10478_v42 = vld [vmem:[#allocation7 + $0xa28] sm:$0xf0]  ;;  %v8364_v53 = vmul.f32 %v15288_v25, %v15284_v54  ;;  %vm8370_vm13 = vweird.f32 %v15288_v25 }
 0x34d   :  { %v13923_v43 = vld [vmem:[#allocation7 + $0xc0c] sm:$0xf]  ;;  %v10481_v60 = vor.u32 %v13859_v30, %v10478_v42  ;;  %7219 = vmatpush.bf16.msrb.mxu0 %v10225_v46  ;;  %vm8371_vm0 = vmor %vm8369_vm15, %vm8370_vm13  ;;  %vm8450_vm13 = vcmask 1042434  }
 0x34e   :  { %v10734_v44 = vld [vmem:[#allocation7 + $0xc28] sm:$0xf0] }
 0x34f   :  { %v13987_v49 = vld [vmem:[#allocation7 + $0xe0c] sm:$0xf]  ;;  %v10737_v32 = vor.u32 %v13923_v43, %v10734_v44  ;;  %7232 = vmatpush.bf16.msrb.mxu1 %v10481_v60 }
 0x350   :  { %v10990_v50 = vld [vmem:[#allocation7 + $0xe28] sm:$0xf0]  ;;  %7220 = vmatmul.bf16.vlgmr.msrb.gmra.mxu0 %v15167_v22 }
 0x351   :  { %v14107_v55 = vld [vmem:[#allocation7 + $0x11cc] sm:$0xf]  ;;  %v10993_v8 = vor.u32 %v13987_v49, %v10990_v50  ;;  %7245 = vmatpush.bf16.msrb.mxu2 %v10737_v32 }
 0x352   :  { %v11470_v56 = vld [vmem:[#allocation7 + $0x11e8] sm:$0xf0]  ;;  %7233 = vmatmul.bf16.vlgmr.msrb.gmra.mxu1 %v15171_v28 }
 0x353   :  { %v14171_v45 = vld [vmem:[#allocation7 + $0x13cc] sm:$0xf]  ;;  %v11473_v63 = vor.u32 %v14107_v55, %v11470_v56  ;;  %7258 = vmatpush.bf16.msrb.mxu3 %v10993_v8  ;;  %v8365_v55 = vmul.f32 %v15288_v25, %v8364_v53 }
 0x354   :  { %v11726_v52 = vld [vmem:[#allocation7 + $0x13e8] sm:$0xf0]  ;;  %7246 = vmatmul.bf16.vlgmr.msrb.gmra.mxu2 %v15169_v23 }
 0x355   :  { %v14235_v59 = vld [vmem:[#allocation7 + $0x15cc] sm:$0xf]  ;;  %v11729_v0 = vor.u32 %v14171_v45, %v11726_v52  ;;  %7264 = vmatpush.bf16.msra.mxu0 %v11473_v63  ;;  %v8366_v46 = vmul.f32 0.5, %v8365_v55  ;;  %v8358_v63 = vmul.f32 %v15280_v15, %v8357_v51 }
 0x356   :  { %v11982_v57 = vld [vmem:[#allocation7 + $0x15e8] sm:$0xf0]  ;;  %7259 = vmatmul.bf16.vlgmr.msrb.gmra.mxu3 %v15173_v29 }
 0x357   :  { %v14299_v61 = vld [vmem:[#allocation7 + $0x17cc] sm:$0xf]  ;;  %v11985_v5 = vor.u32 %v14235_v59, %v11982_v57  ;;  %7277 = vmatpush.bf16.msra.mxu1 %v11729_v0  ;;  %v8367_v0 = vsub.f32 1.5, %v8366_v46  ;;  %v8362_v4 = vsel %vm15309_vm3, %v15280_v15, %v8358_v63 }
 0x358   :  { %v12238_v9 = vld [vmem:[#allocation7 + $0x17e8] sm:$0xf0] }
 0x359   :  { %v14099_v1 = vld [vmem:[#allocation7 + $0x118c] sm:$0xf]  ;;  %v12241_v6 = vor.u32 %v14299_v61, %v12238_v9  ;;  %7290 = vmatpush.bf16.msra.mxu2 %v11985_v5 }
 0x35a   :  { %v11438_v2 = vld [vmem:[#allocation7 + $0x11a8] sm:$0xf0] }
 0x35b   :  { %v14163_v7 = vld [vmem:[#allocation7 + $0x138c] sm:$0xf]  ;;  %v11441_v27 = vor.u32 %v14099_v1, %v11438_v2  ;;  %7303 = vmatpush.bf16.msra.mxu3 %v12241_v6  ;;  %v7013_v1 = vpop.f32.mrf.mxu0 }
 0x35c   :  { %v11694_v12 = vld [vmem:[#allocation7 + $0x13a8] sm:$0xf0] }
 0x35d   :  { %v14227_v13 = vld [vmem:[#allocation7 + $0x158c] sm:$0xf]  ;;  %v11697_v30 = vor.u32 %v14163_v7, %v11694_v12  ;;  %7265 = vmatpush.bf16.msra.mxu0 %v11441_v27 }
 0x35e   :  { %v11950_v16 = vld [vmem:[#allocation7 + $0x15a8] sm:$0xf0] }
 0x35f   :  { %v14291_v20 = vld [vmem:[#allocation7 + $0x178c] sm:$0xf]  ;;  %v11953_v42 = vor.u32 %v14227_v13, %v11950_v16  ;;  %7278 = vmatpush.bf16.msra.mxu1 %v11697_v30  ;;  %v7014_v13 = vadd.f32 %v7013_v1, %v15278_v14  ;;  %v7026_v16 = vpop.f32.mrf.mxu1 }
 0x360   :  { %v12206_v21 = vld [vmem:[#allocation7 + $0x17a8] sm:$0xf0] }
 0x361   :  { %v14091_v34 = vld [vmem:[#allocation7 + $0x114c] sm:$0xf]  ;;  %v12209_v43 = vor.u32 %v14291_v20, %v12206_v21  ;;  %7291 = vmatpush.bf16.msra.mxu2 %v11953_v42  ;;  %v8368_v20 = vmul.f32 %v15288_v25, %v8367_v0  ;;  %v7027_v42 = vadd.f32 %v7026_v16, %v7014_v13 }
 0x362   :  { %v11406_v35 = vld [vmem:[#allocation7 + $0x1168] sm:$0xf0] }
 0x363   :  { %v14155_v24 = vld [vmem:[#allocation7 + $0x134c] sm:$0xf]  ;;  %v11409_v56 = vor.u32 %v14091_v34, %v11406_v35  ;;  %7304 = vmatpush.bf16.msra.mxu3 %v12209_v43  ;;  %v8372_v14 = vsel %vm8371_vm0, %v15288_v25, %v8368_v20 }
 0x364   :  { %v11662_v47 = vld [vmem:[#allocation7 + $0x1368] sm:$0xf0]  ;;  %v8441_v43 = vrot.slane %v8372_v14, 7 }
 0x365   :  { %v14219_v3 = vld [vmem:[#allocation7 + $0x154c] sm:$0xf]  ;;  %v11665_v19 = vor.u32 %v14155_v24, %v11662_v47  ;;  %7266 = vmatpush.bf16.msra.mxu0 %v11409_v56  ;;  %v7039_v56 = vpop.f32.mrf.mxu2 }
 0x366   :  { %v11918_v44 = vld [vmem:[#allocation7 + $0x1568] sm:$0xf0]  ;;  %v7040_v46 = vadd.f32 %v7039_v56, %v7027_v42 }
 0x367   :  { %v14283_v49 = vld [vmem:[#allocation7 + $0x174c] sm:$0xf]  ;;  %v11921_v60 = vor.u32 %v14219_v3, %v11918_v44  ;;  %7279 = vmatpush.bf16.msra.mxu1 %v11665_v19  ;;  %v15317_v19 = vsel %vm8448_vm2, %v8362_v4, %v8441_v43 }
 0x368   :  { %v12174_v50 = vld [vmem:[#allocation7 + $0x1768] sm:$0xf0] }
 0x369   :  { %v14083_v45 = vld [vmem:[#allocation7 + $0x110c] sm:$0xf]  ;;  %v12177_v57 = vor.u32 %v14283_v49, %v12174_v50  ;;  %7292 = vmatpush.bf16.msra.mxu2 %v11921_v60  ;;  %v7052_v60 = vpop.f32.mrf.mxu3 }
 0x36a   :  { %v11374_v52 = vld [vmem:[#allocation7 + $0x1128] sm:$0xf0] }
 0x36b   :  { %v14147_v59 = vld [vmem:[#allocation7 + $0x130c] sm:$0xf]  ;;  %v11377_v2 = vor.u32 %v14083_v45, %v11374_v52  ;;  %7305 = vmatpush.bf16.msra.mxu3 %v12177_v57  ;;  %v7015_v57 = vpop.f32.mrf.mxu0 }
 0x36c   :  { %v11630_v61 = vld [vmem:[#allocation7 + $0x1328] sm:$0xf0] }
 0x36d   :  { %v14211_v9 = vld [vmem:[#allocation7 + $0x150c] sm:$0xf]  ;;  %v11633_v5 = vor.u32 %v14147_v59, %v11630_v61  ;;  %7267 = vmatpush.bf16.msra.mxu0 %v11377_v2  ;;  %v7041_v14 = vpop.f32.mrf.mxu2 }
 0x36e   :  { %v11886_v62 = vld [vmem:[#allocation7 + $0x1528] sm:$0xf0] }
 0x36f   :  { %v14275_v32 = vld [vmem:[#allocation7 + $0x170c] sm:$0xf]  ;;  %v11889_v21 = vor.u32 %v14211_v9, %v11886_v62  ;;  %7280 = vmatpush.bf16.msra.mxu1 %v11633_v5 }
 0x370   :  { %v12142_v8 = vld [vmem:[#allocation7 + $0x1728] sm:$0xf0] }
 0x371   :  { %v14075_v6 = vld [vmem:[#allocation7 + $0x10cc] sm:$0xf]  ;;  %v12145_v26 = vor.u32 %v14275_v32, %v12142_v8  ;;  %7293 = vmatpush.bf16.msra.mxu2 %v11889_v21  ;;  %v15319_v32 = vadd.f32 %v7052_v60, %v7040_v46  ;;  %v7028_v8 = vpop.f32.mrf.mxu1 }
 0x372   :  { %v11342_v7 = vld [vmem:[#allocation7 + $0x10e8] sm:$0xf0] }
 0x373   :  { %v14139_v12 = vld [vmem:[#allocation7 + $0x12cc] sm:$0xf]  ;;  %v11345_v24 = vor.u32 %v14075_v6, %v11342_v7  ;;  %7306 = vmatpush.bf16.msra.mxu3 %v12145_v26 }
 0x374   :  { %v11598_v27 = vld [vmem:[#allocation7 + $0x12e8] sm:$0xf0] }
 0x375   :  { %v14203_v30 = vld [vmem:[#allocation7 + $0x14cc] sm:$0xf]  ;;  %v11601_v47 = vor.u32 %v14139_v12, %v11598_v27  ;;  %7268 = vmatpush.bf16.msra.mxu0 %v11345_v24 }
 0x376   :  { %v11854_v34 = vld [vmem:[#allocation7 + $0x14e8] sm:$0xf0] }
 0x377   :  { %v14267_v35 = vld [vmem:[#allocation7 + $0x16cc] sm:$0xf]  ;;  %v11857_v25 = vor.u32 %v14203_v30, %v11854_v34  ;;  %7281 = vmatpush.bf16.msra.mxu1 %v11601_v47  ;;  %v7054_v47 = vpop.f32.mrf.mxu3 }
 0x378   :  { %v12110_v53 = vld [vmem:[#allocation7 + $0x16e8] sm:$0xf0] }
 0x379   :  { %v14067_v3 = vld [vmem:[#allocation7 + $0x108c] sm:$0xf]  ;;  %v12113_v49 = vor.u32 %v14267_v35, %v12110_v53  ;;  %7294 = vmatpush.bf16.msra.mxu2 %v11857_v25 }
 0x37a   :  { %v11310_v44 = vld [vmem:[#allocation7 + $0x10a8] sm:$0xf0] }
 0x37b   :  { %v14131_v50 = vld [vmem:[#allocation7 + $0x128c] sm:$0xf]  ;;  %v11313_v15 = vor.u32 %v14067_v3, %v11310_v44  ;;  %7307 = vmatpush.bf16.msra.mxu3 %v12113_v49 }
 0x37c   :  { %v11566_v51 = vld [vmem:[#allocation7 + $0x12a8] sm:$0xf0] }
 0x37d   :  { %v14195_v55 = vld [vmem:[#allocation7 + $0x148c] sm:$0xf]  ;;  %v11569_v61 = vor.u32 %v14131_v50, %v11566_v51  ;;  %7269 = vmatpush.bf16.msra.mxu0 %v11313_v15 }
 0x37e   :  { %v11822_v45 = vld [vmem:[#allocation7 + $0x14a8] sm:$0xf0] }
 0x37f   :  { %v14259_v52 = vld [vmem:[#allocation7 + $0x168c] sm:$0xf]  ;;  %v11825_v63 = vor.u32 %v14195_v55, %v11822_v45  ;;  %7282 = vmatpush.bf16.msra.mxu1 %v11569_v61 }
 0x380   :  { %v12078_v59 = vld [vmem:[#allocation7 + $0x16a8] sm:$0xf0] }
 0x381   :  { %v14059_v9 = vld [vmem:[#allocation7 + $0x104c] sm:$0xf]  ;;  %v12081_v0 = vor.u32 %v14259_v52, %v12078_v59  ;;  %7295 = vmatpush.bf16.msra.mxu2 %v11825_v63 }
 0x382   :  { %v11278_v62 = vld [vmem:[#allocation7 + $0x1068] sm:$0xf0] }
 0x383   :  { %v14123_v1 = vld [vmem:[#allocation7 + $0x124c] sm:$0xf]  ;;  %v11281_v16 = vor.u32 %v14059_v9, %v11278_v62  ;;  %7308 = vmatpush.bf16.msra.mxu3 %v12081_v0 }
 0x384   :  { %v11534_v2 = vld [vmem:[#allocation7 + $0x1268] sm:$0xf0] }
 0x385   :  { %v14187_v5 = vld [vmem:[#allocation7 + $0x144c] sm:$0xf]  ;;  %v11537_v20 = vor.u32 %v14123_v1, %v11534_v2  ;;  %7270 = vmatpush.bf16.msra.mxu0 %v11281_v16 }
 0x386   :  { %v11790_v6 = vld [vmem:[#allocation7 + $0x1468] sm:$0xf0] }
 0x387   :  { %v14251_v7 = vld [vmem:[#allocation7 + $0x164c] sm:$0xf]  ;;  %v11793_v30 = vor.u32 %v14187_v5, %v11790_v6  ;;  %7283 = vmatpush.bf16.msra.mxu1 %v11537_v20 }
 0x388   :  { %v12046_v12 = vld [vmem:[#allocation7 + $0x1668] sm:$0xf0] }
 0x389   :  { %v14051_v13 = vld [vmem:[#allocation7 + $0x100c] sm:$0xf]  ;;  %v12049_v34 = vor.u32 %v14251_v7, %v12046_v12  ;;  %7296 = vmatpush.bf16.msra.mxu2 %v11793_v30 }
 0x38a   :  { %v11246_v21 = vld [vmem:[#allocation7 + $0x1028] sm:$0xf0] }
 0x38b   :  { %v14115_v26 = vld [vmem:[#allocation7 + $0x120c] sm:$0xf]  ;;  %v11249_v25 = vor.u32 %v14051_v13, %v11246_v21  ;;  %7309 = vmatpush.bf16.msra.mxu3 %v12049_v34 }
 0x38c   :  { %v11502_v27 = vld [vmem:[#allocation7 + $0x1228] sm:$0xf0] }
 0x38d   :  { %v14179_v35 = vld [vmem:[#allocation7 + $0x140c] sm:$0xf]  ;;  %v11505_v49 = vor.u32 %v14115_v26, %v11502_v27  ;;  %7271 = vmatpush.bf16.msra.mxu0 %v11249_v25 }
 0x38e   :  { %v11758_v53 = vld [vmem:[#allocation7 + $0x1428] sm:$0xf0] }
 0x38f   :  { %v14243_v42 = vld [vmem:[#allocation7 + $0x160c] sm:$0xf]  ;;  %v11761_v56 = vor.u32 %v14179_v35, %v11758_v53  ;;  %7284 = vmatpush.bf16.msra.mxu1 %v11505_v49 }
 0x390   :  { %v12014_v54 = vld [vmem:[#allocation7 + $0x1628] sm:$0xf0]  ;;  %7272 = vmatmul.bf16.vlgmr.msra.gmra.mxu0 %v15179_v36 }
 0x391   :  { %v14363_v43 = vld [vmem:[#allocation7 + $0x19cc] sm:$0xf]  ;;  %v12017_v45 = vor.u32 %v14243_v42, %v12014_v54  ;;  %7297 = vmatpush.bf16.msra.mxu2 %v11761_v56 }
 0x392   :  { %v12494_v24 = vld [vmem:[#allocation7 + $0x19e8] sm:$0xf0]  ;;  %7285 = vmatmul.bf16.vlgmr.msra.gmra.mxu1 %v15183_v40 }
 0x393   :  { %v14427_v3 = vld [vmem:[#allocation7 + $0x1bcc] sm:$0xf]  ;;  %v12497_v52 = vor.u32 %v14363_v43, %v12494_v24  ;;  %7310 = vmatpush.bf16.msra.mxu3 %v12017_v45 }
 0x394   :  { %v12750_v44 = vld [vmem:[#allocation7 + $0x1be8] sm:$0xf0]  ;;  %7298 = vmatmul.bf16.vlgmr.msra.gmra.mxu2 %v15181_v37 }
 0x395   :  { %v14491_v4 = vld [vmem:[#allocation7 + $0x1dcc] sm:$0xf]  ;;  %v12753_v59 = vor.u32 %v14427_v3, %v12750_v44  ;;  %7316 = vmatpush.bf16.msrb.mxu0 %v12497_v52 }
 0x396   :  { %v13006_v50 = vld [vmem:[#allocation7 + $0x1de8] sm:$0xf0]  ;;  %7311 = vmatmul.bf16.vlgmr.msra.gmra.mxu3 %v15185_v41 }
 0x397   :  { %v14555_v51 = vld [vmem:[#allocation7 + $0x1fcc] sm:$0xf]  ;;  %v13009_v57 = vor.u32 %v14491_v4, %v13006_v50  ;;  %7329 = vmatpush.bf16.msrb.mxu1 %v12753_v59  ;;  %v7065_v4 = vpop.f32.mrf.mxu0 }
 0x398   :  { %v13262_v55 = vld [vmem:[#allocation7 + $0x1fe8] sm:$0xf0]  ;;  %v7066_v25 = vadd.f32 %v7065_v4, %v15319_v32 }
 0x399   :  { %v14355_v46 = vld [vmem:[#allocation7 + $0x198c] sm:$0xf]  ;;  %v13265_v15 = vor.u32 %v14555_v51, %v13262_v55  ;;  %7342 = vmatpush.bf16.msrb.mxu2 %v13009_v57  ;;  %v7078_v51 = vpop.f32.mrf.mxu1 }
 0x39a   :  { %v12462_v60 = vld [vmem:[#allocation7 + $0x19a8] sm:$0xf0]  ;;  %v7079_v57 = vadd.f32 %v7078_v51, %v7066_v25 }
 0x39b   :  { %v14419_v61 = vld [vmem:[#allocation7 + $0x1b8c] sm:$0xf]  ;;  %v12465_v1 = vor.u32 %v14355_v46, %v12462_v60  ;;  %7355 = vmatpush.bf16.msrb.mxu3 %v13265_v15 }
 0x39c   :  { %v12718_v9 = vld [vmem:[#allocation7 + $0x1ba8] sm:$0xf0] }
 0x39d   :  { %v14483_v62 = vld [vmem:[#allocation7 + $0x1d8c] sm:$0xf]  ;;  %v12721_v2 = vor.u32 %v14419_v61, %v12718_v9  ;;  %7317 = vmatpush.bf16.msrb.mxu0 %v12465_v1 }
 0x39e   :  { %v12974_v8 = vld [vmem:[#allocation7 + $0x1da8] sm:$0xf0] }
 0x39f   :  { %v14547_v63 = vld [vmem:[#allocation7 + $0x1f8c] sm:$0xf]  ;;  %v12977_v7 = vor.u32 %v14483_v62, %v12974_v8  ;;  %7330 = vmatpush.bf16.msrb.mxu1 %v12721_v2  ;;  %v7091_v2 = vpop.f32.mrf.mxu2 }
 0x3a0   :  { %v13230_v0 = vld [vmem:[#allocation7 + $0x1fa8] sm:$0xf0] }
 0x3a1   :  { %v14347_v5 = vld [vmem:[#allocation7 + $0x194c] sm:$0xf]  ;;  %v13233_v12 = vor.u32 %v14547_v63, %v13230_v0  ;;  %7343 = vmatpush.bf16.msrb.mxu2 %v12977_v7 }
 0x3a2   :  { %v12430_v6 = vld [vmem:[#allocation7 + $0x1968] sm:$0xf0] }
 0x3a3   :  { %v14411_v13 = vld [vmem:[#allocation7 + $0x1b4c] sm:$0xf]  ;;  %v12433_v30 = vor.u32 %v14347_v5, %v12430_v6  ;;  %7356 = vmatpush.bf16.msrb.mxu3 %v13233_v12  ;;  %v7092_v12 = vadd.f32 %v7091_v2, %v7079_v57  ;;  %v13728_v2 = vld [vmem:[#allocation7 + $0x5ec] sm:$0xf0] }
 0x3a4   :  { %v12686_v16 = vld [vmem:[#allocation7 + $0x1b68] sm:$0xf0] }
 0x3a5   :  { %v14475_v20 = vld [vmem:[#allocation7 + $0x1d4c] sm:$0xf]  ;;  %v12689_v34 = vor.u32 %v14411_v13, %v12686_v16  ;;  %7318 = vmatpush.bf16.msrb.mxu0 %v12433_v30  ;;  %v7104_v13 = vpop.f32.mrf.mxu3 }
 0x3a6   :  { %v12942_v21 = vld [vmem:[#allocation7 + $0x1d68] sm:$0xf0] }
 0x3a7   :  { %v14539_v26 = vld [vmem:[#allocation7 + $0x1f4c] sm:$0xf]  ;;  %v12945_v42 = vor.u32 %v14475_v20, %v12942_v21  ;;  %7331 = vmatpush.bf16.msrb.mxu1 %v12689_v34  ;;  %v7093_v57 = vpop.f32.mrf.mxu2 }
 0x3a8   :  { %v13198_v27 = vld [vmem:[#allocation7 + $0x1f68] sm:$0xf0] }
 0x3a9   :  { %v14339_v35 = vld [vmem:[#allocation7 + $0x190c] sm:$0xf]  ;;  %v13201_v14 = vor.u32 %v14539_v26, %v13198_v27  ;;  %7344 = vmatpush.bf16.msrb.mxu2 %v12945_v42  ;;  %v7067_v26 = vpop.f32.mrf.mxu0  ;;  %v15326_v27 = vadd.f32 %v7104_v13, %v7092_v12  ;;  %v7080_v42 = vpop.f32.mrf.mxu1 }
 0x3aa   :  { %v12398_v53 = vld [vmem:[#allocation7 + $0x1928] sm:$0xf0]  ;;  %v13720_v42 = vld [vmem:[#allocation7 + $0x5ac] sm:$0xf0] }
 0x3ab   :  { %v14403_v54 = vld [vmem:[#allocation7 + $0x1b0c] sm:$0xf]  ;;  %v12401_v49 = vor.u32 %v14339_v35, %v12398_v53  ;;  %7357 = vmatpush.bf16.msrb.mxu3 %v13201_v14 }
 0x3ac   :  { %v12654_v43 = vld [vmem:[#allocation7 + $0x1b28] sm:$0xf0] }
 0x3ad   :  { %v14467_v24 = vld [vmem:[#allocation7 + $0x1d0c] sm:$0xf]  ;;  %v12657_v50 = vor.u32 %v14403_v54, %v12654_v43  ;;  %7319 = vmatpush.bf16.msrb.mxu0 %v12401_v49 }
 0x3ae   :  { %v12910_v47 = vld [vmem:[#allocation7 + $0x1d28] sm:$0xf0] }
 0x3af   :  { %v14531_v3 = vld [vmem:[#allocation7 + $0x1f0c] sm:$0xf]  ;;  %v12913_v45 = vor.u32 %v14467_v24, %v12910_v47  ;;  %7332 = vmatpush.bf16.msrb.mxu1 %v12657_v50 }
 0x3b0   :  { %v13166_v44 = vld [vmem:[#allocation7 + $0x1f28] sm:$0xf0] }
 0x3b1   :  { %v14331_v55 = vld [vmem:[#allocation7 + $0x18cc] sm:$0xf]  ;;  %v13169_v52 = vor.u32 %v14531_v3, %v13166_v44  ;;  %7345 = vmatpush.bf16.msrb.mxu2 %v12913_v45 }
 0x3b2   :  { %v12366_v56 = vld [vmem:[#allocation7 + $0x18e8] sm:$0xf0] }
 0x3b3   :  { %v14395_v59 = vld [vmem:[#allocation7 + $0x1acc] sm:$0xf]  ;;  %v12369_v62 = vor.u32 %v14331_v55, %v12366_v56  ;;  %7358 = vmatpush.bf16.msrb.mxu3 %v13169_v52 }
 0x3b4   :  { %v12622_v46 = vld [vmem:[#allocation7 + $0x1ae8] sm:$0xf0] }
 0x3b5   :  { %v14459_v60 = vld [vmem:[#allocation7 + $0x1ccc] sm:$0xf]  ;;  %v12625_v32 = vor.u32 %v14395_v59, %v12622_v46  ;;  %7320 = vmatpush.bf16.msrb.mxu0 %v12369_v62  ;;  %v7106_v62 = vpop.f32.mrf.mxu3 }
 0x3b6   :  { %v12878_v15 = vld [vmem:[#allocation7 + $0x1ce8] sm:$0xf0]  ;;  %v13704_v62 = vld [vmem:[#allocation7 + $0x52c] sm:$0xf0] }
 0x3b7   :  { %v14523_v61 = vld [vmem:[#allocation7 + $0x1ecc] sm:$0xf]  ;;  %v12881_v0 = vor.u32 %v14459_v60, %v12878_v15  ;;  %7333 = vmatpush.bf16.msrb.mxu1 %v12625_v32  ;;  %v9684_v32 = vld [vmem:[#allocation7 + $0x3d0] sm:$0xf] }
 0x3b8   :  { %v13134_v9 = vld [vmem:[#allocation7 + $0x1ee8] sm:$0xf0] }
 0x3b9   :  { %v14323_v8 = vld [vmem:[#allocation7 + $0x188c] sm:$0xf]  ;;  %v13137_v1 = vor.u32 %v14523_v61, %v13134_v9  ;;  %7346 = vmatpush.bf16.msrb.mxu2 %v12881_v0  ;;  %v9428_v61 = vld [vmem:[#allocation7 + $0x1d0] sm:$0xf] }
 0x3ba   :  { %v12334_v63 = vld [vmem:[#allocation7 + $0x18a8] sm:$0xf0]  ;;  %v13600_v9 = vld [vmem:[#allocation7 + $0x1ec] sm:$0xf0] }
 0x3bb   :  { %v14387_v5 = vld [vmem:[#allocation7 + $0x1a8c] sm:$0xf]  ;;  %v12337_v30 = vor.u32 %v14323_v8, %v12334_v63  ;;  %7359 = vmatpush.bf16.msrb.mxu3 %v13137_v1  ;;  %v13664_v8 = vld [vmem:[#allocation7 + $0x3ec] sm:$0xf0]  ;;  %v9429_v13 = vor.u32 %v13600_v9, %v9428_v61 }
 0x3bc   :  { %v12590_v6 = vld [vmem:[#allocation7 + $0x1aa8] sm:$0xf0]  ;;  %v9940_v63 = vld [vmem:[#allocation7 + $0x5d0] sm:$0xf] }
 0x3bd   :  { %v14451_v7 = vld [vmem:[#allocation7 + $0x1c8c] sm:$0xf]  ;;  %v12593_v34 = vor.u32 %v14387_v5, %v12590_v6  ;;  %7321 = vmatpush.bf16.msrb.mxu0 %v12337_v30  ;;  %v10196_v5 = vld [vmem:[#allocation7 + $0x7d0] sm:$0xf]  ;;  %v9941_v26 = vor.u32 %v13728_v2, %v9940_v63  ;;  %v7117_v63 = vpop.f32.mrf.mxu0 }
 0x3be   :  { %v12846_v16 = vld [vmem:[#allocation7 + $0x1ca8] sm:$0xf0]  ;;  %v13792_v6 = vld [vmem:[#allocation7 + $0x7ec] sm:$0xf0] }
 0x3bf   :  { %v14515_v20 = vld [vmem:[#allocation7 + $0x1e8c] sm:$0xf]  ;;  %v12849_v14 = vor.u32 %v14451_v7, %v12846_v16  ;;  %7334 = vmatpush.bf16.msrb.mxu1 %v12593_v34  ;;  %v9685_v16 = vor.u32 %v13664_v8, %v9684_v32  ;;  %v10197_v30 = vor.u32 %v13792_v6, %v10196_v5  ;;  %v9652_v34 = vld [vmem:[#allocation7 + $0x390] sm:$0xf]  ;;  %v7130_v5 = vpop.f32.mrf.mxu1 }
 0x3c0   :  { %v13102_v21 = vld [vmem:[#allocation7 + $0x1ea8] sm:$0xf0]  ;;  %v13640_v61 = vld [vmem:[#allocation7 + $0x32c] sm:$0xf0] }
 0x3c1   :  { %v14315_v35 = vld [vmem:[#allocation7 + $0x184c] sm:$0xf]  ;;  %v13105_v54 = vor.u32 %v14515_v20, %v13102_v21  ;;  %7347 = vmatpush.bf16.msrb.mxu2 %v12849_v14  ;;  %v9396_v20 = vld [vmem:[#allocation7 + $0x190] sm:$0xf] }
 0x3c2   :  { %v12302_v53 = vld [vmem:[#allocation7 + $0x1868] sm:$0xf0]  ;;  %v13592_v21 = vld [vmem:[#allocation7 + $0x1ac] sm:$0xf0] }
 0x3c3   :  { %v14379_v43 = vld [vmem:[#allocation7 + $0x1a4c] sm:$0xf]  ;;  %v12305_v49 = vor.u32 %v14315_v35, %v12302_v53  ;;  %7360 = vmatpush.bf16.msrb.mxu3 %v13105_v54  ;;  %v13656_v35 = vld [vmem:[#allocation7 + $0x3ac] sm:$0xf0] }
 0x3c4   :  { %v12558_v24 = vld [vmem:[#allocation7 + $0x1a68] sm:$0xf0]  ;;  %v9908_v53 = vld [vmem:[#allocation7 + $0x590] sm:$0xf] }
 0x3c5   :  { %v14443_v47 = vld [vmem:[#allocation7 + $0x1c4c] sm:$0xf]  ;;  %v12561_v50 = vor.u32 %v14379_v43, %v12558_v24  ;;  %7322 = vmatpush.bf16.msrb.mxu0 %v12305_v49  ;;  %v10164_v14 = vld [vmem:[#allocation7 + $0x790] sm:$0xf]  ;;  %v9397_v43 = vor.u32 %v13592_v21, %v9396_v20  ;;  %v9653_v24 = vor.u32 %v13656_v35, %v9652_v34 }
 0x3c6   :  { %v12814_v3 = vld [vmem:[#allocation7 + $0x1c68] sm:$0xf0]  ;;  %v13784_v54 = vld [vmem:[#allocation7 + $0x7ac] sm:$0xf0] }
 0x3c7   :  { %v14507_v44 = vld [vmem:[#allocation7 + $0x1e4c] sm:$0xf]  ;;  %v12817_v45 = vor.u32 %v14443_v47, %v12814_v3  ;;  %7335 = vmatpush.bf16.msrb.mxu1 %v12561_v50  ;;  %v9364_v47 = vld [vmem:[#allocation7 + $0x150] sm:$0xf] }
 0x3c8   :  { %v13070_v4 = vld [vmem:[#allocation7 + $0x1e68] sm:$0xf0]  ;;  %v13584_v3 = vld [vmem:[#allocation7 + $0x16c] sm:$0xf0] }
 0x3c9   :  { %v14307_v25 = vld [vmem:[#allocation7 + $0x180c] sm:$0xf]  ;;  %v13073_v52 = vor.u32 %v14507_v44, %v13070_v4  ;;  %7348 = vmatpush.bf16.msrb.mxu2 %v12817_v45  ;;  %v9909_v44 = vor.u32 %v13720_v42, %v9908_v53  ;;  %v10165_v4 = vor.u32 %v13784_v54, %v10164_v14  ;;  %v13648_v49 = vld [vmem:[#allocation7 + $0x36c] sm:$0xf0]  ;;  %v9365_v45 = vor.u32 %v13584_v3, %v9364_v47 }
 0x3ca   :  { %v12270_v51 = vld [vmem:[#allocation7 + $0x1828] sm:$0xf0]  ;;  %v9876_v50 = vld [vmem:[#allocation7 + $0x550] sm:$0xf] }
 0x3cb   :  { %v14371_v55 = vld [vmem:[#allocation7 + $0x1a0c] sm:$0xf]  ;;  %v12273_v0 = vor.u32 %v14307_v25, %v12270_v51  ;;  %7361 = vmatpush.bf16.msrb.mxu3 %v13073_v52  ;;  %v9620_v25 = vld [vmem:[#allocation7 + $0x350] sm:$0xf] }
 0x3cc   :  { %v12526_v56 = vld [vmem:[#allocation7 + $0x1a28] sm:$0xf0]  ;;  %v13712_v51 = vld [vmem:[#allocation7 + $0x56c] sm:$0xf0]  ;;  %v9621_v52 = vor.u32 %v13648_v49, %v9620_v25  ;;  %v7156_v25 = vpop.f32.mrf.mxu3 }
 0x3cd   :  { %v14435_v59 = vld [vmem:[#allocation7 + $0x1c0c] sm:$0xf]  ;;  %v12529_v1 = vor.u32 %v14371_v55, %v12526_v56  ;;  %7323 = vmatpush.bf16.msrb.mxu0 %v12273_v0  ;;  %v10132_v55 = vld [vmem:[#allocation7 + $0x750] sm:$0xf]  ;;  %v7118_v0 = vadd.f32 %v7117_v63, %v15326_v27 }
 0x3ce   :  { %v12782_v46 = vld [vmem:[#allocation7 + $0x1c28] sm:$0xf0]  ;;  %v13776_v56 = vld [vmem:[#allocation7 + $0x76c] sm:$0xf0] }
 0x3cf   :  { %v14499_v60 = vld [vmem:[#allocation7 + $0x1e0c] sm:$0xf]  ;;  %v12785_v7 = vor.u32 %v14435_v59, %v12782_v46  ;;  %7336 = vmatpush.bf16.msrb.mxu1 %v12529_v1  ;;  %v9332_v59 = vld [vmem:[#allocation7 + $0x110] sm:$0xf]  ;;  %v10133_v57 = vor.u32 %v13776_v56, %v10132_v55  ;;  %v7119_v55 = vpop.f32.mrf.mxu0 }
 0x3d0   :  { %v13038_v15 = vld [vmem:[#allocation7 + $0x1e28] sm:$0xf0]  ;;  %7324 = vmatmul.bf16.vlgmr.msrb.gmra.mxu0 %v15191_v31  ;;  %v13576_v46 = vld [vmem:[#allocation7 + $0x12c] sm:$0xf0] }
 0x3d1   :  { %v13041_v12 = vor.u32 %v14499_v60, %v13038_v15  ;;  %7349 = vmatpush.bf16.msrb.mxu2 %v12785_v7  ;;  %7368 = vmatpush.bf16.msra.mxu0 %v9429_v13  ;;  %v9877_v60 = vor.u32 %v13712_v51, %v9876_v50  ;;  %v9588_v15 = vld [vmem:[#allocation7 + $0x310] sm:$0xf]  ;;  %v9333_v1 = vor.u32 %v13576_v46, %v9332_v59 }
 0x3d2   :  { %7337 = vmatmul.bf16.vlgmr.msrb.gmra.mxu1 %v15195_v38  ;;  %v9844_v9 = vld [vmem:[#allocation7 + $0x510] sm:$0xf]  ;;  %v9589_v2 = vor.u32 %v13640_v61, %v9588_v15 }
 0x3d3   :  { %7362 = vmatpush.bf16.msrb.mxu3 %v13041_v12  ;;  %7381 = vmatpush.bf16.msra.mxu1 %v9685_v16  ;;  %v10100_v32 = vld [vmem:[#allocation7 + $0x710] sm:$0xf]  ;;  %v9845_v12 = vor.u32 %v13704_v62, %v9844_v9 }
 0x3d4   :  { %7350 = vmatmul.bf16.vlgmr.msrb.gmra.mxu2 %v15193_v33  ;;  %v13768_v8 = vld [vmem:[#allocation7 + $0x72c] sm:$0xf0] }
 0x3d5   :  { %7394 = vmatpush.bf16.msra.mxu2 %v9941_v26  ;;  %7369 = vmatpush.bf16.msra.mxu0 %v9397_v43  ;;  %v9300_v6 = vld [vmem:[#allocation7 + $0xd0] sm:$0xf]  ;;  %v10101_v13 = vor.u32 %v13768_v8, %v10100_v32  ;;  %v7131_v26 = vadd.f32 %v7130_v5, %v7118_v0 }
 0x3d6   :  { %7363 = vmatmul.bf16.vlgmr.msrb.gmra.mxu3 %v15197_v39  ;;  %v13568_v7 = vld [vmem:[#allocation7 + $0xec] sm:$0xf0] }
 0x3d7   :  { %7407 = vmatpush.bf16.msra.mxu3 %v10197_v30  ;;  %7382 = vmatpush.bf16.msra.mxu1 %v9653_v24  ;;  %v9556_v16 = vld [vmem:[#allocation7 + $0x2d0] sm:$0xf]  ;;  %v9301_v53 = vor.u32 %v13568_v7, %v9300_v6  ;;  %v7143_v24 = vpop.f32.mrf.mxu2 }
 0x3d8   :  { %v13632_v20 = vld [vmem:[#allocation7 + $0x2ec] sm:$0xf0] }
 0x3d9   :  { %7395 = vmatpush.bf16.msra.mxu2 %v9909_v44  ;;  %7370 = vmatpush.bf16.msra.mxu0 %v9365_v45  ;;  %v9812_v21 = vld [vmem:[#allocation7 + $0x4d0] sm:$0xf]  ;;  %v9557_v27 = vor.u32 %v13632_v20, %v9556_v16 }
 0x3da   :  { %v13696_v30 = vld [vmem:[#allocation7 + $0x4ec] sm:$0xf0] }
 0x3db   :  { %7408 = vmatpush.bf16.msra.mxu3 %v10165_v4  ;;  %7383 = vmatpush.bf16.msra.mxu1 %v9621_v52  ;;  %v10068_v34 = vld [vmem:[#allocation7 + $0x6d0] sm:$0xf]  ;;  %v9813_v54 = vor.u32 %v13696_v30, %v9812_v21  ;;  %v7144_v4 = vadd.f32 %v7143_v24, %v7131_v26 }
 0x3dc   :  { %v13760_v35 = vld [vmem:[#allocation7 + $0x6ec] sm:$0xf0] }
 0x3dd   :  { %7396 = vmatpush.bf16.msra.mxu2 %v9877_v60  ;;  %7371 = vmatpush.bf16.msra.mxu0 %v9333_v1  ;;  %v9268_v42 = vld [vmem:[#allocation7 + $0x90] sm:$0xf]  ;;  %v10069_v43 = vor.u32 %v13760_v35, %v10068_v34  ;;  %v15333_v56 = vadd.f32 %v7156_v25, %v7144_v4  ;;  %v7132_v60 = vpop.f32.mrf.mxu1 }
 0x3de   :  { %v13560_v14 = vld [vmem:[#allocation7 + $0xac] sm:$0xf0] }
 0x3df   :  { %7409 = vmatpush.bf16.msra.mxu3 %v10133_v57  ;;  %7384 = vmatpush.bf16.msra.mxu1 %v9589_v2  ;;  %v9524_v47 = vld [vmem:[#allocation7 + $0x290] sm:$0xf]  ;;  %v9269_v45 = vor.u32 %v13560_v14, %v9268_v42  ;;  %v7145_v26 = vpop.f32.mrf.mxu2 }
 0x3e0   :  { %v13624_v3 = vld [vmem:[#allocation7 + $0x2ac] sm:$0xf0] }
 0x3e1   :  { %7397 = vmatpush.bf16.msra.mxu2 %v9845_v12  ;;  %v9780_v44 = vld [vmem:[#allocation7 + $0x490] sm:$0xf]  ;;  %7372 = vmatpush.bf16.msra.mxu0 %v9301_v53  ;;  %v9525_v52 = vor.u32 %v13624_v3, %v9524_v47  ;;  %v7158_v53 = vpop.f32.mrf.mxu3 }
 0x3e2   :  { %v13688_v49 = vld [vmem:[#allocation7 + $0x4ac] sm:$0xf0] }
 0x3e3   :  { %7410 = vmatpush.bf16.msra.mxu3 %v10101_v13  ;;  %v10036_v50 = vld [vmem:[#allocation7 + $0x690] sm:$0xf]  ;;  %7385 = vmatpush.bf16.msra.mxu1 %v9557_v27  ;;  %v9781_v57 = vor.u32 %v13688_v49, %v9780_v44 }
 0x3e4   :  { %v13752_v51 = vld [vmem:[#allocation7 + $0x6ac] sm:$0xf0] }
 0x3e5   :  { %v9236_v59 = vld [vmem:[#allocation7 + $0x50] sm:$0xf]  ;;  %7398 = vmatpush.bf16.msra.mxu2 %v9813_v54  ;;  %v10037_v15 = vor.u32 %v13752_v51, %v10036_v50  ;;  %7373 = vmatpush.bf16.msra.mxu0 %v9269_v45 }
 0x3e6   :  { %v13552_v46 = vld [vmem:[#allocation7 + $0x6c] sm:$0xf0] }
 0x3e7   :  { %7411 = vmatpush.bf16.msra.mxu3 %v10069_v43  ;;  %v9492_v61 = vld [vmem:[#allocation7 + $0x250] sm:$0xf]  ;;  %7386 = vmatpush.bf16.msra.mxu1 %v9525_v52  ;;  %v9237_v1 = vor.u32 %v13552_v46, %v9236_v59 }
 0x3e8   :  { %v13616_v9 = vld [vmem:[#allocation7 + $0x26c] sm:$0xf0] }
 0x3e9   :  { %v9748_v62 = vld [vmem:[#allocation7 + $0x450] sm:$0xf]  ;;  %v9493_v2 = vor.u32 %v13616_v9, %v9492_v61  ;;  %7399 = vmatpush.bf16.msra.mxu2 %v9781_v57  ;;  %7374 = vmatpush.bf16.msra.mxu0 %v9237_v1 }
 0x3ea   :  { %v13680_v32 = vld [vmem:[#allocation7 + $0x46c] sm:$0xf0] }
 0x3eb   :  { %v10004_v8 = vld [vmem:[#allocation7 + $0x650] sm:$0xf]  ;;  %7412 = vmatpush.bf16.msra.mxu3 %v10037_v15  ;;  %v9749_v12 = vor.u32 %v13680_v32, %v9748_v62  ;;  %7387 = vmatpush.bf16.msra.mxu1 %v9493_v2 }
 0x3ec   :  { %v13744_v63 = vld [vmem:[#allocation7 + $0x66c] sm:$0xf0] }
 0x3ed   :  { %v9204_v0 = vld [vmem:[#allocation7 + $0x10] sm:$0xf]  ;;  %v10005_v13 = vor.u32 %v13744_v63, %v10004_v8  ;;  %7400 = vmatpush.bf16.msra.mxu2 %v9749_v12 }
 0x3ee   :  { %v13544_v5 = vld [vmem:[#allocation7 + $0x2c] sm:$0xf0] }
 0x3ef   :  { %v9460_v6 = vld [vmem:[#allocation7 + $0x210] sm:$0xf]  ;;  %v9205_v54 = vor.u32 %v13544_v5, %v9204_v0  ;;  %7413 = vmatpush.bf16.msra.mxu3 %v10005_v13 }
 0x3f0   :  { %v13608_v7 = vld [vmem:[#allocation7 + $0x22c] sm:$0xf0] }
 0x3f1   :  { %v9716_v16 = vld [vmem:[#allocation7 + $0x410] sm:$0xf]  ;;  %v9461_v43 = vor.u32 %v13608_v7, %v9460_v6  ;;  %7375 = vmatpush.bf16.msra.mxu0 %v9205_v54 }
 0x3f2   :  { %v13672_v20 = vld [vmem:[#allocation7 + $0x42c] sm:$0xf0] }
 0x3f3   :  { %v9972_v21 = vld [vmem:[#allocation7 + $0x610] sm:$0xf]  ;;  %v9717_v44 = vor.u32 %v13672_v20, %v9716_v16  ;;  %7388 = vmatpush.bf16.msra.mxu1 %v9461_v43 }
 0x3f4   :  { %v13736_v30 = vld [vmem:[#allocation7 + $0x62c] sm:$0xf0]  ;;  %7376 = vmatmul.bf16.vlgmr.msra.gmra.mxu0 %v15134_v10 }
 0x3f5   :  { %v10452_v34 = vld [vmem:[#allocation7 + $0x9d0] sm:$0xf]  ;;  %v9973_v4 = vor.u32 %v13736_v30, %v9972_v21  ;;  %7401 = vmatpush.bf16.msra.mxu2 %v9717_v44  ;;  %v7182_v44 = vpop.f32.mrf.mxu1 }
 0x3f6   :  { %v13856_v35 = vld [vmem:[#allocation7 + $0x9ec] sm:$0xf0]  ;;  %7389 = vmatmul.bf16.vlgmr.msra.gmra.mxu1 %v15143_v18 }
 0x3f7   :  { %v10708_v27 = vld [vmem:[#allocation7 + $0xbd0] sm:$0xf]  ;;  %v10453_v25 = vor.u32 %v13856_v35, %v10452_v34  ;;  %7414 = vmatpush.bf16.msra.mxu3 %v9973_v4 }
 0x3f8   :  { %v13920_v42 = vld [vmem:[#allocation7 + $0xbec] sm:$0xf0]  ;;  %7402 = vmatmul.bf16.vlgmr.msra.gmra.mxu2 %v15136_v11 }
 0x3f9   :  { %v10964_v14 = vld [vmem:[#allocation7 + $0xdd0] sm:$0xf]  ;;  %v10709_v49 = vor.u32 %v13920_v42, %v10708_v27  ;;  %7420 = vmatpush.bf16.msrb.mxu0 %v10453_v25 }
 0x3fa   :  { %v13984_v24 = vld [vmem:[#allocation7 + $0xdec] sm:$0xf0]  ;;  %7415 = vmatmul.bf16.vlgmr.msra.gmra.mxu3 %v15141_v17 }
 0x3fb   :  { %v11220_v47 = vld [vmem:[#allocation7 + $0xfd0] sm:$0xf]  ;;  %v10965_v55 = vor.u32 %v13984_v24, %v10964_v14  ;;  %7433 = vmatpush.bf16.msrb.mxu1 %v10709_v49  ;;  %v7169_v14 = vpop.f32.mrf.mxu0 }
 0x3fc   :  { %v14048_v3 = vld [vmem:[#allocation7 + $0xfec] sm:$0xf0] }
 0x3fd   :  { %v10420_v50 = vld [vmem:[#allocation7 + $0x990] sm:$0xf]  ;;  %v11221_v45 = vor.u32 %v14048_v3, %v11220_v47  ;;  %7446 = vmatpush.bf16.msrb.mxu2 %v10965_v55 }
 0x3fe   :  { %v13848_v51 = vld [vmem:[#allocation7 + $0x9ac] sm:$0xf0] }
 0x3ff   :  { %v10676_v52 = vld [vmem:[#allocation7 + $0xb90] sm:$0xf]  ;;  %v10421_v61 = vor.u32 %v13848_v51, %v10420_v50  ;;  %7459 = vmatpush.bf16.msrb.mxu3 %v11221_v45  ;;  %v14661_v51 = vld [vmem:[#allocation8] sm:$0xff] }
 0x400   :  { %v13912_v59 = vld [vmem:[#allocation7 + $0xbac] sm:$0xf0]  ;;  %v1403_v55 = vperm.slane %v14661_v51, 3 }
 0x401   :  { %v10932_v46 = vld [vmem:[#allocation7 + $0xd90] sm:$0xf]  ;;  %v10677_v9 = vor.u32 %v13912_v59, %v10676_v52  ;;  %7421 = vmatpush.bf16.msrb.mxu0 %v10421_v61 }
 0x402   :  { %v13976_v60 = vld [vmem:[#allocation7 + $0xdac] sm:$0xf0] }
 0x403   :  { %v11188_v57 = vld [vmem:[#allocation7 + $0xf90] sm:$0xf]  ;;  %v10933_v8 = vor.u32 %v13976_v60, %v10932_v46  ;;  %7434 = vmatpush.bf16.msrb.mxu1 %v10677_v9  ;;  %v7170_v46 = vadd.f32 %v7169_v14, %v1403_v55 }
 0x404   :  { %v14040_v15 = vld [vmem:[#allocation7 + $0xfac] sm:$0xf0] }
 0x405   :  { %v10388_v62 = vld [vmem:[#allocation7 + $0x950] sm:$0xf]  ;;  %v11189_v63 = vor.u32 %v14040_v15, %v11188_v57  ;;  %7447 = vmatpush.bf16.msrb.mxu2 %v10933_v8 }
 0x406   :  { %v13840_v32 = vld [vmem:[#allocation7 + $0x96c] sm:$0xf0] }
 0x407   :  { %v10644_v0 = vld [vmem:[#allocation7 + $0xb50] sm:$0xf]  ;;  %v10389_v12 = vor.u32 %v13840_v32, %v10388_v62  ;;  %7460 = vmatpush.bf16.msrb.mxu3 %v11189_v63 }
 0x408   :  { %v13904_v1 = vld [vmem:[#allocation7 + $0xb6c] sm:$0xf0] }
 0x409   :  { %v10900_v2 = vld [vmem:[#allocation7 + $0xd50] sm:$0xf]  ;;  %v10645_v13 = vor.u32 %v13904_v1, %v10644_v0  ;;  %7422 = vmatpush.bf16.msrb.mxu0 %v10389_v12  ;;  %v7183_v0 = vadd.f32 %v7182_v44, %v7170_v46  ;;  %v7195_v1 = vpop.f32.mrf.mxu2 }
 0x40a   :  { %v13968_v5 = vld [vmem:[#allocation7 + $0xd6c] sm:$0xf0] }
 0x40b   :  { %v11156_v6 = vld [vmem:[#allocation7 + $0xf50] sm:$0xf]  ;;  %v10901_v21 = vor.u32 %v13968_v5, %v10900_v2  ;;  %7435 = vmatpush.bf16.msrb.mxu1 %v10645_v13  ;;  %v7196_v12 = vadd.f32 %v7195_v1, %v7183_v0  ;;  %v7171_v13 = vpop.f32.mrf.mxu0 }
 0x40c   :  { %v14032_v7 = vld [vmem:[#allocation7 + $0xf6c] sm:$0xf0] }
 0x40d   :  { %v10356_v16 = vld [vmem:[#allocation7 + $0x910] sm:$0xf]  ;;  %v11157_v26 = vor.u32 %v14032_v7, %v11156_v6  ;;  %7448 = vmatpush.bf16.msrb.mxu2 %v10901_v21  ;;  %v7208_v7 = vpop.f32.mrf.mxu3 }
 0x40e   :  { %v13832_v20 = vld [vmem:[#allocation7 + $0x92c] sm:$0xf0]  ;;  %v15339_v14 = vadd.f32 %v7208_v7, %v7196_v12 }
 0x40f   :  { %v10612_v30 = vld [vmem:[#allocation7 + $0xb10] sm:$0xf]  ;;  %v10357_v54 = vor.u32 %v13832_v20, %v10356_v16  ;;  %7461 = vmatpush.bf16.msrb.mxu3 %v11157_v26 }
 0x410   :  { %v13896_v34 = vld [vmem:[#allocation7 + $0xb2c] sm:$0xf0] }
 0x411   :  { %v10868_v35 = vld [vmem:[#allocation7 + $0xd10] sm:$0xf]  ;;  %v10613_v43 = vor.u32 %v13896_v34, %v10612_v30  ;;  %7423 = vmatpush.bf16.msrb.mxu0 %v10357_v54  ;;  %v7184_v30 = vpop.f32.mrf.mxu1 }
 0x412   :  { %v13960_v53 = vld [vmem:[#allocation7 + $0xd2c] sm:$0xf0] }
 0x413   :  { %v11124_v27 = vld [vmem:[#allocation7 + $0xf10] sm:$0xf]  ;;  %v10869_v4 = vor.u32 %v13960_v53, %v10868_v35  ;;  %7436 = vmatpush.bf16.msrb.mxu1 %v10613_v43 }
 0x414   :  { %v14024_v42 = vld [vmem:[#allocation7 + $0xf2c] sm:$0xf0] }
 0x415   :  { %v10324_v24 = vld [vmem:[#allocation7 + $0x8d0] sm:$0xf]  ;;  %v11125_v25 = vor.u32 %v14024_v42, %v11124_v27  ;;  %7449 = vmatpush.bf16.msrb.mxu2 %v10869_v4 }
 0x416   :  { %v13824_v47 = vld [vmem:[#allocation7 + $0x8ec] sm:$0xf0] }
 0x417   :  { %v10580_v3 = vld [vmem:[#allocation7 + $0xad0] sm:$0xf]  ;;  %v10325_v60 = vor.u32 %v13824_v47, %v10324_v24  ;;  %7462 = vmatpush.bf16.msrb.mxu3 %v11125_v25 }
 0x418   :  { %v13888_v49 = vld [vmem:[#allocation7 + $0xaec] sm:$0xf0] }
 0x419   :  { %v10836_v50 = vld [vmem:[#allocation7 + $0xcd0] sm:$0xf]  ;;  %v10581_v57 = vor.u32 %v13888_v49, %v10580_v3  ;;  %7424 = vmatpush.bf16.msrb.mxu0 %v10325_v60 }
 0x41a   :  { %v13952_v45 = vld [vmem:[#allocation7 + $0xcec] sm:$0xf0] }
 0x41b   :  { %v11092_v52 = vld [vmem:[#allocation7 + $0xed0] sm:$0xf]  ;;  %v10837_v9 = vor.u32 %v13952_v45, %v10836_v50  ;;  %7437 = vmatpush.bf16.msrb.mxu1 %v10581_v57 }
 0x41c   :  { %v14016_v59 = vld [vmem:[#allocation7 + $0xeec] sm:$0xf0] }
 0x41d   :  { %v10292_v15 = vld [vmem:[#allocation7 + $0x890] sm:$0xf]  ;;  %v11093_v62 = vor.u32 %v14016_v59, %v11092_v52  ;;  %7450 = vmatpush.bf16.msrb.mxu2 %v10837_v9  ;;  %v7197_v59 = vpop.f32.mrf.mxu2 }
 0x41e   :  { %v13816_v61 = vld [vmem:[#allocation7 + $0x8ac] sm:$0xf0] }
 0x41f   :  { %v10548_v32 = vld [vmem:[#allocation7 + $0xa90] sm:$0xf]  ;;  %v10293_v16 = vor.u32 %v13816_v61, %v10292_v15  ;;  %7463 = vmatpush.bf16.msrb.mxu3 %v11093_v62  ;;  %v7210_v15 = vpop.f32.mrf.mxu3 }
 0x420   :  { %v13880_v8 = vld [vmem:[#allocation7 + $0xaac] sm:$0xf0] }
 0x421   :  { %v10804_v63 = vld [vmem:[#allocation7 + $0xc90] sm:$0xf]  ;;  %v10549_v20 = vor.u32 %v13880_v8, %v10548_v32  ;;  %7425 = vmatpush.bf16.msrb.mxu0 %v10293_v16 }
 0x422   :  { %v13944_v2 = vld [vmem:[#allocation7 + $0xcac] sm:$0xf0] }
 0x423   :  { %v11060_v5 = vld [vmem:[#allocation7 + $0xe90] sm:$0xf]  ;;  %v10805_v34 = vor.u32 %v13944_v2, %v10804_v63  ;;  %7438 = vmatpush.bf16.msrb.mxu1 %v10549_v20 }
 0x424   :  { %v14008_v6 = vld [vmem:[#allocation7 + $0xeac] sm:$0xf0] }
 0x425   :  { %v10260_v21 = vld [vmem:[#allocation7 + $0x850] sm:$0xf]  ;;  %v11061_v35 = vor.u32 %v14008_v6, %v11060_v5  ;;  %7451 = vmatpush.bf16.msrb.mxu2 %v10805_v34 }
 0x426   :  { %v13808_v26 = vld [vmem:[#allocation7 + $0x86c] sm:$0xf0] }
 0x427   :  { %v10516_v53 = vld [vmem:[#allocation7 + $0xa50] sm:$0xf]  ;;  %v10261_v3 = vor.u32 %v13808_v26, %v10260_v21  ;;  %7464 = vmatpush.bf16.msrb.mxu3 %v11061_v35 }
 0x428   :  { %v13872_v27 = vld [vmem:[#allocation7 + $0xa6c] sm:$0xf0] }
 0x429   :  { %v10772_v42 = vld [vmem:[#allocation7 + $0xc50] sm:$0xf]  ;;  %v10517_v44 = vor.u32 %v13872_v27, %v10516_v53  ;;  %7426 = vmatpush.bf16.msrb.mxu0 %v10261_v3 }
 0x42a   :  { %v13936_v54 = vld [vmem:[#allocation7 + $0xc6c] sm:$0xf0] }
 0x42b   :  { %v11028_v43 = vld [vmem:[#allocation7 + $0xe50] sm:$0xf]  ;;  %v10773_v50 = vor.u32 %v13936_v54, %v10772_v42  ;;  %7439 = vmatpush.bf16.msrb.mxu1 %v10517_v44 }
 0x42c   :  { %v14000_v24 = vld [vmem:[#allocation7 + $0xe6c] sm:$0xf0] }
 0x42d   :  { %v10228_v47 = vld [vmem:[#allocation7 + $0x810] sm:$0xf]  ;;  %v11029_v51 = vor.u32 %v14000_v24, %v11028_v43  ;;  %7452 = vmatpush.bf16.msrb.mxu2 %v10773_v50 }
 0x42e   :  { %v13800_v4 = vld [vmem:[#allocation7 + $0x82c] sm:$0xf0] }
 0x42f   :  { %v10484_v25 = vld [vmem:[#allocation7 + $0xa10] sm:$0xf]  ;;  %v10229_v32 = vor.u32 %v13800_v4, %v10228_v47  ;;  %7465 = vmatpush.bf16.msrb.mxu3 %v11029_v51 }
 0x430   :  { %v13864_v49 = vld [vmem:[#allocation7 + $0xa2c] sm:$0xf0] }
 0x431   :  { %v10740_v55 = vld [vmem:[#allocation7 + $0xc10] sm:$0xf]  ;;  %v10485_v8 = vor.u32 %v13864_v49, %v10484_v25  ;;  %7427 = vmatpush.bf16.msrb.mxu0 %v10229_v32  ;;  %v7221_v32 = vpop.f32.mrf.mxu0 }
 0x432   :  { %v13928_v45 = vld [vmem:[#allocation7 + $0xc2c] sm:$0xf0] }
 0x433   :  { %v10996_v52 = vld [vmem:[#allocation7 + $0xe10] sm:$0xf]  ;;  %v10741_v2 = vor.u32 %v13928_v45, %v10740_v55  ;;  %7440 = vmatpush.bf16.msrb.mxu1 %v10485_v8 }
 0x434   :  { %v13992_v46 = vld [vmem:[#allocation7 + $0xe2c] sm:$0xf0]  ;;  %7428 = vmatmul.bf16.vlgmr.msrb.gmra.mxu0 %v15167_v22 }
 0x435   :  { %v11476_v60 = vld [vmem:[#allocation7 + $0x11d0] sm:$0xf]  ;;  %v10997_v5 = vor.u32 %v13992_v46, %v10996_v52  ;;  %7453 = vmatpush.bf16.msrb.mxu2 %v10741_v2  ;;  %v7222_v2 = vadd.f32 %v7221_v32, %v15339_v14 }
 0x436   :  { %v14112_v57 = vld [vmem:[#allocation7 + $0x11ec] sm:$0xf0]  ;;  %7441 = vmatmul.bf16.vlgmr.msrb.gmra.mxu1 %v15171_v28 }
 0x437   :  { %v11732_v61 = vld [vmem:[#allocation7 + $0x13d0] sm:$0xf]  ;;  %v11477_v6 = vor.u32 %v14112_v57, %v11476_v60  ;;  %7466 = vmatpush.bf16.msrb.mxu3 %v10997_v5  ;;  %v7234_v5 = vpop.f32.mrf.mxu1 }
 0x438   :  { %v14176_v9 = vld [vmem:[#allocation7 + $0x13ec] sm:$0xf0]  ;;  %7454 = vmatmul.bf16.vlgmr.msrb.gmra.mxu2 %v15169_v23 }
 0x439   :  { %v11988_v62 = vld [vmem:[#allocation7 + $0x15d0] sm:$0xf]  ;;  %v11733_v7 = vor.u32 %v14176_v9, %v11732_v61  ;;  %7472 = vmatpush.bf16.msra.mxu0 %v11477_v6 }
 0x43a   :  { %v14240_v63 = vld [vmem:[#allocation7 + $0x15ec] sm:$0xf0]  ;;  %7467 = vmatmul.bf16.vlgmr.msrb.gmra.mxu3 %v15173_v29 }
 0x43b   :  { %v12244_v0 = vld [vmem:[#allocation7 + $0x17d0] sm:$0xf]  ;;  %v11989_v16 = vor.u32 %v14240_v63, %v11988_v62  ;;  %7485 = vmatpush.bf16.msra.mxu1 %v11733_v7 }
 0x43c   :  { %v14304_v1 = vld [vmem:[#allocation7 + $0x17ec] sm:$0xf0] }
 0x43d   :  { %v11444_v12 = vld [vmem:[#allocation7 + $0x1190] sm:$0xf]  ;;  %v12245_v20 = vor.u32 %v14304_v1, %v12244_v0  ;;  %7498 = vmatpush.bf16.msra.mxu2 %v11989_v16 }
 0x43e   :  { %v14104_v13 = vld [vmem:[#allocation7 + $0x11ac] sm:$0xf0] }
 0x43f   :  { %v11700_v21 = vld [vmem:[#allocation7 + $0x1390] sm:$0xf]  ;;  %v11445_v27 = vor.u32 %v14104_v13, %v11444_v12  ;;  %7511 = vmatpush.bf16.msra.mxu3 %v12245_v20 }
 0x440   :  { %v14168_v26 = vld [vmem:[#allocation7 + $0x13ac] sm:$0xf0] }
 0x441   :  { %v11956_v30 = vld [vmem:[#allocation7 + $0x1590] sm:$0xf]  ;;  %v11701_v42 = vor.u32 %v14168_v26, %v11700_v21  ;;  %7473 = vmatpush.bf16.msra.mxu0 %v11445_v27 }
 0x442   :  { %v14232_v34 = vld [vmem:[#allocation7 + $0x15ac] sm:$0xf0] }
 0x443   :  { %v12212_v35 = vld [vmem:[#allocation7 + $0x1790] sm:$0xf]  ;;  %v11957_v24 = vor.u32 %v14232_v34, %v11956_v30  ;;  %7486 = vmatpush.bf16.msra.mxu1 %v11701_v42  ;;  %v7235_v30 = vadd.f32 %v7234_v5, %v7222_v2 }
 0x444   :  { %v14296_v53 = vld [vmem:[#allocation7 + $0x17ac] sm:$0xf0] }
 0x445   :  { %v11412_v54 = vld [vmem:[#allocation7 + $0x1150] sm:$0xf]  ;;  %v12213_v47 = vor.u32 %v14296_v53, %v12212_v35  ;;  %7499 = vmatpush.bf16.msra.mxu2 %v11957_v24 }
 0x446   :  { %v14096_v43 = vld [vmem:[#allocation7 + $0x116c] sm:$0xf0] }
 0x447   :  { %v11668_v3 = vld [vmem:[#allocation7 + $0x1350] sm:$0xf]  ;;  %v11413_v51 = vor.u32 %v14096_v43, %v11412_v54  ;;  %7512 = vmatpush.bf16.msra.mxu3 %v12213_v47  ;;  %v7247_v47 = vpop.f32.mrf.mxu2 }
 0x448   :  { %v14160_v44 = vld [vmem:[#allocation7 + $0x136c] sm:$0xf0] }
 0x449   :  { %v11924_v4 = vld [vmem:[#allocation7 + $0x1550] sm:$0xf]  ;;  %v11669_v55 = vor.u32 %v14160_v44, %v11668_v3  ;;  %7474 = vmatpush.bf16.msra.mxu0 %v11413_v51  ;;  %v8214_v51 = vsel %vm232_vm6, %v15333_v56, 0.0 }
 0x44a   :  { %v14224_v25 = vld [vmem:[#allocation7 + $0x156c] sm:$0xf0] }
 0x44b   :  { %v12180_v49 = vld [vmem:[#allocation7 + $0x1750] sm:$0xf]  ;;  %v11925_v59 = vor.u32 %v14224_v25, %v11924_v4  ;;  %7487 = vmatpush.bf16.msra.mxu1 %v11669_v55  ;;  %v7248_v25 = vadd.f32 %v7247_v47, %v7235_v30 }
 0x44c   :  { %v14288_v50 = vld [vmem:[#allocation7 + $0x176c] sm:$0xf0] }
 0x44d   :  { %v11380_v45 = vld [vmem:[#allocation7 + $0x1110] sm:$0xf]  ;;  %v12181_v46 = vor.u32 %v14288_v50, %v12180_v49  ;;  %7500 = vmatpush.bf16.msra.mxu2 %v11925_v59  ;;  %v7260_v49 = vpop.f32.mrf.mxu3  ;;  %v7223_v50 = vpop.f32.mrf.mxu0 }
 0x44e   :  { %v14088_v52 = vld [vmem:[#allocation7 + $0x112c] sm:$0xf0] }
 0x44f   :  { %v11636_v60 = vld [vmem:[#allocation7 + $0x1310] sm:$0xf]  ;;  %v11381_v8 = vor.u32 %v14088_v52, %v11380_v45  ;;  %7513 = vmatpush.bf16.msra.mxu3 %v12181_v46  ;;  %v15348_v46 = vadd.f32 %v7260_v49, %v7248_v25  ;;  %v7249_v30 = vpop.f32.mrf.mxu2 }
 0x450   :  { %v14152_v57 = vld [vmem:[#allocation7 + $0x132c] sm:$0xf0] }
 0x451   :  { %v11892_v15 = vld [vmem:[#allocation7 + $0x1510] sm:$0xf]  ;;  %v11637_v63 = vor.u32 %v14152_v57, %v11636_v60  ;;  %7475 = vmatpush.bf16.msra.mxu0 %v11381_v8  ;;  %v7236_v60 = vpop.f32.mrf.mxu1 }
 0x452   :  { %v14216_v61 = vld [vmem:[#allocation7 + $0x152c] sm:$0xf0] }
 0x453   :  { %v12148_v9 = vld [vmem:[#allocation7 + $0x1710] sm:$0xf]  ;;  %v11893_v6 = vor.u32 %v14216_v61, %v11892_v15  ;;  %7488 = vmatpush.bf16.msra.mxu1 %v11637_v63 }
 0x454   :  { %v14280_v62 = vld [vmem:[#allocation7 + $0x172c] sm:$0xf0] }
 0x455   :  { %v11348_v0 = vld [vmem:[#allocation7 + $0x10d0] sm:$0xf]  ;;  %v12149_v7 = vor.u32 %v14280_v62, %v12148_v9  ;;  %7501 = vmatpush.bf16.msra.mxu2 %v11893_v6 }
 0x456   :  { %v14080_v1 = vld [vmem:[#allocation7 + $0x10ec] sm:$0xf0] }
 0x457   :  { %v11604_v12 = vld [vmem:[#allocation7 + $0x12d0] sm:$0xf]  ;;  %v11349_v34 = vor.u32 %v14080_v1, %v11348_v0  ;;  %7514 = vmatpush.bf16.msra.mxu3 %v12149_v7  ;;  %v8215_v0 = vrot.slane %v8214_v51, 4 }
 0x458   :  { %v14144_v13 = vld [vmem:[#allocation7 + $0x12ec] sm:$0xf0] }
 0x459   :  { %v11860_v16 = vld [vmem:[#allocation7 + $0x14d0] sm:$0xf]  ;;  %v11605_v35 = vor.u32 %v14144_v13, %v11604_v12  ;;  %7476 = vmatpush.bf16.msra.mxu0 %v11349_v34  ;;  %v8216_v49 = vadd.f32 %v8215_v0, %v8214_v51 }
 0x45a   :  { %v14208_v20 = vld [vmem:[#allocation7 + $0x14ec] sm:$0xf0] }
 0x45b   :  { %v12116_v21 = vld [vmem:[#allocation7 + $0x16d0] sm:$0xf]  ;;  %v11861_v14 = vor.u32 %v14208_v20, %v11860_v16  ;;  %7489 = vmatpush.bf16.msra.mxu1 %v11605_v35 }
 0x45c   :  { %v14272_v26 = vld [vmem:[#allocation7 + $0x16ec] sm:$0xf0] }
 0x45d   :  { %v11316_v53 = vld [vmem:[#allocation7 + $0x1090] sm:$0xf]  ;;  %v12117_v42 = vor.u32 %v14272_v26, %v12116_v21  ;;  %7502 = vmatpush.bf16.msra.mxu2 %v11861_v14 }
 0x45e   :  { %v14072_v27 = vld [vmem:[#allocation7 + $0x10ac] sm:$0xf0] }
 0x45f   :  { %v11572_v54 = vld [vmem:[#allocation7 + $0x1290] sm:$0xf]  ;;  %v11317_v55 = vor.u32 %v14072_v27, %v11316_v53  ;;  %7515 = vmatpush.bf16.msra.mxu3 %v12117_v42  ;;  %v7262_v27 = vpop.f32.mrf.mxu3 }
 0x460   :  { %v14136_v43 = vld [vmem:[#allocation7 + $0x12ac] sm:$0xf0] }
 0x461   :  { %v11828_v24 = vld [vmem:[#allocation7 + $0x1490] sm:$0xf]  ;;  %v11573_v45 = vor.u32 %v14136_v43, %v11572_v54  ;;  %7477 = vmatpush.bf16.msra.mxu0 %v11317_v55 }
 0x462   :  { %v14200_v3 = vld [vmem:[#allocation7 + $0x14ac] sm:$0xf0] }
 0x463   :  { %v12084_v44 = vld [vmem:[#allocation7 + $0x1690] sm:$0xf]  ;;  %v11829_v57 = vor.u32 %v14200_v3, %v11828_v24  ;;  %7490 = vmatpush.bf16.msra.mxu1 %v11573_v45 }
 0x464   :  { %v14264_v4 = vld [vmem:[#allocation7 + $0x16ac] sm:$0xf0] }
 0x465   :  { %v11284_v52 = vld [vmem:[#allocation7 + $0x1050] sm:$0xf]  ;;  %v12085_v15 = vor.u32 %v14264_v4, %v12084_v44  ;;  %7503 = vmatpush.bf16.msra.mxu2 %v11829_v57 }
 0x466   :  { %v14064_v59 = vld [vmem:[#allocation7 + $0x106c] sm:$0xf0] }
 0x467   :  { %v11540_v61 = vld [vmem:[#allocation7 + $0x1250] sm:$0xf]  ;;  %v11285_v2 = vor.u32 %v14064_v59, %v11284_v52  ;;  %7516 = vmatpush.bf16.msra.mxu3 %v12085_v15 }
 0x468   :  { %v14128_v9 = vld [vmem:[#allocation7 + $0x126c] sm:$0xf0] }
 0x469   :  { %v11796_v62 = vld [vmem:[#allocation7 + $0x1450] sm:$0xf]  ;;  %v11541_v5 = vor.u32 %v14128_v9, %v11540_v61  ;;  %7478 = vmatpush.bf16.msra.mxu0 %v11285_v2 }
 0x46a   :  { %v14192_v32 = vld [vmem:[#allocation7 + $0x146c] sm:$0xf0] }
 0x46b   :  { %v12052_v8 = vld [vmem:[#allocation7 + $0x1650] sm:$0xf]  ;;  %v11797_v13 = vor.u32 %v14192_v32, %v11796_v62  ;;  %7491 = vmatpush.bf16.msra.mxu1 %v11541_v5 }
 0x46c   :  { %v14256_v63 = vld [vmem:[#allocation7 + $0x166c] sm:$0xf0] }
 0x46d   :  { %v11252_v1 = vld [vmem:[#allocation7 + $0x1010] sm:$0xf]  ;;  %v12053_v16 = vor.u32 %v14256_v63, %v12052_v8  ;;  %7504 = vmatpush.bf16.msra.mxu2 %v11797_v13  ;;  %v8217_v8 = vrot.slane %v8216_v49, 2 }
 0x46e   :  { %v14056_v6 = vld [vmem:[#allocation7 + $0x102c] sm:$0xf0] }
 0x46f   :  { %v11508_v7 = vld [vmem:[#allocation7 + $0x1210] sm:$0xf]  ;;  %v11253_v43 = vor.u32 %v14056_v6, %v11252_v1  ;;  %7517 = vmatpush.bf16.msra.mxu3 %v12053_v16 }
 0x470   :  { %v14120_v12 = vld [vmem:[#allocation7 + $0x122c] sm:$0xf0] }
 0x471   :  { %v11764_v20 = vld [vmem:[#allocation7 + $0x1410] sm:$0xf]  ;;  %v11509_v24 = vor.u32 %v14120_v12, %v11508_v7  ;;  %7479 = vmatpush.bf16.msra.mxu0 %v11253_v43 }
 0x472   :  { %v14184_v21 = vld [vmem:[#allocation7 + $0x142c] sm:$0xf0] }
 0x473   :  { %v12020_v26 = vld [vmem:[#allocation7 + $0x1610] sm:$0xf]  ;;  %v11765_v4 = vor.u32 %v14184_v21, %v11764_v20  ;;  %7492 = vmatpush.bf16.msra.mxu1 %v11509_v24  ;;  %v8218_v21 = vadd.f32 %v8217_v8, %v8216_v49 }
 0x474   :  { %v14248_v34 = vld [vmem:[#allocation7 + $0x162c] sm:$0xf0]  ;;  %7480 = vmatmul.bf16.vlgmr.msra.gmra.mxu0 %v15179_v36 }
 0x475   :  { %v12500_v35 = vld [vmem:[#allocation7 + $0x19d0] sm:$0xf]  ;;  %v12021_v25 = vor.u32 %v14248_v34, %v12020_v26  ;;  %7505 = vmatpush.bf16.msra.mxu2 %v11765_v4 }
 0x476   :  { %v14368_v53 = vld [vmem:[#allocation7 + $0x19ec] sm:$0xf0]  ;;  %7493 = vmatmul.bf16.vlgmr.msra.gmra.mxu1 %v15183_v40 }
 0x477   :  { %v12756_v14 = vld [vmem:[#allocation7 + $0x1bd0] sm:$0xf]  ;;  %v12501_v50 = vor.u32 %v14368_v53, %v12500_v35  ;;  %7518 = vmatpush.bf16.msra.mxu3 %v12021_v25 }
 0x478   :  { %v14432_v42 = vld [vmem:[#allocation7 + $0x1bec] sm:$0xf0]  ;;  %7506 = vmatmul.bf16.vlgmr.msra.gmra.mxu2 %v15181_v37 }
 0x479   :  { %v13012_v54 = vld [vmem:[#allocation7 + $0x1dd0] sm:$0xf]  ;;  %v12757_v55 = vor.u32 %v14432_v42, %v12756_v14  ;;  %7524 = vmatpush.bf16.msrb.mxu0 %v12501_v50  ;;  %v7286_v50 = vpop.f32.mrf.mxu1 }
 0x47a   :  { %v14496_v47 = vld [vmem:[#allocation7 + $0x1dec] sm:$0xf0]  ;;  %7519 = vmatmul.bf16.vlgmr.msra.gmra.mxu3 %v15185_v41 }
 0x47b   :  { %v13268_v3 = vld [vmem:[#allocation7 + $0x1fd0] sm:$0xf]  ;;  %v13013_v59 = vor.u32 %v14496_v47, %v13012_v54  ;;  %7537 = vmatpush.bf16.msrb.mxu1 %v12757_v55 }
 0x47c   :  { %v14560_v44 = vld [vmem:[#allocation7 + $0x1fec] sm:$0xf0] }
 0x47d   :  { %v12468_v45 = vld [vmem:[#allocation7 + $0x1990] sm:$0xf]  ;;  %v13269_v60 = vor.u32 %v14560_v44, %v13268_v3  ;;  %7550 = vmatpush.bf16.msrb.mxu2 %v13013_v59  ;;  %v7273_v3 = vpop.f32.mrf.mxu0  ;;  %v8219_v44 = vrot.slane %v8218_v21, 1 }
 0x47e   :  { %v14360_v52 = vld [vmem:[#allocation7 + $0x19ac] sm:$0xf0]  ;;  %v7274_v4 = vadd.f32 %v7273_v3, %v15348_v46 }
 0x47f   :  { %v12724_v57 = vld [vmem:[#allocation7 + $0x1b90] sm:$0xf]  ;;  %v12469_v51 = vor.u32 %v14360_v52, %v12468_v45  ;;  %7563 = vmatpush.bf16.msrb.mxu3 %v13269_v60  ;;  %v8220_v8 = vadd.f32 %v8219_v44, %v8218_v21 }
 0x480   :  { %v14424_v15 = vld [vmem:[#allocation7 + $0x1bac] sm:$0xf0] }
 0x481   :  { %v12980_v61 = vld [vmem:[#allocation7 + $0x1d90] sm:$0xf]  ;;  %v12725_v63 = vor.u32 %v14424_v15, %v12724_v57  ;;  %7525 = vmatpush.bf16.msrb.mxu0 %v12469_v51 }
 0x482   :  { %v14488_v9 = vld [vmem:[#allocation7 + $0x1dac] sm:$0xf0] }
 0x483   :  { %v13236_v62 = vld [vmem:[#allocation7 + $0x1f90] sm:$0xf]  ;;  %v12981_v2 = vor.u32 %v14488_v9, %v12980_v61  ;;  %7538 = vmatpush.bf16.msrb.mxu1 %v12725_v63  ;;  %v7287_v61 = vadd.f32 %v7286_v50, %v7274_v4 }
 0x484   :  { %v14552_v32 = vld [vmem:[#allocation7 + $0x1fac] sm:$0xf0] }
 0x485   :  { %v12436_v0 = vld [vmem:[#allocation7 + $0x1950] sm:$0xf]  ;;  %v13237_v5 = vor.u32 %v14552_v32, %v13236_v62  ;;  %7551 = vmatpush.bf16.msrb.mxu2 %v12981_v2  ;;  %v7275_v21 = vpop.f32.mrf.mxu0 }
 0x486   :  { %v14352_v1 = vld [vmem:[#allocation7 + $0x196c] sm:$0xf0] }
 0x487   :  { %v12692_v6 = vld [vmem:[#allocation7 + $0x1b50] sm:$0xf]  ;;  %v12437_v26 = vor.u32 %v14352_v1, %v12436_v0  ;;  %7564 = vmatpush.bf16.msrb.mxu3 %v13237_v5  ;;  %v7299_v5 = vpop.f32.mrf.mxu2 }
 0x488   :  { %v14416_v7 = vld [vmem:[#allocation7 + $0x1b6c] sm:$0xf0] }
 0x489   :  { %v12948_v12 = vld [vmem:[#allocation7 + $0x1d50] sm:$0xf]  ;;  %v12693_v30 = vor.u32 %v14416_v7, %v12692_v6  ;;  %7526 = vmatpush.bf16.msrb.mxu0 %v12437_v26 }
 0x48a   :  { %v14480_v13 = vld [vmem:[#allocation7 + $0x1d6c] sm:$0xf0] }
 0x48b   :  { %v13204_v16 = vld [vmem:[#allocation7 + $0x1f50] sm:$0xf]  ;;  %v12949_v53 = vor.u32 %v14480_v13, %v12948_v12  ;;  %7539 = vmatpush.bf16.msrb.mxu1 %v12693_v30  ;;  %v7300_v13 = vadd.f32 %v7299_v5, %v7287_v61  ;;  %v13724_v5 = vld [vmem:[#allocation7 + $0x5d4] sm:$0xf] }
 0x48c   :  { %v14544_v20 = vld [vmem:[#allocation7 + $0x1f6c] sm:$0xf0] }
 0x48d   :  { %v12404_v34 = vld [vmem:[#allocation7 + $0x1910] sm:$0xf]  ;;  %v13205_v27 = vor.u32 %v14544_v20, %v13204_v16  ;;  %7552 = vmatpush.bf16.msrb.mxu2 %v12949_v53  ;;  %v7312_v16 = vpop.f32.mrf.mxu3 }
 0x48e   :  { %v14344_v35 = vld [vmem:[#allocation7 + $0x192c] sm:$0xf0] }
 0x48f   :  { %v12660_v14 = vld [vmem:[#allocation7 + $0x1b10] sm:$0xf]  ;;  %v12405_v25 = vor.u32 %v14344_v35, %v12404_v34  ;;  %7565 = vmatpush.bf16.msrb.mxu3 %v13205_v27  ;;  %v8258_v34 = vmul.f32 0.5, %v8220_v8  ;;  %v15355_v35 = vadd.f32 %v7312_v16, %v7300_v13  ;;  %v13788_v13 = vld [vmem:[#allocation7 + $0x7d4] sm:$0xf] }
 0x490   :  { %v14408_v42 = vld [vmem:[#allocation7 + $0x1b2c] sm:$0xf0]  ;;  %v10198_v16 = vld [vmem:[#allocation7 + $0x7f0] sm:$0xf0] }
 0x491   :  { %v12916_v54 = vld [vmem:[#allocation7 + $0x1d10] sm:$0xf]  ;;  %v12661_v49 = vor.u32 %v14408_v42, %v12660_v14  ;;  %7527 = vmatpush.bf16.msrb.mxu0 %v12405_v25  ;;  %v15358_v8 = vsub.f32 %v15333_v56, %v8258_v34  ;;  %v13588_v34 = vld [vmem:[#allocation7 + $0x194] sm:$0xf] }
 0x492   :  { %v14472_v43 = vld [vmem:[#allocation7 + $0x1d2c] sm:$0xf0] }
 0x493   :  { %v13172_v24 = vld [vmem:[#allocation7 + $0x1f10] sm:$0xf]  ;;  %v12917_v52 = vor.u32 %v14472_v43, %v12916_v54  ;;  %7540 = vmatpush.bf16.msrb.mxu1 %v12661_v49  ;;  %v7288_v54 = vpop.f32.mrf.mxu1  ;;  %v8274_v56 = vmul.f32 %v15358_v8, %v15358_v8 }
 0x494   :  { %v14536_v47 = vld [vmem:[#allocation7 + $0x1f2c] sm:$0xf0]  ;;  %v9654_v54 = vld [vmem:[#allocation7 + $0x3b0] sm:$0xf0] }
 0x495   :  { %v12372_v55 = vld [vmem:[#allocation7 + $0x18d0] sm:$0xf]  ;;  %v13173_v59 = vor.u32 %v14536_v47, %v13172_v24  ;;  %7553 = vmatpush.bf16.msrb.mxu2 %v12917_v52 }
 0x496   :  { %v14336_v45 = vld [vmem:[#allocation7 + $0x18ec] sm:$0xf0] }
 0x497   :  { %v12628_v60 = vld [vmem:[#allocation7 + $0x1ad0] sm:$0xf]  ;;  %v12373_v46 = vor.u32 %v14336_v45, %v12372_v55  ;;  %7566 = vmatpush.bf16.msrb.mxu3 %v13173_v59 }
 0x498   :  { %v14400_v57 = vld [vmem:[#allocation7 + $0x1aec] sm:$0xf0] }
 0x499   :  { %v12884_v15 = vld [vmem:[#allocation7 + $0x1cd0] sm:$0xf]  ;;  %v12629_v51 = vor.u32 %v14400_v57, %v12628_v60  ;;  %7528 = vmatpush.bf16.msrb.mxu0 %v12373_v46 }
 0x49a   :  { %v14464_v9 = vld [vmem:[#allocation7 + $0x1cec] sm:$0xf0] }
 0x49b   :  { %v13140_v62 = vld [vmem:[#allocation7 + $0x1ed0] sm:$0xf]  ;;  %v12885_v1 = vor.u32 %v14464_v9, %v12884_v15  ;;  %7541 = vmatpush.bf16.msrb.mxu1 %v12629_v51  ;;  %v13596_v51 = vld [vmem:[#allocation7 + $0x1d4] sm:$0xf] }
 0x49c   :  { %v14528_v32 = vld [vmem:[#allocation7 + $0x1eec] sm:$0xf0] }
 0x49d   :  { %v12340_v63 = vld [vmem:[#allocation7 + $0x1890] sm:$0xf]  ;;  %v13141_v2 = vor.u32 %v14528_v32, %v13140_v62  ;;  %7554 = vmatpush.bf16.msrb.mxu2 %v12885_v1  ;;  %v7301_v32 = vpop.f32.mrf.mxu2  ;;  %v13660_v1 = vld [vmem:[#allocation7 + $0x3d4] sm:$0xf] }
 0x49e   :  { %v14328_v0 = vld [vmem:[#allocation7 + $0x18ac] sm:$0xf0] }
 0x49f   :  { %v12596_v6 = vld [vmem:[#allocation7 + $0x1a90] sm:$0xf]  ;;  %v12341_v53 = vor.u32 %v14328_v0, %v12340_v63  ;;  %7567 = vmatpush.bf16.msrb.mxu3 %v13141_v2  ;;  %v9430_v63 = vld [vmem:[#allocation7 + $0x1f0] sm:$0xf0]  ;;  %v7314_v0 = vpop.f32.mrf.mxu3 }
 0x4a0   :  { %v14392_v7 = vld [vmem:[#allocation7 + $0x1aac] sm:$0xf0]  ;;  %v9686_v2 = vld [vmem:[#allocation7 + $0x3f0] sm:$0xf0] }
 0x4a1   :  { %v12852_v12 = vld [vmem:[#allocation7 + $0x1c90] sm:$0xf]  ;;  %v12597_v27 = vor.u32 %v14392_v7, %v12596_v6  ;;  %7529 = vmatpush.bf16.msrb.mxu0 %v12341_v53  ;;  %v9689_v21 = vor.u32 %v13660_v1, %v9686_v2  ;;  %v9398_v53 = vld [vmem:[#allocation7 + $0x1b0] sm:$0xf0] }
 0x4a2   :  { %v14456_v20 = vld [vmem:[#allocation7 + $0x1cac] sm:$0xf0]  ;;  %v13636_v1 = vld [vmem:[#allocation7 + $0x314] sm:$0xf] }
 0x4a3   :  { %v13108_v26 = vld [vmem:[#allocation7 + $0x1e90] sm:$0xf]  ;;  %v12853_v43 = vor.u32 %v14456_v20, %v12852_v12  ;;  %7542 = vmatpush.bf16.msrb.mxu1 %v12597_v27  ;;  %v9942_v12 = vld [vmem:[#allocation7 + $0x5f0] sm:$0xf0] }
 0x4a4   :  { %v14520_v30 = vld [vmem:[#allocation7 + $0x1eac] sm:$0xf0]  ;;  %v9945_v27 = vor.u32 %v13724_v5, %v9942_v12  ;;  %v9590_v2 = vld [vmem:[#allocation7 + $0x330] sm:$0xf0] }
 0x4a5   :  { %v12308_v14 = vld [vmem:[#allocation7 + $0x1850] sm:$0xf]  ;;  %v13109_v24 = vor.u32 %v14520_v30, %v13108_v26  ;;  %7555 = vmatpush.bf16.msrb.mxu2 %v12853_v43  ;;  %v9433_v30 = vor.u32 %v13596_v51, %v9430_v63  ;;  %v13716_v43 = vld [vmem:[#allocation7 + $0x594] sm:$0xf] }
 0x4a6   :  { %v14320_v42 = vld [vmem:[#allocation7 + $0x186c] sm:$0xf0]  ;;  %v9334_v51 = vld [vmem:[#allocation7 + $0x130] sm:$0xf0] }
 0x4a7   :  { %v12564_v47 = vld [vmem:[#allocation7 + $0x1a50] sm:$0xf]  ;;  %v12309_v55 = vor.u32 %v14320_v42, %v12308_v14  ;;  %7568 = vmatpush.bf16.msrb.mxu3 %v13109_v24  ;;  %v10201_v14 = vor.u32 %v13788_v13, %v10198_v16  ;;  %v13652_v42 = vld [vmem:[#allocation7 + $0x394] sm:$0xf]  ;;  %v7325_v16 = vpop.f32.mrf.mxu0 }
 0x4a8   :  { %v14384_v3 = vld [vmem:[#allocation7 + $0x1a6c] sm:$0xf0]  ;;  %v9910_v24 = vld [vmem:[#allocation7 + $0x5b0] sm:$0xf0] }
 0x4a9   :  { %v12820_v44 = vld [vmem:[#allocation7 + $0x1c50] sm:$0xf]  ;;  %v12565_v45 = vor.u32 %v14384_v3, %v12564_v47  ;;  %7530 = vmatpush.bf16.msrb.mxu0 %v12309_v55  ;;  %v13780_v47 = vld [vmem:[#allocation7 + $0x794] sm:$0xf]  ;;  %v9913_v55 = vor.u32 %v13716_v43, %v9910_v24 }
 0x4aa   :  { %v14448_v4 = vld [vmem:[#allocation7 + $0x1c6c] sm:$0xf0]  ;;  %v10166_v3 = vld [vmem:[#allocation7 + $0x7b0] sm:$0xf0] }
 0x4ab   :  { %v13076_v25 = vld [vmem:[#allocation7 + $0x1e50] sm:$0xf]  ;;  %v12821_v57 = vor.u32 %v14448_v4, %v12820_v44  ;;  %7543 = vmatpush.bf16.msrb.mxu1 %v12565_v45  ;;  %v8294_v44 = vsel %vm232_vm6, %v8274_v56, 0.0  ;;  %v9401_v4 = vor.u32 %v13588_v34, %v9398_v53  ;;  %v10169_v45 = vor.u32 %v13780_v47, %v10166_v3  ;;  %v13700_v5 = vld [vmem:[#allocation7 + $0x514] sm:$0xf] }
 0x4ac   :  { %v14512_v49 = vld [vmem:[#allocation7 + $0x1e6c] sm:$0xf0]  ;;  %v10102_v12 = vld [vmem:[#allocation7 + $0x730] sm:$0xf0]  ;;  %v9593_v56 = vor.u32 %v13636_v1, %v9590_v2 }
 0x4ad   :  { %v12276_v50 = vld [vmem:[#allocation7 + $0x1810] sm:$0xf]  ;;  %v13077_v15 = vor.u32 %v14512_v49, %v13076_v25  ;;  %7556 = vmatpush.bf16.msrb.mxu2 %v12821_v57  ;;  %v9657_v25 = vor.u32 %v13652_v42, %v9654_v54  ;;  %v13580_v49 = vld [vmem:[#allocation7 + $0x154] sm:$0xf] }
 0x4ae   :  { %v14312_v52 = vld [vmem:[#allocation7 + $0x182c] sm:$0xf0]  ;;  %v9878_v57 = vld [vmem:[#allocation7 + $0x570] sm:$0xf0] }
 0x4af   :  { %v12532_v59 = vld [vmem:[#allocation7 + $0x1a10] sm:$0xf]  ;;  %v12277_v6 = vor.u32 %v14312_v52, %v12276_v50  ;;  %7569 = vmatpush.bf16.msrb.mxu3 %v13077_v15  ;;  %v9366_v50 = vld [vmem:[#allocation7 + $0x170] sm:$0xf0] }
 0x4b0   :  { %v14376_v60 = vld [vmem:[#allocation7 + $0x1a2c] sm:$0xf0]  ;;  %v13644_v52 = vld [vmem:[#allocation7 + $0x354] sm:$0xf] }
 0x4b1   :  { %v12788_v61 = vld [vmem:[#allocation7 + $0x1c10] sm:$0xf]  ;;  %v12533_v7 = vor.u32 %v14376_v60, %v12532_v59  ;;  %7531 = vmatpush.bf16.msrb.mxu0 %v12277_v6  ;;  %v9622_v59 = vld [vmem:[#allocation7 + $0x370] sm:$0xf0] }
 0x4b2   :  { %v14440_v9 = vld [vmem:[#allocation7 + $0x1c2c] sm:$0xf0]  ;;  %v13708_v60 = vld [vmem:[#allocation7 + $0x554] sm:$0xf]  ;;  %v9625_v32 = vor.u32 %v13644_v52, %v9622_v59 }
 0x4b3   :  { %v13044_v62 = vld [vmem:[#allocation7 + $0x1e10] sm:$0xf]  ;;  %v12789_v20 = vor.u32 %v14440_v9, %v12788_v61  ;;  %7544 = vmatpush.bf16.msrb.mxu1 %v12533_v7  ;;  %v13772_v15 = vld [vmem:[#allocation7 + $0x754] sm:$0xf]  ;;  %v8295_v9 = vrot.slane %v8294_v44, 4  ;;  %v9881_v63 = vor.u32 %v13708_v60, %v9878_v57 }
 0x4b4   :  { %v14504_v46 = vld [vmem:[#allocation7 + $0x1e2c] sm:$0xf0]  ;;  %7532 = vmatmul.bf16.vlgmr.msrb.gmra.mxu0 %v15191_v31  ;;  %v10134_v61 = vld [vmem:[#allocation7 + $0x770] sm:$0xf0] }
 0x4b5   :  { %v13045_v26 = vor.u32 %v14504_v46, %v13044_v62  ;;  %7557 = vmatpush.bf16.msrb.mxu2 %v12789_v20  ;;  %7576 = vmatpush.bf16.msra.mxu0 %v9433_v30  ;;  %v9369_v62 = vor.u32 %v13580_v49, %v9366_v50  ;;  %v13572_v46 = vld [vmem:[#allocation7 + $0x114] sm:$0xf]  ;;  %v10137_v0 = vor.u32 %v13772_v15, %v10134_v61  ;;  %v7338_v30 = vpop.f32.mrf.mxu1  ;;  %v7364_v15 = vpop.f32.mrf.mxu3 }
 0x4b6   :  { %7545 = vmatmul.bf16.vlgmr.msrb.gmra.mxu1 %v15195_v38  ;;  %v9846_v6 = vld [vmem:[#allocation7 + $0x530] sm:$0xf0]  ;;  %v8296_v13 = vadd.f32 %v8295_v9, %v8294_v44  ;;  %v7326_v20 = vadd.f32 %v7325_v16, %v15355_v35 }
 0x4b7   :  { %7570 = vmatpush.bf16.msrb.mxu3 %v13045_v26  ;;  %7589 = vmatpush.bf16.msra.mxu1 %v9689_v21  ;;  %v13764_v7 = vld [vmem:[#allocation7 + $0x714] sm:$0xf]  ;;  %v9337_v26 = vor.u32 %v13572_v46, %v9334_v51  ;;  %v9849_v53 = vor.u32 %v13700_v5, %v9846_v6  ;;  %v7327_v46 = vpop.f32.mrf.mxu0 }
 0x4b8   :  { %7558 = vmatmul.bf16.vlgmr.msrb.gmra.mxu2 %v15193_v33  ;;  %v13564_v21 = vld [vmem:[#allocation7 + $0xd4] sm:$0xf]  ;;  %v7339_v43 = vadd.f32 %v7338_v30, %v7326_v20  ;;  %v8297_v44 = vrot.slane %v8296_v13, 2 }
 0x4b9   :  { %7602 = vmatpush.bf16.msra.mxu2 %v9945_v27  ;;  %7577 = vmatpush.bf16.msra.mxu0 %v9401_v4  ;;  %v9302_v34 = vld [vmem:[#allocation7 + $0xf0] sm:$0xf0]  ;;  %v10105_v27 = vor.u32 %v13764_v7, %v10102_v12 }
 0x4ba   :  { %7571 = vmatmul.bf16.vlgmr.msrb.gmra.mxu3 %v15197_v39  ;;  %v9558_v42 = vld [vmem:[#allocation7 + $0x2f0] sm:$0xf0]  ;;  %v9305_v35 = vor.u32 %v13564_v21, %v9302_v34 }
 0x4bb   :  { %7615 = vmatpush.bf16.msra.mxu3 %v10201_v14  ;;  %7590 = vmatpush.bf16.msra.mxu1 %v9657_v25  ;;  %v13628_v14 = vld [vmem:[#allocation7 + $0x2d4] sm:$0xf] }
 0x4bc   :  { %v13692_v54 = vld [vmem:[#allocation7 + $0x4d4] sm:$0xf]  ;;  %v9561_v4 = vor.u32 %v13628_v14, %v9558_v42 }
 0x4bd   :  { %7603 = vmatpush.bf16.msra.mxu2 %v9913_v55  ;;  %7578 = vmatpush.bf16.msra.mxu0 %v9369_v62  ;;  %v9814_v24 = vld [vmem:[#allocation7 + $0x4f0] sm:$0xf0]  ;;  %v7340_v6 = vpop.f32.mrf.mxu1 }
 0x4be   :  { %v13756_v47 = vld [vmem:[#allocation7 + $0x6d4] sm:$0xf]  ;;  %v9817_v50 = vor.u32 %v13692_v54, %v9814_v24 }
 0x4bf   :  { %7616 = vmatpush.bf16.msra.mxu3 %v10169_v45  ;;  %7591 = vmatpush.bf16.msra.mxu1 %v9625_v32  ;;  %v10070_v3 = vld [vmem:[#allocation7 + $0x6f0] sm:$0xf0]  ;;  %v7351_v45 = vpop.f32.mrf.mxu2  ;;  %v8298_v32 = vadd.f32 %v8297_v44, %v8296_v13 }
 0x4c0   :  { %v13556_v25 = vld [vmem:[#allocation7 + $0x94] sm:$0xf]  ;;  %v10073_v55 = vor.u32 %v13756_v47, %v10070_v3  ;;  %v7352_v57 = vadd.f32 %v7351_v45, %v7339_v43 }
 0x4c1   :  { %7604 = vmatpush.bf16.msra.mxu2 %v9881_v63  ;;  %7579 = vmatpush.bf16.msra.mxu0 %v9337_v26  ;;  %v9270_v49 = vld [vmem:[#allocation7 + $0xb0] sm:$0xf0]  ;;  %v8299_v21 = vrot.slane %v8298_v32, 1 }
 0x4c2   :  { %v13620_v52 = vld [vmem:[#allocation7 + $0x294] sm:$0xf]  ;;  %v15368_v51 = vadd.f32 %v7364_v15, %v7352_v57  ;;  %v9273_v63 = vor.u32 %v13556_v25, %v9270_v49 }
 0x4c3   :  { %7617 = vmatpush.bf16.msra.mxu3 %v10137_v0  ;;  %7592 = vmatpush.bf16.msra.mxu1 %v9593_v56  ;;  %v9526_v59 = vld [vmem:[#allocation7 + $0x2b0] sm:$0xf0]  ;;  %v8300_v15 = vadd.f32 %v8299_v21, %v8298_v32 }
 0x4c4   :  { %v13684_v60 = vld [vmem:[#allocation7 + $0x494] sm:$0xf]  ;;  %v9529_v0 = vor.u32 %v13620_v52, %v9526_v59  ;;  %v8221_v13 = vsel %vm232_vm6, %v15368_v51, 0.0  ;;  %v7366_v52 = vpop.f32.mrf.mxu3 }
 0x4c5   :  { %7605 = vmatpush.bf16.msra.mxu2 %v9849_v53  ;;  %v9782_v61 = vld [vmem:[#allocation7 + $0x4b0] sm:$0xf0]  ;;  %7580 = vmatpush.bf16.msra.mxu0 %v9305_v35  ;;  %v8222_v34 = vrot.slane %v8221_v13, 4 }
 0x4c6   :  { %v13748_v9 = vld [vmem:[#allocation7 + $0x694] sm:$0xf]  ;;  %v9785_v7 = vor.u32 %v13684_v60, %v9782_v61 }
 0x4c7   :  { %7618 = vmatpush.bf16.msra.mxu3 %v10105_v27  ;;  %v10038_v62 = vld [vmem:[#allocation7 + $0x6b0] sm:$0xf0]  ;;  %7593 = vmatpush.bf16.msra.mxu1 %v9561_v4  ;;  %v8223_v47 = vadd.f32 %v8222_v34, %v8221_v13  ;;  %v7353_v49 = vpop.f32.mrf.mxu2 }
 0x4c8   :  { %v13548_v1 = vld [vmem:[#allocation7 + $0x54] sm:$0xf]  ;;  %v10041_v12 = vor.u32 %v13748_v9, %v10038_v62 }
 0x4c9   :  { %v9238_v2 = vld [vmem:[#allocation7 + $0x70] sm:$0xf0]  ;;  %7606 = vmatpush.bf16.msra.mxu2 %v9817_v50  ;;  %7581 = vmatpush.bf16.msra.mxu0 %v9273_v63  ;;  %v8224_v59 = vrot.slane %v8223_v47, 2 }
 0x4ca   :  { %v13612_v5 = vld [vmem:[#allocation7 + $0x254] sm:$0xf]  ;;  %v9241_v14 = vor.u32 %v13548_v1, %v9238_v2 }
 0x4cb   :  { %7619 = vmatpush.bf16.msra.mxu3 %v10073_v55  ;;  %v9494_v16 = vld [vmem:[#allocation7 + $0x270] sm:$0xf0]  ;;  %7594 = vmatpush.bf16.msra.mxu1 %v9529_v0  ;;  %v8225_v0 = vadd.f32 %v8224_v59, %v8223_v47 }
 0x4cc   :  { %v13676_v20 = vld [vmem:[#allocation7 + $0x454] sm:$0xf]  ;;  %v9497_v42 = vor.u32 %v13612_v5, %v9494_v16 }
 0x4cd   :  { %v9750_v26 = vld [vmem:[#allocation7 + $0x470] sm:$0xf0]  ;;  %7607 = vmatpush.bf16.msra.mxu2 %v9785_v7  ;;  %7582 = vmatpush.bf16.msra.mxu0 %v9241_v14 }
 0x4ce   :  { %v13740_v56 = vld [vmem:[#allocation7 + $0x654] sm:$0xf]  ;;  %v9753_v3 = vor.u32 %v13676_v20, %v9750_v26  ;;  %v8226_v20 = vrot.slane %v8225_v0, 1 }
 0x4cf   :  { %v10006_v30 = vld [vmem:[#allocation7 + $0x670] sm:$0xf0]  ;;  %7620 = vmatpush.bf16.msra.mxu3 %v10041_v12  ;;  %7595 = vmatpush.bf16.msra.mxu1 %v9497_v42 }
 0x4d0   :  { %v13540_v53 = vld [vmem:[#allocation7 + $0x14] sm:$0xf]  ;;  %v10009_v44 = vor.u32 %v13740_v56, %v10006_v30 }
 0x4d1   :  { %v9206_v27 = vld [vmem:[#allocation7 + $0x30] sm:$0xf0]  ;;  %7608 = vmatpush.bf16.msra.mxu2 %v9753_v3 }
 0x4d2   :  { %v13604_v54 = vld [vmem:[#allocation7 + $0x214] sm:$0xf]  ;;  %v9209_v61 = vor.u32 %v13540_v53, %v9206_v27  ;;  %v8338_v53 = vmul.f32 0.5, %v8300_v15  ;;  %v8227_v27 = vadd.f32 %v8226_v20, %v8225_v0 }
 0x4d3   :  { %v9462_v43 = vld [vmem:[#allocation7 + $0x230] sm:$0xf0]  ;;  %7621 = vmatpush.bf16.msra.mxu3 %v10009_v44 }
 0x4d4   :  { %v13668_v24 = vld [vmem:[#allocation7 + $0x414] sm:$0xf]  ;;  %v9465_v9 = vor.u32 %v13604_v54, %v9462_v43  ;;  %7583 = vmatpush.bf16.msra.mxu0 %v9209_v61  ;;  %v8259_v47 = vmul.f32 0.5, %v8227_v27 }
 0x4d5   :  { %v9718_v35 = vld [vmem:[#allocation7 + $0x430] sm:$0xf0] }
 0x4d6   :  { %v13732_v4 = vld [vmem:[#allocation7 + $0x614] sm:$0xf]  ;;  %v9721_v1 = vor.u32 %v13668_v24, %v9718_v35  ;;  %7596 = vmatpush.bf16.msra.mxu1 %v9465_v9 }
 0x4d7   :  { %v9974_v25 = vld [vmem:[#allocation7 + $0x630] sm:$0xf0]  ;;  %7584 = vmatmul.bf16.vlgmr.msra.gmra.mxu0 %v15134_v10 }
 0x4d8   :  { %v13852_v50 = vld [vmem:[#allocation7 + $0x9d4] sm:$0xf]  ;;  %v9977_v2 = vor.u32 %v13732_v4, %v9974_v25  ;;  %7609 = vmatpush.bf16.msra.mxu2 %v9721_v1 }
 0x4d9   :  { %v10454_v55 = vld [vmem:[#allocation7 + $0x9f0] sm:$0xf0]  ;;  %7597 = vmatmul.bf16.vlgmr.msra.gmra.mxu1 %v15143_v18 }
 0x4da   :  { %v13916_v45 = vld [vmem:[#allocation7 + $0xbd4] sm:$0xf]  ;;  %v10457_v5 = vor.u32 %v13852_v50, %v10454_v55  ;;  %7622 = vmatpush.bf16.msra.mxu3 %v9977_v2  ;;  %v15374_v55 = vadd.f32 1e-05, %v8338_v53 }
 0x4db   :  { %v10710_v60 = vld [vmem:[#allocation7 + $0xbf0] sm:$0xf0]  ;;  %7610 = vmatmul.bf16.vlgmr.msra.gmra.mxu2 %v15136_v11 }
 0x4dc   :  { %v13980_v57 = vld [vmem:[#allocation7 + $0xdd4] sm:$0xf]  ;;  %v10713_v6 = vor.u32 %v13916_v45, %v10710_v60  ;;  %7628 = vmatpush.bf16.msrb.mxu0 %v10457_v5  ;;  %v15377_v45 = vsub.f32 %v15368_v51, %v8259_v47  ;;  %14648 = vrsqrt.f32 %v15374_v55  ;;  %vm8379_vm5 = vweird.f32 %v15374_v55 }
 0x4dd   :  { %v10966_v62 = vld [vmem:[#allocation7 + $0xdf0] sm:$0xf0]  ;;  %7623 = vmatmul.bf16.vlgmr.msra.gmra.mxu3 %v15141_v17 }
 0x4de   :  { %v14044_v46 = vld [vmem:[#allocation7 + $0xfd4] sm:$0xf]  ;;  %v10969_v26 = vor.u32 %v13980_v57, %v10966_v62  ;;  %7641 = vmatpush.bf16.msrb.mxu1 %v10713_v6  ;;  %v8275_v15 = vmul.f32 %v15377_v45, %v15377_v45  ;;  %v7377_v6 = vpop.f32.mrf.mxu0 }
 0x4df   :  { %v11222_v63 = vld [vmem:[#allocation7 + $0xff0] sm:$0xf0] }
 0x4e0   :  { %v13844_v7 = vld [vmem:[#allocation7 + $0x994] sm:$0xf]  ;;  %v11225_v32 = vor.u32 %v14044_v46, %v11222_v63  ;;  %7654 = vmatpush.bf16.msrb.mxu2 %v10969_v26  ;;  %v8301_v2 = vsel %vm232_vm6, %v8275_v15, 0.0 }
 0x4e1   :  { %v10422_v12 = vld [vmem:[#allocation7 + $0x9b0] sm:$0xf0] }
 0x4e2   :  { %v13908_v16 = vld [vmem:[#allocation7 + $0xb94] sm:$0xf]  ;;  %v10425_v14 = vor.u32 %v13844_v7, %v10422_v12  ;;  %7667 = vmatpush.bf16.msrb.mxu3 %v11225_v32  ;;  %v8302_v7 = vrot.slane %v8301_v2, 4  ;;  %v7390_v32 = vpop.f32.mrf.mxu1 }
 0x4e3   :  { %v10678_v13 = vld [vmem:[#allocation7 + $0xbb0] sm:$0xf0] }
 0x4e4   :  { %v13972_v56 = vld [vmem:[#allocation7 + $0xd94] sm:$0xf]  ;;  %v10681_v42 = vor.u32 %v13908_v16, %v10678_v13  ;;  %7629 = vmatpush.bf16.msrb.mxu0 %v10425_v14  ;;  %v8303_v27 = vadd.f32 %v8302_v7, %v8301_v2 }
 0x4e5   :  { %v10934_v30 = vld [vmem:[#allocation7 + $0xdb0] sm:$0xf0] }
 0x4e6   :  { %v14036_v21 = vld [vmem:[#allocation7 + $0xf94] sm:$0xf]  ;;  %v10937_v3 = vor.u32 %v13972_v56, %v10934_v30  ;;  %7642 = vmatpush.bf16.msrb.mxu1 %v10681_v42 }
 0x4e7   :  { %v11190_v34 = vld [vmem:[#allocation7 + $0xfb0] sm:$0xf0] }
 0x4e8   :  { %v13836_v54 = vld [vmem:[#allocation7 + $0x954] sm:$0xf]  ;;  %v11193_v44 = vor.u32 %v14036_v21, %v11190_v34  ;;  %7655 = vmatpush.bf16.msrb.mxu2 %v10937_v3  ;;  %v14662_v34 = vld [vmem:[#allocation8] sm:$0xff] }
 0x4e9   :  { %v10390_v43 = vld [vmem:[#allocation7 + $0x970] sm:$0xf0]  ;;  %v1404_v53 = vperm.slane %v14662_v34, 4 }
 0x4ea   :  { %v13900_v24 = vld [vmem:[#allocation7 + $0xb54] sm:$0xf]  ;;  %v10393_v52 = vor.u32 %v13836_v54, %v10390_v43  ;;  %7668 = vmatpush.bf16.msrb.mxu3 %v11193_v44 }
 0x4eb   :  { %v10646_v35 = vld [vmem:[#allocation7 + $0xb70] sm:$0xf0]  ;;  %v7378_v43 = vadd.f32 %v7377_v6, %v1404_v53 }
 0x4ec   :  { %v13964_v4 = vld [vmem:[#allocation7 + $0xd54] sm:$0xf]  ;;  %v10649_v59 = vor.u32 %v13900_v24, %v10646_v35  ;;  %7630 = vmatpush.bf16.msrb.mxu0 %v10393_v52  ;;  %v8304_v24 = vrot.slane %v8303_v27, 2 }
 0x4ed   :  { %v10902_v25 = vld [vmem:[#allocation7 + $0xd70] sm:$0xf0] }
 0x4ee   :  { %v14028_v49 = vld [vmem:[#allocation7 + $0xf54] sm:$0xf]  ;;  %v10905_v61 = vor.u32 %v13964_v4, %v10902_v25  ;;  %7643 = vmatpush.bf16.msrb.mxu1 %v10649_v59  ;;  %v15385_v4 = vpop.eup %14648  ;;  %v8305_v15 = vadd.f32 %v8304_v24, %v8303_v27 }
 0x4ef   :  { %v11158_v50 = vld [vmem:[#allocation7 + $0xf70] sm:$0xf0]  ;;  %vm8380_vm4 = vweird.f32 %v15385_v4 }
 0x4f0   :  { %v13828_v60 = vld [vmem:[#allocation7 + $0x914] sm:$0xf]  ;;  %v11161_v9 = vor.u32 %v14028_v49, %v11158_v50  ;;  %7656 = vmatpush.bf16.msrb.mxu2 %v10905_v61  ;;  %vm15409_vm9 = vmor %vm8379_vm5, %vm8380_vm4  ;;  %vm8453_vm4 = vcmask 1044484  }
 0x4f1   :  { %v10358_v57 = vld [vmem:[#allocation7 + $0x930] sm:$0xf0] }
 0x4f2   :  { %v13892_v62 = vld [vmem:[#allocation7 + $0xb14] sm:$0xf]  ;;  %v10361_v12 = vor.u32 %v13828_v60, %v10358_v57  ;;  %7669 = vmatpush.bf16.msrb.mxu3 %v11161_v9  ;;  %v7391_v60 = vadd.f32 %v7390_v32, %v7378_v43  ;;  %v7403_v57 = vpop.f32.mrf.mxu2 }
 0x4f3   :  { %v10614_v51 = vld [vmem:[#allocation7 + $0xb30] sm:$0xf0] }
 0x4f4   :  { %v13956_v46 = vld [vmem:[#allocation7 + $0xd14] sm:$0xf]  ;;  %v10617_v16 = vor.u32 %v13892_v62, %v10614_v51  ;;  %7631 = vmatpush.bf16.msrb.mxu0 %v10361_v12  ;;  %v7416_v51 = vpop.f32.mrf.mxu3  ;;  %v7392_v12 = vpop.f32.mrf.mxu1 }
 0x4f5   :  { %v10870_v63 = vld [vmem:[#allocation7 + $0xd30] sm:$0xf0] }
 0x4f6   :  { %v14020_v0 = vld [vmem:[#allocation7 + $0xf14] sm:$0xf]  ;;  %v10873_v13 = vor.u32 %v13956_v46, %v10870_v63  ;;  %7644 = vmatpush.bf16.msrb.mxu1 %v10617_v16  ;;  %v7404_v46 = vadd.f32 %v7403_v57, %v7391_v60  ;;  %v7379_v63 = vpop.f32.mrf.mxu0 }
 0x4f7   :  { %v11126_v1 = vld [vmem:[#allocation7 + $0xf30] sm:$0xf0] }
 0x4f8   :  { %v13820_v5 = vld [vmem:[#allocation7 + $0x8d4] sm:$0xf]  ;;  %v11129_v56 = vor.u32 %v14020_v0, %v11126_v1  ;;  %7657 = vmatpush.bf16.msrb.mxu2 %v10873_v13  ;;  %v8374_v0 = vmul.f32 %v15385_v4, %v15374_v55  ;;  %v8306_v1 = vrot.slane %v8305_v15, 1 }
 0x4f9   :  { %v10326_v20 = vld [vmem:[#allocation7 + $0x8f0] sm:$0xf0] }
 0x4fa   :  { %v13884_v26 = vld [vmem:[#allocation7 + $0xad4] sm:$0xf]  ;;  %v10329_v47 = vor.u32 %v13820_v5, %v10326_v20  ;;  %7670 = vmatpush.bf16.msrb.mxu3 %v11129_v56  ;;  %v15389_v56 = vadd.f32 %v7416_v51, %v7404_v46 }
 0x4fb   :  { %v10582_v30 = vld [vmem:[#allocation7 + $0xaf0] sm:$0xf0] }
 0x4fc   :  { %v13948_v21 = vld [vmem:[#allocation7 + $0xcd4] sm:$0xf]  ;;  %v10585_v3 = vor.u32 %v13884_v26, %v10582_v30  ;;  %7632 = vmatpush.bf16.msrb.mxu0 %v10329_v47  ;;  %v8307_v30 = vadd.f32 %v8306_v1, %v8305_v15 }
 0x4fd   :  { %v10838_v14 = vld [vmem:[#allocation7 + $0xcf0] sm:$0xf0] }
 0x4fe   :  { %v14012_v42 = vld [vmem:[#allocation7 + $0xed4] sm:$0xf]  ;;  %v10841_v25 = vor.u32 %v13948_v21, %v10838_v14  ;;  %7645 = vmatpush.bf16.msrb.mxu1 %v10585_v3 }
 0x4ff   :  { %v11094_v54 = vld [vmem:[#allocation7 + $0xef0] sm:$0xf0] }
 0x500   :  { %v13812_v44 = vld [vmem:[#allocation7 + $0x894] sm:$0xf]  ;;  %v11097_v49 = vor.u32 %v14012_v42, %v11094_v54  ;;  %7658 = vmatpush.bf16.msrb.mxu2 %v10841_v25  ;;  %v8339_v54 = vmul.f32 0.5, %v8307_v30 }
 0x501   :  { %v10294_v35 = vld [vmem:[#allocation7 + $0x8b0] sm:$0xf0] }
 0x502   :  { %v13876_v50 = vld [vmem:[#allocation7 + $0xa94] sm:$0xf]  ;;  %v10297_v2 = vor.u32 %v13812_v44, %v10294_v35  ;;  %7671 = vmatpush.bf16.msrb.mxu3 %v11097_v49  ;;  %v8375_v44 = vmul.f32 %v15385_v4, %v8374_v0  ;;  %v15392_v60 = vadd.f32 1e-05, %v8339_v54 }
 0x503   :  { %v10550_v52 = vld [vmem:[#allocation7 + $0xab0] sm:$0xf0] }
 0x504   :  { %v13940_v59 = vld [vmem:[#allocation7 + $0xc94] sm:$0xf]  ;;  %v10553_v5 = vor.u32 %v13876_v50, %v10550_v52  ;;  %7633 = vmatpush.bf16.msrb.mxu0 %v10297_v2  ;;  %14650 = vrsqrt.f32 %v15392_v60  ;;  %vm8389_vm11 = vweird.f32 %v15392_v60 }
 0x505   :  { %v10806_v61 = vld [vmem:[#allocation7 + $0xcb0] sm:$0xf0] }
 0x506   :  { %v14004_v9 = vld [vmem:[#allocation7 + $0xe94] sm:$0xf]  ;;  %v10809_v16 = vor.u32 %v13940_v59, %v10806_v61  ;;  %7646 = vmatpush.bf16.msrb.mxu1 %v10553_v5  ;;  %v7405_v59 = vpop.f32.mrf.mxu2  ;;  %v7418_v61 = vpop.f32.mrf.mxu3  ;;  %v8376_v5 = vmul.f32 0.5, %v8375_v44 }
 0x507   :  { %v11062_v62 = vld [vmem:[#allocation7 + $0xeb0] sm:$0xf0] }
 0x508   :  { %v13804_v6 = vld [vmem:[#allocation7 + $0x854] sm:$0xf]  ;;  %v11065_v20 = vor.u32 %v14004_v9, %v11062_v62  ;;  %7659 = vmatpush.bf16.msrb.mxu2 %v10809_v16 }
 0x509   :  { %v10262_v7 = vld [vmem:[#allocation7 + $0x870] sm:$0xf0] }
 0x50a   :  { %v13868_v26 = vld [vmem:[#allocation7 + $0xa54] sm:$0xf]  ;;  %v10265_v43 = vor.u32 %v13804_v6, %v10262_v7  ;;  %7672 = vmatpush.bf16.msrb.mxu3 %v11065_v20  ;;  %v15395_v54 = vpop.eup %14650 }
 0x50b   :  { %v10518_v32 = vld [vmem:[#allocation7 + $0xa70] sm:$0xf0]  ;;  %v8384_v44 = vmul.f32 %v15395_v54, %v15392_v60  ;;  %vm8390_vm10 = vweird.f32 %v15395_v54 }
 0x50c   :  { %v13932_v13 = vld [vmem:[#allocation7 + $0xc54] sm:$0xf]  ;;  %v10521_v24 = vor.u32 %v13868_v26, %v10518_v32  ;;  %7634 = vmatpush.bf16.msrb.mxu0 %v10265_v43  ;;  %vm8391_vm12 = vmor %vm8389_vm11, %vm8390_vm10 }
 0x50d   :  { %v10774_v21 = vld [vmem:[#allocation7 + $0xc70] sm:$0xf0] }
 0x50e   :  { %v13996_v34 = vld [vmem:[#allocation7 + $0xe54] sm:$0xf]  ;;  %v10777_v35 = vor.u32 %v13932_v13, %v10774_v21  ;;  %7647 = vmatpush.bf16.msrb.mxu1 %v10521_v24 }
 0x50f   :  { %v11030_v53 = vld [vmem:[#allocation7 + $0xe70] sm:$0xf0] }
 0x510   :  { %v13796_v27 = vld [vmem:[#allocation7 + $0x814] sm:$0xf]  ;;  %v11033_v25 = vor.u32 %v13996_v34, %v11030_v53  ;;  %7660 = vmatpush.bf16.msrb.mxu2 %v10777_v35 }
 0x511   :  { %v10230_v14 = vld [vmem:[#allocation7 + $0x830] sm:$0xf0] }
 0x512   :  { %v13860_v42 = vld [vmem:[#allocation7 + $0xa14] sm:$0xf]  ;;  %v10233_v46 = vor.u32 %v13796_v27, %v10230_v14  ;;  %7673 = vmatpush.bf16.msrb.mxu3 %v11033_v25 }
 0x513   :  { %v10486_v47 = vld [vmem:[#allocation7 + $0xa30] sm:$0xf0] }
 0x514   :  { %v13924_v3 = vld [vmem:[#allocation7 + $0xc14] sm:$0xf]  ;;  %v10489_v63 = vor.u32 %v13860_v42, %v10486_v47  ;;  %7635 = vmatpush.bf16.msrb.mxu0 %v10233_v46  ;;  %v8377_v42 = vsub.f32 1.5, %v8376_v5 }
 0x515   :  { %v10742_v49 = vld [vmem:[#allocation7 + $0xc30] sm:$0xf0] }
 0x516   :  { %v13988_v50 = vld [vmem:[#allocation7 + $0xe14] sm:$0xf]  ;;  %v10745_v6 = vor.u32 %v13924_v3, %v10742_v49  ;;  %7648 = vmatpush.bf16.msrb.mxu1 %v10489_v63  ;;  %v8378_v61 = vmul.f32 %v15385_v4, %v8377_v42  ;;  %v7442_v42 = vpop.f32.mrf.mxu1 }
 0x517   :  { %v10998_v52 = vld [vmem:[#allocation7 + $0xe30] sm:$0xf0]  ;;  %7636 = vmatmul.bf16.vlgmr.msrb.gmra.mxu0 %v15167_v22 }
 0x518   :  { %v14108_v57 = vld [vmem:[#allocation7 + $0x11d4] sm:$0xf]  ;;  %v11001_v7 = vor.u32 %v13988_v50, %v10998_v52  ;;  %7661 = vmatpush.bf16.msrb.mxu2 %v10745_v6 }
 0x519   :  { %v11478_v15 = vld [vmem:[#allocation7 + $0x11f0] sm:$0xf0]  ;;  %7649 = vmatmul.bf16.vlgmr.msrb.gmra.mxu1 %v15171_v28 }
 0x51a   :  { %v14172_v9 = vld [vmem:[#allocation7 + $0x13d4] sm:$0xf]  ;;  %v11481_v12 = vor.u32 %v14108_v57, %v11478_v15  ;;  %7674 = vmatpush.bf16.msrb.mxu3 %v11001_v7 }
 0x51b   :  { %v11734_v62 = vld [vmem:[#allocation7 + $0x13f0] sm:$0xf0]  ;;  %7662 = vmatmul.bf16.vlgmr.msrb.gmra.mxu2 %v15169_v23 }
 0x51c   :  { %v14236_v51 = vld [vmem:[#allocation7 + $0x15d4] sm:$0xf]  ;;  %v11737_v16 = vor.u32 %v14172_v9, %v11734_v62  ;;  %7680 = vmatpush.bf16.msra.mxu0 %v11481_v12  ;;  %v8385_v9 = vmul.f32 %v15395_v54, %v8384_v44 }
 0x51d   :  { %v11990_v0 = vld [vmem:[#allocation7 + $0x15f0] sm:$0xf0]  ;;  %7675 = vmatmul.bf16.vlgmr.msrb.gmra.mxu3 %v15173_v29 }
 0x51e   :  { %v14300_v1 = vld [vmem:[#allocation7 + $0x17d4] sm:$0xf]  ;;  %v11993_v32 = vor.u32 %v14236_v51, %v11990_v0  ;;  %7693 = vmatpush.bf16.msra.mxu1 %v11737_v16 }
 0x51f   :  { %v12246_v2 = vld [vmem:[#allocation7 + $0x17f0] sm:$0xf0] }
 0x520   :  { %v14100_v20 = vld [vmem:[#allocation7 + $0x1194] sm:$0xf]  ;;  %v12249_v13 = vor.u32 %v14300_v1, %v12246_v2  ;;  %7706 = vmatpush.bf16.msra.mxu2 %v11993_v32  ;;  %v8386_v2 = vmul.f32 0.5, %v8385_v9 }
 0x521   :  { %v11446_v26 = vld [vmem:[#allocation7 + $0x11b0] sm:$0xf0] }
 0x522   :  { %v14164_v30 = vld [vmem:[#allocation7 + $0x1394] sm:$0xf]  ;;  %v11449_v43 = vor.u32 %v14100_v20, %v11446_v26  ;;  %7719 = vmatpush.bf16.msra.mxu3 %v12249_v13  ;;  %v8382_v26 = vsel %vm15409_vm9, %v15385_v4, %v8378_v61  ;;  %v8387_v32 = vsub.f32 1.5, %v8386_v2  ;;  %v7429_v13 = vpop.f32.mrf.mxu0 }
 0x523   :  { %v11702_v21 = vld [vmem:[#allocation7 + $0x13b0] sm:$0xf0] }
 0x524   :  { %v14228_v34 = vld [vmem:[#allocation7 + $0x1594] sm:$0xf]  ;;  %v11705_v24 = vor.u32 %v14164_v30, %v11702_v21  ;;  %7681 = vmatpush.bf16.msra.mxu0 %v11449_v43  ;;  %v8388_v43 = vmul.f32 %v15395_v54, %v8387_v32 }
 0x525   :  { %v11958_v53 = vld [vmem:[#allocation7 + $0x15b0] sm:$0xf0] }
 0x526   :  { %v14292_v27 = vld [vmem:[#allocation7 + $0x1794] sm:$0xf]  ;;  %v11961_v35 = vor.u32 %v14228_v34, %v11958_v53  ;;  %7694 = vmatpush.bf16.msra.mxu1 %v11705_v24 }
 0x527   :  { %v12214_v14 = vld [vmem:[#allocation7 + $0x17b0] sm:$0xf0] }
 0x528   :  { %v14092_v47 = vld [vmem:[#allocation7 + $0x1154] sm:$0xf]  ;;  %v12217_v25 = vor.u32 %v14292_v27, %v12214_v14  ;;  %7707 = vmatpush.bf16.msra.mxu2 %v11961_v35  ;;  %v7430_v14 = vadd.f32 %v7429_v13, %v15389_v56  ;;  %v8392_v56 = vsel %vm8391_vm12, %v15395_v54, %v8388_v43  ;;  %v7444_v13 = vpop.f32.mrf.mxu1 }
 0x529   :  { %v11414_v3 = vld [vmem:[#allocation7 + $0x1170] sm:$0xf0] }
 0x52a   :  { %v14156_v49 = vld [vmem:[#allocation7 + $0x1354] sm:$0xf]  ;;  %v11417_v62 = vor.u32 %v14092_v47, %v11414_v3  ;;  %7720 = vmatpush.bf16.msra.mxu3 %v12217_v25 }
 0x52b   :  { %v11670_v50 = vld [vmem:[#allocation7 + $0x1370] sm:$0xf0] }
 0x52c   :  { %v14220_v52 = vld [vmem:[#allocation7 + $0x1554] sm:$0xf]  ;;  %v11673_v51 = vor.u32 %v14156_v49, %v11670_v50  ;;  %7682 = vmatpush.bf16.msra.mxu0 %v11417_v62  ;;  %v7443_v49 = vadd.f32 %v7442_v42, %v7430_v14  ;;  %v8442_v50 = vrot.slane %v8382_v26, 6 }
 0x52d   :  { %v11926_v59 = vld [vmem:[#allocation7 + $0x1570] sm:$0xf0] }
 0x52e   :  { %v14284_v57 = vld [vmem:[#allocation7 + $0x1754] sm:$0xf]  ;;  %v11929_v5 = vor.u32 %v14220_v52, %v11926_v59  ;;  %7695 = vmatpush.bf16.msra.mxu1 %v11673_v51  ;;  %v8443_v52 = vrot.slane %v8392_v56, 5 }
 0x52f   :  { %v12182_v15 = vld [vmem:[#allocation7 + $0x1770] sm:$0xf0] }
 0x530   :  { %v14084_v46 = vld [vmem:[#allocation7 + $0x1114] sm:$0xf]  ;;  %v12185_v6 = vor.u32 %v14284_v57, %v12182_v15  ;;  %7708 = vmatpush.bf16.msra.mxu2 %v11929_v5 }
 0x531   :  { %v11382_v63 = vld [vmem:[#allocation7 + $0x1130] sm:$0xf0] }
 0x532   :  { %v14148_v0 = vld [vmem:[#allocation7 + $0x1314] sm:$0xf]  ;;  %v11385_v30 = vor.u32 %v14084_v46, %v11382_v63  ;;  %7721 = vmatpush.bf16.msra.mxu3 %v12185_v6  ;;  %v7455_v63 = vpop.f32.mrf.mxu2  ;;  %v7468_v6 = vpop.f32.mrf.mxu3 }
 0x533   :  { %v11638_v7 = vld [vmem:[#allocation7 + $0x1330] sm:$0xf0]  ;;  %v7456_v5 = vadd.f32 %v7455_v63, %v7443_v49 }
 0x534   :  { %v14212_v55 = vld [vmem:[#allocation7 + $0x1514] sm:$0xf]  ;;  %v11641_v21 = vor.u32 %v14148_v0, %v11638_v7  ;;  %7683 = vmatpush.bf16.msra.mxu0 %v11385_v30  ;;  %v8451_v0 = vsel %vm8450_vm13, %v8442_v50, %v8443_v52  ;;  %vm8455_vm13 = vcmask 1046534  }
 0x535   :  { %v11894_v12 = vld [vmem:[#allocation7 + $0x1530] sm:$0xf0]  ;;  %v15426_v7 = vsel %vm232_vm6, %v15317_v19, %v8451_v0  ;;  %v15428_v32 = vadd.f32 %v7468_v6, %v7456_v5 }
 0x536   :  { %v14276_v16 = vld [vmem:[#allocation7 + $0x1714] sm:$0xf]  ;;  %v11897_v4 = vor.u32 %v14212_v55, %v11894_v12  ;;  %7696 = vmatpush.bf16.msra.mxu1 %v11641_v21  ;;  %v7431_v55 = vpop.f32.mrf.mxu0 }
 0x537   :  { %v12150_v20 = vld [vmem:[#allocation7 + $0x1730] sm:$0xf0] }
 0x538   :  { %v14076_v34 = vld [vmem:[#allocation7 + $0x10d4] sm:$0xf]  ;;  %v12153_v24 = vor.u32 %v14276_v16, %v12150_v20  ;;  %7709 = vmatpush.bf16.msra.mxu2 %v11897_v4 }
 0x539   :  { %v11350_v53 = vld [vmem:[#allocation7 + $0x10f0] sm:$0xf0] }
 0x53a   :  { %v14140_v27 = vld [vmem:[#allocation7 + $0x12d4] sm:$0xf]  ;;  %v11353_v60 = vor.u32 %v14076_v34, %v11350_v53  ;;  %7722 = vmatpush.bf16.msra.mxu3 %v12153_v24  ;;  %v7457_v52 = vpop.f32.mrf.mxu2 }
 0x53b   :  { %v11606_v47 = vld [vmem:[#allocation7 + $0x12f0] sm:$0xf0] }
 0x53c   :  { %v14204_v3 = vld [vmem:[#allocation7 + $0x14d4] sm:$0xf]  ;;  %v11609_v59 = vor.u32 %v14140_v27, %v11606_v47  ;;  %7684 = vmatpush.bf16.msra.mxu0 %v11353_v60 }
 0x53d   :  { %v11862_v44 = vld [vmem:[#allocation7 + $0x14f0] sm:$0xf0] }
 0x53e   :  { %v14268_v35 = vld [vmem:[#allocation7 + $0x16d4] sm:$0xf]  ;;  %v11865_v61 = vor.u32 %v14204_v3, %v11862_v44  ;;  %7697 = vmatpush.bf16.msra.mxu1 %v11609_v59 }
 0x53f   :  { %v12118_v25 = vld [vmem:[#allocation7 + $0x16f0] sm:$0xf0] }
 0x540   :  { %v14068_v57 = vld [vmem:[#allocation7 + $0x1094] sm:$0xf]  ;;  %v12121_v9 = vor.u32 %v14268_v35, %v12118_v25  ;;  %7710 = vmatpush.bf16.msra.mxu2 %v11865_v61 }
 0x541   :  { %v11318_v15 = vld [vmem:[#allocation7 + $0x10b0] sm:$0xf0] }
 0x542   :  { %v14132_v62 = vld [vmem:[#allocation7 + $0x1294] sm:$0xf]  ;;  %v11321_v12 = vor.u32 %v14068_v57, %v11318_v15  ;;  %7723 = vmatpush.bf16.msra.mxu3 %v12121_v9  ;;  %v7470_v15 = vpop.f32.mrf.mxu3 }
 0x543   :  { %v11574_v51 = vld [vmem:[#allocation7 + $0x12b0] sm:$0xf0] }
 0x544   :  { %v14196_v46 = vld [vmem:[#allocation7 + $0x1494] sm:$0xf]  ;;  %v11577_v16 = vor.u32 %v14132_v62, %v11574_v51  ;;  %7685 = vmatpush.bf16.msra.mxu0 %v11321_v12 }
 0x545   :  { %v11830_v54 = vld [vmem:[#allocation7 + $0x14b0] sm:$0xf0] }
 0x546   :  { %v14260_v1 = vld [vmem:[#allocation7 + $0x1694] sm:$0xf]  ;;  %v11833_v30 = vor.u32 %v14196_v46, %v11830_v54  ;;  %7698 = vmatpush.bf16.msra.mxu1 %v11577_v16 }
 0x547   :  { %v12086_v2 = vld [vmem:[#allocation7 + $0x16b0] sm:$0xf0] }
 0x548   :  { %v14060_v20 = vld [vmem:[#allocation7 + $0x1054] sm:$0xf]  ;;  %v12089_v21 = vor.u32 %v14260_v1, %v12086_v2  ;;  %7711 = vmatpush.bf16.msra.mxu2 %v11833_v30 }
 0x549   :  { %v11286_v26 = vld [vmem:[#allocation7 + $0x1070] sm:$0xf0] }
 0x54a   :  { %v14124_v34 = vld [vmem:[#allocation7 + $0x1254] sm:$0xf]  ;;  %v11289_v4 = vor.u32 %v14060_v20, %v11286_v26  ;;  %7724 = vmatpush.bf16.msra.mxu3 %v12089_v21 }
 0x54b   :  { %v11542_v53 = vld [vmem:[#allocation7 + $0x1270] sm:$0xf0] }
 0x54c   :  { %v14188_v27 = vld [vmem:[#allocation7 + $0x1454] sm:$0xf]  ;;  %v11545_v24 = vor.u32 %v14124_v34, %v11542_v53  ;;  %7686 = vmatpush.bf16.msra.mxu0 %v11289_v4 }
 0x54d   :  { %v11798_v14 = vld [vmem:[#allocation7 + $0x1470] sm:$0xf0] }
 0x54e   :  { %v14252_v19 = vld [vmem:[#allocation7 + $0x1654] sm:$0xf]  ;;  %v11801_v35 = vor.u32 %v14188_v27, %v11798_v14  ;;  %7699 = vmatpush.bf16.msra.mxu1 %v11545_v24 }
 0x54f   :  { %v12054_v42 = vld [vmem:[#allocation7 + $0x1670] sm:$0xf0] }
 0x550   :  { %v14052_v43 = vld [vmem:[#allocation7 + $0x1014] sm:$0xf]  ;;  %v12057_v25 = vor.u32 %v14252_v19, %v12054_v42  ;;  %7712 = vmatpush.bf16.msra.mxu2 %v11801_v35 }
 0x551   :  { %v11254_v47 = vld [vmem:[#allocation7 + $0x1030] sm:$0xf0] }
 0x552   :  { %v14116_v3 = vld [vmem:[#allocation7 + $0x1214] sm:$0xf]  ;;  %v11257_v51 = vor.u32 %v14052_v43, %v11254_v47  ;;  %7725 = vmatpush.bf16.msra.mxu3 %v12057_v25 }
 0x553   :  { %v11510_v44 = vld [vmem:[#allocation7 + $0x1230] sm:$0xf0] }
 0x554   :  { %v14180_v49 = vld [vmem:[#allocation7 + $0x1414] sm:$0xf]  ;;  %v11513_v46 = vor.u32 %v14116_v3, %v11510_v44  ;;  %7687 = vmatpush.bf16.msra.mxu0 %v11257_v51 }
 0x555   :  { %v11766_v56 = vld [vmem:[#allocation7 + $0x1430] sm:$0xf0] }
 0x556   :  { %v14244_v50 = vld [vmem:[#allocation7 + $0x1614] sm:$0xf]  ;;  %v11769_v1 = vor.u32 %v14180_v49, %v11766_v56  ;;  %7700 = vmatpush.bf16.msra.mxu1 %v11513_v46  ;;  %v7481_v46 = vpop.f32.mrf.mxu0 }
 0x557   :  { %v12022_v60 = vld [vmem:[#allocation7 + $0x1630] sm:$0xf0]  ;;  %7688 = vmatmul.bf16.vlgmr.msra.gmra.mxu0 %v15179_v36 }
 0x558   :  { %v14364_v59 = vld [vmem:[#allocation7 + $0x19d4] sm:$0xf]  ;;  %v12025_v2 = vor.u32 %v14244_v50, %v12022_v60  ;;  %7713 = vmatpush.bf16.msra.mxu2 %v11769_v1  ;;  %v7494_v1 = vpop.f32.mrf.mxu1 }
 0x559   :  { %v12502_v57 = vld [vmem:[#allocation7 + $0x19f0] sm:$0xf0]  ;;  %7701 = vmatmul.bf16.vlgmr.msra.gmra.mxu1 %v15183_v40 }
 0x55a   :  { %v14428_v61 = vld [vmem:[#allocation7 + $0x1bd4] sm:$0xf]  ;;  %v12505_v5 = vor.u32 %v14364_v59, %v12502_v57  ;;  %7726 = vmatpush.bf16.msra.mxu3 %v12025_v2 }
 0x55b   :  { %v12758_v9 = vld [vmem:[#allocation7 + $0x1bf0] sm:$0xf0]  ;;  %7714 = vmatmul.bf16.vlgmr.msra.gmra.mxu2 %v15181_v37 }
 0x55c   :  { %v14492_v62 = vld [vmem:[#allocation7 + $0x1dd4] sm:$0xf]  ;;  %v12761_v6 = vor.u32 %v14428_v61, %v12758_v9  ;;  %7732 = vmatpush.bf16.msrb.mxu0 %v12505_v5 }
 0x55d   :  { %v13014_v63 = vld [vmem:[#allocation7 + $0x1df0] sm:$0xf0]  ;;  %7727 = vmatmul.bf16.vlgmr.msra.gmra.mxu3 %v15185_v41 }
 0x55e   :  { %v14556_v0 = vld [vmem:[#allocation7 + $0x1fd4] sm:$0xf]  ;;  %v13017_v16 = vor.u32 %v14492_v62, %v13014_v63  ;;  %7745 = vmatpush.bf16.msrb.mxu1 %v12761_v6  ;;  %v7482_v63 = vadd.f32 %v7481_v46, %v15428_v32 }
 0x55f   :  { %v13270_v54 = vld [vmem:[#allocation7 + $0x1ff0] sm:$0xf0] }
 0x560   :  { %v14356_v55 = vld [vmem:[#allocation7 + $0x1994] sm:$0xf]  ;;  %v13273_v20 = vor.u32 %v14556_v0, %v13270_v54  ;;  %7758 = vmatpush.bf16.msrb.mxu2 %v13017_v16 }
 0x561   :  { %v12470_v12 = vld [vmem:[#allocation7 + $0x19b0] sm:$0xf0] }
 0x562   :  { %v14420_v26 = vld [vmem:[#allocation7 + $0x1b94] sm:$0xf]  ;;  %v12473_v27 = vor.u32 %v14356_v55, %v12470_v12  ;;  %7771 = vmatpush.bf16.msrb.mxu3 %v13273_v20 }
 0x563   :  { %v12726_v13 = vld [vmem:[#allocation7 + $0x1bb0] sm:$0xf0] }
 0x564   :  { %v14484_v30 = vld [vmem:[#allocation7 + $0x1d94] sm:$0xf]  ;;  %v12729_v14 = vor.u32 %v14420_v26, %v12726_v13  ;;  %7733 = vmatpush.bf16.msrb.mxu0 %v12473_v27  ;;  %v7495_v26 = vadd.f32 %v7494_v1, %v7482_v63 }
 0x565   :  { %v12982_v21 = vld [vmem:[#allocation7 + $0x1db0] sm:$0xf0] }
 0x566   :  { %v14548_v34 = vld [vmem:[#allocation7 + $0x1f94] sm:$0xf]  ;;  %v12985_v43 = vor.u32 %v14484_v30, %v12982_v21  ;;  %7746 = vmatpush.bf16.msrb.mxu1 %v12729_v14 }
 0x567   :  { %v13238_v53 = vld [vmem:[#allocation7 + $0x1fb0] sm:$0xf0] }
 0x568   :  { %v14348_v19 = vld [vmem:[#allocation7 + $0x1954] sm:$0xf]  ;;  %v13241_v4 = vor.u32 %v14548_v34, %v13238_v53  ;;  %7759 = vmatpush.bf16.msrb.mxu2 %v12985_v43 }
 0x569   :  { %v12438_v42 = vld [vmem:[#allocation7 + $0x1970] sm:$0xf0] }
 0x56a   :  { %v14412_v24 = vld [vmem:[#allocation7 + $0x1b54] sm:$0xf]  ;;  %v12441_v49 = vor.u32 %v14348_v19, %v12438_v42  ;;  %7772 = vmatpush.bf16.msrb.mxu3 %v13241_v4  ;;  %v7507_v42 = vpop.f32.mrf.mxu2 }
 0x56b   :  { %v12694_v47 = vld [vmem:[#allocation7 + $0x1b70] sm:$0xf0] }
 0x56c   :  { %v14476_v3 = vld [vmem:[#allocation7 + $0x1d54] sm:$0xf]  ;;  %v12697_v56 = vor.u32 %v14412_v24, %v12694_v47  ;;  %7734 = vmatpush.bf16.msrb.mxu0 %v12441_v49  ;;  %v7508_v47 = vadd.f32 %v7507_v42, %v7495_v26  ;;  %v7483_v49 = vpop.f32.mrf.mxu0 }
 0x56d   :  { %v12950_v44 = vld [vmem:[#allocation7 + $0x1d70] sm:$0xf0]  ;;  %v9404_v49 = vld [vmem:[#allocation7 + $0x198] sm:$0xf] }
 0x56e   :  { %v14540_v35 = vld [vmem:[#allocation7 + $0x1f54] sm:$0xf]  ;;  %v12953_v60 = vor.u32 %v14476_v3, %v12950_v44  ;;  %7747 = vmatpush.bf16.msrb.mxu1 %v12697_v56  ;;  %v7520_v3 = vpop.f32.mrf.mxu3 }
 0x56f   :  { %v13206_v25 = vld [vmem:[#allocation7 + $0x1f70] sm:$0xf0]  ;;  %v15435_v56 = vadd.f32 %v7520_v3, %v7508_v47  ;;  %v13793_v47 = vld [vmem:[#allocation7 + $0x7f4] sm:$0xf0] }
 0x570   :  { %v14340_v50 = vld [vmem:[#allocation7 + $0x1914] sm:$0xf]  ;;  %v13209_v59 = vor.u32 %v14540_v35, %v13206_v25  ;;  %7760 = vmatpush.bf16.msrb.mxu2 %v12953_v60 }
 0x571   :  { %v12406_v52 = vld [vmem:[#allocation7 + $0x1930] sm:$0xf0] }
 0x572   :  { %v14404_v57 = vld [vmem:[#allocation7 + $0x1b14] sm:$0xf]  ;;  %v12409_v0 = vor.u32 %v14340_v50, %v12406_v52  ;;  %7773 = vmatpush.bf16.msrb.mxu3 %v13209_v59 }
 0x573   :  { %v12662_v15 = vld [vmem:[#allocation7 + $0x1b30] sm:$0xf0] }
 0x574   :  { %v14468_v61 = vld [vmem:[#allocation7 + $0x1d14] sm:$0xf]  ;;  %v12665_v54 = vor.u32 %v14404_v57, %v12662_v15  ;;  %7735 = vmatpush.bf16.msrb.mxu0 %v12409_v0  ;;  %v7496_v57 = vpop.f32.mrf.mxu1 }
 0x575   :  { %v12918_v9 = vld [vmem:[#allocation7 + $0x1d30] sm:$0xf0]  ;;  %v13657_v57 = vld [vmem:[#allocation7 + $0x3b4] sm:$0xf0] }
 0x576   :  { %v14532_v62 = vld [vmem:[#allocation7 + $0x1f14] sm:$0xf]  ;;  %v12921_v6 = vor.u32 %v14468_v61, %v12918_v9  ;;  %7748 = vmatpush.bf16.msrb.mxu1 %v12665_v54 }
 0x577   :  { %v13174_v51 = vld [vmem:[#allocation7 + $0x1f30] sm:$0xf0] }
 0x578   :  { %v14332_v2 = vld [vmem:[#allocation7 + $0x18d4] sm:$0xf]  ;;  %v13177_v55 = vor.u32 %v14532_v62, %v13174_v51  ;;  %7761 = vmatpush.bf16.msrb.mxu2 %v12921_v6 }
 0x579   :  { %v12374_v5 = vld [vmem:[#allocation7 + $0x18f0] sm:$0xf0] }
 0x57a   :  { %v14396_v12 = vld [vmem:[#allocation7 + $0x1ad4] sm:$0xf]  ;;  %v12377_v34 = vor.u32 %v14332_v2, %v12374_v5  ;;  %7774 = vmatpush.bf16.msrb.mxu3 %v13177_v55 }
 0x57b   :  { %v12630_v16 = vld [vmem:[#allocation7 + $0x1af0] sm:$0xf0] }
 0x57c   :  { %v14460_v20 = vld [vmem:[#allocation7 + $0x1cd4] sm:$0xf]  ;;  %v12633_v32 = vor.u32 %v14396_v12, %v12630_v16  ;;  %7736 = vmatpush.bf16.msrb.mxu0 %v12377_v34  ;;  %v9436_v34 = vld [vmem:[#allocation7 + $0x1d8] sm:$0xf] }
 0x57d   :  { %v12886_v13 = vld [vmem:[#allocation7 + $0x1cf0] sm:$0xf0] }
 0x57e   :  { %v14524_v30 = vld [vmem:[#allocation7 + $0x1ed4] sm:$0xf]  ;;  %v12889_v14 = vor.u32 %v14460_v20, %v12886_v13  ;;  %7749 = vmatpush.bf16.msrb.mxu1 %v12633_v32  ;;  %v13601_v32 = vld [vmem:[#allocation7 + $0x1f4] sm:$0xf0] }
 0x57f   :  { %v13142_v21 = vld [vmem:[#allocation7 + $0x1ef0] sm:$0xf0] }
 0x580   :  { %v14324_v53 = vld [vmem:[#allocation7 + $0x1894] sm:$0xf]  ;;  %v13145_v19 = vor.u32 %v14524_v30, %v13142_v21  ;;  %7762 = vmatpush.bf16.msrb.mxu2 %v12889_v14  ;;  %v7509_v30 = vpop.f32.mrf.mxu2  ;;  %v13665_v14 = vld [vmem:[#allocation7 + $0x3f4] sm:$0xf0] }
 0x581   :  { %v12342_v27 = vld [vmem:[#allocation7 + $0x18b0] sm:$0xf0]  ;;  %v13577_v30 = vld [vmem:[#allocation7 + $0x134] sm:$0xf0] }
 0x582   :  { %v14388_v43 = vld [vmem:[#allocation7 + $0x1a94] sm:$0xf]  ;;  %v12345_v50 = vor.u32 %v14324_v53, %v12342_v27  ;;  %7775 = vmatpush.bf16.msrb.mxu3 %v13145_v19  ;;  %v7522_v53 = vpop.f32.mrf.mxu3  ;;  %v9692_v27 = vld [vmem:[#allocation7 + $0x3d8] sm:$0xf] }
 0x583   :  { %v12598_v4 = vld [vmem:[#allocation7 + $0x1ab0] sm:$0xf0]  ;;  %v9948_v19 = vld [vmem:[#allocation7 + $0x5d8] sm:$0xf] }
 0x584   :  { %v14452_v24 = vld [vmem:[#allocation7 + $0x1c94] sm:$0xf]  ;;  %v12601_v52 = vor.u32 %v14388_v43, %v12598_v4  ;;  %7737 = vmatpush.bf16.msrb.mxu0 %v12345_v50  ;;  %v13729_v4 = vld [vmem:[#allocation7 + $0x5f4] sm:$0xf0] }
 0x585   :  { %v12854_v44 = vld [vmem:[#allocation7 + $0x1cb0] sm:$0xf0]  ;;  %v13593_v50 = vld [vmem:[#allocation7 + $0x1b4] sm:$0xf0] }
 0x586   :  { %v14516_v35 = vld [vmem:[#allocation7 + $0x1e94] sm:$0xf]  ;;  %v12857_v15 = vor.u32 %v14452_v24, %v12854_v44  ;;  %7750 = vmatpush.bf16.msrb.mxu1 %v12601_v52  ;;  %v10204_v24 = vld [vmem:[#allocation7 + $0x7d8] sm:$0xf]  ;;  %v9949_v52 = vor.u32 %v13729_v4, %v9948_v19 }
 0x587   :  { %v13110_v25 = vld [vmem:[#allocation7 + $0x1eb0] sm:$0xf0]  ;;  %v13641_v53 = vld [vmem:[#allocation7 + $0x334] sm:$0xf0] }
 0x588   :  { %v14316_v60 = vld [vmem:[#allocation7 + $0x1854] sm:$0xf]  ;;  %v13113_v61 = vor.u32 %v14516_v35, %v13110_v25  ;;  %7763 = vmatpush.bf16.msrb.mxu2 %v12857_v15  ;;  %v9437_v35 = vor.u32 %v13601_v32, %v9436_v34  ;;  %v9693_v25 = vor.u32 %v13665_v14, %v9692_v27  ;;  %v9916_v15 = vld [vmem:[#allocation7 + $0x598] sm:$0xf] }
 0x589   :  { %v12310_v59 = vld [vmem:[#allocation7 + $0x1870] sm:$0xf0]  ;;  %v9596_v32 = vld [vmem:[#allocation7 + $0x318] sm:$0xf] }
 0x58a   :  { %v14380_v9 = vld [vmem:[#allocation7 + $0x1a54] sm:$0xf]  ;;  %v12313_v1 = vor.u32 %v14316_v60, %v12310_v59  ;;  %7776 = vmatpush.bf16.msrb.mxu3 %v13113_v61  ;;  %v10205_v60 = vor.u32 %v13793_v47, %v10204_v24  ;;  %v9660_v59 = vld [vmem:[#allocation7 + $0x398] sm:$0xf]  ;;  %v9597_v47 = vor.u32 %v13641_v53, %v9596_v32 }
 0x58b   :  { %v12566_v62 = vld [vmem:[#allocation7 + $0x1a70] sm:$0xf0]  ;;  %v13721_v61 = vld [vmem:[#allocation7 + $0x5b4] sm:$0xf0] }
 0x58c   :  { %v14444_v51 = vld [vmem:[#allocation7 + $0x1c54] sm:$0xf]  ;;  %v12569_v2 = vor.u32 %v14380_v9, %v12566_v62  ;;  %7738 = vmatpush.bf16.msrb.mxu0 %v12313_v1  ;;  %v10172_v9 = vld [vmem:[#allocation7 + $0x798] sm:$0xf] }
 0x58d   :  { %v12822_v46 = vld [vmem:[#allocation7 + $0x1c70] sm:$0xf0]  ;;  %v13785_v62 = vld [vmem:[#allocation7 + $0x7b4] sm:$0xf0] }
 0x58e   :  { %v14508_v63 = vld [vmem:[#allocation7 + $0x1e54] sm:$0xf]  ;;  %v12825_v12 = vor.u32 %v14444_v51, %v12822_v46  ;;  %7751 = vmatpush.bf16.msrb.mxu1 %v12569_v2  ;;  %v9405_v51 = vor.u32 %v13593_v50, %v9404_v49  ;;  %v9661_v46 = vor.u32 %v13657_v57, %v9660_v59  ;;  %v10173_v1 = vor.u32 %v13785_v62, %v10172_v9  ;;  %v9628_v2 = vld [vmem:[#allocation7 + $0x358] sm:$0xf] }
 0x58f   :  { %v13078_v0 = vld [vmem:[#allocation7 + $0x1e70] sm:$0xf0]  ;;  %v9852_v27 = vld [vmem:[#allocation7 + $0x518] sm:$0xf] }
 0x590   :  { %v14308_v54 = vld [vmem:[#allocation7 + $0x1814] sm:$0xf]  ;;  %v13081_v16 = vor.u32 %v14508_v63, %v13078_v0  ;;  %7764 = vmatpush.bf16.msrb.mxu2 %v12825_v12  ;;  %v9372_v63 = vld [vmem:[#allocation7 + $0x158] sm:$0xf] }
 0x591   :  { %v12278_v5 = vld [vmem:[#allocation7 + $0x1830] sm:$0xf0]  ;;  %v13585_v0 = vld [vmem:[#allocation7 + $0x174] sm:$0xf0] }
 0x592   :  { %v14372_v6 = vld [vmem:[#allocation7 + $0x1a14] sm:$0xf]  ;;  %v12281_v42 = vor.u32 %v14308_v54, %v12278_v5  ;;  %7777 = vmatpush.bf16.msrb.mxu3 %v13081_v16  ;;  %v9917_v54 = vor.u32 %v13721_v61, %v9916_v15  ;;  %v13649_v5 = vld [vmem:[#allocation7 + $0x374] sm:$0xf0] }
 0x593   :  { %v12534_v55 = vld [vmem:[#allocation7 + $0x1a30] sm:$0xf0]  ;;  %v10140_v12 = vld [vmem:[#allocation7 + $0x758] sm:$0xf] }
 0x594   :  { %v14436_v20 = vld [vmem:[#allocation7 + $0x1c14] sm:$0xf]  ;;  %v12537_v43 = vor.u32 %v14372_v6, %v12534_v55  ;;  %7739 = vmatpush.bf16.msrb.mxu0 %v12281_v42  ;;  %v9884_v6 = vld [vmem:[#allocation7 + $0x558] sm:$0xf] }
 0x595   :  { %v12790_v26 = vld [vmem:[#allocation7 + $0x1c30] sm:$0xf0]  ;;  %v13713_v55 = vld [vmem:[#allocation7 + $0x574] sm:$0xf0] }
 0x596   :  { %v14500_v13 = vld [vmem:[#allocation7 + $0x1e14] sm:$0xf]  ;;  %v12793_v3 = vor.u32 %v14436_v20, %v12790_v26  ;;  %7752 = vmatpush.bf16.msrb.mxu1 %v12537_v43  ;;  %v13777_v16 = vld [vmem:[#allocation7 + $0x774] sm:$0xf0]  ;;  %v9373_v20 = vor.u32 %v13585_v0, %v9372_v63  ;;  %v9629_v26 = vor.u32 %v13649_v5, %v9628_v2  ;;  %v7533_v43 = vpop.f32.mrf.mxu0  ;;  %v7559_v0 = vpop.f32.mrf.mxu2 }
 0x597   :  { %v13046_v21 = vld [vmem:[#allocation7 + $0x1e30] sm:$0xf0]  ;;  %7740 = vmatmul.bf16.vlgmr.msrb.gmra.mxu0 %v15191_v31  ;;  %v10141_v34 = vor.u32 %v13777_v16, %v10140_v12  ;;  %v13705_v14 = vld [vmem:[#allocation7 + $0x534] sm:$0xf0]  ;;  %v7534_v4 = vadd.f32 %v7533_v43, %v15435_v56 }
 0x598   :  { %v13049_v44 = vor.u32 %v14500_v13, %v13046_v21  ;;  %7765 = vmatpush.bf16.msrb.mxu2 %v12793_v3  ;;  %7784 = vmatpush.bf16.msra.mxu0 %v9437_v35  ;;  %v9340_v13 = vld [vmem:[#allocation7 + $0x118] sm:$0xf]  ;;  %v9885_v21 = vor.u32 %v13713_v55, %v9884_v6  ;;  %v7546_v3 = vpop.f32.mrf.mxu1  ;;  %v7572_v6 = vpop.f32.mrf.mxu3 }
 0x599   :  { %7753 = vmatmul.bf16.vlgmr.msrb.gmra.mxu1 %v15195_v38  ;;  %v10108_v19 = vld [vmem:[#allocation7 + $0x718] sm:$0xf]  ;;  %v9341_v24 = vor.u32 %v13577_v30, %v9340_v13  ;;  %v7547_v59 = vadd.f32 %v7546_v3, %v7534_v4 }
 0x59a   :  { %7778 = vmatpush.bf16.msrb.mxu3 %v13049_v44  ;;  %7797 = vmatpush.bf16.msra.mxu1 %v9693_v25  ;;  %v13769_v42 = vld [vmem:[#allocation7 + $0x734] sm:$0xf0]  ;;  %v9853_v25 = vor.u32 %v13705_v14, %v9852_v27 }
 0x59b   :  { %7766 = vmatmul.bf16.vlgmr.msrb.gmra.mxu2 %v15193_v33  ;;  %v9308_v44 = vld [vmem:[#allocation7 + $0xd8] sm:$0xf]  ;;  %v10109_v49 = vor.u32 %v13769_v42, %v10108_v19  ;;  %v7560_v5 = vadd.f32 %v7559_v0, %v7547_v59 }
 0x59c   :  { %7810 = vmatpush.bf16.msra.mxu2 %v9949_v52  ;;  %7785 = vmatpush.bf16.msra.mxu0 %v9405_v51  ;;  %v13569_v35 = vld [vmem:[#allocation7 + $0xf4] sm:$0xf0] }
 0x59d   :  { %7779 = vmatmul.bf16.vlgmr.msrb.gmra.mxu3 %v15197_v39  ;;  %v9564_v50 = vld [vmem:[#allocation7 + $0x2d8] sm:$0xf]  ;;  %v9309_v9 = vor.u32 %v13569_v35, %v9308_v44 }
 0x59e   :  { %7823 = vmatpush.bf16.msra.mxu3 %v10205_v60  ;;  %7798 = vmatpush.bf16.msra.mxu1 %v9661_v46  ;;  %v13633_v52 = vld [vmem:[#allocation7 + $0x2f4] sm:$0xf0] }
 0x59f   :  { %v9820_v60 = vld [vmem:[#allocation7 + $0x4d8] sm:$0xf]  ;;  %v9565_v56 = vor.u32 %v13633_v52, %v9564_v50 }
 0x5a0   :  { %7811 = vmatpush.bf16.msra.mxu2 %v9917_v54  ;;  %7786 = vmatpush.bf16.msra.mxu0 %v9373_v20  ;;  %v13697_v57 = vld [vmem:[#allocation7 + $0x4f4] sm:$0xf0]  ;;  %v7535_v20 = vpop.f32.mrf.mxu0  ;;  %v7548_v32 = vpop.f32.mrf.mxu1 }
 0x5a1   :  { %v10076_v15 = vld [vmem:[#allocation7 + $0x6d8] sm:$0xf]  ;;  %v9821_v46 = vor.u32 %v13697_v57, %v9820_v60 }
 0x5a2   :  { %7824 = vmatpush.bf16.msra.mxu3 %v10173_v1  ;;  %7799 = vmatpush.bf16.msra.mxu1 %v9629_v26  ;;  %v13761_v61 = vld [vmem:[#allocation7 + $0x6f4] sm:$0xf0]  ;;  %v15442_v26 = vadd.f32 %v7572_v6, %v7560_v5 }
 0x5a3   :  { %v9276_v62 = vld [vmem:[#allocation7 + $0x98] sm:$0xf]  ;;  %v10077_v63 = vor.u32 %v13761_v61, %v10076_v15  ;;  %v7561_v15 = vpop.f32.mrf.mxu2 }
 0x5a4   :  { %7812 = vmatpush.bf16.msra.mxu2 %v9885_v21  ;;  %7787 = vmatpush.bf16.msra.mxu0 %v9341_v24  ;;  %v13561_v51 = vld [vmem:[#allocation7 + $0xb4] sm:$0xf0] }
 0x5a5   :  { %v9532_v54 = vld [vmem:[#allocation7 + $0x298] sm:$0xf]  ;;  %v9277_v13 = vor.u32 %v13561_v51, %v9276_v62  ;;  %v7574_v62 = vpop.f32.mrf.mxu3 }
 0x5a6   :  { %7825 = vmatpush.bf16.msra.mxu3 %v10141_v34  ;;  %7800 = vmatpush.bf16.msra.mxu1 %v9597_v47  ;;  %v13625_v1 = vld [vmem:[#allocation7 + $0x2b4] sm:$0xf0] }
 0x5a7   :  { %v9788_v2 = vld [vmem:[#allocation7 + $0x498] sm:$0xf]  ;;  %v9533_v30 = vor.u32 %v13625_v1, %v9532_v54 }
 0x5a8   :  { %7813 = vmatpush.bf16.msra.mxu2 %v9853_v25  ;;  %v13689_v55 = vld [vmem:[#allocation7 + $0x4b4] sm:$0xf0]  ;;  %7788 = vmatpush.bf16.msra.mxu0 %v9309_v9 }
 0x5a9   :  { %v10044_v12 = vld [vmem:[#allocation7 + $0x698] sm:$0xf]  ;;  %v9789_v53 = vor.u32 %v13689_v55, %v9788_v2 }
 0x5aa   :  { %7826 = vmatpush.bf16.msra.mxu3 %v10109_v49  ;;  %v13753_v16 = vld [vmem:[#allocation7 + $0x6b4] sm:$0xf0]  ;;  %7801 = vmatpush.bf16.msra.mxu1 %v9565_v56 }
 0x5ab   :  { %v9244_v21 = vld [vmem:[#allocation7 + $0x58] sm:$0xf]  ;;  %v10045_v27 = vor.u32 %v13753_v16, %v10044_v12 }
 0x5ac   :  { %v13553_v34 = vld [vmem:[#allocation7 + $0x74] sm:$0xf0]  ;;  %7814 = vmatpush.bf16.msra.mxu2 %v9821_v46  ;;  %7789 = vmatpush.bf16.msra.mxu0 %v9277_v13 }
 0x5ad   :  { %v9500_v14 = vld [vmem:[#allocation7 + $0x258] sm:$0xf]  ;;  %v9245_v3 = vor.u32 %v13553_v34, %v9244_v21 }
 0x5ae   :  { %7827 = vmatpush.bf16.msra.mxu3 %v10077_v63  ;;  %v13617_v19 = vld [vmem:[#allocation7 + $0x274] sm:$0xf0]  ;;  %7802 = vmatpush.bf16.msra.mxu1 %v9533_v30 }
 0x5af   :  { %v9756_v42 = vld [vmem:[#allocation7 + $0x458] sm:$0xf]  ;;  %v9501_v44 = vor.u32 %v13617_v19, %v9500_v14 }
 0x5b0   :  { %v13681_v43 = vld [vmem:[#allocation7 + $0x474] sm:$0xf0]  ;;  %7815 = vmatpush.bf16.msra.mxu2 %v9789_v53  ;;  %7790 = vmatpush.bf16.msra.mxu0 %v9245_v3 }
 0x5b1   :  { %v10012_v4 = vld [vmem:[#allocation7 + $0x658] sm:$0xf]  ;;  %v9757_v50 = vor.u32 %v13681_v43, %v9756_v42 }
 0x5b2   :  { %v13745_v24 = vld [vmem:[#allocation7 + $0x674] sm:$0xf0]  ;;  %7828 = vmatpush.bf16.msra.mxu3 %v10045_v27  ;;  %7803 = vmatpush.bf16.msra.mxu1 %v9501_v44 }
 0x5b3   :  { %v9212_v47 = vld [vmem:[#allocation7 + $0x18] sm:$0xf]  ;;  %v10013_v52 = vor.u32 %v13745_v24, %v10012_v4 }
 0x5b4   :  { %v13545_v35 = vld [vmem:[#allocation7 + $0x34] sm:$0xf0]  ;;  %7816 = vmatpush.bf16.msra.mxu2 %v9757_v50 }
 0x5b5   :  { %v9468_v25 = vld [vmem:[#allocation7 + $0x218] sm:$0xf]  ;;  %v9213_v0 = vor.u32 %v13545_v35, %v9212_v47 }
 0x5b6   :  { %v13609_v49 = vld [vmem:[#allocation7 + $0x234] sm:$0xf0]  ;;  %7829 = vmatpush.bf16.msra.mxu3 %v10013_v52 }
 0x5b7   :  { %v9724_v60 = vld [vmem:[#allocation7 + $0x418] sm:$0xf]  ;;  %v9469_v54 = vor.u32 %v13609_v49, %v9468_v25  ;;  %7791 = vmatpush.bf16.msra.mxu0 %v9213_v0 }
 0x5b8   :  { %v13673_v59 = vld [vmem:[#allocation7 + $0x434] sm:$0xf0] }
 0x5b9   :  { %v9980_v57 = vld [vmem:[#allocation7 + $0x618] sm:$0xf]  ;;  %v9725_v6 = vor.u32 %v13673_v59, %v9724_v60  ;;  %7804 = vmatpush.bf16.msra.mxu1 %v9469_v54  ;;  %v7585_v54 = vpop.f32.mrf.mxu0 }
 0x5ba   :  { %v13737_v61 = vld [vmem:[#allocation7 + $0x634] sm:$0xf0]  ;;  %7792 = vmatmul.bf16.vlgmr.msra.gmra.mxu0 %v15134_v10 }
 0x5bb   :  { %v10460_v9 = vld [vmem:[#allocation7 + $0x9d8] sm:$0xf]  ;;  %v9981_v55 = vor.u32 %v13737_v61, %v9980_v57  ;;  %7817 = vmatpush.bf16.msra.mxu2 %v9725_v6 }
 0x5bc   :  { %v13857_v56 = vld [vmem:[#allocation7 + $0x9f4] sm:$0xf0]  ;;  %7805 = vmatmul.bf16.vlgmr.msra.gmra.mxu1 %v15143_v18 }
 0x5bd   :  { %v10716_v51 = vld [vmem:[#allocation7 + $0xbd8] sm:$0xf]  ;;  %v10461_v12 = vor.u32 %v13857_v56, %v10460_v9  ;;  %7830 = vmatpush.bf16.msra.mxu3 %v9981_v55 }
 0x5be   :  { %v13921_v46 = vld [vmem:[#allocation7 + $0xbf4] sm:$0xf0]  ;;  %7818 = vmatmul.bf16.vlgmr.msra.gmra.mxu2 %v15136_v11 }
 0x5bf   :  { %v10972_v63 = vld [vmem:[#allocation7 + $0xdd8] sm:$0xf]  ;;  %v10717_v16 = vor.u32 %v13921_v46, %v10716_v51  ;;  %7836 = vmatpush.bf16.msrb.mxu0 %v10461_v12  ;;  %v7598_v12 = vpop.f32.mrf.mxu1 }
 0x5c0   :  { %v13985_v1 = vld [vmem:[#allocation7 + $0xdf4] sm:$0xf0]  ;;  %7831 = vmatmul.bf16.vlgmr.msra.gmra.mxu3 %v15141_v17 }
 0x5c1   :  { %v11228_v2 = vld [vmem:[#allocation7 + $0xfd8] sm:$0xf]  ;;  %v10973_v30 = vor.u32 %v13985_v1, %v10972_v63  ;;  %7849 = vmatpush.bf16.msrb.mxu1 %v10717_v16 }
 0x5c2   :  { %v14049_v5 = vld [vmem:[#allocation7 + $0xff4] sm:$0xf0] }
 0x5c3   :  { %v10428_v20 = vld [vmem:[#allocation7 + $0x998] sm:$0xf]  ;;  %v11229_v21 = vor.u32 %v14049_v5, %v11228_v2  ;;  %7862 = vmatpush.bf16.msrb.mxu2 %v10973_v30 }
 0x5c4   :  { %v13849_v13 = vld [vmem:[#allocation7 + $0x9b4] sm:$0xf0] }
 0x5c5   :  { %v10684_v34 = vld [vmem:[#allocation7 + $0xb98] sm:$0xf]  ;;  %v10429_v42 = vor.u32 %v13849_v13, %v10428_v20  ;;  %7875 = vmatpush.bf16.msrb.mxu3 %v11229_v21  ;;  %v14663_v21 = vld [vmem:[#allocation8] sm:$0xff] }
 0x5c6   :  { %v13913_v32 = vld [vmem:[#allocation7 + $0xbb4] sm:$0xf0] }
 0x5c7   :  { %v10940_v53 = vld [vmem:[#allocation7 + $0xd98] sm:$0xf]  ;;  %v10685_v43 = vor.u32 %v13913_v32, %v10684_v34  ;;  %7837 = vmatpush.bf16.msrb.mxu0 %v10429_v42  ;;  %v1405_v34 = vperm.slane %v14663_v21, 5 }
 0x5c8   :  { %v13977_v27 = vld [vmem:[#allocation7 + $0xdb4] sm:$0xf0] }
 0x5c9   :  { %v11196_v14 = vld [vmem:[#allocation7 + $0xf98] sm:$0xf]  ;;  %v10941_v47 = vor.u32 %v13977_v27, %v10940_v53  ;;  %7850 = vmatpush.bf16.msrb.mxu1 %v10685_v43 }
 0x5ca   :  { %v14041_v19 = vld [vmem:[#allocation7 + $0xfb4] sm:$0xf0] }
 0x5cb   :  { %v10396_v4 = vld [vmem:[#allocation7 + $0x958] sm:$0xf]  ;;  %v11197_v3 = vor.u32 %v14041_v19, %v11196_v14  ;;  %7863 = vmatpush.bf16.msrb.mxu2 %v10941_v47  ;;  %v7586_v14 = vadd.f32 %v7585_v54, %v1405_v34 }
 0x5cc   :  { %v13841_v24 = vld [vmem:[#allocation7 + $0x974] sm:$0xf0] }
 0x5cd   :  { %v10652_v44 = vld [vmem:[#allocation7 + $0xb58] sm:$0xf]  ;;  %v10397_v60 = vor.u32 %v13841_v24, %v10396_v4  ;;  %7876 = vmatpush.bf16.msrb.mxu3 %v11197_v3 }
 0x5ce   :  { %v13905_v35 = vld [vmem:[#allocation7 + $0xb74] sm:$0xf0] }
 0x5cf   :  { %v10908_v25 = vld [vmem:[#allocation7 + $0xd58] sm:$0xf]  ;;  %v10653_v59 = vor.u32 %v13905_v35, %v10652_v44  ;;  %7838 = vmatpush.bf16.msrb.mxu0 %v10397_v60 }
 0x5d0   :  { %v13969_v49 = vld [vmem:[#allocation7 + $0xd74] sm:$0xf0] }
 0x5d1   :  { %v11164_v50 = vld [vmem:[#allocation7 + $0xf58] sm:$0xf]  ;;  %v10909_v61 = vor.u32 %v13969_v49, %v10908_v25  ;;  %7851 = vmatpush.bf16.msrb.mxu1 %v10653_v59  ;;  %v7599_v25 = vadd.f32 %v7598_v12, %v7586_v14  ;;  %v7611_v49 = vpop.f32.mrf.mxu2  ;;  %v7624_v59 = vpop.f32.mrf.mxu3 }
 0x5d2   :  { %v14033_v52 = vld [vmem:[#allocation7 + $0xf74] sm:$0xf0] }
 0x5d3   :  { %v10364_v57 = vld [vmem:[#allocation7 + $0x918] sm:$0xf]  ;;  %v11165_v9 = vor.u32 %v14033_v52, %v11164_v50  ;;  %7864 = vmatpush.bf16.msrb.mxu2 %v10909_v61 }
 0x5d4   :  { %v13833_v15 = vld [vmem:[#allocation7 + $0x934] sm:$0xf0] }
 0x5d5   :  { %v10620_v56 = vld [vmem:[#allocation7 + $0xb18] sm:$0xf]  ;;  %v10365_v1 = vor.u32 %v13833_v15, %v10364_v57  ;;  %7877 = vmatpush.bf16.msrb.mxu3 %v11165_v9  ;;  %v7612_v57 = vadd.f32 %v7611_v49, %v7599_v25  ;;  %v7587_v15 = vpop.f32.mrf.mxu0 }
 0x5d6   :  { %v13897_v62 = vld [vmem:[#allocation7 + $0xb34] sm:$0xf0] }
 0x5d7   :  { %v10876_v51 = vld [vmem:[#allocation7 + $0xd18] sm:$0xf]  ;;  %v10621_v2 = vor.u32 %v13897_v62, %v10620_v56  ;;  %7839 = vmatpush.bf16.msrb.mxu0 %v10365_v1 }
 0x5d8   :  { %v13961_v46 = vld [vmem:[#allocation7 + $0xd34] sm:$0xf0] }
 0x5d9   :  { %v11132_v63 = vld [vmem:[#allocation7 + $0xf18] sm:$0xf]  ;;  %v10877_v16 = vor.u32 %v13961_v46, %v10876_v51  ;;  %7852 = vmatpush.bf16.msrb.mxu1 %v10621_v2  ;;  %v7600_v51 = vpop.f32.mrf.mxu1  ;;  %v15448_v2 = vadd.f32 %v7624_v59, %v7612_v57 }
 0x5da   :  { %v14025_v0 = vld [vmem:[#allocation7 + $0xf34] sm:$0xf0] }
 0x5db   :  { %v10332_v5 = vld [vmem:[#allocation7 + $0x8d8] sm:$0xf]  ;;  %v11133_v20 = vor.u32 %v14025_v0, %v11132_v63  ;;  %7865 = vmatpush.bf16.msrb.mxu2 %v10877_v16 }
 0x5dc   :  { %v13825_v6 = vld [vmem:[#allocation7 + $0x8f4] sm:$0xf0] }
 0x5dd   :  { %v10588_v55 = vld [vmem:[#allocation7 + $0xad8] sm:$0xf]  ;;  %v10333_v19 = vor.u32 %v13825_v6, %v10332_v5  ;;  %7878 = vmatpush.bf16.msrb.mxu3 %v11133_v20 }
 0x5de   :  { %v13889_v13 = vld [vmem:[#allocation7 + $0xaf4] sm:$0xf0] }
 0x5df   :  { %v10844_v30 = vld [vmem:[#allocation7 + $0xcd8] sm:$0xf]  ;;  %v10589_v42 = vor.u32 %v13889_v13, %v10588_v55  ;;  %7840 = vmatpush.bf16.msrb.mxu0 %v10333_v19  ;;  %v7613_v19 = vpop.f32.mrf.mxu2 }
 0x5e0   :  { %v13953_v32 = vld [vmem:[#allocation7 + $0xcf4] sm:$0xf0] }
 0x5e1   :  { %v11100_v53 = vld [vmem:[#allocation7 + $0xed8] sm:$0xf]  ;;  %v10845_v24 = vor.u32 %v13953_v32, %v10844_v30  ;;  %7853 = vmatpush.bf16.msrb.mxu1 %v10589_v42 }
 0x5e2   :  { %v14017_v27 = vld [vmem:[#allocation7 + $0xef4] sm:$0xf0] }
 0x5e3   :  { %v10300_v43 = vld [vmem:[#allocation7 + $0x898] sm:$0xf]  ;;  %v11101_v47 = vor.u32 %v14017_v27, %v11100_v53  ;;  %7866 = vmatpush.bf16.msrb.mxu2 %v10845_v24  ;;  %v7626_v24 = vpop.f32.mrf.mxu3 }
 0x5e4   :  { %v13817_v4 = vld [vmem:[#allocation7 + $0x8b4] sm:$0xf0] }
 0x5e5   :  { %v10556_v3 = vld [vmem:[#allocation7 + $0xa98] sm:$0xf]  ;;  %v10301_v61 = vor.u32 %v13817_v4, %v10300_v43  ;;  %7879 = vmatpush.bf16.msrb.mxu3 %v11101_v47 }
 0x5e6   :  { %v13881_v44 = vld [vmem:[#allocation7 + $0xab4] sm:$0xf0] }
 0x5e7   :  { %v10812_v35 = vld [vmem:[#allocation7 + $0xc98] sm:$0xf]  ;;  %v10557_v9 = vor.u32 %v13881_v44, %v10556_v3  ;;  %7841 = vmatpush.bf16.msrb.mxu0 %v10301_v61 }
 0x5e8   :  { %v13945_v50 = vld [vmem:[#allocation7 + $0xcb4] sm:$0xf0] }
 0x5e9   :  { %v11068_v52 = vld [vmem:[#allocation7 + $0xe98] sm:$0xf]  ;;  %v10813_v46 = vor.u32 %v13945_v50, %v10812_v35  ;;  %7854 = vmatpush.bf16.msrb.mxu1 %v10557_v9 }
 0x5ea   :  { %v14009_v60 = vld [vmem:[#allocation7 + $0xeb4] sm:$0xf0] }
 0x5eb   :  { %v10268_v56 = vld [vmem:[#allocation7 + $0x858] sm:$0xf]  ;;  %v11069_v63 = vor.u32 %v14009_v60, %v11068_v52  ;;  %7867 = vmatpush.bf16.msrb.mxu2 %v10813_v46 }
 0x5ec   :  { %v13809_v62 = vld [vmem:[#allocation7 + $0x874] sm:$0xf0] }
 0x5ed   :  { %v10524_v0 = vld [vmem:[#allocation7 + $0xa58] sm:$0xf]  ;;  %v10269_v16 = vor.u32 %v13809_v62, %v10268_v56  ;;  %7880 = vmatpush.bf16.msrb.mxu3 %v11069_v63 }
 0x5ee   :  { %v13873_v54 = vld [vmem:[#allocation7 + $0xa74] sm:$0xf0] }
 0x5ef   :  { %v10780_v1 = vld [vmem:[#allocation7 + $0xc58] sm:$0xf]  ;;  %v10525_v20 = vor.u32 %v13873_v54, %v10524_v0  ;;  %7842 = vmatpush.bf16.msrb.mxu0 %v10269_v16 }
 0x5f0   :  { %v13937_v5 = vld [vmem:[#allocation7 + $0xc74] sm:$0xf0] }
 0x5f1   :  { %v11036_v6 = vld [vmem:[#allocation7 + $0xe58] sm:$0xf]  ;;  %v10781_v34 = vor.u32 %v13937_v5, %v10780_v1  ;;  %7855 = vmatpush.bf16.msrb.mxu1 %v10525_v20 }
 0x5f2   :  { %v14001_v55 = vld [vmem:[#allocation7 + $0xe74] sm:$0xf0] }
 0x5f3   :  { %v10236_v12 = vld [vmem:[#allocation7 + $0x818] sm:$0xf]  ;;  %v11037_v32 = vor.u32 %v14001_v55, %v11036_v6  ;;  %7868 = vmatpush.bf16.msrb.mxu2 %v10781_v34 }
 0x5f4   :  { %v13801_v13 = vld [vmem:[#allocation7 + $0x834] sm:$0xf0] }
 0x5f5   :  { %v10492_v30 = vld [vmem:[#allocation7 + $0xa18] sm:$0xf]  ;;  %v10237_v35 = vor.u32 %v13801_v13, %v10236_v12  ;;  %7881 = vmatpush.bf16.msrb.mxu3 %v11037_v32 }
 0x5f6   :  { %v13865_v21 = vld [vmem:[#allocation7 + $0xa34] sm:$0xf0] }
 0x5f7   :  { %v10748_v53 = vld [vmem:[#allocation7 + $0xc18] sm:$0xf]  ;;  %v10493_v25 = vor.u32 %v13865_v21, %v10492_v30  ;;  %7843 = vmatpush.bf16.msrb.mxu0 %v10237_v35 }
 0x5f8   :  { %v13929_v27 = vld [vmem:[#allocation7 + $0xc34] sm:$0xf0] }
 0x5f9   :  { %v11004_v14 = vld [vmem:[#allocation7 + $0xe18] sm:$0xf]  ;;  %v10749_v60 = vor.u32 %v13929_v27, %v10748_v53  ;;  %7856 = vmatpush.bf16.msrb.mxu1 %v10493_v25 }
 0x5fa   :  { %v13993_v42 = vld [vmem:[#allocation7 + $0xe34] sm:$0xf0]  ;;  %7844 = vmatmul.bf16.vlgmr.msrb.gmra.mxu0 %v15167_v22 }
 0x5fb   :  { %v11484_v43 = vld [vmem:[#allocation7 + $0x11d8] sm:$0xf]  ;;  %v11005_v59 = vor.u32 %v13993_v42, %v11004_v14  ;;  %7869 = vmatpush.bf16.msrb.mxu2 %v10749_v60 }
 0x5fc   :  { %v14113_v4 = vld [vmem:[#allocation7 + $0x11f4] sm:$0xf0]  ;;  %7857 = vmatmul.bf16.vlgmr.msrb.gmra.mxu1 %v15171_v28 }
 0x5fd   :  { %v11740_v47 = vld [vmem:[#allocation7 + $0x13d8] sm:$0xf]  ;;  %v11485_v57 = vor.u32 %v14113_v4, %v11484_v43  ;;  %7882 = vmatpush.bf16.msrb.mxu3 %v11005_v59 }
 0x5fe   :  { %v14177_v3 = vld [vmem:[#allocation7 + $0x13f4] sm:$0xf0]  ;;  %7870 = vmatmul.bf16.vlgmr.msrb.gmra.mxu2 %v15169_v23 }
 0x5ff   :  { %v11996_v44 = vld [vmem:[#allocation7 + $0x15d8] sm:$0xf]  ;;  %v11741_v15 = vor.u32 %v14177_v3, %v11740_v47  ;;  %7888 = vmatpush.bf16.msra.mxu0 %v11485_v57 }
 0x600   :  { %v14241_v49 = vld [vmem:[#allocation7 + $0x15f4] sm:$0xf0]  ;;  %7883 = vmatmul.bf16.vlgmr.msrb.gmra.mxu3 %v15173_v29 }
 0x601   :  { %v12252_v50 = vld [vmem:[#allocation7 + $0x17d8] sm:$0xf]  ;;  %v11997_v56 = vor.u32 %v14241_v49, %v11996_v44  ;;  %7901 = vmatpush.bf16.msra.mxu1 %v11741_v15  ;;  %v7637_v49 = vpop.f32.mrf.mxu0  ;;  %v7650_v15 = vpop.f32.mrf.mxu1 }
 0x602   :  { %v14305_v52 = vld [vmem:[#allocation7 + $0x17f4] sm:$0xf0]  ;;  %v7638_v57 = vadd.f32 %v7637_v49, %v15448_v2 }
 0x603   :  { %v11452_v61 = vld [vmem:[#allocation7 + $0x1198] sm:$0xf]  ;;  %v12253_v62 = vor.u32 %v14305_v52, %v12252_v50  ;;  %7914 = vmatpush.bf16.msra.mxu2 %v11997_v56 }
 0x604   :  { %v14105_v9 = vld [vmem:[#allocation7 + $0x11b4] sm:$0xf0] }
 0x605   :  { %v11708_v51 = vld [vmem:[#allocation7 + $0x1398] sm:$0xf]  ;;  %v11453_v5 = vor.u32 %v14105_v9, %v11452_v61  ;;  %7927 = vmatpush.bf16.msra.mxu3 %v12253_v62 }
 0x606   :  { %v14169_v46 = vld [vmem:[#allocation7 + $0x13b4] sm:$0xf0] }
 0x607   :  { %v11964_v63 = vld [vmem:[#allocation7 + $0x1598] sm:$0xf]  ;;  %v11709_v6 = vor.u32 %v14169_v46, %v11708_v51  ;;  %7889 = vmatpush.bf16.msra.mxu0 %v11453_v5 }
 0x608   :  { %v14233_v0 = vld [vmem:[#allocation7 + $0x15b4] sm:$0xf0] }
 0x609   :  { %v12220_v54 = vld [vmem:[#allocation7 + $0x1798] sm:$0xf]  ;;  %v11965_v16 = vor.u32 %v14233_v0, %v11964_v63  ;;  %7902 = vmatpush.bf16.msra.mxu1 %v11709_v6 }
 0x60a   :  { %v14297_v1 = vld [vmem:[#allocation7 + $0x17b4] sm:$0xf0] }
 0x60b   :  { %v11420_v55 = vld [vmem:[#allocation7 + $0x1158] sm:$0xf]  ;;  %v12221_v20 = vor.u32 %v14297_v1, %v12220_v54  ;;  %7915 = vmatpush.bf16.msra.mxu2 %v11965_v16  ;;  %v7651_v54 = vadd.f32 %v7650_v15, %v7638_v57 }
 0x60c   :  { %v14097_v12 = vld [vmem:[#allocation7 + $0x1174] sm:$0xf0] }
 0x60d   :  { %v11676_v13 = vld [vmem:[#allocation7 + $0x1358] sm:$0xf]  ;;  %v11421_v27 = vor.u32 %v14097_v12, %v11420_v55  ;;  %7928 = vmatpush.bf16.msra.mxu3 %v12221_v20 }
 0x60e   :  { %v14161_v30 = vld [vmem:[#allocation7 + $0x1374] sm:$0xf0] }
 0x60f   :  { %v11932_v21 = vld [vmem:[#allocation7 + $0x1558] sm:$0xf]  ;;  %v11677_v14 = vor.u32 %v14161_v30, %v11676_v13  ;;  %7890 = vmatpush.bf16.msra.mxu0 %v11421_v27  ;;  %v7663_v30 = vpop.f32.mrf.mxu2  ;;  %v7676_v27 = vpop.f32.mrf.mxu3 }
 0x610   :  { %v14225_v34 = vld [vmem:[#allocation7 + $0x1574] sm:$0xf0] }
 0x611   :  { %v12188_v32 = vld [vmem:[#allocation7 + $0x1758] sm:$0xf]  ;;  %v11933_v43 = vor.u32 %v14225_v34, %v11932_v21  ;;  %7903 = vmatpush.bf16.msra.mxu1 %v11677_v14  ;;  %v7639_v14 = vpop.f32.mrf.mxu0 }
 0x612   :  { %v14289_v53 = vld [vmem:[#allocation7 + $0x1774] sm:$0xf0] }
 0x613   :  { %v11388_v19 = vld [vmem:[#allocation7 + $0x1118] sm:$0xf]  ;;  %v12189_v4 = vor.u32 %v14289_v53, %v12188_v32  ;;  %7916 = vmatpush.bf16.msra.mxu2 %v11933_v43  ;;  %v7664_v53 = vadd.f32 %v7663_v30, %v7651_v54 }
 0x614   :  { %v14089_v42 = vld [vmem:[#allocation7 + $0x1134] sm:$0xf0] }
 0x615   :  { %v11644_v24 = vld [vmem:[#allocation7 + $0x1318] sm:$0xf]  ;;  %v11389_v50 = vor.u32 %v14089_v42, %v11388_v19  ;;  %7929 = vmatpush.bf16.msra.mxu3 %v12189_v4  ;;  %v8228_v19 = vsel %vm232_vm6, %v15442_v26, 0.0 }
 0x616   :  { %v14153_v47 = vld [vmem:[#allocation7 + $0x1334] sm:$0xf0]  ;;  %v8229_v57 = vrot.slane %v8228_v19, 4 }
 0x617   :  { %v11900_v3 = vld [vmem:[#allocation7 + $0x1518] sm:$0xf]  ;;  %v11645_v52 = vor.u32 %v14153_v47, %v11644_v24  ;;  %7891 = vmatpush.bf16.msra.mxu0 %v11389_v50  ;;  %v15457_v47 = vadd.f32 %v7676_v27, %v7664_v53 }
 0x618   :  { %v14217_v44 = vld [vmem:[#allocation7 + $0x1534] sm:$0xf0] }
 0x619   :  { %v12156_v35 = vld [vmem:[#allocation7 + $0x1718] sm:$0xf]  ;;  %v11901_v61 = vor.u32 %v14217_v44, %v11900_v3  ;;  %7904 = vmatpush.bf16.msra.mxu1 %v11645_v52  ;;  %v7652_v3 = vpop.f32.mrf.mxu1 }
 0x61a   :  { %v14281_v25 = vld [vmem:[#allocation7 + $0x1734] sm:$0xf0] }
 0x61b   :  { %v11356_v60 = vld [vmem:[#allocation7 + $0x10d8] sm:$0xf]  ;;  %v12157_v9 = vor.u32 %v14281_v25, %v12156_v35  ;;  %7917 = vmatpush.bf16.msra.mxu2 %v11901_v61 }
 0x61c   :  { %v14081_v59 = vld [vmem:[#allocation7 + $0x10f4] sm:$0xf0] }
 0x61d   :  { %v11612_v56 = vld [vmem:[#allocation7 + $0x12d8] sm:$0xf]  ;;  %v11357_v1 = vor.u32 %v14081_v59, %v11356_v60  ;;  %7930 = vmatpush.bf16.msra.mxu3 %v12157_v9 }
 0x61e   :  { %v14145_v62 = vld [vmem:[#allocation7 + $0x12f4] sm:$0xf0] }
 0x61f   :  { %v11868_v51 = vld [vmem:[#allocation7 + $0x14d8] sm:$0xf]  ;;  %v11613_v5 = vor.u32 %v14145_v62, %v11612_v56  ;;  %7892 = vmatpush.bf16.msra.mxu0 %v11357_v1 }
 0x620   :  { %v14209_v46 = vld [vmem:[#allocation7 + $0x14f4] sm:$0xf0] }
 0x621   :  { %v12124_v63 = vld [vmem:[#allocation7 + $0x16d8] sm:$0xf]  ;;  %v11869_v2 = vor.u32 %v14209_v46, %v11868_v51  ;;  %7905 = vmatpush.bf16.msra.mxu1 %v11613_v5  ;;  %v7665_v5 = vpop.f32.mrf.mxu2 }
 0x622   :  { %v14273_v0 = vld [vmem:[#allocation7 + $0x16f4] sm:$0xf0] }
 0x623   :  { %v11324_v6 = vld [vmem:[#allocation7 + $0x1098] sm:$0xf]  ;;  %v12125_v12 = vor.u32 %v14273_v0, %v12124_v63  ;;  %7918 = vmatpush.bf16.msra.mxu2 %v11869_v2 }
 0x624   :  { %v14073_v55 = vld [vmem:[#allocation7 + $0x10b4] sm:$0xf0] }
 0x625   :  { %v11580_v16 = vld [vmem:[#allocation7 + $0x1298] sm:$0xf]  ;;  %v11325_v42 = vor.u32 %v14073_v55, %v11324_v6  ;;  %7931 = vmatpush.bf16.msra.mxu3 %v12125_v12  ;;  %v7678_v12 = vpop.f32.mrf.mxu3 }
 0x626   :  { %v14137_v20 = vld [vmem:[#allocation7 + $0x12b4] sm:$0xf0] }
 0x627   :  { %v11836_v13 = vld [vmem:[#allocation7 + $0x1498] sm:$0xf]  ;;  %v11581_v43 = vor.u32 %v14137_v20, %v11580_v16  ;;  %7893 = vmatpush.bf16.msra.mxu0 %v11325_v42  ;;  %v8230_v42 = vadd.f32 %v8229_v57, %v8228_v19 }
 0x628   :  { %v14201_v21 = vld [vmem:[#allocation7 + $0x14b4] sm:$0xf0] }
 0x629   :  { %v12092_v34 = vld [vmem:[#allocation7 + $0x1698] sm:$0xf]  ;;  %v11837_v44 = vor.u32 %v14201_v21, %v11836_v13  ;;  %7906 = vmatpush.bf16.msra.mxu1 %v11581_v43 }
 0x62a   :  { %v14265_v32 = vld [vmem:[#allocation7 + $0x16b4] sm:$0xf0] }
 0x62b   :  { %v11292_v4 = vld [vmem:[#allocation7 + $0x1058] sm:$0xf]  ;;  %v12093_v35 = vor.u32 %v14265_v32, %v12092_v34  ;;  %7919 = vmatpush.bf16.msra.mxu2 %v11837_v44 }
 0x62c   :  { %v14065_v24 = vld [vmem:[#allocation7 + $0x1074] sm:$0xf0] }
 0x62d   :  { %v11548_v25 = vld [vmem:[#allocation7 + $0x1258] sm:$0xf]  ;;  %v11293_v61 = vor.u32 %v14065_v24, %v11292_v4  ;;  %7932 = vmatpush.bf16.msra.mxu3 %v12093_v35 }
 0x62e   :  { %v14129_v49 = vld [vmem:[#allocation7 + $0x1274] sm:$0xf0] }
 0x62f   :  { %v11804_v50 = vld [vmem:[#allocation7 + $0x1458] sm:$0xf]  ;;  %v11549_v9 = vor.u32 %v14129_v49, %v11548_v25  ;;  %7894 = vmatpush.bf16.msra.mxu0 %v11293_v61 }
 0x630   :  { %v14193_v52 = vld [vmem:[#allocation7 + $0x1474] sm:$0xf0] }
 0x631   :  { %v12060_v60 = vld [vmem:[#allocation7 + $0x1658] sm:$0xf]  ;;  %v11805_v46 = vor.u32 %v14193_v52, %v11804_v50  ;;  %7907 = vmatpush.bf16.msra.mxu1 %v11549_v9 }
 0x632   :  { %v14257_v59 = vld [vmem:[#allocation7 + $0x1674] sm:$0xf0] }
 0x633   :  { %v11260_v15 = vld [vmem:[#allocation7 + $0x1018] sm:$0xf]  ;;  %v12061_v63 = vor.u32 %v14257_v59, %v12060_v60  ;;  %7920 = vmatpush.bf16.msra.mxu2 %v11805_v46 }
 0x634   :  { %v14057_v56 = vld [vmem:[#allocation7 + $0x1034] sm:$0xf0] }
 0x635   :  { %v11516_v62 = vld [vmem:[#allocation7 + $0x1218] sm:$0xf]  ;;  %v11261_v30 = vor.u32 %v14057_v56, %v11260_v15  ;;  %7933 = vmatpush.bf16.msra.mxu3 %v12061_v63  ;;  %v8231_v15 = vrot.slane %v8230_v42, 2 }
 0x636   :  { %v14121_v51 = vld [vmem:[#allocation7 + $0x1234] sm:$0xf0] }
 0x637   :  { %v11772_v0 = vld [vmem:[#allocation7 + $0x1418] sm:$0xf]  ;;  %v11517_v21 = vor.u32 %v14121_v51, %v11516_v62  ;;  %7895 = vmatpush.bf16.msra.mxu0 %v11261_v30  ;;  %v8232_v5 = vadd.f32 %v8231_v15, %v8230_v42 }
 0x638   :  { %v14185_v54 = vld [vmem:[#allocation7 + $0x1434] sm:$0xf0] }
 0x639   :  { %v12028_v1 = vld [vmem:[#allocation7 + $0x1618] sm:$0xf]  ;;  %v11773_v27 = vor.u32 %v14185_v54, %v11772_v0  ;;  %7908 = vmatpush.bf16.msra.mxu1 %v11517_v21 }
 0x63a   :  { %v14249_v6 = vld [vmem:[#allocation7 + $0x1634] sm:$0xf0]  ;;  %7896 = vmatmul.bf16.vlgmr.msra.gmra.mxu0 %v15179_v36 }
 0x63b   :  { %v12508_v55 = vld [vmem:[#allocation7 + $0x19d8] sm:$0xf]  ;;  %v12029_v14 = vor.u32 %v14249_v6, %v12028_v1  ;;  %7921 = vmatpush.bf16.msra.mxu2 %v11773_v27  ;;  %v7689_v27 = vpop.f32.mrf.mxu0 }
 0x63c   :  { %v14369_v2 = vld [vmem:[#allocation7 + $0x19f4] sm:$0xf0]  ;;  %7909 = vmatmul.bf16.vlgmr.msra.gmra.mxu1 %v15183_v40  ;;  %v7690_v42 = vadd.f32 %v7689_v27, %v15457_v47 }
 0x63d   :  { %v12764_v16 = vld [vmem:[#allocation7 + $0x1bd8] sm:$0xf]  ;;  %v12509_v43 = vor.u32 %v14369_v2, %v12508_v55  ;;  %7934 = vmatpush.bf16.msra.mxu3 %v12029_v14  ;;  %v8233_v14 = vrot.slane %v8232_v5, 1 }
 0x63e   :  { %v14433_v20 = vld [vmem:[#allocation7 + $0x1bf4] sm:$0xf0]  ;;  %7922 = vmatmul.bf16.vlgmr.msra.gmra.mxu2 %v15181_v37 }
 0x63f   :  { %v13020_v13 = vld [vmem:[#allocation7 + $0x1dd8] sm:$0xf]  ;;  %v12765_v4 = vor.u32 %v14433_v20, %v12764_v16  ;;  %7940 = vmatpush.bf16.msrb.mxu0 %v12509_v43 }
 0x640   :  { %v14497_v34 = vld [vmem:[#allocation7 + $0x1df4] sm:$0xf0]  ;;  %7935 = vmatmul.bf16.vlgmr.msra.gmra.mxu3 %v15185_v41 }
 0x641   :  { %v13276_v32 = vld [vmem:[#allocation7 + $0x1fd8] sm:$0xf]  ;;  %v13021_v44 = vor.u32 %v14497_v34, %v13020_v13  ;;  %7953 = vmatpush.bf16.msrb.mxu1 %v12765_v4 }
 0x642   :  { %v14561_v53 = vld [vmem:[#allocation7 + $0x1ff4] sm:$0xf0] }
 0x643   :  { %v12476_v24 = vld [vmem:[#allocation7 + $0x1998] sm:$0xf]  ;;  %v13277_v35 = vor.u32 %v14561_v53, %v13276_v32  ;;  %7966 = vmatpush.bf16.msrb.mxu2 %v13021_v44 }
 0x644   :  { %v14361_v3 = vld [vmem:[#allocation7 + $0x19b4] sm:$0xf0] }
 0x645   :  { %v12732_v25 = vld [vmem:[#allocation7 + $0x1b98] sm:$0xf]  ;;  %v12477_v19 = vor.u32 %v14361_v3, %v12476_v24  ;;  %7979 = vmatpush.bf16.msrb.mxu3 %v13277_v35  ;;  %v7702_v24 = vpop.f32.mrf.mxu1 }
 0x646   :  { %v14425_v49 = vld [vmem:[#allocation7 + $0x1bb4] sm:$0xf0] }
 0x647   :  { %v12988_v50 = vld [vmem:[#allocation7 + $0x1d98] sm:$0xf]  ;;  %v12733_v57 = vor.u32 %v14425_v49, %v12732_v25  ;;  %7941 = vmatpush.bf16.msrb.mxu0 %v12477_v19 }
 0x648   :  { %v14489_v52 = vld [vmem:[#allocation7 + $0x1db4] sm:$0xf0] }
 0x649   :  { %v13244_v60 = vld [vmem:[#allocation7 + $0x1f98] sm:$0xf]  ;;  %v12989_v56 = vor.u32 %v14489_v52, %v12988_v50  ;;  %7954 = vmatpush.bf16.msrb.mxu1 %v12733_v57  ;;  %v8234_v57 = vadd.f32 %v8233_v14, %v8232_v5  ;;  %v7691_v5 = vpop.f32.mrf.mxu0 }
 0x64a   :  { %v14553_v59 = vld [vmem:[#allocation7 + $0x1fb4] sm:$0xf0] }
 0x64b   :  { %v12444_v61 = vld [vmem:[#allocation7 + $0x1958] sm:$0xf]  ;;  %v13245_v62 = vor.u32 %v14553_v59, %v13244_v60  ;;  %7967 = vmatpush.bf16.msrb.mxu2 %v12989_v56  ;;  %v7703_v60 = vadd.f32 %v7702_v24, %v7690_v42 }
 0x64c   :  { %v14353_v9 = vld [vmem:[#allocation7 + $0x1974] sm:$0xf0] }
 0x64d   :  { %v12700_v51 = vld [vmem:[#allocation7 + $0x1b58] sm:$0xf]  ;;  %v12445_v6 = vor.u32 %v14353_v9, %v12444_v61  ;;  %7980 = vmatpush.bf16.msrb.mxu3 %v13245_v62 }
 0x64e   :  { %v14417_v46 = vld [vmem:[#allocation7 + $0x1b74] sm:$0xf0] }
 0x64f   :  { %v12956_v63 = vld [vmem:[#allocation7 + $0x1d58] sm:$0xf]  ;;  %v12701_v55 = vor.u32 %v14417_v46, %v12700_v51  ;;  %7942 = vmatpush.bf16.msrb.mxu0 %v12445_v6  ;;  %v7715_v46 = vpop.f32.mrf.mxu2  ;;  %v7728_v6 = vpop.f32.mrf.mxu3 }
 0x650   :  { %v14481_v0 = vld [vmem:[#allocation7 + $0x1d74] sm:$0xf0] }
 0x651   :  { %v13212_v54 = vld [vmem:[#allocation7 + $0x1f58] sm:$0xf]  ;;  %v12957_v16 = vor.u32 %v14481_v0, %v12956_v63  ;;  %7955 = vmatpush.bf16.msrb.mxu1 %v12701_v55 }
 0x652   :  { %v14545_v1 = vld [vmem:[#allocation7 + $0x1f74] sm:$0xf0] }
 0x653   :  { %v12412_v2 = vld [vmem:[#allocation7 + $0x1918] sm:$0xf]  ;;  %v13213_v20 = vor.u32 %v14545_v1, %v13212_v54  ;;  %7968 = vmatpush.bf16.msrb.mxu2 %v12957_v16  ;;  %v7716_v1 = vadd.f32 %v7715_v46, %v7703_v60  ;;  %v8260_v16 = vmul.f32 0.5, %v8234_v57  ;;  %v13661_v46 = vld [vmem:[#allocation7 + $0x3dc] sm:$0xf] }
 0x654   :  { %v14345_v12 = vld [vmem:[#allocation7 + $0x1934] sm:$0xf0] }
 0x655   :  { %v12668_v13 = vld [vmem:[#allocation7 + $0x1b18] sm:$0xf]  ;;  %v12413_v43 = vor.u32 %v14345_v12, %v12412_v2  ;;  %7981 = vmatpush.bf16.msrb.mxu3 %v13213_v20  ;;  %v15464_v20 = vadd.f32 %v7728_v6, %v7716_v1  ;;  %v9950_v6 = vld [vmem:[#allocation7 + $0x5f8] sm:$0xf0] }
 0x656   :  { %v14409_v30 = vld [vmem:[#allocation7 + $0x1b34] sm:$0xf0] }
 0x657   :  { %v12924_v21 = vld [vmem:[#allocation7 + $0x1d18] sm:$0xf]  ;;  %v12669_v4 = vor.u32 %v14409_v30, %v12668_v13  ;;  %7943 = vmatpush.bf16.msrb.mxu0 %v12413_v43 }
 0x658   :  { %v14473_v34 = vld [vmem:[#allocation7 + $0x1d34] sm:$0xf0] }
 0x659   :  { %v13180_v32 = vld [vmem:[#allocation7 + $0x1f18] sm:$0xf]  ;;  %v12925_v35 = vor.u32 %v14473_v34, %v12924_v21  ;;  %7956 = vmatpush.bf16.msrb.mxu1 %v12669_v4 }
 0x65a   :  { %v14537_v53 = vld [vmem:[#allocation7 + $0x1f34] sm:$0xf0] }
 0x65b   :  { %v12380_v3 = vld [vmem:[#allocation7 + $0x18d8] sm:$0xf]  ;;  %v13181_v25 = vor.u32 %v14537_v53, %v13180_v32  ;;  %7969 = vmatpush.bf16.msrb.mxu2 %v12925_v35  ;;  %v7704_v32 = vpop.f32.mrf.mxu1 }
 0x65c   :  { %v14337_v44 = vld [vmem:[#allocation7 + $0x18f4] sm:$0xf0] }
 0x65d   :  { %v12636_v49 = vld [vmem:[#allocation7 + $0x1ad8] sm:$0xf]  ;;  %v12381_v47 = vor.u32 %v14337_v44, %v12380_v3  ;;  %7982 = vmatpush.bf16.msrb.mxu3 %v13181_v25 }
 0x65e   :  { %v14401_v50 = vld [vmem:[#allocation7 + $0x1af4] sm:$0xf0] }
 0x65f   :  { %v12892_v52 = vld [vmem:[#allocation7 + $0x1cd8] sm:$0xf]  ;;  %v12637_v61 = vor.u32 %v14401_v50, %v12636_v49  ;;  %7944 = vmatpush.bf16.msrb.mxu0 %v12381_v47  ;;  %v7717_v47 = vpop.f32.mrf.mxu2 }
 0x660   :  { %v14465_v59 = vld [vmem:[#allocation7 + $0x1cf4] sm:$0xf0] }
 0x661   :  { %v13148_v15 = vld [vmem:[#allocation7 + $0x1ed8] sm:$0xf]  ;;  %v12893_v62 = vor.u32 %v14465_v59, %v12892_v52  ;;  %7957 = vmatpush.bf16.msrb.mxu1 %v12637_v61  ;;  %v15467_v61 = vsub.f32 %v15442_v26, %v8260_v16 }
 0x662   :  { %v14529_v19 = vld [vmem:[#allocation7 + $0x1ef4] sm:$0xf0] }
 0x663   :  { %v12348_v9 = vld [vmem:[#allocation7 + $0x1898] sm:$0xf]  ;;  %v13149_v51 = vor.u32 %v14529_v19, %v13148_v15  ;;  %7970 = vmatpush.bf16.msrb.mxu2 %v12893_v62  ;;  %v9438_v62 = vld [vmem:[#allocation7 + $0x1f8] sm:$0xf0]  ;;  %v8276_v26 = vmul.f32 %v15467_v61, %v15467_v61 }
 0x664   :  { %v14329_v56 = vld [vmem:[#allocation7 + $0x18b4] sm:$0xf0] }
 0x665   :  { %v12604_v63 = vld [vmem:[#allocation7 + $0x1a98] sm:$0xf]  ;;  %v12349_v13 = vor.u32 %v14329_v56, %v12348_v9  ;;  %7983 = vmatpush.bf16.msrb.mxu3 %v13149_v51  ;;  %v13597_v56 = vld [vmem:[#allocation7 + $0x1dc] sm:$0xf]  ;;  %v7730_v51 = vpop.f32.mrf.mxu3 }
 0x666   :  { %v14393_v0 = vld [vmem:[#allocation7 + $0x1ab4] sm:$0xf0]  ;;  %v9441_v16 = vor.u32 %v13597_v56, %v9438_v62  ;;  %v13573_v62 = vld [vmem:[#allocation7 + $0x11c] sm:$0xf] }
 0x667   :  { %v12860_v54 = vld [vmem:[#allocation7 + $0x1c98] sm:$0xf]  ;;  %v12605_v30 = vor.u32 %v14393_v0, %v12604_v63  ;;  %7945 = vmatpush.bf16.msrb.mxu0 %v12349_v13  ;;  %v9694_v63 = vld [vmem:[#allocation7 + $0x3f8] sm:$0xf0] }
 0x668   :  { %v14457_v55 = vld [vmem:[#allocation7 + $0x1cb4] sm:$0xf0]  ;;  %v13725_v0 = vld [vmem:[#allocation7 + $0x5dc] sm:$0xf]  ;;  %v9697_v13 = vor.u32 %v13661_v46, %v9694_v63 }
 0x669   :  { %v13116_v2 = vld [vmem:[#allocation7 + $0x1e98] sm:$0xf]  ;;  %v12861_v53 = vor.u32 %v14457_v55, %v12860_v54  ;;  %7958 = vmatpush.bf16.msrb.mxu1 %v12605_v30  ;;  %v13789_v55 = vld [vmem:[#allocation7 + $0x7dc] sm:$0xf] }
 0x66a   :  { %v14521_v12 = vld [vmem:[#allocation7 + $0x1eb4] sm:$0xf0]  ;;  %v13589_v30 = vld [vmem:[#allocation7 + $0x19c] sm:$0xf] }
 0x66b   :  { %v12316_v21 = vld [vmem:[#allocation7 + $0x1858] sm:$0xf]  ;;  %v13117_v27 = vor.u32 %v14521_v12, %v13116_v2  ;;  %7971 = vmatpush.bf16.msrb.mxu2 %v12861_v53  ;;  %v10206_v2 = vld [vmem:[#allocation7 + $0x7f8] sm:$0xf0] }
 0x66c   :  { %v14321_v34 = vld [vmem:[#allocation7 + $0x1874] sm:$0xf0]  ;;  %v10209_v32 = vor.u32 %v13789_v55, %v10206_v2  ;;  %v13653_v53 = vld [vmem:[#allocation7 + $0x39c] sm:$0xf] }
 0x66d   :  { %v12572_v14 = vld [vmem:[#allocation7 + $0x1a58] sm:$0xf]  ;;  %v12317_v35 = vor.u32 %v14321_v34, %v12316_v21  ;;  %7984 = vmatpush.bf16.msrb.mxu3 %v13117_v27  ;;  %v9406_v21 = vld [vmem:[#allocation7 + $0x1b8] sm:$0xf0]  ;;  %v9953_v34 = vor.u32 %v13725_v0, %v9950_v6 }
 0x66e   :  { %v14385_v42 = vld [vmem:[#allocation7 + $0x1a74] sm:$0xf0]  ;;  %v9662_v27 = vld [vmem:[#allocation7 + $0x3b8] sm:$0xf0] }
 0x66f   :  { %v12828_v43 = vld [vmem:[#allocation7 + $0x1c58] sm:$0xf]  ;;  %v12573_v25 = vor.u32 %v14385_v42, %v12572_v14  ;;  %7946 = vmatpush.bf16.msrb.mxu0 %v12317_v35  ;;  %v13717_v14 = vld [vmem:[#allocation7 + $0x59c] sm:$0xf] }
 0x670   :  { %v14449_v4 = vld [vmem:[#allocation7 + $0x1c74] sm:$0xf0]  ;;  %v9918_v42 = vld [vmem:[#allocation7 + $0x5b8] sm:$0xf0] }
 0x671   :  { %v13084_v24 = vld [vmem:[#allocation7 + $0x1e58] sm:$0xf]  ;;  %v12829_v60 = vor.u32 %v14449_v4, %v12828_v43  ;;  %7959 = vmatpush.bf16.msrb.mxu1 %v12573_v25  ;;  %v13781_v43 = vld [vmem:[#allocation7 + $0x79c] sm:$0xf] }
 0x672   :  { %v14513_v3 = vld [vmem:[#allocation7 + $0x1e74] sm:$0xf0]  ;;  %v10174_v4 = vld [vmem:[#allocation7 + $0x7b8] sm:$0xf0] }
 0x673   :  { %v12284_v44 = vld [vmem:[#allocation7 + $0x1818] sm:$0xf]  ;;  %v13085_v59 = vor.u32 %v14513_v3, %v13084_v24  ;;  %7972 = vmatpush.bf16.msrb.mxu2 %v12829_v60  ;;  %v8308_v24 = vsel %vm232_vm6, %v8276_v26, 0.0  ;;  %v9409_v3 = vor.u32 %v13589_v30, %v9406_v21  ;;  %v13581_v35 = vld [vmem:[#allocation7 + $0x15c] sm:$0xf]  ;;  %v7754_v30 = vpop.f32.mrf.mxu1 }
 0x674   :  { %v14313_v49 = vld [vmem:[#allocation7 + $0x1834] sm:$0xf0]  ;;  %v9374_v25 = vld [vmem:[#allocation7 + $0x178] sm:$0xf0]  ;;  %v8309_v47 = vrot.slane %v8308_v24, 4 }
 0x675   :  { %v12540_v50 = vld [vmem:[#allocation7 + $0x1a18] sm:$0xf]  ;;  %v12285_v54 = vor.u32 %v14313_v49, %v12284_v44  ;;  %7985 = vmatpush.bf16.msrb.mxu3 %v13085_v59  ;;  %v9665_v44 = vor.u32 %v13653_v53, %v9662_v27  ;;  %v9921_v49 = vor.u32 %v13717_v14, %v9918_v42  ;;  %v9630_v60 = vld [vmem:[#allocation7 + $0x378] sm:$0xf0] }
 0x676   :  { %v14377_v52 = vld [vmem:[#allocation7 + $0x1a34] sm:$0xf0]  ;;  %v13709_v59 = vld [vmem:[#allocation7 + $0x55c] sm:$0xf] }
 0x677   :  { %v12796_v15 = vld [vmem:[#allocation7 + $0x1c18] sm:$0xf]  ;;  %v12541_v1 = vor.u32 %v14377_v52, %v12540_v50  ;;  %7947 = vmatpush.bf16.msrb.mxu0 %v12285_v54  ;;  %v10177_v50 = vor.u32 %v13781_v43, %v10174_v4  ;;  %v13645_v52 = vld [vmem:[#allocation7 + $0x35c] sm:$0xf] }
 0x678   :  { %v14441_v19 = vld [vmem:[#allocation7 + $0x1c34] sm:$0xf0]  ;;  %v9633_v56 = vor.u32 %v13645_v52, %v9630_v60  ;;  %v9342_v51 = vld [vmem:[#allocation7 + $0x138] sm:$0xf0]  ;;  %v7767_v60 = vpop.f32.mrf.mxu2 }
 0x679   :  { %v13052_v57 = vld [vmem:[#allocation7 + $0x1e18] sm:$0xf]  ;;  %v12797_v12 = vor.u32 %v14441_v19, %v12796_v15  ;;  %7960 = vmatpush.bf16.msrb.mxu1 %v12541_v1  ;;  %v9886_v15 = vld [vmem:[#allocation7 + $0x578] sm:$0xf0] }
 0x67a   :  { %v14505_v9 = vld [vmem:[#allocation7 + $0x1e34] sm:$0xf0]  ;;  %7948 = vmatmul.bf16.vlgmr.msrb.gmra.mxu0 %v15191_v31  ;;  %v13773_v19 = vld [vmem:[#allocation7 + $0x75c] sm:$0xf]  ;;  %v9889_v46 = vor.u32 %v13709_v59, %v9886_v15 }
 0x67b   :  { %v13053_v5 = vor.u32 %v14505_v9, %v13052_v57  ;;  %7973 = vmatpush.bf16.msrb.mxu2 %v12797_v12  ;;  %7992 = vmatpush.bf16.msra.mxu0 %v9441_v16  ;;  %v10142_v57 = vld [vmem:[#allocation7 + $0x778] sm:$0xf0]  ;;  %v9377_v9 = vor.u32 %v13581_v35, %v9374_v25  ;;  %v8310_v12 = vadd.f32 %v8309_v47, %v8308_v24  ;;  %v7780_v47 = vpop.f32.mrf.mxu3 }
 0x67c   :  { %7961 = vmatmul.bf16.vlgmr.msrb.gmra.mxu1 %v15195_v38  ;;  %v10145_v63 = vor.u32 %v13773_v19, %v10142_v57  ;;  %v13637_v0 = vld [vmem:[#allocation7 + $0x31c] sm:$0xf]  ;;  %v9345_v16 = vor.u32 %v13573_v62, %v9342_v51 }
 0x67d   :  { %7986 = vmatpush.bf16.msrb.mxu3 %v13053_v5  ;;  %8005 = vmatpush.bf16.msra.mxu1 %v9697_v13  ;;  %v9598_v54 = vld [vmem:[#allocation7 + $0x338] sm:$0xf0]  ;;  %v7741_v5 = vpop.f32.mrf.mxu0 }
 0x67e   :  { %7974 = vmatmul.bf16.vlgmr.msrb.gmra.mxu2 %v15193_v33  ;;  %v13701_v1 = vld [vmem:[#allocation7 + $0x51c] sm:$0xf]  ;;  %v7742_v26 = vadd.f32 %v7741_v5, %v15464_v20  ;;  %v9601_v13 = vor.u32 %v13637_v0, %v9598_v54 }
 0x67f   :  { %8018 = vmatpush.bf16.msra.mxu2 %v9953_v34  ;;  %7993 = vmatpush.bf16.msra.mxu0 %v9409_v3  ;;  %v9854_v6 = vld [vmem:[#allocation7 + $0x538] sm:$0xf0] }
 0x680   :  { %7987 = vmatmul.bf16.vlgmr.msrb.gmra.mxu3 %v15197_v39  ;;  %v13765_v55 = vld [vmem:[#allocation7 + $0x71c] sm:$0xf]  ;;  %v7755_v43 = vadd.f32 %v7754_v30, %v7742_v26 }
 0x681   :  { %8031 = vmatpush.bf16.msra.mxu3 %v10209_v32  ;;  %8006 = vmatpush.bf16.msra.mxu1 %v9665_v44  ;;  %v10110_v2 = vld [vmem:[#allocation7 + $0x738] sm:$0xf0]  ;;  %v9857_v32 = vor.u32 %v13701_v1, %v9854_v6  ;;  %v8311_v44 = vrot.slane %v8310_v12, 2 }
 0x682   :  { %v13565_v21 = vld [vmem:[#allocation7 + $0xdc] sm:$0xf]  ;;  %v10113_v53 = vor.u32 %v13765_v55, %v10110_v2  ;;  %v7768_v57 = vadd.f32 %v7767_v60, %v7755_v43  ;;  %v7756_v2 = vpop.f32.mrf.mxu1 }
 0x683   :  { %8019 = vmatpush.bf16.msra.mxu2 %v9921_v49  ;;  %7994 = vmatpush.bf16.msra.mxu0 %v9377_v9  ;;  %v9310_v34 = vld [vmem:[#allocation7 + $0xf8] sm:$0xf0]  ;;  %v8312_v51 = vadd.f32 %v8311_v44, %v8310_v12 }
 0x684   :  { %v13629_v27 = vld [vmem:[#allocation7 + $0x2dc] sm:$0xf]  ;;  %v9313_v20 = vor.u32 %v13565_v21, %v9310_v34 }
 0x685   :  { %8032 = vmatpush.bf16.msra.mxu3 %v10177_v50  ;;  %8007 = vmatpush.bf16.msra.mxu1 %v9633_v56  ;;  %v9566_v14 = vld [vmem:[#allocation7 + $0x2f8] sm:$0xf0] }
 0x686   :  { %v13693_v42 = vld [vmem:[#allocation7 + $0x4dc] sm:$0xf]  ;;  %v9569_v35 = vor.u32 %v13629_v27, %v9566_v14 }
 0x687   :  { %8020 = vmatpush.bf16.msra.mxu2 %v9889_v46  ;;  %v9822_v4 = vld [vmem:[#allocation7 + $0x4f8] sm:$0xf0]  ;;  %7995 = vmatpush.bf16.msra.mxu0 %v9345_v16  ;;  %v7743_v46 = vpop.f32.mrf.mxu0 }
 0x688   :  { %v13757_v24 = vld [vmem:[#allocation7 + $0x6dc] sm:$0xf]  ;;  %v9825_v50 = vor.u32 %v13693_v42, %v9822_v4 }
 0x689   :  { %8033 = vmatpush.bf16.msra.mxu3 %v10145_v63  ;;  %v10078_v3 = vld [vmem:[#allocation7 + $0x6f8] sm:$0xf0]  ;;  %8008 = vmatpush.bf16.msra.mxu1 %v9601_v13  ;;  %v15477_v63 = vadd.f32 %v7780_v47, %v7768_v57 }
 0x68a   :  { %v13557_v25 = vld [vmem:[#allocation7 + $0x9c] sm:$0xf]  ;;  %v10081_v52 = vor.u32 %v13757_v24, %v10078_v3 }
 0x68b   :  { %v9278_v49 = vld [vmem:[#allocation7 + $0xb8] sm:$0xf0]  ;;  %8021 = vmatpush.bf16.msra.mxu2 %v9857_v32  ;;  %7996 = vmatpush.bf16.msra.mxu0 %v9313_v20  ;;  %v8235_v12 = vsel %vm232_vm6, %v15477_v63, 0.0  ;;  %v8313_v32 = vrot.slane %v8312_v51, 1 }
 0x68c   :  { %v13621_v59 = vld [vmem:[#allocation7 + $0x29c] sm:$0xf]  ;;  %v9281_v0 = vor.u32 %v13557_v25, %v9278_v49 }
 0x68d   :  { %8034 = vmatpush.bf16.msra.mxu3 %v10113_v53  ;;  %v9534_v15 = vld [vmem:[#allocation7 + $0x2b8] sm:$0xf0]  ;;  %8009 = vmatpush.bf16.msra.mxu1 %v9569_v35  ;;  %v8236_v53 = vrot.slane %v8235_v12, 4 }
 0x68e   :  { %v13685_v19 = vld [vmem:[#allocation7 + $0x49c] sm:$0xf]  ;;  %v9537_v54 = vor.u32 %v13621_v59, %v9534_v15 }
 0x68f   :  { %v9790_v9 = vld [vmem:[#allocation7 + $0x4b8] sm:$0xf0]  ;;  %8022 = vmatpush.bf16.msra.mxu2 %v9825_v50  ;;  %7997 = vmatpush.bf16.msra.mxu0 %v9281_v0  ;;  %v8237_v44 = vadd.f32 %v8236_v53, %v8235_v12 }
 0x690   :  { %v13749_v56 = vld [vmem:[#allocation7 + $0x69c] sm:$0xf]  ;;  %v9793_v5 = vor.u32 %v13685_v19, %v9790_v9  ;;  %v7782_v19 = vpop.f32.mrf.mxu3 }
 0x691   :  { %v10046_v62 = vld [vmem:[#allocation7 + $0x6b8] sm:$0xf0]  ;;  %8035 = vmatpush.bf16.msra.mxu3 %v10081_v52  ;;  %8010 = vmatpush.bf16.msra.mxu1 %v9537_v54  ;;  %v7769_v52 = vpop.f32.mrf.mxu2  ;;  %v8238_v57 = vrot.slane %v8237_v44, 2 }
 0x692   :  { %v13549_v1 = vld [vmem:[#allocation7 + $0x5c] sm:$0xf]  ;;  %v10049_v26 = vor.u32 %v13749_v56, %v10046_v62  ;;  %v8314_v56 = vadd.f32 %v8313_v32, %v8312_v51 }
 0x693   :  { %v9246_v6 = vld [vmem:[#allocation7 + $0x78] sm:$0xf0]  ;;  %8023 = vmatpush.bf16.msra.mxu2 %v9793_v5 }
 0x694   :  { %v13613_v55 = vld [vmem:[#allocation7 + $0x25c] sm:$0xf]  ;;  %v9249_v42 = vor.u32 %v13549_v1, %v9246_v6  ;;  %v8239_v6 = vadd.f32 %v8238_v57, %v8237_v44 }
 0x695   :  { %v9502_v16 = vld [vmem:[#allocation7 + $0x278] sm:$0xf0]  ;;  %8036 = vmatpush.bf16.msra.mxu3 %v10049_v26 }
 0x696   :  { %v13677_v13 = vld [vmem:[#allocation7 + $0x45c] sm:$0xf]  ;;  %v9505_v43 = vor.u32 %v13613_v55, %v9502_v16  ;;  %7998 = vmatpush.bf16.msra.mxu0 %v9249_v42  ;;  %v8240_v12 = vrot.slane %v8239_v6, 1  ;;  %v8340_v42 = vmul.f32 0.5, %v8314_v56 }
 0x697   :  { %v9758_v30 = vld [vmem:[#allocation7 + $0x478] sm:$0xf0] }
 0x698   :  { %v13741_v21 = vld [vmem:[#allocation7 + $0x65c] sm:$0xf]  ;;  %v9761_v20 = vor.u32 %v13677_v13, %v9758_v30  ;;  %8011 = vmatpush.bf16.msra.mxu1 %v9505_v43  ;;  %v8241_v43 = vadd.f32 %v8240_v12, %v8239_v6  ;;  %v15483_v19 = vadd.f32 1e-05, %v8340_v42  ;;  %v7806_v12 = vpop.f32.mrf.mxu1 }
 0x699   :  { %v10014_v34 = vld [vmem:[#allocation7 + $0x678] sm:$0xf0] }
 0x69a   :  { %v13541_v27 = vld [vmem:[#allocation7 + $0x1c] sm:$0xf]  ;;  %v10017_v35 = vor.u32 %v13741_v21, %v10014_v34  ;;  %8024 = vmatpush.bf16.msra.mxu2 %v9761_v20  ;;  %14652 = vrsqrt.f32 %v15483_v19  ;;  %vm8399_vm15 = vweird.f32 %v15483_v19 }
 0x69b   :  { %v9214_v14 = vld [vmem:[#allocation7 + $0x38] sm:$0xf0] }
 0x69c   :  { %v13605_v4 = vld [vmem:[#allocation7 + $0x21c] sm:$0xf]  ;;  %v9217_v62 = vor.u32 %v13541_v27, %v9214_v14  ;;  %8037 = vmatpush.bf16.msra.mxu3 %v10017_v35  ;;  %v8261_v35 = vmul.f32 0.5, %v8241_v43 }
 0x69d   :  { %v9470_v24 = vld [vmem:[#allocation7 + $0x238] sm:$0xf0] }
 0x69e   :  { %v13669_v3 = vld [vmem:[#allocation7 + $0x41c] sm:$0xf]  ;;  %v9473_v46 = vor.u32 %v13605_v4, %v9470_v24  ;;  %7999 = vmatpush.bf16.msra.mxu0 %v9217_v62  ;;  %v15486_v57 = vsub.f32 %v15477_v63, %v8261_v35 }
 0x69f   :  { %v9726_v25 = vld [vmem:[#allocation7 + $0x438] sm:$0xf0] }
 0x6a0   :  { %v13733_v49 = vld [vmem:[#allocation7 + $0x61c] sm:$0xf]  ;;  %v9729_v55 = vor.u32 %v13669_v3, %v9726_v25  ;;  %8012 = vmatpush.bf16.msra.mxu1 %v9473_v46 }
 0x6a1   :  { %v9982_v50 = vld [vmem:[#allocation7 + $0x638] sm:$0xf0]  ;;  %8000 = vmatmul.bf16.vlgmr.msra.gmra.mxu0 %v15134_v10 }
 0x6a2   :  { %v13853_v60 = vld [vmem:[#allocation7 + $0x9dc] sm:$0xf]  ;;  %v9985_v2 = vor.u32 %v13733_v49, %v9982_v50  ;;  %8025 = vmatpush.bf16.msra.mxu2 %v9729_v55 }
 0x6a3   :  { %v10462_v59 = vld [vmem:[#allocation7 + $0x9f8] sm:$0xf0]  ;;  %8013 = vmatmul.bf16.vlgmr.msra.gmra.mxu1 %v15143_v18 }
 0x6a4   :  { %v13917_v15 = vld [vmem:[#allocation7 + $0xbdc] sm:$0xf]  ;;  %v10465_v5 = vor.u32 %v13853_v60, %v10462_v59  ;;  %8038 = vmatpush.bf16.msra.mxu3 %v9985_v2  ;;  %v7793_v2 = vpop.f32.mrf.mxu0 }
 0x6a5   :  { %v10718_v47 = vld [vmem:[#allocation7 + $0xbf8] sm:$0xf0]  ;;  %8026 = vmatmul.bf16.vlgmr.msra.gmra.mxu2 %v15136_v11  ;;  %v8277_v11 = vmul.f32 %v15486_v57, %v15486_v57 }
 0x6a6   :  { %v13981_v9 = vld [vmem:[#allocation7 + $0xddc] sm:$0xf]  ;;  %v10721_v26 = vor.u32 %v13917_v15, %v10718_v47  ;;  %8044 = vmatpush.bf16.msrb.mxu0 %v10465_v5 }
 0x6a7   :  { %v10974_v0 = vld [vmem:[#allocation7 + $0xdf8] sm:$0xf0]  ;;  %8039 = vmatmul.bf16.vlgmr.msra.gmra.mxu3 %v15141_v17  ;;  %v8315_v18 = vsel %vm232_vm6, %v8277_v11, 0.0 }
 0x6a8   :  { %v14045_v54 = vld [vmem:[#allocation7 + $0xfdc] sm:$0xf]  ;;  %v10977_v21 = vor.u32 %v13981_v9, %v10974_v0  ;;  %8057 = vmatpush.bf16.msrb.mxu1 %v10721_v26  ;;  %v8316_v5 = vrot.slane %v8315_v18, 4 }
 0x6a9   :  { %v11230_v1 = vld [vmem:[#allocation7 + $0xff8] sm:$0xf0] }
 0x6aa   :  { %v13845_v16 = vld [vmem:[#allocation7 + $0x99c] sm:$0xf]  ;;  %v11233_v51 = vor.u32 %v14045_v54, %v11230_v1  ;;  %8070 = vmatpush.bf16.msrb.mxu2 %v10977_v21 }
 0x6ab   :  { %v10430_v13 = vld [vmem:[#allocation7 + $0x9b8] sm:$0xf0] }
 0x6ac   :  { %v13909_v30 = vld [vmem:[#allocation7 + $0xb9c] sm:$0xf]  ;;  %v10433_v4 = vor.u32 %v13845_v16, %v10430_v13  ;;  %8083 = vmatpush.bf16.msrb.mxu3 %v11233_v51 }
 0x6ad   :  { %v10686_v34 = vld [vmem:[#allocation7 + $0xbb8] sm:$0xf0] }
 0x6ae   :  { %v13973_v32 = vld [vmem:[#allocation7 + $0xd9c] sm:$0xf]  ;;  %v10689_v24 = vor.u32 %v13909_v30, %v10686_v34  ;;  %8045 = vmatpush.bf16.msrb.mxu0 %v10433_v4 }
 0x6af   :  { %v10942_v53 = vld [vmem:[#allocation7 + $0xdb8] sm:$0xf0] }
 0x6b0   :  { %v14037_v27 = vld [vmem:[#allocation7 + $0xf9c] sm:$0xf]  ;;  %v10945_v25 = vor.u32 %v13973_v32, %v10942_v53  ;;  %8058 = vmatpush.bf16.msrb.mxu1 %v10689_v24  ;;  %v15494_v53 = vld [vmem:[#allocation8] sm:$0xff] }
 0x6b1   :  { %v11198_v14 = vld [vmem:[#allocation7 + $0xfb8] sm:$0xf0] }
 0x6b2   :  { %v13837_v3 = vld [vmem:[#allocation7 + $0x95c] sm:$0xf]  ;;  %v11201_v49 = vor.u32 %v14037_v27, %v11198_v14  ;;  %8071 = vmatpush.bf16.msrb.mxu2 %v10945_v25  ;;  %v1406_v27 = vperm.slane %v15494_v53, 6  ;;  %v8317_v14 = vadd.f32 %v8316_v5, %v8315_v18 }
 0x6b3   :  { %v10398_v44 = vld [vmem:[#allocation7 + $0x978] sm:$0xf0] }
 0x6b4   :  { %v13901_v20 = vld [vmem:[#allocation7 + $0xb5c] sm:$0xf]  ;;  %v10401_v47 = vor.u32 %v13837_v3, %v10398_v44  ;;  %8084 = vmatpush.bf16.msrb.mxu3 %v11201_v49  ;;  %v7794_v24 = vadd.f32 %v7793_v2, %v1406_v27  ;;  %v8318_v3 = vrot.slane %v8317_v14, 2  ;;  %v15497_v49 = vpop.eup %14652  ;;  %v7808_v2 = vpop.f32.mrf.mxu1 }
 0x6b5   :  { %v10654_v50 = vld [vmem:[#allocation7 + $0xb78] sm:$0xf0]  ;;  %vm8400_vm14 = vweird.f32 %v15497_v49 }
 0x6b6   :  { %v13965_v52 = vld [vmem:[#allocation7 + $0xd5c] sm:$0xf]  ;;  %v10657_v9 = vor.u32 %v13901_v20, %v10654_v50  ;;  %8046 = vmatpush.bf16.msrb.mxu0 %v10401_v47  ;;  %v7807_v47 = vadd.f32 %v7806_v12, %v7794_v24  ;;  %vm15521_vm0 = vmor %vm8399_vm15, %vm8400_vm14 }
 0x6b7   :  { %v10910_v60 = vld [vmem:[#allocation7 + $0xd78] sm:$0xf0] }
 0x6b8   :  { %v14029_v59 = vld [vmem:[#allocation7 + $0xf5c] sm:$0xf]  ;;  %v10913_v10 = vor.u32 %v13965_v52, %v10910_v60  ;;  %8059 = vmatpush.bf16.msrb.mxu1 %v10657_v9  ;;  %v7819_v9 = vpop.f32.mrf.mxu2 }
 0x6b9   :  { %v11166_v15 = vld [vmem:[#allocation7 + $0xf78] sm:$0xf0] }
 0x6ba   :  { %v13829_v56 = vld [vmem:[#allocation7 + $0x91c] sm:$0xf]  ;;  %v11169_v46 = vor.u32 %v14029_v59, %v11166_v15  ;;  %8072 = vmatpush.bf16.msrb.mxu2 %v10913_v10 }
 0x6bb   :  { %v10366_v62 = vld [vmem:[#allocation7 + $0x938] sm:$0xf0] }
 0x6bc   :  { %v13893_v0 = vld [vmem:[#allocation7 + $0xb1c] sm:$0xf]  ;;  %v10369_v26 = vor.u32 %v13829_v56, %v10366_v62  ;;  %8085 = vmatpush.bf16.msrb.mxu3 %v11169_v46  ;;  %v8319_v56 = vadd.f32 %v8318_v3, %v8317_v14  ;;  %v7832_v46 = vpop.f32.mrf.mxu3 }
 0x6bd   :  { %v10622_v63 = vld [vmem:[#allocation7 + $0xb38] sm:$0xf0] }
 0x6be   :  { %v13957_v54 = vld [vmem:[#allocation7 + $0xd1c] sm:$0xf]  ;;  %v10625_v16 = vor.u32 %v13893_v0, %v10622_v63  ;;  %8047 = vmatpush.bf16.msrb.mxu0 %v10369_v26  ;;  %v7820_v0 = vadd.f32 %v7819_v9, %v7807_v47  ;;  %v7795_v63 = vpop.f32.mrf.mxu0 }
 0x6bf   :  { %v10878_v1 = vld [vmem:[#allocation7 + $0xd38] sm:$0xf0] }
 0x6c0   :  { %v14021_v17 = vld [vmem:[#allocation7 + $0xf1c] sm:$0xf]  ;;  %v10881_v21 = vor.u32 %v13957_v54, %v10878_v1  ;;  %8060 = vmatpush.bf16.msrb.mxu1 %v10625_v16  ;;  %v8394_v54 = vmul.f32 %v15497_v49, %v15483_v19  ;;  %v8320_v1 = vrot.slane %v8319_v56, 1  ;;  %v15501_v12 = vadd.f32 %v7832_v46, %v7820_v0 }
 0x6c1   :  { %v11134_v6 = vld [vmem:[#allocation7 + $0xf38] sm:$0xf0] }
 0x6c2   :  { %v13821_v55 = vld [vmem:[#allocation7 + $0x8dc] sm:$0xf]  ;;  %v11137_v51 = vor.u32 %v14021_v17, %v11134_v6  ;;  %8073 = vmatpush.bf16.msrb.mxu2 %v10881_v21  ;;  %v8321_v21 = vadd.f32 %v8320_v1, %v8319_v56 }
 0x6c3   :  { %v10334_v13 = vld [vmem:[#allocation7 + $0x8f8] sm:$0xf0] }
 0x6c4   :  { %v13885_v30 = vld [vmem:[#allocation7 + $0xadc] sm:$0xf]  ;;  %v10337_v44 = vor.u32 %v13821_v55, %v10334_v13  ;;  %8086 = vmatpush.bf16.msrb.mxu3 %v11137_v51  ;;  %v7834_v56 = vpop.f32.mrf.mxu3 }
 0x6c5   :  { %v10590_v34 = vld [vmem:[#allocation7 + $0xaf8] sm:$0xf0] }
 0x6c6   :  { %v13949_v32 = vld [vmem:[#allocation7 + $0xcdc] sm:$0xf]  ;;  %v10593_v20 = vor.u32 %v13885_v30, %v10590_v34  ;;  %8048 = vmatpush.bf16.msrb.mxu0 %v10337_v44 }
 0x6c7   :  { %v10846_v42 = vld [vmem:[#allocation7 + $0xcf8] sm:$0xf0] }
 0x6c8   :  { %v14013_v43 = vld [vmem:[#allocation7 + $0xedc] sm:$0xf]  ;;  %v10849_v50 = vor.u32 %v13949_v32, %v10846_v42  ;;  %8061 = vmatpush.bf16.msrb.mxu1 %v10593_v20  ;;  %v8395_v20 = vmul.f32 %v15497_v49, %v8394_v54 }
 0x6c9   :  { %v11102_v4 = vld [vmem:[#allocation7 + $0xef8] sm:$0xf0] }
 0x6ca   :  { %v13813_v35 = vld [vmem:[#allocation7 + $0x89c] sm:$0xf]  ;;  %v11105_v52 = vor.u32 %v14013_v43, %v11102_v4  ;;  %8074 = vmatpush.bf16.msrb.mxu2 %v10849_v50  ;;  %v8341_v43 = vmul.f32 0.5, %v8321_v21 }
 0x6cb   :  { %v10302_v25 = vld [vmem:[#allocation7 + $0x8b8] sm:$0xf0] }
 0x6cc   :  { %v13877_v60 = vld [vmem:[#allocation7 + $0xa9c] sm:$0xf]  ;;  %v10305_v17 = vor.u32 %v13813_v35, %v10302_v25  ;;  %8087 = vmatpush.bf16.msrb.mxu3 %v11105_v52 }
 0x6cd   :  { %v10558_v59 = vld [vmem:[#allocation7 + $0xab8] sm:$0xf0] }
 0x6ce   :  { %v13941_v15 = vld [vmem:[#allocation7 + $0xc9c] sm:$0xf]  ;;  %v10561_v6 = vor.u32 %v13877_v60, %v10558_v59  ;;  %8049 = vmatpush.bf16.msrb.mxu0 %v10305_v17  ;;  %v7821_v59 = vpop.f32.mrf.mxu2  ;;  %v8396_v17 = vmul.f32 0.5, %v8395_v20 }
 0x6cf   :  { %v10814_v62 = vld [vmem:[#allocation7 + $0xcb8] sm:$0xf0] }
 0x6d0   :  { %v14005_v11 = vld [vmem:[#allocation7 + $0xe9c] sm:$0xf]  ;;  %v10817_v5 = vor.u32 %v13941_v15, %v10814_v62  ;;  %8062 = vmatpush.bf16.msrb.mxu1 %v10561_v6  ;;  %v15504_v15 = vadd.f32 1e-05, %v8341_v43 }
 0x6d1   :  { %v11070_v10 = vld [vmem:[#allocation7 + $0xeb8] sm:$0xf0] }
 0x6d2   :  { %v13805_v18 = vld [vmem:[#allocation7 + $0x85c] sm:$0xf]  ;;  %v11073_v26 = vor.u32 %v14005_v11, %v11070_v10  ;;  %8075 = vmatpush.bf16.msrb.mxu2 %v10817_v5  ;;  %14654 = vrsqrt.f32 %v15504_v15  ;;  %vm8409_vm2 = vweird.f32 %v15504_v15 }
 0x6d3   :  { %v10270_v55 = vld [vmem:[#allocation7 + $0x878] sm:$0xf0] }
 0x6d4   :  { %v13869_v16 = vld [vmem:[#allocation7 + $0xa5c] sm:$0xf]  ;;  %v10273_v4 = vor.u32 %v13805_v18, %v10270_v55  ;;  %8088 = vmatpush.bf16.msrb.mxu3 %v11073_v26 }
 0x6d5   :  { %v10526_v13 = vld [vmem:[#allocation7 + $0xa78] sm:$0xf0] }
 0x6d6   :  { %v13933_v30 = vld [vmem:[#allocation7 + $0xc5c] sm:$0xf]  ;;  %v10529_v24 = vor.u32 %v13869_v16, %v10526_v13  ;;  %8050 = vmatpush.bf16.msrb.mxu0 %v10273_v4 }
 0x6d7   :  { %v10782_v51 = vld [vmem:[#allocation7 + $0xc78] sm:$0xf0] }
 0x6d8   :  { %v13997_v34 = vld [vmem:[#allocation7 + $0xe5c] sm:$0xf]  ;;  %v10785_v35 = vor.u32 %v13933_v30, %v10782_v51  ;;  %8063 = vmatpush.bf16.msrb.mxu1 %v10529_v24 }
 0x6d9   :  { %v11038_v32 = vld [vmem:[#allocation7 + $0xe78] sm:$0xf0] }
 0x6da   :  { %v13797_v27 = vld [vmem:[#allocation7 + $0x81c] sm:$0xf]  ;;  %v11041_v25 = vor.u32 %v13997_v34, %v11038_v32  ;;  %8076 = vmatpush.bf16.msrb.mxu2 %v10785_v35 }
 0x6db   :  { %v10238_v14 = vld [vmem:[#allocation7 + $0x838] sm:$0xf0] }
 0x6dc   :  { %v13861_v42 = vld [vmem:[#allocation7 + $0xa1c] sm:$0xf]  ;;  %v10241_v46 = vor.u32 %v13797_v27, %v10238_v14  ;;  %8089 = vmatpush.bf16.msrb.mxu3 %v11041_v25  ;;  %v8397_v14 = vsub.f32 1.5, %v8396_v17 }
 0x6dd   :  { %v10494_v3 = vld [vmem:[#allocation7 + $0xa38] sm:$0xf0] }
 0x6de   :  { %v13925_v44 = vld [vmem:[#allocation7 + $0xc1c] sm:$0xf]  ;;  %v10497_v0 = vor.u32 %v13861_v42, %v10494_v3  ;;  %8051 = vmatpush.bf16.msrb.mxu0 %v10241_v46  ;;  %v15507_v42 = vpop.eup %14654 }
 0x6df   :  { %v10750_v50 = vld [vmem:[#allocation7 + $0xc38] sm:$0xf0]  ;;  %vm8410_vm1 = vweird.f32 %v15507_v42 }
 0x6e0   :  { %v13989_v52 = vld [vmem:[#allocation7 + $0xe1c] sm:$0xf]  ;;  %v10753_v6 = vor.u32 %v13925_v44, %v10750_v50  ;;  %8064 = vmatpush.bf16.msrb.mxu1 %v10497_v0  ;;  %v8404_v44 = vmul.f32 %v15507_v42, %v15504_v15  ;;  %vm8411_vm3 = vmor %vm8409_vm2, %vm8410_vm1 }
 0x6e1   :  { %v11006_v60 = vld [vmem:[#allocation7 + $0xe38] sm:$0xf0]  ;;  %8052 = vmatmul.bf16.vlgmr.msrb.gmra.mxu0 %v15167_v22 }
 0x6e2   :  { %v14109_v47 = vld [vmem:[#allocation7 + $0x11dc] sm:$0xf]  ;;  %v11009_v18 = vor.u32 %v13989_v52, %v11006_v60  ;;  %8077 = vmatpush.bf16.msrb.mxu2 %v10753_v6  ;;  %v8405_v56 = vmul.f32 %v15507_v42, %v8404_v44 }
 0x6e3   :  { %v11486_v9 = vld [vmem:[#allocation7 + $0x11f8] sm:$0xf0]  ;;  %8065 = vmatmul.bf16.vlgmr.msrb.gmra.mxu1 %v15171_v28 }
 0x6e4   :  { %v14173_v62 = vld [vmem:[#allocation7 + $0x13dc] sm:$0xf]  ;;  %v11489_v55 = vor.u32 %v14109_v47, %v11486_v9  ;;  %8090 = vmatpush.bf16.msrb.mxu3 %v11009_v18  ;;  %v8398_v9 = vmul.f32 %v15497_v49, %v8397_v14  ;;  %v8406_v0 = vmul.f32 0.5, %v8405_v56 }
 0x6e5   :  { %v11742_v11 = vld [vmem:[#allocation7 + $0x13f8] sm:$0xf0]  ;;  %8078 = vmatmul.bf16.vlgmr.msrb.gmra.mxu2 %v15169_v23 }
 0x6e6   :  { %v14237_v10 = vld [vmem:[#allocation7 + $0x15dc] sm:$0xf]  ;;  %v11745_v2 = vor.u32 %v14173_v62, %v11742_v11  ;;  %8096 = vmatpush.bf16.msra.mxu0 %v11489_v55  ;;  %v8402_v6 = vsel %vm15521_vm0, %v15497_v49, %v8398_v9  ;;  %v8407_v18 = vsub.f32 1.5, %v8406_v0  ;;  %v7845_v55 = vpop.f32.mrf.mxu0  ;;  %v7871_v9 = vpop.f32.mrf.mxu2 }
 0x6e7   :  { %v11998_v63 = vld [vmem:[#allocation7 + $0x15f8] sm:$0xf0]  ;;  %8091 = vmatmul.bf16.vlgmr.msrb.gmra.mxu3 %v15173_v29 }
 0x6e8   :  { %v14301_v54 = vld [vmem:[#allocation7 + $0x17dc] sm:$0xf]  ;;  %v12001_v16 = vor.u32 %v14237_v10, %v11998_v63  ;;  %8109 = vmatpush.bf16.msra.mxu1 %v11745_v2 }
 0x6e9   :  { %v12254_v1 = vld [vmem:[#allocation7 + $0x17f8] sm:$0xf0] }
 0x6ea   :  { %v14101_v5 = vld [vmem:[#allocation7 + $0x119c] sm:$0xf]  ;;  %v12257_v13 = vor.u32 %v14301_v54, %v12254_v1  ;;  %8122 = vmatpush.bf16.msra.mxu2 %v12001_v16 }
 0x6eb   :  { %v11454_v26 = vld [vmem:[#allocation7 + $0x11b8] sm:$0xf0] }
 0x6ec   :  { %v14165_v30 = vld [vmem:[#allocation7 + $0x139c] sm:$0xf]  ;;  %v11457_v43 = vor.u32 %v14101_v5, %v11454_v26  ;;  %8135 = vmatpush.bf16.msra.mxu3 %v12257_v13 }
 0x6ed   :  { %v11710_v21 = vld [vmem:[#allocation7 + $0x13b8] sm:$0xf0] }
 0x6ee   :  { %v14229_v51 = vld [vmem:[#allocation7 + $0x159c] sm:$0xf]  ;;  %v11713_v4 = vor.u32 %v14165_v30, %v11710_v21  ;;  %8097 = vmatpush.bf16.msra.mxu0 %v11457_v43  ;;  %v7846_v30 = vadd.f32 %v7845_v55, %v15501_v12  ;;  %v7858_v21 = vpop.f32.mrf.mxu1 }
 0x6ef   :  { %v11966_v34 = vld [vmem:[#allocation7 + $0x15b8] sm:$0xf0] }
 0x6f0   :  { %v14293_v32 = vld [vmem:[#allocation7 + $0x179c] sm:$0xf]  ;;  %v11969_v20 = vor.u32 %v14229_v51, %v11966_v34  ;;  %8110 = vmatpush.bf16.msra.mxu1 %v11713_v4  ;;  %v8408_v51 = vmul.f32 %v15507_v42, %v8407_v18 }
 0x6f1   :  { %v12222_v27 = vld [vmem:[#allocation7 + $0x17b8] sm:$0xf0] }
 0x6f2   :  { %v14093_v24 = vld [vmem:[#allocation7 + $0x115c] sm:$0xf]  ;;  %v12225_v35 = vor.u32 %v14293_v32, %v12222_v27  ;;  %8123 = vmatpush.bf16.msra.mxu2 %v11969_v20  ;;  %v8412_v12 = vsel %vm8411_vm3, %v15507_v42, %v8408_v51 }
 0x6f3   :  { %v11422_v3 = vld [vmem:[#allocation7 + $0x1178] sm:$0xf0]  ;;  %v8445_v44 = vrot.slane %v8412_v12, 3 }
 0x6f4   :  { %v14157_v25 = vld [vmem:[#allocation7 + $0x135c] sm:$0xf]  ;;  %v11425_v62 = vor.u32 %v14093_v24, %v11422_v3  ;;  %8136 = vmatpush.bf16.msra.mxu3 %v12225_v35  ;;  %v7859_v24 = vadd.f32 %v7858_v21, %v7846_v30  ;;  %v8444_v3 = vrot.slane %v8402_v6, 4 }
 0x6f5   :  { %v11678_v50 = vld [vmem:[#allocation7 + $0x1378] sm:$0xf0] }
 0x6f6   :  { %v14221_v52 = vld [vmem:[#allocation7 + $0x155c] sm:$0xf]  ;;  %v11681_v11 = vor.u32 %v14157_v25, %v11678_v50  ;;  %8098 = vmatpush.bf16.msra.mxu0 %v11425_v62  ;;  %v15536_v56 = vsel %vm8453_vm4, %v8444_v3, %v8445_v44 }
 0x6f7   :  { %v11934_v60 = vld [vmem:[#allocation7 + $0x1578] sm:$0xf0] }
 0x6f8   :  { %v14285_v59 = vld [vmem:[#allocation7 + $0x175c] sm:$0xf]  ;;  %v11937_v29 = vor.u32 %v14221_v52, %v11934_v60  ;;  %8111 = vmatpush.bf16.msra.mxu1 %v11681_v11 }
 0x6f9   :  { %v12190_v47 = vld [vmem:[#allocation7 + $0x1778] sm:$0xf0] }
 0x6fa   :  { %v14085_v23 = vld [vmem:[#allocation7 + $0x111c] sm:$0xf]  ;;  %v12193_v28 = vor.u32 %v14285_v59, %v12190_v47  ;;  %8124 = vmatpush.bf16.msra.mxu2 %v11937_v29 }
 0x6fb   :  { %v11390_v10 = vld [vmem:[#allocation7 + $0x1138] sm:$0xf0] }
 0x6fc   :  { %v14149_v46 = vld [vmem:[#allocation7 + $0x131c] sm:$0xf]  ;;  %v11393_v2 = vor.u32 %v14085_v23, %v11390_v10  ;;  %8137 = vmatpush.bf16.msra.mxu3 %v12193_v28  ;;  %v7872_v23 = vadd.f32 %v7871_v9, %v7859_v24  ;;  %v7884_v10 = vpop.f32.mrf.mxu3 }
 0x6fd   :  { %v11646_v63 = vld [vmem:[#allocation7 + $0x1338] sm:$0xf0] }
 0x6fe   :  { %v14213_v19 = vld [vmem:[#allocation7 + $0x151c] sm:$0xf]  ;;  %v11649_v5 = vor.u32 %v14149_v46, %v11646_v63  ;;  %8099 = vmatpush.bf16.msra.mxu0 %v11393_v2  ;;  %v7847_v46 = vpop.f32.mrf.mxu0  ;;  %v15538_v63 = vadd.f32 %v7884_v10, %v7872_v23 }
 0x6ff   :  { %v11902_v54 = vld [vmem:[#allocation7 + $0x1538] sm:$0xf0] }
 0x700   :  { %v14277_v1 = vld [vmem:[#allocation7 + $0x171c] sm:$0xf]  ;;  %v11905_v49 = vor.u32 %v14213_v19, %v11902_v54  ;;  %8112 = vmatpush.bf16.msra.mxu1 %v11649_v5  ;;  %v7860_v19 = vpop.f32.mrf.mxu1 }
 0x701   :  { %v12158_v17 = vld [vmem:[#allocation7 + $0x1738] sm:$0xf0] }
 0x702   :  { %v14077_v26 = vld [vmem:[#allocation7 + $0x10dc] sm:$0xf]  ;;  %v12161_v34 = vor.u32 %v14277_v1, %v12158_v17  ;;  %8125 = vmatpush.bf16.msra.mxu2 %v11905_v49 }
 0x703   :  { %v11358_v16 = vld [vmem:[#allocation7 + $0x10f8] sm:$0xf0] }
 0x704   :  { %v14141_v13 = vld [vmem:[#allocation7 + $0x12dc] sm:$0xf]  ;;  %v11361_v15 = vor.u32 %v14077_v26, %v11358_v16  ;;  %8138 = vmatpush.bf16.msra.mxu3 %v12161_v34  ;;  %v7886_v3 = vpop.f32.mrf.mxu3 }
 0x705   :  { %v11614_v32 = vld [vmem:[#allocation7 + $0x12f8] sm:$0xf0] }
 0x706   :  { %v14205_v27 = vld [vmem:[#allocation7 + $0x14dc] sm:$0xf]  ;;  %v11617_v20 = vor.u32 %v14141_v13, %v11614_v32  ;;  %8100 = vmatpush.bf16.msra.mxu0 %v11361_v15 }
 0x707   :  { %v11870_v14 = vld [vmem:[#allocation7 + $0x14f8] sm:$0xf0] }
 0x708   :  { %v14269_v43 = vld [vmem:[#allocation7 + $0x16dc] sm:$0xf]  ;;  %v11873_v50 = vor.u32 %v14205_v27, %v11870_v14  ;;  %8113 = vmatpush.bf16.msra.mxu1 %v11617_v20 }
 0x709   :  { %v12126_v4 = vld [vmem:[#allocation7 + $0x16f8] sm:$0xf0] }
 0x70a   :  { %v14069_v35 = vld [vmem:[#allocation7 + $0x109c] sm:$0xf]  ;;  %v12129_v52 = vor.u32 %v14269_v43, %v12126_v4  ;;  %8126 = vmatpush.bf16.msra.mxu2 %v11873_v50  ;;  %v7873_v43 = vpop.f32.mrf.mxu2 }
 0x70b   :  { %v11326_v25 = vld [vmem:[#allocation7 + $0x10b8] sm:$0xf0] }
 0x70c   :  { %v14133_v60 = vld [vmem:[#allocation7 + $0x129c] sm:$0xf]  ;;  %v11329_v22 = vor.u32 %v14069_v35, %v11326_v25  ;;  %8139 = vmatpush.bf16.msra.mxu3 %v12129_v52 }
 0x70d   :  { %v11582_v59 = vld [vmem:[#allocation7 + $0x12b8] sm:$0xf0] }
 0x70e   :  { %v14197_v47 = vld [vmem:[#allocation7 + $0x149c] sm:$0xf]  ;;  %v11585_v0 = vor.u32 %v14133_v60, %v11582_v59  ;;  %8101 = vmatpush.bf16.msra.mxu0 %v11329_v22 }
 0x70f   :  { %v11838_v42 = vld [vmem:[#allocation7 + $0x14b8] sm:$0xf0] }
 0x710   :  { %v14261_v62 = vld [vmem:[#allocation7 + $0x169c] sm:$0xf]  ;;  %v11841_v54 = vor.u32 %v14197_v47, %v11838_v42  ;;  %8114 = vmatpush.bf16.msra.mxu1 %v11585_v0 }
 0x711   :  { %v12094_v11 = vld [vmem:[#allocation7 + $0x16b8] sm:$0xf0] }
 0x712   :  { %v14061_v29 = vld [vmem:[#allocation7 + $0x105c] sm:$0xf]  ;;  %v12097_v1 = vor.u32 %v14261_v62, %v12094_v11  ;;  %8127 = vmatpush.bf16.msra.mxu2 %v11841_v54 }
 0x713   :  { %v11294_v28 = vld [vmem:[#allocation7 + $0x1078] sm:$0xf0] }
 0x714   :  { %v14125_v17 = vld [vmem:[#allocation7 + $0x125c] sm:$0xf]  ;;  %v11297_v16 = vor.u32 %v14061_v29, %v11294_v28  ;;  %8140 = vmatpush.bf16.msra.mxu3 %v12097_v1 }
 0x715   :  { %v11550_v6 = vld [vmem:[#allocation7 + $0x1278] sm:$0xf0] }
 0x716   :  { %v14189_v18 = vld [vmem:[#allocation7 + $0x145c] sm:$0xf]  ;;  %v11553_v13 = vor.u32 %v14125_v17, %v11550_v6  ;;  %8102 = vmatpush.bf16.msra.mxu0 %v11297_v16 }
 0x717   :  { %v11806_v55 = vld [vmem:[#allocation7 + $0x1478] sm:$0xf0] }
 0x718   :  { %v14253_v2 = vld [vmem:[#allocation7 + $0x165c] sm:$0xf]  ;;  %v11809_v49 = vor.u32 %v14189_v18, %v11806_v55  ;;  %8115 = vmatpush.bf16.msra.mxu1 %v11553_v13 }
 0x719   :  { %v12062_v5 = vld [vmem:[#allocation7 + $0x1678] sm:$0xf0] }
 0x71a   :  { %v14053_v26 = vld [vmem:[#allocation7 + $0x101c] sm:$0xf]  ;;  %v12065_v34 = vor.u32 %v14253_v2, %v12062_v5  ;;  %8128 = vmatpush.bf16.msra.mxu2 %v11809_v49 }
 0x71b   :  { %v11262_v30 = vld [vmem:[#allocation7 + $0x1038] sm:$0xf0] }
 0x71c   :  { %v14117_v21 = vld [vmem:[#allocation7 + $0x121c] sm:$0xf]  ;;  %v11265_v35 = vor.u32 %v14053_v26, %v11262_v30  ;;  %8141 = vmatpush.bf16.msra.mxu3 %v12065_v34 }
 0x71d   :  { %v11518_v51 = vld [vmem:[#allocation7 + $0x1238] sm:$0xf0] }
 0x71e   :  { %v14181_v32 = vld [vmem:[#allocation7 + $0x141c] sm:$0xf]  ;;  %v11521_v25 = vor.u32 %v14117_v21, %v11518_v51  ;;  %8103 = vmatpush.bf16.msra.mxu0 %v11265_v35 }
 0x71f   :  { %v11774_v27 = vld [vmem:[#allocation7 + $0x1438] sm:$0xf0] }
 0x720   :  { %v14245_v14 = vld [vmem:[#allocation7 + $0x161c] sm:$0xf]  ;;  %v11777_v59 = vor.u32 %v14181_v32, %v11774_v27  ;;  %8116 = vmatpush.bf16.msra.mxu1 %v11521_v25 }
 0x721   :  { %v12030_v4 = vld [vmem:[#allocation7 + $0x1638] sm:$0xf0]  ;;  %8104 = vmatmul.bf16.vlgmr.msra.gmra.mxu0 %v15179_v36 }
 0x722   :  { %v14365_v24 = vld [vmem:[#allocation7 + $0x19dc] sm:$0xf]  ;;  %v12033_v47 = vor.u32 %v14245_v14, %v12030_v4  ;;  %8129 = vmatpush.bf16.msra.mxu2 %v11777_v59 }
 0x723   :  { %v12510_v12 = vld [vmem:[#allocation7 + $0x19f8] sm:$0xf0]  ;;  %8117 = vmatmul.bf16.vlgmr.msra.gmra.mxu1 %v15183_v40 }
 0x724   :  { %v14429_v44 = vld [vmem:[#allocation7 + $0x1bdc] sm:$0xf]  ;;  %v12513_v9 = vor.u32 %v14365_v24, %v12510_v12  ;;  %8142 = vmatpush.bf16.msra.mxu3 %v12033_v47  ;;  %v7897_v12 = vpop.f32.mrf.mxu0 }
 0x725   :  { %v12766_v15 = vld [vmem:[#allocation7 + $0x1bf8] sm:$0xf0]  ;;  %8130 = vmatmul.bf16.vlgmr.msra.gmra.mxu2 %v15181_v37  ;;  %v7898_v40 = vadd.f32 %v7897_v12, %v15538_v63 }
 0x726   :  { %v14493_v20 = vld [vmem:[#allocation7 + $0x1ddc] sm:$0xf]  ;;  %v12769_v42 = vor.u32 %v14429_v44, %v12766_v15  ;;  %8148 = vmatpush.bf16.msrb.mxu0 %v12513_v9  ;;  %v7910_v44 = vpop.f32.mrf.mxu1 }
 0x727   :  { %v13022_v50 = vld [vmem:[#allocation7 + $0x1df8] sm:$0xf0]  ;;  %8143 = vmatmul.bf16.vlgmr.msra.gmra.mxu3 %v15185_v41  ;;  %v7911_v59 = vadd.f32 %v7910_v44, %v7898_v40 }
 0x728   :  { %v14557_v52 = vld [vmem:[#allocation7 + $0x1fdc] sm:$0xf]  ;;  %v13025_v23 = vor.u32 %v14493_v20, %v13022_v50  ;;  %8161 = vmatpush.bf16.msrb.mxu1 %v12769_v42 }
 0x729   :  { %v13278_v60 = vld [vmem:[#allocation7 + $0x1ff8] sm:$0xf0] }
 0x72a   :  { %v14357_v62 = vld [vmem:[#allocation7 + $0x199c] sm:$0xf]  ;;  %v13281_v10 = vor.u32 %v14557_v52, %v13278_v60  ;;  %8174 = vmatpush.bf16.msrb.mxu2 %v13025_v23 }
 0x72b   :  { %v12478_v11 = vld [vmem:[#allocation7 + $0x19b8] sm:$0xf0] }
 0x72c   :  { %v14421_v46 = vld [vmem:[#allocation7 + $0x1b9c] sm:$0xf]  ;;  %v12481_v54 = vor.u32 %v14357_v62, %v12478_v11  ;;  %8187 = vmatpush.bf16.msrb.mxu3 %v13281_v10 }
 0x72d   :  { %v12734_v22 = vld [vmem:[#allocation7 + $0x1bb8] sm:$0xf0] }
 0x72e   :  { %v14485_v0 = vld [vmem:[#allocation7 + $0x1d9c] sm:$0xf]  ;;  %v12737_v1 = vor.u32 %v14421_v46, %v12734_v22  ;;  %8149 = vmatpush.bf16.msrb.mxu0 %v12481_v54  ;;  %v7923_v22 = vpop.f32.mrf.mxu2  ;;  %v7936_v54 = vpop.f32.mrf.mxu3 }
 0x72f   :  { %v12990_v29 = vld [vmem:[#allocation7 + $0x1db8] sm:$0xf0] }
 0x730   :  { %v14549_v28 = vld [vmem:[#allocation7 + $0x1f9c] sm:$0xf]  ;;  %v12993_v18 = vor.u32 %v14485_v0, %v12990_v29  ;;  %8162 = vmatpush.bf16.msrb.mxu1 %v12737_v1 }
 0x731   :  { %v13246_v19 = vld [vmem:[#allocation7 + $0x1fb8] sm:$0xf0] }
 0x732   :  { %v14349_v17 = vld [vmem:[#allocation7 + $0x195c] sm:$0xf]  ;;  %v13249_v55 = vor.u32 %v14549_v28, %v13246_v19  ;;  %8175 = vmatpush.bf16.msrb.mxu2 %v12993_v18  ;;  %v7924_v19 = vadd.f32 %v7923_v22, %v7911_v59  ;;  %v7899_v18 = vpop.f32.mrf.mxu0 }
 0x733   :  { %v12446_v6 = vld [vmem:[#allocation7 + $0x1978] sm:$0xf0] }
 0x734   :  { %v14413_v2 = vld [vmem:[#allocation7 + $0x1b5c] sm:$0xf]  ;;  %v12449_v21 = vor.u32 %v14349_v17, %v12446_v6  ;;  %8188 = vmatpush.bf16.msrb.mxu3 %v13249_v55  ;;  %v7937_v55 = vadd.f32 %v7936_v54, %v7924_v19 }
 0x735   :  { %v12702_v5 = vld [vmem:[#allocation7 + $0x1b78] sm:$0xf0] }
 0x736   :  { %v14477_v26 = vld [vmem:[#allocation7 + $0x1d5c] sm:$0xf]  ;;  %v12705_v51 = vor.u32 %v14413_v2, %v12702_v5  ;;  %8150 = vmatpush.bf16.msrb.mxu0 %v12449_v21  ;;  %v7925_v44 = vpop.f32.mrf.mxu2 }
 0x737   :  { %v12958_v16 = vld [vmem:[#allocation7 + $0x1d78] sm:$0xf0] }
 0x738   :  { %v14541_v13 = vld [vmem:[#allocation7 + $0x1f5c] sm:$0xf]  ;;  %v12961_v32 = vor.u32 %v14477_v26, %v12958_v16  ;;  %8163 = vmatpush.bf16.msrb.mxu1 %v12705_v51 }
 0x739   :  { %v13214_v30 = vld [vmem:[#allocation7 + $0x1f78] sm:$0xf0] }
 0x73a   :  { %v14341_v49 = vld [vmem:[#allocation7 + $0x191c] sm:$0xf]  ;;  %v13217_v27 = vor.u32 %v14541_v13, %v13214_v30  ;;  %8176 = vmatpush.bf16.msrb.mxu2 %v12961_v32  ;;  %v7912_v13 = vpop.f32.mrf.mxu1 }
 0x73b   :  { %v12414_v34 = vld [vmem:[#allocation7 + $0x1938] sm:$0xf0] }
 0x73c   :  { %v14405_v36 = vld [vmem:[#allocation7 + $0x1b1c] sm:$0xf]  ;;  %v12417_v41 = vor.u32 %v14341_v49, %v12414_v34  ;;  %8189 = vmatpush.bf16.msrb.mxu3 %v13217_v27 }
 0x73d   :  { %v12670_v14 = vld [vmem:[#allocation7 + $0x1b38] sm:$0xf0] }
 0x73e   :  { %v14469_v37 = vld [vmem:[#allocation7 + $0x1d1c] sm:$0xf]  ;;  %v12673_v3 = vor.u32 %v14405_v36, %v12670_v14  ;;  %8151 = vmatpush.bf16.msrb.mxu0 %v12417_v41 }
 0x73f   :  { %v12926_v43 = vld [vmem:[#allocation7 + $0x1d38] sm:$0xf0] }
 0x740   :  { %v14533_v4 = vld [vmem:[#allocation7 + $0x1f1c] sm:$0xf]  ;;  %v12929_v35 = vor.u32 %v14469_v37, %v12926_v43  ;;  %8164 = vmatpush.bf16.msrb.mxu1 %v12673_v3 }
 0x741   :  { %v13182_v24 = vld [vmem:[#allocation7 + $0x1f38] sm:$0xf0] }
 0x742   :  { %v14333_v15 = vld [vmem:[#allocation7 + $0x18dc] sm:$0xf]  ;;  %v13185_v25 = vor.u32 %v14533_v4, %v13182_v24  ;;  %8177 = vmatpush.bf16.msrb.mxu2 %v12929_v35 }
 0x743   :  { %v12382_v20 = vld [vmem:[#allocation7 + $0x18f8] sm:$0xf0] }
 0x744   :  { %v14397_v50 = vld [vmem:[#allocation7 + $0x1adc] sm:$0xf]  ;;  %v12385_v62 = vor.u32 %v14333_v15, %v12382_v20  ;;  %8190 = vmatpush.bf16.msrb.mxu3 %v13185_v25  ;;  %v7938_v25 = vpop.f32.mrf.mxu3 }
 0x745   :  { %v12638_v52 = vld [vmem:[#allocation7 + $0x1af8] sm:$0xf0] }
 0x746   :  { %v14461_v60 = vld [vmem:[#allocation7 + $0x1cdc] sm:$0xf]  ;;  %v12641_v63 = vor.u32 %v14397_v50, %v12638_v52  ;;  %8152 = vmatpush.bf16.msrb.mxu0 %v12385_v62 }
 0x747   :  { %v12894_v47 = vld [vmem:[#allocation7 + $0x1cf8] sm:$0xf0] }
 0x748   :  { %v14525_v9 = vld [vmem:[#allocation7 + $0x1edc] sm:$0xf]  ;;  %v12897_v10 = vor.u32 %v14461_v60, %v12894_v47  ;;  %8165 = vmatpush.bf16.msrb.mxu1 %v12641_v63  ;;  %v7949_v47 = vpop.f32.mrf.mxu0  ;;  %v7975_v63 = vpop.f32.mrf.mxu2 }
 0x749   :  { %v13150_v42 = vld [vmem:[#allocation7 + $0x1ef8] sm:$0xf0] }
 0x74a   :  { %v14325_v11 = vld [vmem:[#allocation7 + $0x189c] sm:$0xf]  ;;  %v13153_v46 = vor.u32 %v14525_v9, %v13150_v42  ;;  %8178 = vmatpush.bf16.msrb.mxu2 %v12897_v10  ;;  %v7950_v9 = vadd.f32 %v7949_v47, %v7937_v55  ;;  %v7962_v42 = vpop.f32.mrf.mxu1 }
 0x74b   :  { %v12350_v23 = vld [vmem:[#allocation7 + $0x18b8] sm:$0xf0] }
 0x74c   :  { %v14389_v0 = vld [vmem:[#allocation7 + $0x1a9c] sm:$0xf]  ;;  %v12353_v2 = vor.u32 %v14325_v11, %v12350_v23  ;;  %8191 = vmatpush.bf16.msrb.mxu3 %v13153_v46  ;;  %v7963_v62 = vadd.f32 %v7962_v42, %v7950_v9  ;;  %v7988_v23 = vpop.f32.mrf.mxu3 }
 0x74d   :  { %v12606_v29 = vld [vmem:[#allocation7 + $0x1ab8] sm:$0xf0] }
 0x74e   :  { %v14453_v28 = vld [vmem:[#allocation7 + $0x1c9c] sm:$0xf]  ;;  %v12609_v5 = vor.u32 %v14389_v0, %v12606_v29  ;;  %8153 = vmatpush.bf16.msrb.mxu0 %v12353_v2  ;;  %v7976_v11 = vadd.f32 %v7975_v63, %v7963_v62 }
 0x74f   :  { %v12862_v1 = vld [vmem:[#allocation7 + $0x1cb8] sm:$0xf0] }
 0x750   :  { %v14517_v17 = vld [vmem:[#allocation7 + $0x1e9c] sm:$0xf]  ;;  %v12865_v30 = vor.u32 %v14453_v28, %v12862_v1  ;;  %8166 = vmatpush.bf16.msrb.mxu1 %v12609_v5  ;;  %v7951_v10 = vpop.f32.mrf.mxu0  ;;  %v7989_v46 = vadd.f32 %v7988_v23, %v7976_v11  ;;  %v7977_v0 = vpop.f32.mrf.mxu2 }
 0x751   :  { %v13118_v6 = vld [vmem:[#allocation7 + $0x1eb8] sm:$0xf0] }
 0x752   :  { %v14317_v26 = vld [vmem:[#allocation7 + $0x185c] sm:$0xf]  ;;  %v13121_v21 = vor.u32 %v14517_v17, %v13118_v6  ;;  %8179 = vmatpush.bf16.msrb.mxu2 %v12865_v30  ;;  %v7964_v22 = vpop.f32.mrf.mxu1 }
 0x753   :  { %v12318_v16 = vld [vmem:[#allocation7 + $0x1878] sm:$0xf0] }
 0x754   :  { %v14381_v51 = vld [vmem:[#allocation7 + $0x1a5c] sm:$0xf]  ;;  %v12321_v14 = vor.u32 %v14317_v26, %v12318_v16  ;;  %8192 = vmatpush.bf16.msrb.mxu3 %v13121_v21  ;;  %v7990_v29 = vpop.f32.mrf.mxu3 }
 0x755   :  { %v12574_v49 = vld [vmem:[#allocation7 + $0x1a78] sm:$0xf0]  ;;  %v14569_v29 = vld [vmem:[#allocation13 + $0x38] sm:$0xff] }
 0x756   :  { %v14445_v34 = vld [vmem:[#allocation7 + $0x1c5c] sm:$0xf]  ;;  %v12577_v37 = vor.u32 %v14381_v51, %v12574_v49  ;;  %8154 = vmatpush.bf16.msrb.mxu0 %v12321_v14  ;;  %v8242_v49 = vsel %vm232_vm6, %v7989_v46, 0.0 }
 0x757   :  { %v12830_v32 = vld [vmem:[#allocation7 + $0x1c78] sm:$0xf0] }
 0x758   :  { %v14509_v27 = vld [vmem:[#allocation7 + $0x1e5c] sm:$0xf]  ;;  %v12833_v24 = vor.u32 %v14445_v34, %v12830_v32  ;;  %8167 = vmatpush.bf16.msrb.mxu1 %v12577_v37  ;;  %v8001_v28 = vpop.f32.mrf.mxu0  ;;  %v8027_v54 = vpop.f32.mrf.mxu2  ;;  %v8243_v34 = vrot.slane %v8242_v49, 4 }
 0x759   :  { %v13086_v36 = vld [vmem:[#allocation7 + $0x1e78] sm:$0xf0] }
 0x75a   :  { %v14309_v43 = vld [vmem:[#allocation7 + $0x181c] sm:$0xf]  ;;  %v13089_v12 = vor.u32 %v14509_v27, %v13086_v36  ;;  %8180 = vmatpush.bf16.msrb.mxu2 %v12833_v24  ;;  %v8014_v19 = vpop.f32.mrf.mxu1  ;;  %v8244_v32 = vadd.f32 %v8243_v34, %v8242_v49  ;;  %v14591_v34 = vld [vmem:[#allocation13 + $0xe8] sm:$0xff] }
 0x75b   :  { %v12286_v4 = vld [vmem:[#allocation7 + $0x1838] sm:$0xf0] }
 0x75c   :  { %v14373_v40 = vld [vmem:[#allocation7 + $0x1a1c] sm:$0xf]  ;;  %v12289_v50 = vor.u32 %v14309_v43, %v12286_v4  ;;  %8193 = vmatpush.bf16.msrb.mxu3 %v13089_v12  ;;  %v8040_v1 = vpop.f32.mrf.mxu3  ;;  %v8245_v27 = vrot.slane %v8244_v32, 2 }
 0x75d   :  { %v12542_v41 = vld [vmem:[#allocation7 + $0x1a38] sm:$0xf0] }
 0x75e   :  { %v14437_v3 = vld [vmem:[#allocation7 + $0x1c1c] sm:$0xf]  ;;  %v12545_v52 = vor.u32 %v14373_v40, %v12542_v41  ;;  %8155 = vmatpush.bf16.msrb.mxu0 %v12289_v50  ;;  %v8246_v37 = vadd.f32 %v8245_v27, %v8244_v32 }
 0x75f   :  { %v12798_v15 = vld [vmem:[#allocation7 + $0x1c38] sm:$0xf0] }
 0x760   :  { %v14501_v20 = vld [vmem:[#allocation7 + $0x1e1c] sm:$0xf]  ;;  %v12801_v60 = vor.u32 %v14437_v3, %v12798_v15  ;;  %8168 = vmatpush.bf16.msrb.mxu1 %v12545_v52  ;;  %v8003_v17 = vpop.f32.mrf.mxu0  ;;  %v8029_v55 = vpop.f32.mrf.mxu2  ;;  %v8247_v12 = vrot.slane %v8246_v37, 1 }
 0x761   :  { %v13054_v35 = vld [vmem:[#allocation7 + $0x1e38] sm:$0xf0]  ;;  %8156 = vmatmul.bf16.vlgmr.msrb.gmra.mxu0 %v15191_v31  ;;  %v1407_v31 = vperm.slane %v15494_v53, 7  ;;  %v14584_v55 = vld [vmem:[#allocation13 + $0xb0] sm:$0xff] }
 0x762   :  { %v13057_v59 = vor.u32 %v14501_v20, %v13054_v35  ;;  %8181 = vmatpush.bf16.msrb.mxu2 %v12801_v60  ;;  %v8016_v18 = vpop.f32.mrf.mxu1  ;;  %v8248_v44 = vadd.f32 %v8247_v12, %v8246_v37  ;;  %9060 = vmatpush.bf16.msra.mxu0 %v14569_v29  ;;  %v14582_v37 = vld [vmem:[#allocation13 + $0xa0] sm:$0xff] }
 0x763   :  { %8169 = vmatmul.bf16.vlgmr.msrb.gmra.mxu1 %v15195_v38  ;;  %v8002_v38 = vadd.f32 %v8001_v28, %v1407_v31  ;;  %v14577_v31 = vld [vmem:[#allocation13 + $0x78] sm:$0xff]  ;;  %v14576_v18 = vld [vmem:[#allocation13 + $0x70] sm:$0xff]  ;;  %v14562_v29 = vld [vmem:[#allocation13] sm:$0xff] }
 0x764   :  { %8194 = vmatpush.bf16.msrb.mxu3 %v13057_v59  ;;  %v8042_v2 = vpop.f32.mrf.mxu3  ;;  %v8262_v25 = vmul.f32 0.5, %v8248_v44  ;;  %v14585_v28 = vld [vmem:[#allocation13 + $0xb8] sm:$0xff]  ;;  %9073 = vmatpush.bf16.msra.mxu1 %v14577_v31  ;;  %v14570_v31 = vld [vmem:[#allocation13 + $0x40] sm:$0xff] }
 0x765   :  { %8182 = vmatmul.bf16.vlgmr.msrb.gmra.mxu2 %v15193_v33  ;;  %v8015_v33 = vadd.f32 %v8014_v19, %v8002_v38  ;;  %v14593_v19 = vld [vmem:[#allocation13 + $0xf8] sm:$0xff]  ;;  %v14592_v2 = vld [vmem:[#allocation13 + $0xf0] sm:$0xff] }
 0x766   :  { %v15551_v60 = vsub.f32 %v7989_v46, %v8262_v25  ;;  %9086 = vmatpush.bf16.msra.mxu2 %v14585_v28  ;;  %v14564_v25 = vld [vmem:[#allocation13 + $0x10] sm:$0xff]  ;;  %v14578_v28 = vld [vmem:[#allocation13 + $0x80] sm:$0xff] }
 0x767   :  { %8195 = vmatmul.bf16.vlgmr.msrb.gmra.mxu3 %v15197_v39  ;;  %v8028_v39 = vadd.f32 %v8027_v54, %v8015_v33 }
 0x768   :  { %v8053_v5 = vpop.f32.mrf.mxu0  ;;  %v8079_v16 = vpop.f32.mrf.mxu2  ;;  %v8278_v47 = vmul.f32 %v15551_v60, %v15551_v60  ;;  %9099 = vmatpush.bf16.msra.mxu3 %v14593_v19  ;;  %9074 = vmatpush.bf16.msra.mxu1 %v14576_v18  ;;  %v14609_v19 = vld [vmem:[#allocation13 + $0x178] sm:$0xff]  ;;  %v14616_v18 = vld [vmem:[#allocation13 + $0x1b0] sm:$0xff] }
 0x769   :  { %v8041_v6 = vadd.f32 %v8040_v1, %v8028_v39 }
 0x76a   :  { %v8066_v26 = vpop.f32.mrf.mxu1  ;;  %v8322_v42 = vsel %vm232_vm6, %v8278_v47, 0.0  ;;  %9087 = vmatpush.bf16.msra.mxu2 %v14584_v55  ;;  %v14588_v47 = vld [vmem:[#allocation13 + $0xd0] sm:$0xff] }
 0x76b   :  { %v8054_v43 = vadd.f32 %v8053_v5, %v8041_v6  ;;  %v8323_v23 = vrot.slane %v8322_v42, 4  ;;  %v14568_v6 = vld [vmem:[#allocation13 + $0x30] sm:$0xff] }
 0x76c   :  { %v8092_v13 = vpop.f32.mrf.mxu3  ;;  %9061 = vmatpush.bf16.msra.mxu0 %v14568_v6  ;;  %9100 = vmatpush.bf16.msra.mxu3 %v14592_v2  ;;  %v14608_v6 = vld [vmem:[#allocation13 + $0x170] sm:$0xff] }
 0x76d   :  { %v8067_v41 = vadd.f32 %v8066_v26, %v8054_v43  ;;  %v8324_v22 = vadd.f32 %v8323_v23, %v8322_v42 }
 0x76f   :  { %v8080_v15 = vadd.f32 %v8079_v16, %v8067_v41  ;;  %v8325_v1 = vrot.slane %v8324_v22, 2  ;;  %v14573_v41 = vld [vmem:[#allocation13 + $0x58] sm:$0xff] }
 0x770   :  { %v8055_v30 = vpop.f32.mrf.mxu0  ;;  %v8081_v51 = vpop.f32.mrf.mxu2  ;;  %9101 = vmatpush.bf16.msra.mxu3 %v14591_v34 }
 0x771   :  { %v8093_v50 = vadd.f32 %v8092_v13, %v8080_v15  ;;  %v8326_v16 = vadd.f32 %v8325_v1, %v8324_v22  ;;  %v14567_v13 = vld [vmem:[#allocation13 + $0x28] sm:$0xff]  ;;  %v14589_v15 = vld [vmem:[#allocation13 + $0xd8] sm:$0xff] }
 0x772   :  { %v8068_v21 = vpop.f32.mrf.mxu1  ;;  %v14575_v30 = vld [vmem:[#allocation13 + $0x68] sm:$0xff]  ;;  %9062 = vmatpush.bf16.msra.mxu0 %v14567_v13 }
 0x773   :  { %v14583_v21 = vld [vmem:[#allocation13 + $0xa8] sm:$0xff]  ;;  %9075 = vmatpush.bf16.msra.mxu1 %v14575_v30  ;;  %v8327_v27 = vrot.slane %v8326_v16, 1 }
 0x774   :  { %v8094_v53 = vpop.f32.mrf.mxu3  ;;  %9088 = vmatpush.bf16.msra.mxu2 %v14583_v21  ;;  %v14599_v13 = vld [vmem:[#allocation13 + $0x128] sm:$0xff] }
 0x775   :  { %v8328_v12 = vadd.f32 %v8327_v27, %v8326_v16  ;;  %v14607_v30 = vld [vmem:[#allocation13 + $0x168] sm:$0xff]  ;;  %v14606_v27 = vld [vmem:[#allocation13 + $0x160] sm:$0xff] }
 0x776   :  { %v14615_v21 = vld [vmem:[#allocation13 + $0x1a8] sm:$0xff] }
 0x778   :  { %9089 = vmatpush.bf16.msra.mxu2 %v14582_v37 }
 0x79e   :  { %v8105_v36 = vpop.f32.mrf.mxu0 }
 0x79f   :  { %v8106_v52 = vadd.f32 %v8105_v36, %v8093_v50  ;;  %v14566_v36 = vld [vmem:[#allocation13 + $0x20] sm:$0xff]  ;;  %v14572_v50 = vld [vmem:[#allocation13 + $0x50] sm:$0xff] }
 0x7a0   :  { %v8118_v14 = vpop.f32.mrf.mxu1  ;;  %9063 = vmatpush.bf16.msra.mxu0 %v14566_v36  ;;  %v14614_v36 = vld [vmem:[#allocation13 + $0x1a0] sm:$0xff] }
 0x7a1   :  { %v8119_v59 = vadd.f32 %v8118_v14, %v8106_v52  ;;  %v14574_v14 = vld [vmem:[#allocation13 + $0x60] sm:$0xff]  ;;  %v14580_v52 = vld [vmem:[#allocation13 + $0x90] sm:$0xff] }
 0x7a2   :  { %9076 = vmatpush.bf16.msra.mxu1 %v14574_v14  ;;  %v14622_v14 = vld [vmem:[#allocation13 + $0x1e0] sm:$0xff] }
 0x7a6   :  { %v8107_v40 = vpop.f32.mrf.mxu0  ;;  %9077 = vmatpush.bf16.msra.mxu1 %v14573_v41 }
 0x7a7   :  { %v14565_v40 = vld [vmem:[#allocation13 + $0x18] sm:$0xff] }
 0x7a8   :  { %v8131_v4 = vpop.f32.mrf.mxu2  ;;  %v8120_v3 = vpop.f32.mrf.mxu1  ;;  %9064 = vmatpush.bf16.msra.mxu0 %v14565_v40  ;;  %v14621_v40 = vld [vmem:[#allocation13 + $0x1d8] sm:$0xff] }
 0x7a9   :  { %v8132_v9 = vadd.f32 %v8131_v4, %v8119_v59  ;;  %v14590_v4 = vld [vmem:[#allocation13 + $0xe0] sm:$0xff]  ;;  %v14581_v3 = vld [vmem:[#allocation13 + $0x98] sm:$0xff] }
 0x7aa   :  { %v8144_v24 = vpop.f32.mrf.mxu3  ;;  %9102 = vmatpush.bf16.msra.mxu3 %v14590_v4  ;;  %9090 = vmatpush.bf16.msra.mxu2 %v14581_v3  ;;  %v14605_v4 = vld [vmem:[#allocation13 + $0x158] sm:$0xff] }
 0x7ab   :  { %v8145_v62 = vadd.f32 %v8144_v24, %v8132_v9  ;;  %9078 = vmatpush.bf16.msra.mxu1 %v14572_v50 }
 0x7ac   :  { %9065 = vmatpush.bf16.msra.mxu0 %v14564_v25 }
 0x7ae   :  { %9103 = vmatpush.bf16.msra.mxu3 %v14589_v15  ;;  %9091 = vmatpush.bf16.msra.mxu2 %v14580_v52  ;;  %v14604_v15 = vld [vmem:[#allocation13 + $0x150] sm:$0xff] }
 0x7b0   :  { %v8133_v20 = vpop.f32.mrf.mxu2 }
 0x7b2   :  { %v8146_v35 = vpop.f32.mrf.mxu3  ;;  %9104 = vmatpush.bf16.msra.mxu3 %v14588_v47  ;;  %v14595_v47 = vld [vmem:[#allocation13 + $0x108] sm:$0xff] }
 0x7b3   :  { %v8342_v35 = vmul.f32 0.5, %v8328_v12 }
 0x7b5   :  { %v15561_v42 = vadd.f32 1e-05, %v8342_v35  ;;  %v14620_v35 = vld [vmem:[#allocation13 + $0x1d0] sm:$0xff] }
 0x7b7   :  { %14656 = vrsqrt.f32 %v15561_v42  ;;  %vm8419_vm5 = vweird.f32 %v15561_v42 }
 0x7bd   :  { %v15565_v55 = vpop.eup %14656 }
 0x7be   :  { %v8414_v16 = vmul.f32 %v15565_v55, %v15561_v42 }
 0x7c0   :  { %v8415_v34 = vmul.f32 %v15565_v55, %v8414_v16 }
 0x7c2   :  { %v8416_v37 = vmul.f32 0.5, %v8415_v34 }
 0x7c4   :  { %v8417_v41 = vsub.f32 1.5, %v8416_v37 }
 0x7c6   :  { %v8418_v50 = vmul.f32 %v15565_v55, %v8417_v41 }
 0x7de   :  { %v8157_v63 = vpop.f32.mrf.mxu0 }
 0x7df   :  { %v8158_v10 = vadd.f32 %v8157_v63, %v8145_v62  ;;  %v14563_v62 = vld [vmem:[#allocation13 + $0x8] sm:$0xff] }
 0x7e0   :  { %v8170_v11 = vpop.f32.mrf.mxu1  ;;  %v14571_v63 = vld [vmem:[#allocation13 + $0x48] sm:$0xff]  ;;  %9066 = vmatpush.bf16.msra.mxu0 %v14563_v62 }
 0x7e1   :  { %v8171_v0 = vadd.f32 %v8170_v11, %v8158_v10  ;;  %v14579_v11 = vld [vmem:[#allocation13 + $0x88] sm:$0xff]  ;;  %9079 = vmatpush.bf16.msra.mxu1 %v14571_v63 }
 0x7e2   :  { %v14587_v10 = vld [vmem:[#allocation13 + $0xc8] sm:$0xff]  ;;  %9092 = vmatpush.bf16.msra.mxu2 %v14579_v11 }
 0x7e3   :  { %9105 = vmatpush.bf16.msra.mxu3 %v14587_v10  ;;  %v14611_v62 = vld [vmem:[#allocation13 + $0x188] sm:$0xff] }
 0x7e4   :  { %9067 = vmatpush.bf16.msra.mxu0 %v14562_v29  ;;  %v14619_v63 = vld [vmem:[#allocation13 + $0x1c8] sm:$0xff]  ;;  %v14610_v29 = vld [vmem:[#allocation13 + $0x180] sm:$0xff] }
 0x7e5   :  { %9080 = vmatpush.bf16.msra.mxu1 %v14570_v31  ;;  %v14618_v31 = vld [vmem:[#allocation13 + $0x1c0] sm:$0xff] }
 0x7e6   :  { %v8159_v54 = vpop.f32.mrf.mxu0  ;;  %9093 = vmatpush.bf16.msra.mxu2 %v14578_v28 }
 0x7e7   :  { %v14617_v54 = vld [vmem:[#allocation13 + $0x1b8] sm:$0xff] }
 0x7e8   :  { %v8183_v38 = vpop.f32.mrf.mxu2  ;;  %v8172_v39 = vpop.f32.mrf.mxu1 }
 0x7e9   :  { %v8184_v33 = vadd.f32 %v8183_v38, %v8171_v0  ;;  %v14586_v38 = vld [vmem:[#allocation13 + $0xc0] sm:$0xff]  ;;  %v14625_v39 = vld [vmem:[#allocation13 + $0x1f8] sm:$0xff]  ;;  %9125 = vmatpush.bf16.msrb.mxu1 %v14609_v19 }
 0x7ea   :  { %v8196_v46 = vpop.f32.mrf.mxu3  ;;  %9106 = vmatpush.bf16.msra.mxu3 %v14586_v38  ;;  %9138 = vmatpush.bf16.msrb.mxu2 %v14617_v54  ;;  %v8486_v54 = vld [vmem:[#allocation11] sm:$0xff] }
 0x7eb   :  { %v8197_v17 = vadd.f32 %v8196_v46, %v8184_v33  ;;  %v14601_v46 = vld [vmem:[#allocation13 + $0x138] sm:$0xff] }
 0x7ec   :  { %9112 = vmatpush.bf16.msrb.mxu0 %v14601_v46  ;;  %v8344_v46 = vld [vmem:[#allocation10] sm:$0xff] }
 0x7ed   :  { %v8249_v5 = vsel %vm232_vm6, %v8197_v17, 0.0  ;;  %9126 = vmatpush.bf16.msrb.mxu1 %v14608_v6  ;;  %v8489_v6 = vperm.slane %v8486_v54, 1 }
 0x7ee   :  { %v8250_v26 = vrot.slane %v8249_v5, 4  ;;  %9151 = vmatpush.bf16.msrb.mxu3 %v14625_v39  ;;  %9139 = vmatpush.bf16.msrb.mxu2 %v14616_v18  ;;  %v8490_v18 = vperm.slane %v8486_v54, 2 }
 0x7f0   :  { %v8251_v51 = vadd.f32 %v8250_v26, %v8249_v5  ;;  %v8185_v53 = vpop.f32.mrf.mxu2  ;;  %v14624_v5 = vld [vmem:[#allocation13 + $0x1f0] sm:$0xff] }
 0x7f1   :  { %v14623_v53 = vld [vmem:[#allocation13 + $0x1e8] sm:$0xff]  ;;  %9127 = vmatpush.bf16.msrb.mxu1 %v14607_v30 }
 0x7f2   :  { %v8198_v49 = vpop.f32.mrf.mxu3  ;;  %v8252_v32 = vrot.slane %v8251_v51, 2  ;;  %9152 = vmatpush.bf16.msrb.mxu3 %v14624_v5  ;;  %9140 = vmatpush.bf16.msrb.mxu2 %v14615_v21 }
 0x7f4   :  { %v8253_v43 = vadd.f32 %v8252_v32, %v8251_v51  ;;  %v14598_v32 = vld [vmem:[#allocation13 + $0x120] sm:$0xff] }
 0x7f5   :  { %9128 = vmatpush.bf16.msrb.mxu1 %v14606_v27 }
 0x7f6   :  { %v8254_v24 = vrot.slane %v8253_v43, 1  ;;  %9153 = vmatpush.bf16.msrb.mxu3 %v14623_v53  ;;  %9141 = vmatpush.bf16.msrb.mxu2 %v14614_v36 }
 0x7f8   :  { %v8255_v44 = vadd.f32 %v8254_v24, %v8253_v43  ;;  %v14597_v43 = vld [vmem:[#allocation13 + $0x118] sm:$0xff] }
 0x7f9   :  { %v14613_v24 = vld [vmem:[#allocation13 + $0x198] sm:$0xff]  ;;  %9129 = vmatpush.bf16.msrb.mxu1 %v14605_v4 }
 0x7fa   :  { %v8263_v20 = vmul.f32 0.5, %v8255_v44  ;;  %9154 = vmatpush.bf16.msrb.mxu3 %v14622_v14  ;;  %v14596_v44 = vld [vmem:[#allocation13 + $0x110] sm:$0xff]  ;;  %9142 = vmatpush.bf16.msrb.mxu2 %v14613_v24 }
 0x7fc   :  { %v15557_v59 = vsub.f32 %v8197_v17, %v8263_v20  ;;  %v14600_v17 = vld [vmem:[#allocation13 + $0x130] sm:$0xff] }
 0x7fd   :  { %9113 = vmatpush.bf16.msrb.mxu0 %v14600_v17  ;;  %v14612_v20 = vld [vmem:[#allocation13 + $0x190] sm:$0xff]  ;;  %9130 = vmatpush.bf16.msrb.mxu1 %v14604_v15  ;;  %v8488_v17 = vperm.slane %v8486_v54, 0  ;;  %v8494_v15 = vperm.slane %v8486_v54, 6 }
 0x7fe   :  { %v8279_v9 = vmul.f32 %v15557_v59, %v15557_v59  ;;  %9155 = vmatpush.bf16.msrb.mxu3 %v14621_v40  ;;  %9143 = vmatpush.bf16.msrb.mxu2 %v14612_v20  ;;  %v8495_v20 = vperm.slane %v8486_v54, 7 }
 0x800   :  { %v8329_v23 = vsel %vm232_vm6, %v8279_v9, 0.0  ;;  %vm8420_vm6 = vweird.f32 %v15565_v55  ;;  %v14603_v9 = vld [vmem:[#allocation13 + $0x148] sm:$0xff] }
 0x801   :  { %v8330_v22 = vrot.slane %v8329_v23, 4  ;;  %9114 = vmatpush.bf16.msrb.mxu0 %v14599_v13  ;;  %vm8421_vm10 = vmor %vm8419_vm5, %vm8420_vm6  ;;  %9131 = vmatpush.bf16.msrb.mxu1 %v14603_v9 }
 0x802   :  { %9156 = vmatpush.bf16.msrb.mxu3 %v14620_v35  ;;  %9144 = vmatpush.bf16.msrb.mxu2 %v14611_v62 }
 0x803   :  { %v8331_v0 = vadd.f32 %v8330_v22, %v8329_v23  ;;  %v8422_v23 = vsel %vm8421_vm10, %v15565_v55, %v8418_v50  ;;  %v14594_v22 = vld [vmem:[#allocation13 + $0x100] sm:$0xff]  ;;  %v8491_v55 = vperm.slane %v8486_v54, 3 }
 0x804   :  { %v8446_v38 = vrot.slane %v8422_v23, 2 }
 0x805   :  { %v8332_v33 = vrot.slane %v8331_v0, 2  ;;  %9115 = vmatpush.bf16.msrb.mxu0 %v14598_v32 }
 0x806   :  { %9157 = vmatpush.bf16.msrb.mxu3 %v14619_v63  ;;  %9145 = vmatpush.bf16.msrb.mxu2 %v14610_v29 }
 0x807   :  { %v8333_v1 = vadd.f32 %v8332_v33, %v8331_v0  ;;  %v14602_v0 = vld [vmem:[#allocation13 + $0x140] sm:$0xff] }
 0x808   :  { %9132 = vmatpush.bf16.msrb.mxu1 %v14602_v0 }
 0x809   :  { %v8334_v2 = vrot.slane %v8333_v1, 1  ;;  %9116 = vmatpush.bf16.msrb.mxu0 %v14597_v43 }
 0x80a   :  { %9158 = vmatpush.bf16.msrb.mxu3 %v14618_v31 }
 0x80b   :  { %v8335_v26 = vadd.f32 %v8334_v2, %v8333_v1 }
 0x80d   :  { %v8343_v51 = vmul.f32 0.5, %v8335_v26  ;;  %9117 = vmatpush.bf16.msrb.mxu0 %v14596_v44  ;;  %v8493_v44 = vperm.slane %v8486_v54, 5 }
 0x80f   :  { %v8352_v49 = vadd.f32 1e-05, %v8343_v51 }
 0x811   :  { %14658 = vrsqrt.f32 %v8352_v49  ;;  %vm8429_vm11 = vweird.f32 %v8352_v49  ;;  %9118 = vmatpush.bf16.msrb.mxu0 %v14595_v47 }
 0x815   :  { %9119 = vmatpush.bf16.msrb.mxu0 %v14594_v22 }
 0x817   :  { %v14659_v12 = vpop.eup %14658 }
 0x818   :  { %v8424_v3 = vmul.f32 %v14659_v12, %v8352_v49  ;;  %vm8430_vm9 = vweird.f32 %v14659_v12 }
 0x819   :  { %vm8431_vm12 = vmor %vm8429_vm11, %vm8430_vm9 }
 0x81a   :  { %v8425_v25 = vmul.f32 %v14659_v12, %v8424_v3 }
 0x81c   :  { %v8426_v52 = vmul.f32 0.5, %v8425_v25 }
 0x81e   :  { %v8427_v11 = vsub.f32 1.5, %v8426_v52 }
 0x820   :  { %v8428_v10 = vmul.f32 %v14659_v12, %v8427_v11 }
 0x822   :  { %v8432_v28 = vsel %vm8431_vm12, %v14659_v12, %v8428_v10 }
 0x823   :  { %v8447_v42 = vrot.slane %v8432_v28, 1 }
 0x825   :  { %v8456_v19 = vsel %vm8455_vm13, %v8446_v38, %v8447_v42 }
 0x826   :  { %v8457_v33 = vsel %vm234_vm7, %v15536_v56, %v8456_v19 }
 0x827   :  { %v8458_v39 = vsel %vm236_vm8, %v15426_v7, %v8457_v33 }
 0x828   :  { %v8460_v1 = vmul.f32 %v8458_v39, %v8344_v46  ;;  %v14639_v46 = vld [vmem:[#allocation14] ss:$0 sm:$0xff] }
 0x82a   :  { %v8469_v2 = vperm.slane %v8460_v1, 7  ;;  %v8462_v5 = vperm.slane %v8460_v1, 0  ;;  %v8463_v26 = vperm.slane %v8460_v1, 1  ;;  %v8464_v16 = vperm.slane %v8460_v1, 2 }
 0x82b   :  { %v8465_v13 = vperm.slane %v8460_v1, 3  ;;  %v8466_v30 = vperm.slane %v8460_v1, 4  ;;  %v8467_v21 = vperm.slane %v8460_v1, 5  ;;  %v8468_v51 = vperm.slane %v8460_v1, 6 }
 0x82c   :  { %v8485_v53 = vmul.f32 %v8469_v2, %v15557_v59  ;;  %v8478_v56 = vmul.f32 %v8462_v5, %v15251_v48  ;;  %v8479_v49 = vmul.f32 %v8463_v26, %v15268_v58  ;;  %v8480_v7 = vmul.f32 %v8464_v16, %v15358_v8 }
 0x82d   :  { %v8481_v34 = vmul.f32 %v8465_v13, %v15377_v45  ;;  %v8482_v32 = vmul.f32 %v8466_v30, %v15467_v61  ;;  %v8483_v27 = vmul.f32 %v8467_v21, %v15486_v57  ;;  %v8484_v36 = vmul.f32 %v8468_v51, %v15551_v60 }
 0x82e   :  { %v8504_v14 = vadd.f32 %v8488_v17, %v8478_v56  ;;  %v8505_v37 = vadd.f32 %v8489_v6, %v8479_v49  ;;  %v8506_v43 = vadd.f32 %v8490_v18, %v8480_v7  ;;  %v8492_v60 = vperm.slane %v8486_v54, 4 }
 0x82f   :  { %v8507_v4 = vadd.f32 %v8491_v55, %v8481_v34  ;;  %v8509_v25 = vadd.f32 %v8493_v44, %v8483_v27  ;;  %v8510_v50 = vadd.f32 %v8494_v15, %v8484_v36  ;;  %v8511_v52 = vadd.f32 %v8495_v20, %v8485_v53 }
 0x830   :  { %vm8512_vm7 = vcmp.ge.f32.partialorder %v8504_v14, 0.0  ;;  %v8520_v59 = vmul.f32 0.2, %v8504_v14  ;;  %vm8513_vm8 = vcmp.ge.f32.partialorder %v8505_v37, 0.0  ;;  %v8521_v48 = vmul.f32 0.2, %v8505_v37 }
 0x831   :  { %vm8514_vm14 = vcmp.ge.f32.partialorder %v8506_v43, 0.0  ;;  %v8522_v58 = vmul.f32 0.2, %v8506_v43  ;;  %vm8515_vm15 = vcmp.ge.f32.partialorder %v8507_v4, 0.0  ;;  %v8523_v8 = vmul.f32 0.2, %v8507_v4 }
 0x832   :  { %v8528_v24 = vsel %vm8512_vm7, %v8504_v14, %v8520_v59  ;;  %v8529_v12 = vsel %vm8513_vm8, %v8505_v37, %v8521_v48  ;;  %v8508_v35 = vadd.f32 %v8492_v60, %v8482_v32  ;;  %v8525_v9 = vmul.f32 0.2, %v8509_v25 }
 0x833   :  { %v8536_v45 = vpack.c.bf16 %v8528_v24, %v8528_v24  ;;  %v8530_v61 = vsel %vm8514_vm14, %v8506_v43, %v8522_v58  ;;  %v8537_v40 = vpack.c.bf16 %v8529_v12, %v8529_v12  ;;  %v8531_v41 = vsel %vm8515_vm15, %v8507_v4, %v8523_v8 }
 0x834   :  { %v8538_v57 = vpack.c.bf16 %v8530_v61, %v8530_v61  ;;  %v8539_v3 = vpack.c.bf16 %v8531_v41, %v8531_v41  ;;  %v8524_v47 = vmul.f32 0.2, %v8508_v35  ;;  %vm8516_vm0 = vcmp.ge.f32.partialorder %v8508_v35, 0.0 }
 0x835   :  { %9068 = vmatmul.bf16.vlgmr.msra.gmra.mxu0 %v8536_v45  ;;  %9081 = vmatmul.bf16.vlgmr.msra.gmra.mxu1 %v8537_v40  ;;  %v8526_v62 = vmul.f32 0.2, %v8510_v50  ;;  %v8527_v63 = vmul.f32 0.2, %v8511_v52  ;;  %vm8517_vm1 = vcmp.ge.f32.partialorder %v8509_v25, 0.0  ;;  %vm8518_vm2 = vcmp.ge.f32.partialorder %v8510_v50, 0.0 }
 0x836   :  { %9094 = vmatmul.bf16.vlgmr.msra.gmra.mxu2 %v8538_v57  ;;  %9107 = vmatmul.bf16.vlgmr.msra.gmra.mxu3 %v8539_v3  ;;  %vm8519_vm3 = vcmp.ge.f32.partialorder %v8511_v52, 0.0  ;;  %v8532_v11 = vsel %vm8516_vm0, %v8508_v35, %v8524_v47  ;;  %v8533_v23 = vsel %vm8517_vm1, %v8509_v25, %v8525_v9 }
 0x837   :  { %v8534_v10 = vsel %vm8518_vm2, %v8510_v50, %v8526_v62  ;;  %v8535_v22 = vsel %vm8519_vm3, %v8511_v52, %v8527_v63  ;;  %v8540_v0 = vpack.c.bf16 %v8532_v11, %v8532_v11  ;;  %v8541_v29 = vpack.c.bf16 %v8533_v23, %v8533_v23 }
 0x838   :  { %v8542_v31 = vpack.c.bf16 %v8534_v10, %v8534_v10  ;;  %v8543_v28 = vpack.c.bf16 %v8535_v22, %v8535_v22 }
 0x845   :  { %9120 = vmatmul.bf16.vlgmr.msrb.gmra.mxu0 %v8540_v0  ;;  %9133 = vmatmul.bf16.vlgmr.msrb.gmra.mxu1 %v8541_v29 }
 0x846   :  { %9146 = vmatmul.bf16.vlgmr.msrb.gmra.mxu2 %v8542_v31  ;;  %9159 = vmatmul.bf16.vlgmr.msrb.gmra.mxu3 %v8543_v28 }
 0x8b2   :  { %v9069_v38 = vpop.f32.mrf.mxu0  ;;  %v9082_v42 = vpop.f32.mrf.mxu1 }
 0x8b3   :  { %v9070_v19 = vadd.f32 %v14639_v46, %v9069_v38 }
 0x8b5   :  { %v9083_v17 = vadd.f32 %v9082_v42, %v9070_v19 }
 0x8b9   :  { %v9095_v33 = vpop.f32.mrf.mxu2  ;;  %v9108_v54 = vpop.f32.mrf.mxu3 }
 0x8ba   :  { %v9071_v39 = vpop.f32.mrf.mxu0  ;;  %v9084_v1 = vpop.f32.mrf.mxu1  ;;  %v9096_v6 = vadd.f32 %v9095_v33, %v9083_v17 }
 0x8bc   :  { %v9109_v55 = vadd.f32 %v9108_v54, %v9096_v6 }
 0x8c1   :  { %v9097_v18 = vpop.f32.mrf.mxu2  ;;  %v9110_v2 = vpop.f32.mrf.mxu3 }
 0x8c2   :  { %v9121_v5 = vpop.f32.mrf.mxu0  ;;  %v9134_v26 = vpop.f32.mrf.mxu1 }
 0x8c3   :  { %v9122_v16 = vadd.f32 %v9121_v5, %v9109_v55 }
 0x8c5   :  { %v9135_v13 = vadd.f32 %v9134_v26, %v9122_v16 }
 0x8c9   :  { %v9147_v30 = vpop.f32.mrf.mxu2  ;;  %v9160_v51 = vpop.f32.mrf.mxu3 }
 0x8ca   :  { %v9148_v21 = vadd.f32 %v9147_v30, %v9135_v13  ;;  %v9123_v53 = vpop.f32.mrf.mxu0  ;;  %v9136_v56 = vpop.f32.mrf.mxu1 }
 0x8cc   :  { %v9161_v49 = vadd.f32 %v9160_v51, %v9148_v21 }
 0x8ce   :  { %9164 = vst [vmem:[#allocation16] sm:$0x3] %v9161_v49 }
 0x8cf   :  { %9175 = dma.vmem_to_hbm [thread:$0]  %s9171_s25, 32, %s9173_s5, [#allocation4]  }
 0x8d1   :  { %v9149_v7 = vpop.f32.mrf.mxu2  ;;  %v9162_v34 = vpop.f32.mrf.mxu3 }
 0x8d2   :  { %14891 = dma.done.wait [#allocation4], 32  }
 0x8d3   :  { %14892 = vsyncadd [#allocation4], 4294967264 }
 0x8d4   :  { %9180 = vsyncpa [#allocation3], 1 }
 0x8d5   :  { %9181 = vsyncpa [#allocation6], 1 }
 0x8d6   :  { %9182 = vsyncpa [#allocation9], 1 }
 0x8d7   :  { %9183 = vsyncpa [#allocation12], 1 }
 0x8d8   :  { %9184 = vsyncpa [#allocation15], 1 }
 0x8d9   :  { %9185 = vsyncpa [#allocation4], 1 }

</bundles_post_ra>
